<compile_context>
chip_gen: v5e
topology: v5e:2x2
jax: 0.10.0
libtpu: 0.0.40
codegen_flags: <defaults>
</compile_context>

<pallas_src>
import numpy as np
import jax
import jax.numpy as jnp
from jax.experimental import pallas as pl
from jax.experimental.pallas import tpu as pltpu


_BLOCKS = ("conv0", "conv1", "conv2", "conv3", "conv4")


def _layer_defs(ic, oc):
    """(cin, cout, relu_after) per conv layer of each nn.Sequential block."""
    return {
        "conv0": [(ic, ic, True), (ic, ic, True), (ic, 2 * ic, False)],
        "conv1": [(2 * ic, 2 * ic, True), (2 * ic, 2 * ic, True),
                  (2 * ic, 4 * ic, False)],
        "conv2": [(4 * ic, 8 * ic, True), (8 * ic, 8 * ic, True),
                  (8 * ic, 8 * ic, True), (8 * ic, 8 * ic, True),
                  (8 * ic, 4 * ic, False)],
        # relu0 folded into the last layer of conv3.
        "conv3": [(8 * ic, 4 * ic, True), (4 * ic, 4 * ic, True),
                  (4 * ic, 2 * ic, True)],
        "conv4": [(4 * ic, 2 * ic, True), (2 * ic, 2 * ic, True),
                  (2 * ic, oc, False)],
    }


# -----------------------------------------------------------------------------
# Small constant matrices (maxpool lane-compaction, bilinear interpolation)
# -----------------------------------------------------------------------------
def _pool_select_matrix(h, w):
    """(h*w, (h/2)*(w/2)) 0/1 matrix selecting the top-left of each 2x2 window."""
    ho, wo = h // 2, w // 2
    m = np.zeros((h * w, ho * wo), np.float32)
    for yo in range(ho):
        for xo in range(wo):
            m[(2 * yo) * w + 2 * xo, yo * wo + xo] = 1.0
    return m


def _interp_matrix_1d(n_in, n_out):
    """1-D bilinear interpolation matrix matching F.interpolate(align_corners=True)."""
    m = np.zeros((n_out, n_in), np.float32)
    if n_in == 1:
        m[:, 0] = 1.0
        return m
    for i in range(n_out):
        pos = i * (n_in - 1) / (n_out - 1)
        lo = min(int(np.floor(pos)), n_in - 1)
        hi = min(lo + 1, n_in - 1)
        frac = pos - lo
        m[i, lo] += 1.0 - frac
        m[i, hi] += frac
    return m


def _upsample_matrix(h, w):
    """(h*w, 4*h*w) matrix M so that x(C, h*w) @ M == bilinear x2 (align_corners)."""
    m = np.kron(_interp_matrix_1d(h, 2 * h), _interp_matrix_1d(w, 2 * w))
    return np.ascontiguousarray(m.T.astype(np.float32))


# -----------------------------------------------------------------------------
# Fused Pallas kernel
# -----------------------------------------------------------------------------
def _build_kernel(defs, H, W):
    def kernel(*refs):
        # ---- unpack refs -----------------------------------------------------
        x_ref = refs[0]
        pos = 1
        wb = {}
        for name in _BLOCKS:
            lst = []
            for _ in defs[name]:
                lst.append((refs[pos], refs[pos + 1]))
                pos += 2
            wb[name] = lst
        sel0_ref, sel1_ref, up0_ref, up1_ref = (
            refs[pos], refs[pos + 1], refs[pos + 2], refs[pos + 3])
        o_ref = refs[pos + 4]
        pad_ref = refs[pos + 5]          # VMEM scratch: zero-guarded flat window

        # ---- helpers ---------------------------------------------------------
        def write_padded(vals, h, w):
            """Channel-stack `vals` into pad_ref with zero guards of width w+1
            on both sides of the flattened (row-major) spatial axis."""
            s = h * w
            guard = w + 1
            width = s + 2 * guard
            cin = sum(int(v.shape[0]) for v in vals)
            zero = jnp.zeros((cin, guard), jnp.float32)
            pad_ref[0:cin, 0:guard] = zero
            pad_ref[0:cin, guard + s:width] = zero
            off = 0
            for v in vals:
                c = int(v.shape[0])
                pad_ref[off:off + c, guard:guard + s] = v
                off += c
            return cin, guard, s

        def conv3x3(vals, w_ref, b_ref, h, w, relu):
            """3x3, padding=1 conv as one deep-K bf16 matmul (f32 accumulate)."""
            cin, guard, s = write_padded(vals, h, w)
            col = jax.lax.broadcasted_iota(jnp.int32, (1, s), 1) % w
            not_first_col = col != 0
            not_last_col = col != (w - 1)
            taps = []
            for dy in (-1, 0, 1):
                for dx in (-1, 0, 1):
                    o = dy * w + dx
                    t = pad_ref[0:cin, guard + o:guard + o + s]
                    if dx == 1:        # tap reads (y, x+1): invalid at x == w-1
                        t = jnp.where(not_last_col, t, 0.0)
                    elif dx == -1:     # tap reads (y, x-1): invalid at x == 0
                        t = jnp.where(not_first_col, t, 0.0)
                    taps.append(t)
            patches = jnp.concatenate(taps, axis=0).astype(jnp.bfloat16)  # (9cin, s)
            acc = jnp.dot(w_ref[...], patches,
                          preferred_element_type=jnp.float32)            # (cout, s)
            acc = acc + b_ref[...]
            if relu:
                acc = jnp.maximum(acc, 0.0)
            return acc

        def conv_block(vals, name, h, w):
            x = None
            for li, ((w_ref, b_ref), (_, _, relu)) in enumerate(
                    zip(wb[name], defs[name])):
                x = conv3x3(vals if li == 0 else [x], w_ref, b_ref, h, w, relu)
            return x

        def maxpool2(v, sel_ref, h, w):
            cin, guard, s = write_padded([v], h, w)
            t01 = pad_ref[0:cin, guard + 1:guard + 1 + s]
            t10 = pad_ref[0:cin, guard + w:guard + w + s]
            t11 = pad_ref[0:cin, guard + w + 1:guard + w + 1 + s]
            m = jnp.maximum(jnp.maximum(v, t01), jnp.maximum(t10, t11))
            # Exact lane compaction (one 1.0 per output column), kept in f32.
            return jnp.dot(m, sel_ref[...], preferred_element_type=jnp.float32)

        def upsample2x(v, up_ref):
            return jnp.dot(v, up_ref[...], preferred_element_type=jnp.float32)

        # ---- forward pass (per batch element) --------------------------------
        h0, w0 = H, W
        h1, w1 = H // 2, W // 2
        h2, w2 = H // 4, W // 4

        x = x_ref[0].astype(jnp.float32)                 # (C_in, H*W)
        x = conv_block([x], "conv0", h0, w0)
        skip0 = x
        x = maxpool2(x, sel0_ref, h0, w0)
        x = conv_block([x], "conv1", h1, w1)
        skip1 = x
        x = maxpool2(x, sel1_ref, h1, w1)
        x = conv_block([x], "conv2", h2, w2)
        x = upsample2x(x, up0_ref)
        x = conv_block([x, skip1], "conv3", h1, w1)      # cat((up, skip1)); relu0 folded
        x = upsample2x(x, up1_ref)
        x = conv_block([x, skip0], "conv4", h0, w0)      # cat((up, skip0))
        o_ref[0] = x.astype(o_ref.dtype)

    return kernel


# -----------------------------------------------------------------------------
# Parameters and wrapper
# -----------------------------------------------------------------------------
def init_params(key, num_input_channels, num_output_channels):
    """Deterministic synthetic parameters; conv weights are HWIO (3,3,Cin,Cout)."""
    defs = _layer_defs(num_input_channels, num_output_channels)
    params = {}
    idx = 0
    for name in _BLOCKS:
        plist = []
        for (cin, cout, _) in defs[name]:
            k = jax.random.fold_in(key, idx)
            idx += 1
            kw, kb = jax.random.split(k)
            w = jax.random.normal(kw, (3, 3, cin, cout), jnp.float32) / np.sqrt(9.0 * cin)
            b = 0.01 * jax.random.normal(kb, (cout,), jnp.float32)
            plist.append((w, b))
        params[name] = plist
    return params


def pack_params(params, defs):
    """Pack each conv as bf16 (Cout, 9*Cin) matmul weight + f32 (Cout, 1) bias."""
    flat = []
    for name in _BLOCKS:
        for (w, b), (cin, cout, _) in zip(params[name], defs[name]):
            wmat = jnp.transpose(w.reshape(9 * cin, cout)).astype(jnp.bfloat16)
            flat.append(wmat)
            flat.append(b.reshape(cout, 1).astype(jnp.float32))
    return flat


def encoder_unet_forward(x_nchw, params):
    N, C_in, H, W = x_nchw.shape
    assert H % 4 == 0 and W % 4 == 0
    C_out = params["conv4"][-1][1].shape[0]
    defs = _layer_defs(C_in, C_out)
    S0 = H * W

    flat_params = pack_params(params, defs)
    consts = [
        jnp.asarray(_pool_select_matrix(H, W)),            # (S0, S1)
        jnp.asarray(_pool_select_matrix(H // 2, W // 2)),  # (S1, S2)
        jnp.asarray(_upsample_matrix(H // 4, W // 4)),     # (S2, S1)
        jnp.asarray(_upsample_matrix(H // 2, W // 2)),     # (S1, S0)
    ]

    def full_spec(arr):
        return pl.BlockSpec(tuple(int(d) for d in arr.shape), lambda n: (0, 0))

    in_specs = [pl.BlockSpec((1, C_in, S0), lambda n: (n, 0, 0))]
    in_specs += [full_spec(a) for a in flat_params]
    in_specs += [full_spec(a) for a in consts]

    max_c = max(cin for layers in defs.values() for (cin, _, _) in layers)
    pad_width = S0 + 2 * (W + 1)

    out = pl.pallas_call(
        _build_kernel(defs, H, W),
        out_shape=jax.ShapeDtypeStruct((N, C_out, S0), x_nchw.dtype),
        grid=(N,),
        in_specs=in_specs,
        out_specs=pl.BlockSpec((1, C_out, S0), lambda n: (n, 0, 0)),
        scratch_shapes=[pltpu.VMEM((max_c, pad_width), jnp.float32)],
        compiler_params=pltpu.CompilerParams(
            dimension_semantics=("parallel",),        # batch across v7x's 2 TCs
            vmem_limit_bytes=32 * 1024 * 1024,        # well under v7x 64 MiB
        ),
    )(x_nchw.reshape(N, C_in, S0), *flat_params, *consts)
    return out.reshape(N, C_out, H, W)


# -----------------------------------------------------------------------------
# Plain-XLA reference (for a loose numerical sanity check)
# -----------------------------------------------------------------------------
def encoder_unet_reference(x_nchw, params):
    C_in = x_nchw.shape[1]
    C_out = params["conv4"][-1][1].shape[0]
    defs = _layer_defs(C_in, C_out)
    hp = jax.lax.Precision.HIGHEST

    def conv_block(x, name):
        for (w, b), (_, _, relu) in zip(params[name], defs[name]):
            w = w.astype(jnp.bfloat16).astype(jnp.float32)   # match packed weights
            x = jax.lax.conv_general_dilated(
                x, w, window_strides=(1, 1), padding=((1, 1), (1, 1)),
                dimension_numbers=("NCHW", "HWIO", "NCHW"), precision=hp)
            x = x + b.reshape(1, -1, 1, 1)
            if relu:
                x = jnp.maximum(x, 0.0)
        return x

    def pool(x):
        return jax.lax.reduce_window(x, -jnp.inf, jax.lax.max,
                                     (1, 1, 2, 2), (1, 1, 2, 2), "VALID")

    def upsample(x):
        h, w = x.shape[2], x.shape[3]
        mh = jnp.asarray(_interp_matrix_1d(h, 2 * h))
        mw = jnp.asarray(_interp_matrix_1d(w, 2 * w))
        return jnp.einsum("oy,px,ncyx->ncop", mh, mw, x, precision=hp)

    x = conv_block(x_nchw, "conv0")
    skip0 = x
    x = pool(x)
    x = conv_block(x, "conv1")
    skip1 = x
    x = pool(x)
    x = conv_block(x, "conv2")
    x = upsample(x)
    x = jnp.concatenate([x, skip1], axis=1)
    x = conv_block(x, "conv3")                 # includes relu0 (folded)
    x = upsample(x)
    x = jnp.concatenate([x, skip0], axis=1)
    x = conv_block(x, "conv4")
    return x


if __name__ == "__main__":
    key = jax.random.PRNGKey(0)
    N, C_IN, H, W = 2, 4, 16, 16
    C_OUT = 4

    params = init_params(key, C_IN, C_OUT)
    x = jax.random.normal(jax.random.fold_in(key, 999), (N, C_IN, H, W),
                          jnp.float32)

    y = jax.block_until_ready(jax.jit(encoder_unet_forward)(x, params))
    assert y.shape == (N, C_OUT, H, W), y.shape
    assert bool(jnp.all(jnp.isfinite(y)))

    # Loose sanity check vs plain-XLA reference (kernel uses bf16 MXU operands
    # with f32 accumulation, so a small numerical drift is expected).
    y_ref = jax.block_until_ready(jax.jit(encoder_unet_reference)(x, params))
    err = float(jnp.max(jnp.abs(y - y_ref)))
    tol = 0.1 * max(1.0, float(jnp.max(jnp.abs(y_ref))))
    assert err < tol, f"max |pallas - reference| = {err} (tol {tol})"

    print("KERNEL_OK")
</pallas_src>

<mosaic_0001>
module attributes {stable_mosaic.version = 11 : i64} {
  func.func @kernel(%arg0: i32, %arg1: memref<1x4x256xf32, #tpu.memory_space<vmem>>, %arg2: memref<4x36xbf16, #tpu.memory_space<vmem>>, %arg3: memref<4x1xf32, #tpu.memory_space<vmem>>, %arg4: memref<4x36xbf16, #tpu.memory_space<vmem>>, %arg5: memref<4x1xf32, #tpu.memory_space<vmem>>, %arg6: memref<8x36xbf16, #tpu.memory_space<vmem>>, %arg7: memref<8x1xf32, #tpu.memory_space<vmem>>, %arg8: memref<8x72xbf16, #tpu.memory_space<vmem>>, %arg9: memref<8x1xf32, #tpu.memory_space<vmem>>, %arg10: memref<8x72xbf16, #tpu.memory_space<vmem>>, %arg11: memref<8x1xf32, #tpu.memory_space<vmem>>, %arg12: memref<16x72xbf16, #tpu.memory_space<vmem>>, %arg13: memref<16x1xf32, #tpu.memory_space<vmem>>, %arg14: memref<32x144xbf16, #tpu.memory_space<vmem>>, %arg15: memref<32x1xf32, #tpu.memory_space<vmem>>, %arg16: memref<32x288xbf16, #tpu.memory_space<vmem>>, %arg17: memref<32x1xf32, #tpu.memory_space<vmem>>, %arg18: memref<32x288xbf16, #tpu.memory_space<vmem>>, %arg19: memref<32x1xf32, #tpu.memory_space<vmem>>, %arg20: memref<32x288xbf16, #tpu.memory_space<vmem>>, %arg21: memref<32x1xf32, #tpu.memory_space<vmem>>, %arg22: memref<16x288xbf16, #tpu.memory_space<vmem>>, %arg23: memref<16x1xf32, #tpu.memory_space<vmem>>, %arg24: memref<16x288xbf16, #tpu.memory_space<vmem>>, %arg25: memref<16x1xf32, #tpu.memory_space<vmem>>, %arg26: memref<16x144xbf16, #tpu.memory_space<vmem>>, %arg27: memref<16x1xf32, #tpu.memory_space<vmem>>, %arg28: memref<8x144xbf16, #tpu.memory_space<vmem>>, %arg29: memref<8x1xf32, #tpu.memory_space<vmem>>, %arg30: memref<8x144xbf16, #tpu.memory_space<vmem>>, %arg31: memref<8x1xf32, #tpu.memory_space<vmem>>, %arg32: memref<8x72xbf16, #tpu.memory_space<vmem>>, %arg33: memref<8x1xf32, #tpu.memory_space<vmem>>, %arg34: memref<4x72xbf16, #tpu.memory_space<vmem>>, %arg35: memref<4x1xf32, #tpu.memory_space<vmem>>, %arg36: memref<256x64xf32, #tpu.memory_space<vmem>>, %arg37: memref<64x16xf32, #tpu.memory_space<vmem>>, %arg38: memref<16x64xf32, #tpu.memory_space<vmem>>, %arg39: memref<64x256xf32, #tpu.memory_space<vmem>>, %arg40: memref<1x4x256xf32, #tpu.memory_space<vmem>>, %arg41: memref<32x290xf32, #tpu.memory_space<vmem>>) attributes {dimension_semantics = [#tpu.dimension_semantics<parallel>], iteration_bounds = array<i64: 2>, scalar_prefetch = 0 : i64, scratch_operands = 1 : i64, tpu.core_type = #tpu.core_type<tc>, window_params = [{transform_indices = @transform_0, window_bounds = array<i64: 1, 4, 256>}, {pipeline_mode = #tpu.pipeline_mode<synchronous>, transform_indices = @transform_1, window_bounds = array<i64: 4, 36>}, {pipeline_mode = #tpu.pipeline_mode<synchronous>, transform_indices = @transform_2, window_bounds = array<i64: 4, 1>}, {pipeline_mode = #tpu.pipeline_mode<synchronous>, transform_indices = @transform_3, window_bounds = array<i64: 4, 36>}, {pipeline_mode = #tpu.pipeline_mode<synchronous>, transform_indices = @transform_4, window_bounds = array<i64: 4, 1>}, {pipeline_mode = #tpu.pipeline_mode<synchronous>, transform_indices = @transform_5, window_bounds = array<i64: 8, 36>}, {pipeline_mode = #tpu.pipeline_mode<synchronous>, transform_indices = @transform_6, window_bounds = array<i64: 8, 1>}, {pipeline_mode = #tpu.pipeline_mode<synchronous>, transform_indices = @transform_7, window_bounds = array<i64: 8, 72>}, {pipeline_mode = #tpu.pipeline_mode<synchronous>, transform_indices = @transform_8, window_bounds = array<i64: 8, 1>}, {pipeline_mode = #tpu.pipeline_mode<synchronous>, transform_indices = @transform_9, window_bounds = array<i64: 8, 72>}, {pipeline_mode = #tpu.pipeline_mode<synchronous>, transform_indices = @transform_10, window_bounds = array<i64: 8, 1>}, {pipeline_mode = #tpu.pipeline_mode<synchronous>, transform_indices = @transform_11, window_bounds = array<i64: 16, 72>}, {pipeline_mode = #tpu.pipeline_mode<synchronous>, transform_indices = @transform_12, window_bounds = array<i64: 16, 1>}, {pipeline_mode = #tpu.pipeline_mode<synchronous>, transform_indices = @transform_13, window_bounds = array<i64: 32, 144>}, {pipeline_mode = #tpu.pipeline_mode<synchronous>, transform_indices = @transform_14, window_bounds = array<i64: 32, 1>}, {pipeline_mode = #tpu.pipeline_mode<synchronous>, transform_indices = @transform_15, window_bounds = array<i64: 32, 288>}, {pipeline_mode = #tpu.pipeline_mode<synchronous>, transform_indices = @transform_16, window_bounds = array<i64: 32, 1>}, {pipeline_mode = #tpu.pipeline_mode<synchronous>, transform_indices = @transform_17, window_bounds = array<i64: 32, 288>}, {pipeline_mode = #tpu.pipeline_mode<synchronous>, transform_indices = @transform_18, window_bounds = array<i64: 32, 1>}, {pipeline_mode = #tpu.pipeline_mode<synchronous>, transform_indices = @transform_19, window_bounds = array<i64: 32, 288>}, {pipeline_mode = #tpu.pipeline_mode<synchronous>, transform_indices = @transform_20, window_bounds = array<i64: 32, 1>}, {pipeline_mode = #tpu.pipeline_mode<synchronous>, transform_indices = @transform_21, window_bounds = array<i64: 16, 288>}, {pipeline_mode = #tpu.pipeline_mode<synchronous>, transform_indices = @transform_22, window_bounds = array<i64: 16, 1>}, {pipeline_mode = #tpu.pipeline_mode<synchronous>, transform_indices = @transform_23, window_bounds = array<i64: 16, 288>}, {pipeline_mode = #tpu.pipeline_mode<synchronous>, transform_indices = @transform_24, window_bounds = array<i64: 16, 1>}, {pipeline_mode = #tpu.pipeline_mode<synchronous>, transform_indices = @transform_25, window_bounds = array<i64: 16, 144>}, {pipeline_mode = #tpu.pipeline_mode<synchronous>, transform_indices = @transform_26, window_bounds = array<i64: 16, 1>}, {pipeline_mode = #tpu.pipeline_mode<synchronous>, transform_indices = @transform_27, window_bounds = array<i64: 8, 144>}, {pipeline_mode = #tpu.pipeline_mode<synchronous>, transform_indices = @transform_28, window_bounds = array<i64: 8, 1>}, {pipeline_mode = #tpu.pipeline_mode<synchronous>, transform_indices = @transform_29, window_bounds = array<i64: 8, 144>}, {pipeline_mode = #tpu.pipeline_mode<synchronous>, transform_indices = @transform_30, window_bounds = array<i64: 8, 1>}, {pipeline_mode = #tpu.pipeline_mode<synchronous>, transform_indices = @transform_31, window_bounds = array<i64: 8, 72>}, {pipeline_mode = #tpu.pipeline_mode<synchronous>, transform_indices = @transform_32, window_bounds = array<i64: 8, 1>}, {pipeline_mode = #tpu.pipeline_mode<synchronous>, transform_indices = @transform_33, window_bounds = array<i64: 4, 72>}, {pipeline_mode = #tpu.pipeline_mode<synchronous>, transform_indices = @transform_34, window_bounds = array<i64: 4, 1>}, {pipeline_mode = #tpu.pipeline_mode<synchronous>, transform_indices = @transform_35, window_bounds = array<i64: 256, 64>}, {pipeline_mode = #tpu.pipeline_mode<synchronous>, transform_indices = @transform_36, window_bounds = array<i64: 64, 16>}, {pipeline_mode = #tpu.pipeline_mode<synchronous>, transform_indices = @transform_37, window_bounds = array<i64: 16, 64>}, {pipeline_mode = #tpu.pipeline_mode<synchronous>, transform_indices = @transform_38, window_bounds = array<i64: 64, 256>}, {transform_indices = @transform_39, window_bounds = array<i64: 1, 4, 256>}]} {
    %c0 = arith.constant 0 : index
    %c0_0 = arith.constant 0 : index
    %c0_1 = arith.constant 0 : index
    %0 = vector.load %arg1[%c0, %c0_0, %c0_1] : memref<1x4x256xf32, #tpu.memory_space<vmem>>, vector<1x4x256xf32>
    %1 = vector.shape_cast %0 : vector<1x4x256xf32> to vector<4x256xf32>
    %cst = arith.constant 0.000000e+00 : f32
    %2 = vector.broadcast %cst : f32 to vector<4x17xf32>
    %c0_2 = arith.constant 0 : index
    %c0_3 = arith.constant 0 : index
    %3 = vector.load %arg41[%c0_2, %c0_3] : memref<32x290xf32, #tpu.memory_space<vmem>>, vector<4x17xf32>
    tpu.vector_store %arg41[%c0_2, %c0_3], %2 {strides = array<i32>} : memref<32x290xf32, #tpu.memory_space<vmem>>, vector<4x17xf32>,
    %c0_4 = arith.constant 0 : index
    %c273 = arith.constant 273 : index
    %4 = vector.load %arg41[%c0_4, %c273] : memref<32x290xf32, #tpu.memory_space<vmem>>, vector<4x17xf32>
    tpu.vector_store %arg41[%c0_4, %c273], %2 {strides = array<i32>} : memref<32x290xf32, #tpu.memory_space<vmem>>, vector<4x17xf32>,
    %c0_5 = arith.constant 0 : index
    %c17 = arith.constant 17 : index
    %5 = vector.load %arg41[%c0_5, %c17] : memref<32x290xf32, #tpu.memory_space<vmem>>, vector<4x256xf32>
    tpu.vector_store %arg41[%c0_5, %c17], %1 {strides = array<i32>} : memref<32x290xf32, #tpu.memory_space<vmem>>, vector<4x256xf32>,
    %6 = tpu.iota {dimensions = array<i32: 1>} : vector<1x256xi32>
    %c16_i32 = arith.constant 16 : i32
    %c0_i32 = arith.constant 0 : i32
    %7 = arith.cmpi eq, %c16_i32, %c0_i32 : i32
    %c1_i32 = arith.constant 1 : i32
    %8 = arith.select %7, %c1_i32, %c16_i32 : i32
    %9 = vector.broadcast %8 : i32 to vector<1x256xi32>
    %10 = arith.remsi %6, %9 : vector<1x256xi32>
    %c0_i32_6 = arith.constant 0 : i32
    %11 = vector.broadcast %c0_i32_6 : i32 to vector<1x256xi32>
    %12 = arith.cmpi ne, %10, %11 : vector<1x256xi32>
    %c0_i32_7 = arith.constant 0 : i32
    %13 = vector.broadcast %c0_i32_7 : i32 to vector<1x256xi32>
    %14 = arith.cmpi slt, %10, %13 : vector<1x256xi32>
    %c0_i32_8 = arith.constant 0 : i32
    %15 = arith.cmpi slt, %8, %c0_i32_8 : i32
    %16 = vector.broadcast %15 : i1 to vector<1x256xi1>
    %17 = vector.broadcast %16 : vector<1x256xi1> to vector<1x256xi1>
    %18 = arith.xori %14, %17 : vector<1x256xi1>
    %19 = arith.andi %18, %12 : vector<1x256xi1>
    %20 = vector.broadcast %8 : i32 to vector<1x256xi32>
    %21 = arith.addi %10, %20 : vector<1x256xi32>
    %22 = arith.select %19, %21, %10 : vector<1x256xi1>, vector<1x256xi32>
    %c0_i32_9 = arith.constant 0 : i32
    %23 = vector.broadcast %c0_i32_9 : i32 to vector<1x256xi32>
    %24 = arith.cmpi ne, %22, %23 : vector<1x256xi32>
    %c15_i32 = arith.constant 15 : i32
    %25 = vector.broadcast %c15_i32 : i32 to vector<1x256xi32>
    %26 = arith.cmpi ne, %22, %25 : vector<1x256xi32>
    %c0_10 = arith.constant 0 : index
    %c0_11 = arith.constant 0 : index
    %27 = vector.load %arg41[%c0_10, %c0_11] : memref<32x290xf32, #tpu.memory_space<vmem>>, vector<4x256xf32>
    %cst_12 = arith.constant 0.000000e+00 : f32
    %28 = vector.shape_cast %24 : vector<1x256xi1> to vector<1x256xi1>
    %29 = vector.broadcast %28 : vector<1x256xi1> to vector<4x256xi1>
    %30 = vector.broadcast %cst_12 : f32 to vector<4x256xf32>
    %31 = arith.select %29, %27, %30 : vector<4x256xi1>, vector<4x256xf32>
    %c0_13 = arith.constant 0 : index
    %c1 = arith.constant 1 : index
    %32 = vector.load %arg41[%c0_13, %c1] : memref<32x290xf32, #tpu.memory_space<vmem>>, vector<4x256xf32>
    %c0_14 = arith.constant 0 : index
    %c2 = arith.constant 2 : index
    %33 = vector.load %arg41[%c0_14, %c2] : memref<32x290xf32, #tpu.memory_space<vmem>>, vector<4x256xf32>
    %cst_15 = arith.constant 0.000000e+00 : f32
    %34 = vector.shape_cast %26 : vector<1x256xi1> to vector<1x256xi1>
    %35 = vector.broadcast %34 : vector<1x256xi1> to vector<4x256xi1>
    %36 = vector.broadcast %cst_15 : f32 to vector<4x256xf32>
    %37 = arith.select %35, %33, %36 : vector<4x256xi1>, vector<4x256xf32>
    %c0_16 = arith.constant 0 : index
    %c16 = arith.constant 16 : index
    %38 = vector.load %arg41[%c0_16, %c16] : memref<32x290xf32, #tpu.memory_space<vmem>>, vector<4x256xf32>
    %cst_17 = arith.constant 0.000000e+00 : f32
    %39 = vector.shape_cast %24 : vector<1x256xi1> to vector<1x256xi1>
    %40 = vector.broadcast %39 : vector<1x256xi1> to vector<4x256xi1>
    %41 = vector.broadcast %cst_17 : f32 to vector<4x256xf32>
    %42 = arith.select %40, %38, %41 : vector<4x256xi1>, vector<4x256xf32>
    %c0_18 = arith.constant 0 : index
    %c17_19 = arith.constant 17 : index
    %43 = vector.load %arg41[%c0_18, %c17_19] : memref<32x290xf32, #tpu.memory_space<vmem>>, vector<4x256xf32>
    %c0_20 = arith.constant 0 : index
    %c18 = arith.constant 18 : index
    %44 = vector.load %arg41[%c0_20, %c18] : memref<32x290xf32, #tpu.memory_space<vmem>>, vector<4x256xf32>
    %cst_21 = arith.constant 0.000000e+00 : f32
    %45 = vector.shape_cast %26 : vector<1x256xi1> to vector<1x256xi1>
    %46 = vector.broadcast %45 : vector<1x256xi1> to vector<4x256xi1>
    %47 = vector.broadcast %cst_21 : f32 to vector<4x256xf32>
    %48 = arith.select %46, %44, %47 : vector<4x256xi1>, vector<4x256xf32>
    %c0_22 = arith.constant 0 : index
    %c32 = arith.constant 32 : index
    %49 = vector.load %arg41[%c0_22, %c32] : memref<32x290xf32, #tpu.memory_space<vmem>>, vector<4x256xf32>
    %cst_23 = arith.constant 0.000000e+00 : f32
    %50 = vector.shape_cast %24 : vector<1x256xi1> to vector<1x256xi1>
    %51 = vector.broadcast %50 : vector<1x256xi1> to vector<4x256xi1>
    %52 = vector.broadcast %cst_23 : f32 to vector<4x256xf32>
    %53 = arith.select %51, %49, %52 : vector<4x256xi1>, vector<4x256xf32>
    %c0_24 = arith.constant 0 : index
    %c33 = arith.constant 33 : index
    %54 = vector.load %arg41[%c0_24, %c33] : memref<32x290xf32, #tpu.memory_space<vmem>>, vector<4x256xf32>
    %c0_25 = arith.constant 0 : index
    %c34 = arith.constant 34 : index
    %55 = vector.load %arg41[%c0_25, %c34] : memref<32x290xf32, #tpu.memory_space<vmem>>, vector<4x256xf32>
    %cst_26 = arith.constant 0.000000e+00 : f32
    %56 = vector.shape_cast %26 : vector<1x256xi1> to vector<1x256xi1>
    %57 = vector.broadcast %56 : vector<1x256xi1> to vector<4x256xi1>
    %58 = vector.broadcast %cst_26 : f32 to vector<4x256xf32>
    %59 = arith.select %57, %55, %58 : vector<4x256xi1>, vector<4x256xf32>
    %60 = tpu.concatenate %31, %32, %37, %42, %43, %48, %53, %54, %59 in 0 : vector<4x256xf32>, vector<4x256xf32>, vector<4x256xf32>, vector<4x256xf32>, vector<4x256xf32>, vector<4x256xf32>, vector<4x256xf32>, vector<4x256xf32>, vector<4x256xf32> -> vector<36x256xf32>
    %61 = arith.truncf %60 : vector<36x256xf32> to vector<36x256xbf16>
    %c0_27 = arith.constant 0 : index
    %c0_28 = arith.constant 0 : index
    %62 = vector.load %arg2[%c0_27, %c0_28] : memref<4x36xbf16, #tpu.memory_space<vmem>>, vector<4x36xbf16>
    %cst_29 = arith.constant dense<0.000000e+00> : vector<4x256xf32>
    %63 = tpu.matmul %62, %61, %cst_29 {dimension_numbers = #tpu.dot_dimension_numbers<[1], [0], [0], [1], [0, 0, 1, 1], [], []>} : vector<4x36xbf16>, vector<36x256xbf16>, vector<4x256xf32> -> vector<4x256xf32>
    %c0_30 = arith.constant 0 : index
    %c0_31 = arith.constant 0 : index
    %64 = vector.load %arg3[%c0_30, %c0_31] : memref<4x1xf32, #tpu.memory_space<vmem>>, vector<4x1xf32>
    %65 = vector.broadcast %64 : vector<4x1xf32> to vector<4x256xf32>
    %66 = arith.addf %63, %65 : vector<4x256xf32>
    %cst_32 = arith.constant 0.000000e+00 : f32
    %67 = vector.broadcast %cst_32 : f32 to vector<4x256xf32>
    %68 = arith.maximumf %66, %67 : vector<4x256xf32>
    %cst_33 = arith.constant 0.000000e+00 : f32
    %69 = vector.broadcast %cst_33 : f32 to vector<4x17xf32>
    %c0_34 = arith.constant 0 : index
    %c0_35 = arith.constant 0 : index
    %70 = vector.load %arg41[%c0_34, %c0_35] : memref<32x290xf32, #tpu.memory_space<vmem>>, vector<4x17xf32>
    tpu.vector_store %arg41[%c0_34, %c0_35], %69 {strides = array<i32>} : memref<32x290xf32, #tpu.memory_space<vmem>>, vector<4x17xf32>,
    %c0_36 = arith.constant 0 : index
    %c273_37 = arith.constant 273 : index
    %71 = vector.load %arg41[%c0_36, %c273_37] : memref<32x290xf32, #tpu.memory_space<vmem>>, vector<4x17xf32>
    tpu.vector_store %arg41[%c0_36, %c273_37], %69 {strides = array<i32>} : memref<32x290xf32, #tpu.memory_space<vmem>>, vector<4x17xf32>,
    %c0_38 = arith.constant 0 : index
    %c17_39 = arith.constant 17 : index
    %72 = vector.load %arg41[%c0_38, %c17_39] : memref<32x290xf32, #tpu.memory_space<vmem>>, vector<4x256xf32>
    tpu.vector_store %arg41[%c0_38, %c17_39], %68 {strides = array<i32>} : memref<32x290xf32, #tpu.memory_space<vmem>>, vector<4x256xf32>,
    %73 = tpu.iota {dimensions = array<i32: 1>} : vector<1x256xi32>
    %c16_i32_40 = arith.constant 16 : i32
    %c0_i32_41 = arith.constant 0 : i32
    %74 = arith.cmpi eq, %c16_i32_40, %c0_i32_41 : i32
    %c1_i32_42 = arith.constant 1 : i32
    %75 = arith.select %74, %c1_i32_42, %c16_i32_40 : i32
    %76 = vector.broadcast %75 : i32 to vector<1x256xi32>
    %77 = arith.remsi %73, %76 : vector<1x256xi32>
    %c0_i32_43 = arith.constant 0 : i32
    %78 = vector.broadcast %c0_i32_43 : i32 to vector<1x256xi32>
    %79 = arith.cmpi ne, %77, %78 : vector<1x256xi32>
    %c0_i32_44 = arith.constant 0 : i32
    %80 = vector.broadcast %c0_i32_44 : i32 to vector<1x256xi32>
    %81 = arith.cmpi slt, %77, %80 : vector<1x256xi32>
    %c0_i32_45 = arith.constant 0 : i32
    %82 = arith.cmpi slt, %75, %c0_i32_45 : i32
    %83 = vector.broadcast %82 : i1 to vector<1x256xi1>
    %84 = vector.broadcast %83 : vector<1x256xi1> to vector<1x256xi1>
    %85 = arith.xori %81, %84 : vector<1x256xi1>
    %86 = arith.andi %85, %79 : vector<1x256xi1>
    %87 = vector.broadcast %75 : i32 to vector<1x256xi32>
    %88 = arith.addi %77, %87 : vector<1x256xi32>
    %89 = arith.select %86, %88, %77 : vector<1x256xi1>, vector<1x256xi32>
    %c0_i32_46 = arith.constant 0 : i32
    %90 = vector.broadcast %c0_i32_46 : i32 to vector<1x256xi32>
    %91 = arith.cmpi ne, %89, %90 : vector<1x256xi32>
    %c15_i32_47 = arith.constant 15 : i32
    %92 = vector.broadcast %c15_i32_47 : i32 to vector<1x256xi32>
    %93 = arith.cmpi ne, %89, %92 : vector<1x256xi32>
    %c0_48 = arith.constant 0 : index
    %c0_49 = arith.constant 0 : index
    %94 = vector.load %arg41[%c0_48, %c0_49] : memref<32x290xf32, #tpu.memory_space<vmem>>, vector<4x256xf32>
    %cst_50 = arith.constant 0.000000e+00 : f32
    %95 = vector.shape_cast %91 : vector<1x256xi1> to vector<1x256xi1>
    %96 = vector.broadcast %95 : vector<1x256xi1> to vector<4x256xi1>
    %97 = vector.broadcast %cst_50 : f32 to vector<4x256xf32>
    %98 = arith.select %96, %94, %97 : vector<4x256xi1>, vector<4x256xf32>
    %c0_51 = arith.constant 0 : index
    %c1_52 = arith.constant 1 : index
    %99 = vector.load %arg41[%c0_51, %c1_52] : memref<32x290xf32, #tpu.memory_space<vmem>>, vector<4x256xf32>
    %c0_53 = arith.constant 0 : index
    %c2_54 = arith.constant 2 : index
    %100 = vector.load %arg41[%c0_53, %c2_54] : memref<32x290xf32, #tpu.memory_space<vmem>>, vector<4x256xf32>
    %cst_55 = arith.constant 0.000000e+00 : f32
    %101 = vector.shape_cast %93 : vector<1x256xi1> to vector<1x256xi1>
    %102 = vector.broadcast %101 : vector<1x256xi1> to vector<4x256xi1>
    %103 = vector.broadcast %cst_55 : f32 to vector<4x256xf32>
    %104 = arith.select %102, %100, %103 : vector<4x256xi1>, vector<4x256xf32>
    %c0_56 = arith.constant 0 : index
    %c16_57 = arith.constant 16 : index
    %105 = vector.load %arg41[%c0_56, %c16_57] : memref<32x290xf32, #tpu.memory_space<vmem>>, vector<4x256xf32>
    %cst_58 = arith.constant 0.000000e+00 : f32
    %106 = vector.shape_cast %91 : vector<1x256xi1> to vector<1x256xi1>
    %107 = vector.broadcast %106 : vector<1x256xi1> to vector<4x256xi1>
    %108 = vector.broadcast %cst_58 : f32 to vector<4x256xf32>
    %109 = arith.select %107, %105, %108 : vector<4x256xi1>, vector<4x256xf32>
    %c0_59 = arith.constant 0 : index
    %c17_60 = arith.constant 17 : index
    %110 = vector.load %arg41[%c0_59, %c17_60] : memref<32x290xf32, #tpu.memory_space<vmem>>, vector<4x256xf32>
    %c0_61 = arith.constant 0 : index
    %c18_62 = arith.constant 18 : index
    %111 = vector.load %arg41[%c0_61, %c18_62] : memref<32x290xf32, #tpu.memory_space<vmem>>, vector<4x256xf32>
    %cst_63 = arith.constant 0.000000e+00 : f32
    %112 = vector.shape_cast %93 : vector<1x256xi1> to vector<1x256xi1>
    %113 = vector.broadcast %112 : vector<1x256xi1> to vector<4x256xi1>
    %114 = vector.broadcast %cst_63 : f32 to vector<4x256xf32>
    %115 = arith.select %113, %111, %114 : vector<4x256xi1>, vector<4x256xf32>
    %c0_64 = arith.constant 0 : index
    %c32_65 = arith.constant 32 : index
    %116 = vector.load %arg41[%c0_64, %c32_65] : memref<32x290xf32, #tpu.memory_space<vmem>>, vector<4x256xf32>
    %cst_66 = arith.constant 0.000000e+00 : f32
    %117 = vector.shape_cast %91 : vector<1x256xi1> to vector<1x256xi1>
    %118 = vector.broadcast %117 : vector<1x256xi1> to vector<4x256xi1>
    %119 = vector.broadcast %cst_66 : f32 to vector<4x256xf32>
    %120 = arith.select %118, %116, %119 : vector<4x256xi1>, vector<4x256xf32>
    %c0_67 = arith.constant 0 : index
    %c33_68 = arith.constant 33 : index
    %121 = vector.load %arg41[%c0_67, %c33_68] : memref<32x290xf32, #tpu.memory_space<vmem>>, vector<4x256xf32>
    %c0_69 = arith.constant 0 : index
    %c34_70 = arith.constant 34 : index
    %122 = vector.load %arg41[%c0_69, %c34_70] : memref<32x290xf32, #tpu.memory_space<vmem>>, vector<4x256xf32>
    %cst_71 = arith.constant 0.000000e+00 : f32
    %123 = vector.shape_cast %93 : vector<1x256xi1> to vector<1x256xi1>
    %124 = vector.broadcast %123 : vector<1x256xi1> to vector<4x256xi1>
    %125 = vector.broadcast %cst_71 : f32 to vector<4x256xf32>
    %126 = arith.select %124, %122, %125 : vector<4x256xi1>, vector<4x256xf32>
    %127 = tpu.concatenate %98, %99, %104, %109, %110, %115, %120, %121, %126 in 0 : vector<4x256xf32>, vector<4x256xf32>, vector<4x256xf32>, vector<4x256xf32>, vector<4x256xf32>, vector<4x256xf32>, vector<4x256xf32>, vector<4x256xf32>, vector<4x256xf32> -> vector<36x256xf32>
    %128 = arith.truncf %127 : vector<36x256xf32> to vector<36x256xbf16>
    %c0_72 = arith.constant 0 : index
    %c0_73 = arith.constant 0 : index
    %129 = vector.load %arg4[%c0_72, %c0_73] : memref<4x36xbf16, #tpu.memory_space<vmem>>, vector<4x36xbf16>
    %cst_74 = arith.constant dense<0.000000e+00> : vector<4x256xf32>
    %130 = tpu.matmul %129, %128, %cst_74 {dimension_numbers = #tpu.dot_dimension_numbers<[1], [0], [0], [1], [0, 0, 1, 1], [], []>} : vector<4x36xbf16>, vector<36x256xbf16>, vector<4x256xf32> -> vector<4x256xf32>
    %c0_75 = arith.constant 0 : index
    %c0_76 = arith.constant 0 : index
    %131 = vector.load %arg5[%c0_75, %c0_76] : memref<4x1xf32, #tpu.memory_space<vmem>>, vector<4x1xf32>
    %132 = vector.broadcast %131 : vector<4x1xf32> to vector<4x256xf32>
    %133 = arith.addf %130, %132 : vector<4x256xf32>
    %cst_77 = arith.constant 0.000000e+00 : f32
    %134 = vector.broadcast %cst_77 : f32 to vector<4x256xf32>
    %135 = arith.maximumf %133, %134 : vector<4x256xf32>
    %cst_78 = arith.constant 0.000000e+00 : f32
    %136 = vector.broadcast %cst_78 : f32 to vector<4x17xf32>
    %c0_79 = arith.constant 0 : index
    %c0_80 = arith.constant 0 : index
    %137 = vector.load %arg41[%c0_79, %c0_80] : memref<32x290xf32, #tpu.memory_space<vmem>>, vector<4x17xf32>
    tpu.vector_store %arg41[%c0_79, %c0_80], %136 {strides = array<i32>} : memref<32x290xf32, #tpu.memory_space<vmem>>, vector<4x17xf32>,
    %c0_81 = arith.constant 0 : index
    %c273_82 = arith.constant 273 : index
    %138 = vector.load %arg41[%c0_81, %c273_82] : memref<32x290xf32, #tpu.memory_space<vmem>>, vector<4x17xf32>
    tpu.vector_store %arg41[%c0_81, %c273_82], %136 {strides = array<i32>} : memref<32x290xf32, #tpu.memory_space<vmem>>, vector<4x17xf32>,
    %c0_83 = arith.constant 0 : index
    %c17_84 = arith.constant 17 : index
    %139 = vector.load %arg41[%c0_83, %c17_84] : memref<32x290xf32, #tpu.memory_space<vmem>>, vector<4x256xf32>
    tpu.vector_store %arg41[%c0_83, %c17_84], %135 {strides = array<i32>} : memref<32x290xf32, #tpu.memory_space<vmem>>, vector<4x256xf32>,
    %140 = tpu.iota {dimensions = array<i32: 1>} : vector<1x256xi32>
    %c16_i32_85 = arith.constant 16 : i32
    %c0_i32_86 = arith.constant 0 : i32
    %141 = arith.cmpi eq, %c16_i32_85, %c0_i32_86 : i32
    %c1_i32_87 = arith.constant 1 : i32
    %142 = arith.select %141, %c1_i32_87, %c16_i32_85 : i32
    %143 = vector.broadcast %142 : i32 to vector<1x256xi32>
    %144 = arith.remsi %140, %143 : vector<1x256xi32>
    %c0_i32_88 = arith.constant 0 : i32
    %145 = vector.broadcast %c0_i32_88 : i32 to vector<1x256xi32>
    %146 = arith.cmpi ne, %144, %145 : vector<1x256xi32>
    %c0_i32_89 = arith.constant 0 : i32
    %147 = vector.broadcast %c0_i32_89 : i32 to vector<1x256xi32>
    %148 = arith.cmpi slt, %144, %147 : vector<1x256xi32>
    %c0_i32_90 = arith.constant 0 : i32
    %149 = arith.cmpi slt, %142, %c0_i32_90 : i32
    %150 = vector.broadcast %149 : i1 to vector<1x256xi1>
    %151 = vector.broadcast %150 : vector<1x256xi1> to vector<1x256xi1>
    %152 = arith.xori %148, %151 : vector<1x256xi1>
    %153 = arith.andi %152, %146 : vector<1x256xi1>
    %154 = vector.broadcast %142 : i32 to vector<1x256xi32>
    %155 = arith.addi %144, %154 : vector<1x256xi32>
    %156 = arith.select %153, %155, %144 : vector<1x256xi1>, vector<1x256xi32>
    %c0_i32_91 = arith.constant 0 : i32
    %157 = vector.broadcast %c0_i32_91 : i32 to vector<1x256xi32>
    %158 = arith.cmpi ne, %156, %157 : vector<1x256xi32>
    %c15_i32_92 = arith.constant 15 : i32
    %159 = vector.broadcast %c15_i32_92 : i32 to vector<1x256xi32>
    %160 = arith.cmpi ne, %156, %159 : vector<1x256xi32>
    %c0_93 = arith.constant 0 : index
    %c0_94 = arith.constant 0 : index
    %161 = vector.load %arg41[%c0_93, %c0_94] : memref<32x290xf32, #tpu.memory_space<vmem>>, vector<4x256xf32>
    %cst_95 = arith.constant 0.000000e+00 : f32
    %162 = vector.shape_cast %158 : vector<1x256xi1> to vector<1x256xi1>
    %163 = vector.broadcast %162 : vector<1x256xi1> to vector<4x256xi1>
    %164 = vector.broadcast %cst_95 : f32 to vector<4x256xf32>
    %165 = arith.select %163, %161, %164 : vector<4x256xi1>, vector<4x256xf32>
    %c0_96 = arith.constant 0 : index
    %c1_97 = arith.constant 1 : index
    %166 = vector.load %arg41[%c0_96, %c1_97] : memref<32x290xf32, #tpu.memory_space<vmem>>, vector<4x256xf32>
    %c0_98 = arith.constant 0 : index
    %c2_99 = arith.constant 2 : index
    %167 = vector.load %arg41[%c0_98, %c2_99] : memref<32x290xf32, #tpu.memory_space<vmem>>, vector<4x256xf32>
    %cst_100 = arith.constant 0.000000e+00 : f32
    %168 = vector.shape_cast %160 : vector<1x256xi1> to vector<1x256xi1>
    %169 = vector.broadcast %168 : vector<1x256xi1> to vector<4x256xi1>
    %170 = vector.broadcast %cst_100 : f32 to vector<4x256xf32>
    %171 = arith.select %169, %167, %170 : vector<4x256xi1>, vector<4x256xf32>
    %c0_101 = arith.constant 0 : index
    %c16_102 = arith.constant 16 : index
    %172 = vector.load %arg41[%c0_101, %c16_102] : memref<32x290xf32, #tpu.memory_space<vmem>>, vector<4x256xf32>
    %cst_103 = arith.constant 0.000000e+00 : f32
    %173 = vector.shape_cast %158 : vector<1x256xi1> to vector<1x256xi1>
    %174 = vector.broadcast %173 : vector<1x256xi1> to vector<4x256xi1>
    %175 = vector.broadcast %cst_103 : f32 to vector<4x256xf32>
    %176 = arith.select %174, %172, %175 : vector<4x256xi1>, vector<4x256xf32>
    %c0_104 = arith.constant 0 : index
    %c17_105 = arith.constant 17 : index
    %177 = vector.load %arg41[%c0_104, %c17_105] : memref<32x290xf32, #tpu.memory_space<vmem>>, vector<4x256xf32>
    %c0_106 = arith.constant 0 : index
    %c18_107 = arith.constant 18 : index
    %178 = vector.load %arg41[%c0_106, %c18_107] : memref<32x290xf32, #tpu.memory_space<vmem>>, vector<4x256xf32>
    %cst_108 = arith.constant 0.000000e+00 : f32
    %179 = vector.shape_cast %160 : vector<1x256xi1> to vector<1x256xi1>
    %180 = vector.broadcast %179 : vector<1x256xi1> to vector<4x256xi1>
    %181 = vector.broadcast %cst_108 : f32 to vector<4x256xf32>
    %182 = arith.select %180, %178, %181 : vector<4x256xi1>, vector<4x256xf32>
    %c0_109 = arith.constant 0 : index
    %c32_110 = arith.constant 32 : index
    %183 = vector.load %arg41[%c0_109, %c32_110] : memref<32x290xf32, #tpu.memory_space<vmem>>, vector<4x256xf32>
    %cst_111 = arith.constant 0.000000e+00 : f32
    %184 = vector.shape_cast %158 : vector<1x256xi1> to vector<1x256xi1>
    %185 = vector.broadcast %184 : vector<1x256xi1> to vector<4x256xi1>
    %186 = vector.broadcast %cst_111 : f32 to vector<4x256xf32>
    %187 = arith.select %185, %183, %186 : vector<4x256xi1>, vector<4x256xf32>
    %c0_112 = arith.constant 0 : index
    %c33_113 = arith.constant 33 : index
    %188 = vector.load %arg41[%c0_112, %c33_113] : memref<32x290xf32, #tpu.memory_space<vmem>>, vector<4x256xf32>
    %c0_114 = arith.constant 0 : index
    %c34_115 = arith.constant 34 : index
    %189 = vector.load %arg41[%c0_114, %c34_115] : memref<32x290xf32, #tpu.memory_space<vmem>>, vector<4x256xf32>
    %cst_116 = arith.constant 0.000000e+00 : f32
    %190 = vector.shape_cast %160 : vector<1x256xi1> to vector<1x256xi1>
    %191 = vector.broadcast %190 : vector<1x256xi1> to vector<4x256xi1>
    %192 = vector.broadcast %cst_116 : f32 to vector<4x256xf32>
    %193 = arith.select %191, %189, %192 : vector<4x256xi1>, vector<4x256xf32>
    %194 = tpu.concatenate %165, %166, %171, %176, %177, %182, %187, %188, %193 in 0 : vector<4x256xf32>, vector<4x256xf32>, vector<4x256xf32>, vector<4x256xf32>, vector<4x256xf32>, vector<4x256xf32>, vector<4x256xf32>, vector<4x256xf32>, vector<4x256xf32> -> vector<36x256xf32>
    %195 = arith.truncf %194 : vector<36x256xf32> to vector<36x256xbf16>
    %c0_117 = arith.constant 0 : index
    %c0_118 = arith.constant 0 : index
    %196 = vector.load %arg6[%c0_117, %c0_118] : memref<8x36xbf16, #tpu.memory_space<vmem>>, vector<8x36xbf16>
    %cst_119 = arith.constant dense<0.000000e+00> : vector<8x256xf32>
    %197 = tpu.matmul %196, %195, %cst_119 {dimension_numbers = #tpu.dot_dimension_numbers<[1], [0], [0], [1], [0, 0, 1, 1], [], []>} : vector<8x36xbf16>, vector<36x256xbf16>, vector<8x256xf32> -> vector<8x256xf32>
    %c0_120 = arith.constant 0 : index
    %c0_121 = arith.constant 0 : index
    %198 = vector.load %arg7[%c0_120, %c0_121] : memref<8x1xf32, #tpu.memory_space<vmem>>, vector<8x1xf32>
    %199 = vector.broadcast %198 : vector<8x1xf32> to vector<8x256xf32>
    %200 = arith.addf %197, %199 : vector<8x256xf32>
    %cst_122 = arith.constant 0.000000e+00 : f32
    %201 = vector.broadcast %cst_122 : f32 to vector<8x17xf32>
    %c0_123 = arith.constant 0 : index
    %c0_124 = arith.constant 0 : index
    %202 = vector.load %arg41[%c0_123, %c0_124] : memref<32x290xf32, #tpu.memory_space<vmem>>, vector<8x17xf32>
    tpu.vector_store %arg41[%c0_123, %c0_124], %201 {strides = array<i32>} : memref<32x290xf32, #tpu.memory_space<vmem>>, vector<8x17xf32>,
    %c0_125 = arith.constant 0 : index
    %c273_126 = arith.constant 273 : index
    %203 = vector.load %arg41[%c0_125, %c273_126] : memref<32x290xf32, #tpu.memory_space<vmem>>, vector<8x17xf32>
    tpu.vector_store %arg41[%c0_125, %c273_126], %201 {strides = array<i32>} : memref<32x290xf32, #tpu.memory_space<vmem>>, vector<8x17xf32>,
    %c0_127 = arith.constant 0 : index
    %c17_128 = arith.constant 17 : index
    %204 = vector.load %arg41[%c0_127, %c17_128] : memref<32x290xf32, #tpu.memory_space<vmem>>, vector<8x256xf32>
    tpu.vector_store %arg41[%c0_127, %c17_128], %200 {strides = array<i32>} : memref<32x290xf32, #tpu.memory_space<vmem>>, vector<8x256xf32>,
    %c0_129 = arith.constant 0 : index
    %c18_130 = arith.constant 18 : index
    %205 = vector.load %arg41[%c0_129, %c18_130] : memref<32x290xf32, #tpu.memory_space<vmem>>, vector<8x256xf32>
    %c0_131 = arith.constant 0 : index
    %c33_132 = arith.constant 33 : index
    %206 = vector.load %arg41[%c0_131, %c33_132] : memref<32x290xf32, #tpu.memory_space<vmem>>, vector<8x256xf32>
    %c0_133 = arith.constant 0 : index
    %c34_134 = arith.constant 34 : index
    %207 = vector.load %arg41[%c0_133, %c34_134] : memref<32x290xf32, #tpu.memory_space<vmem>>, vector<8x256xf32>
    %208 = arith.maximumf %200, %205 : vector<8x256xf32>
    %209 = arith.maximumf %206, %207 : vector<8x256xf32>
    %210 = arith.maximumf %208, %209 : vector<8x256xf32>
    %c0_135 = arith.constant 0 : index
    %c0_136 = arith.constant 0 : index
    %211 = vector.load %arg36[%c0_135, %c0_136] : memref<256x64xf32, #tpu.memory_space<vmem>>, vector<256x64xf32>
    %cst_137 = arith.constant dense<0.000000e+00> : vector<8x64xf32>
    %212 = tpu.matmul %210, %211, %cst_137 {dimension_numbers = #tpu.dot_dimension_numbers<[1], [0], [0], [1], [0, 0, 1, 1], [], []>} : vector<8x256xf32>, vector<256x64xf32>, vector<8x64xf32> -> vector<8x64xf32>
    %cst_138 = arith.constant 0.000000e+00 : f32
    %213 = vector.broadcast %cst_138 : f32 to vector<8x9xf32>
    %c0_139 = arith.constant 0 : index
    %c0_140 = arith.constant 0 : index
    %214 = vector.load %arg41[%c0_139, %c0_140] : memref<32x290xf32, #tpu.memory_space<vmem>>, vector<8x9xf32>
    tpu.vector_store %arg41[%c0_139, %c0_140], %213 {strides = array<i32>} : memref<32x290xf32, #tpu.memory_space<vmem>>, vector<8x9xf32>,
    %c0_141 = arith.constant 0 : index
    %c73 = arith.constant 73 : index
    %215 = vector.load %arg41[%c0_141, %c73] : memref<32x290xf32, #tpu.memory_space<vmem>>, vector<8x9xf32>
    tpu.vector_store %arg41[%c0_141, %c73], %213 {strides = array<i32>} : memref<32x290xf32, #tpu.memory_space<vmem>>, vector<8x9xf32>,
    %c0_142 = arith.constant 0 : index
    %c9 = arith.constant 9 : index
    %216 = vector.load %arg41[%c0_142, %c9] : memref<32x290xf32, #tpu.memory_space<vmem>>, vector<8x64xf32>
    tpu.vector_store %arg41[%c0_142, %c9], %212 {strides = array<i32>} : memref<32x290xf32, #tpu.memory_space<vmem>>, vector<8x64xf32>,
    %217 = tpu.iota {dimensions = array<i32: 1>} : vector<1x64xi32>
    %c8_i32 = arith.constant 8 : i32
    %c0_i32_143 = arith.constant 0 : i32
    %218 = arith.cmpi eq, %c8_i32, %c0_i32_143 : i32
    %c1_i32_144 = arith.constant 1 : i32
    %219 = arith.select %218, %c1_i32_144, %c8_i32 : i32
    %220 = vector.broadcast %219 : i32 to vector<1x64xi32>
    %221 = arith.remsi %217, %220 : vector<1x64xi32>
    %c0_i32_145 = arith.constant 0 : i32
    %222 = vector.broadcast %c0_i32_145 : i32 to vector<1x64xi32>
    %223 = arith.cmpi ne, %221, %222 : vector<1x64xi32>
    %c0_i32_146 = arith.constant 0 : i32
    %224 = vector.broadcast %c0_i32_146 : i32 to vector<1x64xi32>
    %225 = arith.cmpi slt, %221, %224 : vector<1x64xi32>
    %c0_i32_147 = arith.constant 0 : i32
    %226 = arith.cmpi slt, %219, %c0_i32_147 : i32
    %227 = vector.broadcast %226 : i1 to vector<1x64xi1>
    %228 = vector.broadcast %227 : vector<1x64xi1> to vector<1x64xi1>
    %229 = arith.xori %225, %228 : vector<1x64xi1>
    %230 = arith.andi %229, %223 : vector<1x64xi1>
    %231 = vector.broadcast %219 : i32 to vector<1x64xi32>
    %232 = arith.addi %221, %231 : vector<1x64xi32>
    %233 = arith.select %230, %232, %221 : vector<1x64xi1>, vector<1x64xi32>
    %c0_i32_148 = arith.constant 0 : i32
    %234 = vector.broadcast %c0_i32_148 : i32 to vector<1x64xi32>
    %235 = arith.cmpi ne, %233, %234 : vector<1x64xi32>
    %c7_i32 = arith.constant 7 : i32
    %236 = vector.broadcast %c7_i32 : i32 to vector<1x64xi32>
    %237 = arith.cmpi ne, %233, %236 : vector<1x64xi32>
    %c0_149 = arith.constant 0 : index
    %c0_150 = arith.constant 0 : index
    %238 = vector.load %arg41[%c0_149, %c0_150] : memref<32x290xf32, #tpu.memory_space<vmem>>, vector<8x64xf32>
    %cst_151 = arith.constant 0.000000e+00 : f32
    %239 = vector.shape_cast %235 : vector<1x64xi1> to vector<1x64xi1>
    %240 = vector.broadcast %239 : vector<1x64xi1> to vector<8x64xi1>
    %241 = vector.broadcast %cst_151 : f32 to vector<8x64xf32>
    %242 = arith.select %240, %238, %241 : vector<8x64xi1>, vector<8x64xf32>
    %c0_152 = arith.constant 0 : index
    %c1_153 = arith.constant 1 : index
    %243 = vector.load %arg41[%c0_152, %c1_153] : memref<32x290xf32, #tpu.memory_space<vmem>>, vector<8x64xf32>
    %c0_154 = arith.constant 0 : index
    %c2_155 = arith.constant 2 : index
    %244 = vector.load %arg41[%c0_154, %c2_155] : memref<32x290xf32, #tpu.memory_space<vmem>>, vector<8x64xf32>
    %cst_156 = arith.constant 0.000000e+00 : f32
    %245 = vector.shape_cast %237 : vector<1x64xi1> to vector<1x64xi1>
    %246 = vector.broadcast %245 : vector<1x64xi1> to vector<8x64xi1>
    %247 = vector.broadcast %cst_156 : f32 to vector<8x64xf32>
    %248 = arith.select %246, %244, %247 : vector<8x64xi1>, vector<8x64xf32>
    %c0_157 = arith.constant 0 : index
    %c8 = arith.constant 8 : index
    %249 = vector.load %arg41[%c0_157, %c8] : memref<32x290xf32, #tpu.memory_space<vmem>>, vector<8x64xf32>
    %cst_158 = arith.constant 0.000000e+00 : f32
    %250 = vector.shape_cast %235 : vector<1x64xi1> to vector<1x64xi1>
    %251 = vector.broadcast %250 : vector<1x64xi1> to vector<8x64xi1>
    %252 = vector.broadcast %cst_158 : f32 to vector<8x64xf32>
    %253 = arith.select %251, %249, %252 : vector<8x64xi1>, vector<8x64xf32>
    %c0_159 = arith.constant 0 : index
    %c9_160 = arith.constant 9 : index
    %254 = vector.load %arg41[%c0_159, %c9_160] : memref<32x290xf32, #tpu.memory_space<vmem>>, vector<8x64xf32>
    %c0_161 = arith.constant 0 : index
    %c10 = arith.constant 10 : index
    %255 = vector.load %arg41[%c0_161, %c10] : memref<32x290xf32, #tpu.memory_space<vmem>>, vector<8x64xf32>
    %cst_162 = arith.constant 0.000000e+00 : f32
    %256 = vector.shape_cast %237 : vector<1x64xi1> to vector<1x64xi1>
    %257 = vector.broadcast %256 : vector<1x64xi1> to vector<8x64xi1>
    %258 = vector.broadcast %cst_162 : f32 to vector<8x64xf32>
    %259 = arith.select %257, %255, %258 : vector<8x64xi1>, vector<8x64xf32>
    %c0_163 = arith.constant 0 : index
    %c16_164 = arith.constant 16 : index
    %260 = vector.load %arg41[%c0_163, %c16_164] : memref<32x290xf32, #tpu.memory_space<vmem>>, vector<8x64xf32>
    %cst_165 = arith.constant 0.000000e+00 : f32
    %261 = vector.shape_cast %235 : vector<1x64xi1> to vector<1x64xi1>
    %262 = vector.broadcast %261 : vector<1x64xi1> to vector<8x64xi1>
    %263 = vector.broadcast %cst_165 : f32 to vector<8x64xf32>
    %264 = arith.select %262, %260, %263 : vector<8x64xi1>, vector<8x64xf32>
    %c0_166 = arith.constant 0 : index
    %c17_167 = arith.constant 17 : index
    %265 = vector.load %arg41[%c0_166, %c17_167] : memref<32x290xf32, #tpu.memory_space<vmem>>, vector<8x64xf32>
    %c0_168 = arith.constant 0 : index
    %c18_169 = arith.constant 18 : index
    %266 = vector.load %arg41[%c0_168, %c18_169] : memref<32x290xf32, #tpu.memory_space<vmem>>, vector<8x64xf32>
    %cst_170 = arith.constant 0.000000e+00 : f32
    %267 = vector.shape_cast %237 : vector<1x64xi1> to vector<1x64xi1>
    %268 = vector.broadcast %267 : vector<1x64xi1> to vector<8x64xi1>
    %269 = vector.broadcast %cst_170 : f32 to vector<8x64xf32>
    %270 = arith.select %268, %266, %269 : vector<8x64xi1>, vector<8x64xf32>
    %271 = tpu.concatenate %242, %243, %248, %253, %254, %259, %264, %265, %270 in 0 : vector<8x64xf32>, vector<8x64xf32>, vector<8x64xf32>, vector<8x64xf32>, vector<8x64xf32>, vector<8x64xf32>, vector<8x64xf32>, vector<8x64xf32>, vector<8x64xf32> -> vector<72x64xf32>
    %272 = arith.truncf %271 : vector<72x64xf32> to vector<72x64xbf16>
    %c0_171 = arith.constant 0 : index
    %c0_172 = arith.constant 0 : index
    %273 = vector.load %arg8[%c0_171, %c0_172] : memref<8x72xbf16, #tpu.memory_space<vmem>>, vector<8x72xbf16>
    %cst_173 = arith.constant dense<0.000000e+00> : vector<8x64xf32>
    %274 = tpu.matmul %273, %272, %cst_173 {dimension_numbers = #tpu.dot_dimension_numbers<[1], [0], [0], [1], [0, 0, 1, 1], [], []>} : vector<8x72xbf16>, vector<72x64xbf16>, vector<8x64xf32> -> vector<8x64xf32>
    %c0_174 = arith.constant 0 : index
    %c0_175 = arith.constant 0 : index
    %275 = vector.load %arg9[%c0_174, %c0_175] : memref<8x1xf32, #tpu.memory_space<vmem>>, vector<8x1xf32>
    %276 = vector.broadcast %275 : vector<8x1xf32> to vector<8x64xf32>
    %277 = arith.addf %274, %276 : vector<8x64xf32>
    %cst_176 = arith.constant 0.000000e+00 : f32
    %278 = vector.broadcast %cst_176 : f32 to vector<8x64xf32>
    %279 = arith.maximumf %277, %278 : vector<8x64xf32>
    %cst_177 = arith.constant 0.000000e+00 : f32
    %280 = vector.broadcast %cst_177 : f32 to vector<8x9xf32>
    %c0_178 = arith.constant 0 : index
    %c0_179 = arith.constant 0 : index
    %281 = vector.load %arg41[%c0_178, %c0_179] : memref<32x290xf32, #tpu.memory_space<vmem>>, vector<8x9xf32>
    tpu.vector_store %arg41[%c0_178, %c0_179], %280 {strides = array<i32>} : memref<32x290xf32, #tpu.memory_space<vmem>>, vector<8x9xf32>,
    %c0_180 = arith.constant 0 : index
    %c73_181 = arith.constant 73 : index
    %282 = vector.load %arg41[%c0_180, %c73_181] : memref<32x290xf32, #tpu.memory_space<vmem>>, vector<8x9xf32>
    tpu.vector_store %arg41[%c0_180, %c73_181], %280 {strides = array<i32>} : memref<32x290xf32, #tpu.memory_space<vmem>>, vector<8x9xf32>,
    %c0_182 = arith.constant 0 : index
    %c9_183 = arith.constant 9 : index
    %283 = vector.load %arg41[%c0_182, %c9_183] : memref<32x290xf32, #tpu.memory_space<vmem>>, vector<8x64xf32>
    tpu.vector_store %arg41[%c0_182, %c9_183], %279 {strides = array<i32>} : memref<32x290xf32, #tpu.memory_space<vmem>>, vector<8x64xf32>,
    %284 = tpu.iota {dimensions = array<i32: 1>} : vector<1x64xi32>
    %c8_i32_184 = arith.constant 8 : i32
    %c0_i32_185 = arith.constant 0 : i32
    %285 = arith.cmpi eq, %c8_i32_184, %c0_i32_185 : i32
    %c1_i32_186 = arith.constant 1 : i32
    %286 = arith.select %285, %c1_i32_186, %c8_i32_184 : i32
    %287 = vector.broadcast %286 : i32 to vector<1x64xi32>
    %288 = arith.remsi %284, %287 : vector<1x64xi32>
    %c0_i32_187 = arith.constant 0 : i32
    %289 = vector.broadcast %c0_i32_187 : i32 to vector<1x64xi32>
    %290 = arith.cmpi ne, %288, %289 : vector<1x64xi32>
    %c0_i32_188 = arith.constant 0 : i32
    %291 = vector.broadcast %c0_i32_188 : i32 to vector<1x64xi32>
    %292 = arith.cmpi slt, %288, %291 : vector<1x64xi32>
    %c0_i32_189 = arith.constant 0 : i32
    %293 = arith.cmpi slt, %286, %c0_i32_189 : i32
    %294 = vector.broadcast %293 : i1 to vector<1x64xi1>
    %295 = vector.broadcast %294 : vector<1x64xi1> to vector<1x64xi1>
    %296 = arith.xori %292, %295 : vector<1x64xi1>
    %297 = arith.andi %296, %290 : vector<1x64xi1>
    %298 = vector.broadcast %286 : i32 to vector<1x64xi32>
    %299 = arith.addi %288, %298 : vector<1x64xi32>
    %300 = arith.select %297, %299, %288 : vector<1x64xi1>, vector<1x64xi32>
    %c0_i32_190 = arith.constant 0 : i32
    %301 = vector.broadcast %c0_i32_190 : i32 to vector<1x64xi32>
    %302 = arith.cmpi ne, %300, %301 : vector<1x64xi32>
    %c7_i32_191 = arith.constant 7 : i32
    %303 = vector.broadcast %c7_i32_191 : i32 to vector<1x64xi32>
    %304 = arith.cmpi ne, %300, %303 : vector<1x64xi32>
    %c0_192 = arith.constant 0 : index
    %c0_193 = arith.constant 0 : index
    %305 = vector.load %arg41[%c0_192, %c0_193] : memref<32x290xf32, #tpu.memory_space<vmem>>, vector<8x64xf32>
    %cst_194 = arith.constant 0.000000e+00 : f32
    %306 = vector.shape_cast %302 : vector<1x64xi1> to vector<1x64xi1>
    %307 = vector.broadcast %306 : vector<1x64xi1> to vector<8x64xi1>
    %308 = vector.broadcast %cst_194 : f32 to vector<8x64xf32>
    %309 = arith.select %307, %305, %308 : vector<8x64xi1>, vector<8x64xf32>
    %c0_195 = arith.constant 0 : index
    %c1_196 = arith.constant 1 : index
    %310 = vector.load %arg41[%c0_195, %c1_196] : memref<32x290xf32, #tpu.memory_space<vmem>>, vector<8x64xf32>
    %c0_197 = arith.constant 0 : index
    %c2_198 = arith.constant 2 : index
    %311 = vector.load %arg41[%c0_197, %c2_198] : memref<32x290xf32, #tpu.memory_space<vmem>>, vector<8x64xf32>
    %cst_199 = arith.constant 0.000000e+00 : f32
    %312 = vector.shape_cast %304 : vector<1x64xi1> to vector<1x64xi1>
    %313 = vector.broadcast %312 : vector<1x64xi1> to vector<8x64xi1>
    %314 = vector.broadcast %cst_199 : f32 to vector<8x64xf32>
    %315 = arith.select %313, %311, %314 : vector<8x64xi1>, vector<8x64xf32>
    %c0_200 = arith.constant 0 : index
    %c8_201 = arith.constant 8 : index
    %316 = vector.load %arg41[%c0_200, %c8_201] : memref<32x290xf32, #tpu.memory_space<vmem>>, vector<8x64xf32>
    %cst_202 = arith.constant 0.000000e+00 : f32
    %317 = vector.shape_cast %302 : vector<1x64xi1> to vector<1x64xi1>
    %318 = vector.broadcast %317 : vector<1x64xi1> to vector<8x64xi1>
    %319 = vector.broadcast %cst_202 : f32 to vector<8x64xf32>
    %320 = arith.select %318, %316, %319 : vector<8x64xi1>, vector<8x64xf32>
    %c0_203 = arith.constant 0 : index
    %c9_204 = arith.constant 9 : index
    %321 = vector.load %arg41[%c0_203, %c9_204] : memref<32x290xf32, #tpu.memory_space<vmem>>, vector<8x64xf32>
    %c0_205 = arith.constant 0 : index
    %c10_206 = arith.constant 10 : index
    %322 = vector.load %arg41[%c0_205, %c10_206] : memref<32x290xf32, #tpu.memory_space<vmem>>, vector<8x64xf32>
    %cst_207 = arith.constant 0.000000e+00 : f32
    %323 = vector.shape_cast %304 : vector<1x64xi1> to vector<1x64xi1>
    %324 = vector.broadcast %323 : vector<1x64xi1> to vector<8x64xi1>
    %325 = vector.broadcast %cst_207 : f32 to vector<8x64xf32>
    %326 = arith.select %324, %322, %325 : vector<8x64xi1>, vector<8x64xf32>
    %c0_208 = arith.constant 0 : index
    %c16_209 = arith.constant 16 : index
    %327 = vector.load %arg41[%c0_208, %c16_209] : memref<32x290xf32, #tpu.memory_space<vmem>>, vector<8x64xf32>
    %cst_210 = arith.constant 0.000000e+00 : f32
    %328 = vector.shape_cast %302 : vector<1x64xi1> to vector<1x64xi1>
    %329 = vector.broadcast %328 : vector<1x64xi1> to vector<8x64xi1>
    %330 = vector.broadcast %cst_210 : f32 to vector<8x64xf32>
    %331 = arith.select %329, %327, %330 : vector<8x64xi1>, vector<8x64xf32>
    %c0_211 = arith.constant 0 : index
    %c17_212 = arith.constant 17 : index
    %332 = vector.load %arg41[%c0_211, %c17_212] : memref<32x290xf32, #tpu.memory_space<vmem>>, vector<8x64xf32>
    %c0_213 = arith.constant 0 : index
    %c18_214 = arith.constant 18 : index
    %333 = vector.load %arg41[%c0_213, %c18_214] : memref<32x290xf32, #tpu.memory_space<vmem>>, vector<8x64xf32>
    %cst_215 = arith.constant 0.000000e+00 : f32
    %334 = vector.shape_cast %304 : vector<1x64xi1> to vector<1x64xi1>
    %335 = vector.broadcast %334 : vector<1x64xi1> to vector<8x64xi1>
    %336 = vector.broadcast %cst_215 : f32 to vector<8x64xf32>
    %337 = arith.select %335, %333, %336 : vector<8x64xi1>, vector<8x64xf32>
    %338 = tpu.concatenate %309, %310, %315, %320, %321, %326, %331, %332, %337 in 0 : vector<8x64xf32>, vector<8x64xf32>, vector<8x64xf32>, vector<8x64xf32>, vector<8x64xf32>, vector<8x64xf32>, vector<8x64xf32>, vector<8x64xf32>, vector<8x64xf32> -> vector<72x64xf32>
    %339 = arith.truncf %338 : vector<72x64xf32> to vector<72x64xbf16>
    %c0_216 = arith.constant 0 : index
    %c0_217 = arith.constant 0 : index
    %340 = vector.load %arg10[%c0_216, %c0_217] : memref<8x72xbf16, #tpu.memory_space<vmem>>, vector<8x72xbf16>
    %cst_218 = arith.constant dense<0.000000e+00> : vector<8x64xf32>
    %341 = tpu.matmul %340, %339, %cst_218 {dimension_numbers = #tpu.dot_dimension_numbers<[1], [0], [0], [1], [0, 0, 1, 1], [], []>} : vector<8x72xbf16>, vector<72x64xbf16>, vector<8x64xf32> -> vector<8x64xf32>
    %c0_219 = arith.constant 0 : index
    %c0_220 = arith.constant 0 : index
    %342 = vector.load %arg11[%c0_219, %c0_220] : memref<8x1xf32, #tpu.memory_space<vmem>>, vector<8x1xf32>
    %343 = vector.broadcast %342 : vector<8x1xf32> to vector<8x64xf32>
    %344 = arith.addf %341, %343 : vector<8x64xf32>
    %cst_221 = arith.constant 0.000000e+00 : f32
    %345 = vector.broadcast %cst_221 : f32 to vector<8x64xf32>
    %346 = arith.maximumf %344, %345 : vector<8x64xf32>
    %cst_222 = arith.constant 0.000000e+00 : f32
    %347 = vector.broadcast %cst_222 : f32 to vector<8x9xf32>
    %c0_223 = arith.constant 0 : index
    %c0_224 = arith.constant 0 : index
    %348 = vector.load %arg41[%c0_223, %c0_224] : memref<32x290xf32, #tpu.memory_space<vmem>>, vector<8x9xf32>
    tpu.vector_store %arg41[%c0_223, %c0_224], %347 {strides = array<i32>} : memref<32x290xf32, #tpu.memory_space<vmem>>, vector<8x9xf32>,
    %c0_225 = arith.constant 0 : index
    %c73_226 = arith.constant 73 : index
    %349 = vector.load %arg41[%c0_225, %c73_226] : memref<32x290xf32, #tpu.memory_space<vmem>>, vector<8x9xf32>
    tpu.vector_store %arg41[%c0_225, %c73_226], %347 {strides = array<i32>} : memref<32x290xf32, #tpu.memory_space<vmem>>, vector<8x9xf32>,
    %c0_227 = arith.constant 0 : index
    %c9_228 = arith.constant 9 : index
    %350 = vector.load %arg41[%c0_227, %c9_228] : memref<32x290xf32, #tpu.memory_space<vmem>>, vector<8x64xf32>
    tpu.vector_store %arg41[%c0_227, %c9_228], %346 {strides = array<i32>} : memref<32x290xf32, #tpu.memory_space<vmem>>, vector<8x64xf32>,
    %351 = tpu.iota {dimensions = array<i32: 1>} : vector<1x64xi32>
    %c8_i32_229 = arith.constant 8 : i32
    %c0_i32_230 = arith.constant 0 : i32
    %352 = arith.cmpi eq, %c8_i32_229, %c0_i32_230 : i32
    %c1_i32_231 = arith.constant 1 : i32
    %353 = arith.select %352, %c1_i32_231, %c8_i32_229 : i32
    %354 = vector.broadcast %353 : i32 to vector<1x64xi32>
    %355 = arith.remsi %351, %354 : vector<1x64xi32>
    %c0_i32_232 = arith.constant 0 : i32
    %356 = vector.broadcast %c0_i32_232 : i32 to vector<1x64xi32>
    %357 = arith.cmpi ne, %355, %356 : vector<1x64xi32>
    %c0_i32_233 = arith.constant 0 : i32
    %358 = vector.broadcast %c0_i32_233 : i32 to vector<1x64xi32>
    %359 = arith.cmpi slt, %355, %358 : vector<1x64xi32>
    %c0_i32_234 = arith.constant 0 : i32
    %360 = arith.cmpi slt, %353, %c0_i32_234 : i32
    %361 = vector.broadcast %360 : i1 to vector<1x64xi1>
    %362 = vector.broadcast %361 : vector<1x64xi1> to vector<1x64xi1>
    %363 = arith.xori %359, %362 : vector<1x64xi1>
    %364 = arith.andi %363, %357 : vector<1x64xi1>
    %365 = vector.broadcast %353 : i32 to vector<1x64xi32>
    %366 = arith.addi %355, %365 : vector<1x64xi32>
    %367 = arith.select %364, %366, %355 : vector<1x64xi1>, vector<1x64xi32>
    %c0_i32_235 = arith.constant 0 : i32
    %368 = vector.broadcast %c0_i32_235 : i32 to vector<1x64xi32>
    %369 = arith.cmpi ne, %367, %368 : vector<1x64xi32>
    %c7_i32_236 = arith.constant 7 : i32
    %370 = vector.broadcast %c7_i32_236 : i32 to vector<1x64xi32>
    %371 = arith.cmpi ne, %367, %370 : vector<1x64xi32>
    %c0_237 = arith.constant 0 : index
    %c0_238 = arith.constant 0 : index
    %372 = vector.load %arg41[%c0_237, %c0_238] : memref<32x290xf32, #tpu.memory_space<vmem>>, vector<8x64xf32>
    %cst_239 = arith.constant 0.000000e+00 : f32
    %373 = vector.shape_cast %369 : vector<1x64xi1> to vector<1x64xi1>
    %374 = vector.broadcast %373 : vector<1x64xi1> to vector<8x64xi1>
    %375 = vector.broadcast %cst_239 : f32 to vector<8x64xf32>
    %376 = arith.select %374, %372, %375 : vector<8x64xi1>, vector<8x64xf32>
    %c0_240 = arith.constant 0 : index
    %c1_241 = arith.constant 1 : index
    %377 = vector.load %arg41[%c0_240, %c1_241] : memref<32x290xf32, #tpu.memory_space<vmem>>, vector<8x64xf32>
    %c0_242 = arith.constant 0 : index
    %c2_243 = arith.constant 2 : index
    %378 = vector.load %arg41[%c0_242, %c2_243] : memref<32x290xf32, #tpu.memory_space<vmem>>, vector<8x64xf32>
    %cst_244 = arith.constant 0.000000e+00 : f32
    %379 = vector.shape_cast %371 : vector<1x64xi1> to vector<1x64xi1>
    %380 = vector.broadcast %379 : vector<1x64xi1> to vector<8x64xi1>
    %381 = vector.broadcast %cst_244 : f32 to vector<8x64xf32>
    %382 = arith.select %380, %378, %381 : vector<8x64xi1>, vector<8x64xf32>
    %c0_245 = arith.constant 0 : index
    %c8_246 = arith.constant 8 : index
    %383 = vector.load %arg41[%c0_245, %c8_246] : memref<32x290xf32, #tpu.memory_space<vmem>>, vector<8x64xf32>
    %cst_247 = arith.constant 0.000000e+00 : f32
    %384 = vector.shape_cast %369 : vector<1x64xi1> to vector<1x64xi1>
    %385 = vector.broadcast %384 : vector<1x64xi1> to vector<8x64xi1>
    %386 = vector.broadcast %cst_247 : f32 to vector<8x64xf32>
    %387 = arith.select %385, %383, %386 : vector<8x64xi1>, vector<8x64xf32>
    %c0_248 = arith.constant 0 : index
    %c9_249 = arith.constant 9 : index
    %388 = vector.load %arg41[%c0_248, %c9_249] : memref<32x290xf32, #tpu.memory_space<vmem>>, vector<8x64xf32>
    %c0_250 = arith.constant 0 : index
    %c10_251 = arith.constant 10 : index
    %389 = vector.load %arg41[%c0_250, %c10_251] : memref<32x290xf32, #tpu.memory_space<vmem>>, vector<8x64xf32>
    %cst_252 = arith.constant 0.000000e+00 : f32
    %390 = vector.shape_cast %371 : vector<1x64xi1> to vector<1x64xi1>
    %391 = vector.broadcast %390 : vector<1x64xi1> to vector<8x64xi1>
    %392 = vector.broadcast %cst_252 : f32 to vector<8x64xf32>
    %393 = arith.select %391, %389, %392 : vector<8x64xi1>, vector<8x64xf32>
    %c0_253 = arith.constant 0 : index
    %c16_254 = arith.constant 16 : index
    %394 = vector.load %arg41[%c0_253, %c16_254] : memref<32x290xf32, #tpu.memory_space<vmem>>, vector<8x64xf32>
    %cst_255 = arith.constant 0.000000e+00 : f32
    %395 = vector.shape_cast %369 : vector<1x64xi1> to vector<1x64xi1>
    %396 = vector.broadcast %395 : vector<1x64xi1> to vector<8x64xi1>
    %397 = vector.broadcast %cst_255 : f32 to vector<8x64xf32>
    %398 = arith.select %396, %394, %397 : vector<8x64xi1>, vector<8x64xf32>
    %c0_256 = arith.constant 0 : index
    %c17_257 = arith.constant 17 : index
    %399 = vector.load %arg41[%c0_256, %c17_257] : memref<32x290xf32, #tpu.memory_space<vmem>>, vector<8x64xf32>
    %c0_258 = arith.constant 0 : index
    %c18_259 = arith.constant 18 : index
    %400 = vector.load %arg41[%c0_258, %c18_259] : memref<32x290xf32, #tpu.memory_space<vmem>>, vector<8x64xf32>
    %cst_260 = arith.constant 0.000000e+00 : f32
    %401 = vector.shape_cast %371 : vector<1x64xi1> to vector<1x64xi1>
    %402 = vector.broadcast %401 : vector<1x64xi1> to vector<8x64xi1>
    %403 = vector.broadcast %cst_260 : f32 to vector<8x64xf32>
    %404 = arith.select %402, %400, %403 : vector<8x64xi1>, vector<8x64xf32>
    %405 = tpu.concatenate %376, %377, %382, %387, %388, %393, %398, %399, %404 in 0 : vector<8x64xf32>, vector<8x64xf32>, vector<8x64xf32>, vector<8x64xf32>, vector<8x64xf32>, vector<8x64xf32>, vector<8x64xf32>, vector<8x64xf32>, vector<8x64xf32> -> vector<72x64xf32>
    %406 = arith.truncf %405 : vector<72x64xf32> to vector<72x64xbf16>
    %c0_261 = arith.constant 0 : index
    %c0_262 = arith.constant 0 : index
    %407 = vector.load %arg12[%c0_261, %c0_262] : memref<16x72xbf16, #tpu.memory_space<vmem>>, vector<16x72xbf16>
    %cst_263 = arith.constant dense<0.000000e+00> : vector<16x64xf32>
    %408 = tpu.matmul %407, %406, %cst_263 {dimension_numbers = #tpu.dot_dimension_numbers<[1], [0], [0], [1], [0, 0, 1, 1], [], []>} : vector<16x72xbf16>, vector<72x64xbf16>, vector<16x64xf32> -> vector<16x64xf32>
    %c0_264 = arith.constant 0 : index
    %c0_265 = arith.constant 0 : index
    %409 = vector.load %arg13[%c0_264, %c0_265] : memref<16x1xf32, #tpu.memory_space<vmem>>, vector<16x1xf32>
    %410 = vector.broadcast %409 : vector<16x1xf32> to vector<16x64xf32>
    %411 = arith.addf %408, %410 : vector<16x64xf32>
    %cst_266 = arith.constant 0.000000e+00 : f32
    %412 = vector.broadcast %cst_266 : f32 to vector<16x9xf32>
    %c0_267 = arith.constant 0 : index
    %c0_268 = arith.constant 0 : index
    %413 = vector.load %arg41[%c0_267, %c0_268] : memref<32x290xf32, #tpu.memory_space<vmem>>, vector<16x9xf32>
    tpu.vector_store %arg41[%c0_267, %c0_268], %412 {strides = array<i32>} : memref<32x290xf32, #tpu.memory_space<vmem>>, vector<16x9xf32>,
    %c0_269 = arith.constant 0 : index
    %c73_270 = arith.constant 73 : index
    %414 = vector.load %arg41[%c0_269, %c73_270] : memref<32x290xf32, #tpu.memory_space<vmem>>, vector<16x9xf32>
    tpu.vector_store %arg41[%c0_269, %c73_270], %412 {strides = array<i32>} : memref<32x290xf32, #tpu.memory_space<vmem>>, vector<16x9xf32>,
    %c0_271 = arith.constant 0 : index
    %c9_272 = arith.constant 9 : index
    %415 = vector.load %arg41[%c0_271, %c9_272] : memref<32x290xf32, #tpu.memory_space<vmem>>, vector<16x64xf32>
    tpu.vector_store %arg41[%c0_271, %c9_272], %411 {strides = array<i32>} : memref<32x290xf32, #tpu.memory_space<vmem>>, vector<16x64xf32>,
    %c0_273 = arith.constant 0 : index
    %c10_274 = arith.constant 10 : index
    %416 = vector.load %arg41[%c0_273, %c10_274] : memref<32x290xf32, #tpu.memory_space<vmem>>, vector<16x64xf32>
    %c0_275 = arith.constant 0 : index
    %c17_276 = arith.constant 17 : index
    %417 = vector.load %arg41[%c0_275, %c17_276] : memref<32x290xf32, #tpu.memory_space<vmem>>, vector<16x64xf32>
    %c0_277 = arith.constant 0 : index
    %c18_278 = arith.constant 18 : index
    %418 = vector.load %arg41[%c0_277, %c18_278] : memref<32x290xf32, #tpu.memory_space<vmem>>, vector<16x64xf32>
    %419 = arith.maximumf %411, %416 : vector<16x64xf32>
    %420 = arith.maximumf %417, %418 : vector<16x64xf32>
    %421 = arith.maximumf %419, %420 : vector<16x64xf32>
    %c0_279 = arith.constant 0 : index
    %c0_280 = arith.constant 0 : index
    %422 = vector.load %arg37[%c0_279, %c0_280] : memref<64x16xf32, #tpu.memory_space<vmem>>, vector<64x16xf32>
    %cst_281 = arith.constant dense<0.000000e+00> : vector<16x16xf32>
    %423 = tpu.matmul %421, %422, %cst_281 {dimension_numbers = #tpu.dot_dimension_numbers<[1], [0], [0], [1], [0, 0, 1, 1], [], []>} : vector<16x64xf32>, vector<64x16xf32>, vector<16x16xf32> -> vector<16x16xf32>
    %cst_282 = arith.constant 0.000000e+00 : f32
    %424 = vector.broadcast %cst_282 : f32 to vector<16x5xf32>
    %c0_283 = arith.constant 0 : index
    %c0_284 = arith.constant 0 : index
    %425 = vector.load %arg41[%c0_283, %c0_284] : memref<32x290xf32, #tpu.memory_space<vmem>>, vector<16x5xf32>
    tpu.vector_store %arg41[%c0_283, %c0_284], %424 {strides = array<i32>} : memref<32x290xf32, #tpu.memory_space<vmem>>, vector<16x5xf32>,
    %c0_285 = arith.constant 0 : index
    %c21 = arith.constant 21 : index
    %426 = vector.load %arg41[%c0_285, %c21] : memref<32x290xf32, #tpu.memory_space<vmem>>, vector<16x5xf32>
    tpu.vector_store %arg41[%c0_285, %c21], %424 {strides = array<i32>} : memref<32x290xf32, #tpu.memory_space<vmem>>, vector<16x5xf32>,
    %c0_286 = arith.constant 0 : index
    %c5 = arith.constant 5 : index
    %427 = vector.load %arg41[%c0_286, %c5] : memref<32x290xf32, #tpu.memory_space<vmem>>, vector<16x16xf32>
    tpu.vector_store %arg41[%c0_286, %c5], %423 {strides = array<i32>} : memref<32x290xf32, #tpu.memory_space<vmem>>, vector<16x16xf32>,
    %428 = tpu.iota {dimensions = array<i32: 1>} : vector<1x16xi32>
    %c4_i32 = arith.constant 4 : i32
    %c0_i32_287 = arith.constant 0 : i32
    %429 = arith.cmpi eq, %c4_i32, %c0_i32_287 : i32
    %c1_i32_288 = arith.constant 1 : i32
    %430 = arith.select %429, %c1_i32_288, %c4_i32 : i32
    %431 = vector.broadcast %430 : i32 to vector<1x16xi32>
    %432 = arith.remsi %428, %431 : vector<1x16xi32>
    %c0_i32_289 = arith.constant 0 : i32
    %433 = vector.broadcast %c0_i32_289 : i32 to vector<1x16xi32>
    %434 = arith.cmpi ne, %432, %433 : vector<1x16xi32>
    %c0_i32_290 = arith.constant 0 : i32
    %435 = vector.broadcast %c0_i32_290 : i32 to vector<1x16xi32>
    %436 = arith.cmpi slt, %432, %435 : vector<1x16xi32>
    %c0_i32_291 = arith.constant 0 : i32
    %437 = arith.cmpi slt, %430, %c0_i32_291 : i32
    %438 = vector.broadcast %437 : i1 to vector<1x16xi1>
    %439 = vector.broadcast %438 : vector<1x16xi1> to vector<1x16xi1>
    %440 = arith.xori %436, %439 : vector<1x16xi1>
    %441 = arith.andi %440, %434 : vector<1x16xi1>
    %442 = vector.broadcast %430 : i32 to vector<1x16xi32>
    %443 = arith.addi %432, %442 : vector<1x16xi32>
    %444 = arith.select %441, %443, %432 : vector<1x16xi1>, vector<1x16xi32>
    %c0_i32_292 = arith.constant 0 : i32
    %445 = vector.broadcast %c0_i32_292 : i32 to vector<1x16xi32>
    %446 = arith.cmpi ne, %444, %445 : vector<1x16xi32>
    %c3_i32 = arith.constant 3 : i32
    %447 = vector.broadcast %c3_i32 : i32 to vector<1x16xi32>
    %448 = arith.cmpi ne, %444, %447 : vector<1x16xi32>
    %c0_293 = arith.constant 0 : index
    %c0_294 = arith.constant 0 : index
    %449 = vector.load %arg41[%c0_293, %c0_294] : memref<32x290xf32, #tpu.memory_space<vmem>>, vector<16x16xf32>
    %cst_295 = arith.constant 0.000000e+00 : f32
    %450 = vector.shape_cast %446 : vector<1x16xi1> to vector<1x16xi1>
    %451 = vector.broadcast %450 : vector<1x16xi1> to vector<16x16xi1>
    %452 = vector.broadcast %cst_295 : f32 to vector<16x16xf32>
    %453 = arith.select %451, %449, %452 : vector<16x16xi1>, vector<16x16xf32>
    %c0_296 = arith.constant 0 : index
    %c1_297 = arith.constant 1 : index
    %454 = vector.load %arg41[%c0_296, %c1_297] : memref<32x290xf32, #tpu.memory_space<vmem>>, vector<16x16xf32>
    %c0_298 = arith.constant 0 : index
    %c2_299 = arith.constant 2 : index
    %455 = vector.load %arg41[%c0_298, %c2_299] : memref<32x290xf32, #tpu.memory_space<vmem>>, vector<16x16xf32>
    %cst_300 = arith.constant 0.000000e+00 : f32
    %456 = vector.shape_cast %448 : vector<1x16xi1> to vector<1x16xi1>
    %457 = vector.broadcast %456 : vector<1x16xi1> to vector<16x16xi1>
    %458 = vector.broadcast %cst_300 : f32 to vector<16x16xf32>
    %459 = arith.select %457, %455, %458 : vector<16x16xi1>, vector<16x16xf32>
    %c0_301 = arith.constant 0 : index
    %c4 = arith.constant 4 : index
    %460 = vector.load %arg41[%c0_301, %c4] : memref<32x290xf32, #tpu.memory_space<vmem>>, vector<16x16xf32>
    %cst_302 = arith.constant 0.000000e+00 : f32
    %461 = vector.shape_cast %446 : vector<1x16xi1> to vector<1x16xi1>
    %462 = vector.broadcast %461 : vector<1x16xi1> to vector<16x16xi1>
    %463 = vector.broadcast %cst_302 : f32 to vector<16x16xf32>
    %464 = arith.select %462, %460, %463 : vector<16x16xi1>, vector<16x16xf32>
    %c0_303 = arith.constant 0 : index
    %c5_304 = arith.constant 5 : index
    %465 = vector.load %arg41[%c0_303, %c5_304] : memref<32x290xf32, #tpu.memory_space<vmem>>, vector<16x16xf32>
    %c0_305 = arith.constant 0 : index
    %c6 = arith.constant 6 : index
    %466 = vector.load %arg41[%c0_305, %c6] : memref<32x290xf32, #tpu.memory_space<vmem>>, vector<16x16xf32>
    %cst_306 = arith.constant 0.000000e+00 : f32
    %467 = vector.shape_cast %448 : vector<1x16xi1> to vector<1x16xi1>
    %468 = vector.broadcast %467 : vector<1x16xi1> to vector<16x16xi1>
    %469 = vector.broadcast %cst_306 : f32 to vector<16x16xf32>
    %470 = arith.select %468, %466, %469 : vector<16x16xi1>, vector<16x16xf32>
    %c0_307 = arith.constant 0 : index
    %c8_308 = arith.constant 8 : index
    %471 = vector.load %arg41[%c0_307, %c8_308] : memref<32x290xf32, #tpu.memory_space<vmem>>, vector<16x16xf32>
    %cst_309 = arith.constant 0.000000e+00 : f32
    %472 = vector.shape_cast %446 : vector<1x16xi1> to vector<1x16xi1>
    %473 = vector.broadcast %472 : vector<1x16xi1> to vector<16x16xi1>
    %474 = vector.broadcast %cst_309 : f32 to vector<16x16xf32>
    %475 = arith.select %473, %471, %474 : vector<16x16xi1>, vector<16x16xf32>
    %c0_310 = arith.constant 0 : index
    %c9_311 = arith.constant 9 : index
    %476 = vector.load %arg41[%c0_310, %c9_311] : memref<32x290xf32, #tpu.memory_space<vmem>>, vector<16x16xf32>
    %c0_312 = arith.constant 0 : index
    %c10_313 = arith.constant 10 : index
    %477 = vector.load %arg41[%c0_312, %c10_313] : memref<32x290xf32, #tpu.memory_space<vmem>>, vector<16x16xf32>
    %cst_314 = arith.constant 0.000000e+00 : f32
    %478 = vector.shape_cast %448 : vector<1x16xi1> to vector<1x16xi1>
    %479 = vector.broadcast %478 : vector<1x16xi1> to vector<16x16xi1>
    %480 = vector.broadcast %cst_314 : f32 to vector<16x16xf32>
    %481 = arith.select %479, %477, %480 : vector<16x16xi1>, vector<16x16xf32>
    %482 = tpu.concatenate %453, %454, %459, %464, %465, %470, %475, %476, %481 in 0 : vector<16x16xf32>, vector<16x16xf32>, vector<16x16xf32>, vector<16x16xf32>, vector<16x16xf32>, vector<16x16xf32>, vector<16x16xf32>, vector<16x16xf32>, vector<16x16xf32> -> vector<144x16xf32>
    %483 = arith.truncf %482 : vector<144x16xf32> to vector<144x16xbf16>
    %c0_315 = arith.constant 0 : index
    %c0_316 = arith.constant 0 : index
    %484 = vector.load %arg14[%c0_315, %c0_316] : memref<32x144xbf16, #tpu.memory_space<vmem>>, vector<32x144xbf16>
    %cst_317 = arith.constant dense<0.000000e+00> : vector<32x16xf32>
    %485 = tpu.matmul %484, %483, %cst_317 {dimension_numbers = #tpu.dot_dimension_numbers<[1], [0], [0], [1], [0, 0, 1, 1], [], []>} : vector<32x144xbf16>, vector<144x16xbf16>, vector<32x16xf32> -> vector<32x16xf32>
    %c0_318 = arith.constant 0 : index
    %c0_319 = arith.constant 0 : index
    %486 = vector.load %arg15[%c0_318, %c0_319] : memref<32x1xf32, #tpu.memory_space<vmem>>, vector<32x1xf32>
    %487 = vector.broadcast %486 : vector<32x1xf32> to vector<32x16xf32>
    %488 = arith.addf %485, %487 : vector<32x16xf32>
    %cst_320 = arith.constant 0.000000e+00 : f32
    %489 = vector.broadcast %cst_320 : f32 to vector<32x16xf32>
    %490 = arith.maximumf %488, %489 : vector<32x16xf32>
    %cst_321 = arith.constant 0.000000e+00 : f32
    %491 = vector.broadcast %cst_321 : f32 to vector<32x5xf32>
    %c0_322 = arith.constant 0 : index
    %c0_323 = arith.constant 0 : index
    %492 = vector.load %arg41[%c0_322, %c0_323] : memref<32x290xf32, #tpu.memory_space<vmem>>, vector<32x5xf32>
    tpu.vector_store %arg41[%c0_322, %c0_323], %491 {strides = array<i32>} : memref<32x290xf32, #tpu.memory_space<vmem>>, vector<32x5xf32>,
    %c0_324 = arith.constant 0 : index
    %c21_325 = arith.constant 21 : index
    %493 = vector.load %arg41[%c0_324, %c21_325] : memref<32x290xf32, #tpu.memory_space<vmem>>, vector<32x5xf32>
    tpu.vector_store %arg41[%c0_324, %c21_325], %491 {strides = array<i32>} : memref<32x290xf32, #tpu.memory_space<vmem>>, vector<32x5xf32>,
    %c0_326 = arith.constant 0 : index
    %c5_327 = arith.constant 5 : index
    %494 = vector.load %arg41[%c0_326, %c5_327] : memref<32x290xf32, #tpu.memory_space<vmem>>, vector<32x16xf32>
    tpu.vector_store %arg41[%c0_326, %c5_327], %490 {strides = array<i32>} : memref<32x290xf32, #tpu.memory_space<vmem>>, vector<32x16xf32>,
    %495 = tpu.iota {dimensions = array<i32: 1>} : vector<1x16xi32>
    %c4_i32_328 = arith.constant 4 : i32
    %c0_i32_329 = arith.constant 0 : i32
    %496 = arith.cmpi eq, %c4_i32_328, %c0_i32_329 : i32
    %c1_i32_330 = arith.constant 1 : i32
    %497 = arith.select %496, %c1_i32_330, %c4_i32_328 : i32
    %498 = vector.broadcast %497 : i32 to vector<1x16xi32>
    %499 = arith.remsi %495, %498 : vector<1x16xi32>
    %c0_i32_331 = arith.constant 0 : i32
    %500 = vector.broadcast %c0_i32_331 : i32 to vector<1x16xi32>
    %501 = arith.cmpi ne, %499, %500 : vector<1x16xi32>
    %c0_i32_332 = arith.constant 0 : i32
    %502 = vector.broadcast %c0_i32_332 : i32 to vector<1x16xi32>
    %503 = arith.cmpi slt, %499, %502 : vector<1x16xi32>
    %c0_i32_333 = arith.constant 0 : i32
    %504 = arith.cmpi slt, %497, %c0_i32_333 : i32
    %505 = vector.broadcast %504 : i1 to vector<1x16xi1>
    %506 = vector.broadcast %505 : vector<1x16xi1> to vector<1x16xi1>
    %507 = arith.xori %503, %506 : vector<1x16xi1>
    %508 = arith.andi %507, %501 : vector<1x16xi1>
    %509 = vector.broadcast %497 : i32 to vector<1x16xi32>
    %510 = arith.addi %499, %509 : vector<1x16xi32>
    %511 = arith.select %508, %510, %499 : vector<1x16xi1>, vector<1x16xi32>
    %c0_i32_334 = arith.constant 0 : i32
    %512 = vector.broadcast %c0_i32_334 : i32 to vector<1x16xi32>
    %513 = arith.cmpi ne, %511, %512 : vector<1x16xi32>
    %c3_i32_335 = arith.constant 3 : i32
    %514 = vector.broadcast %c3_i32_335 : i32 to vector<1x16xi32>
    %515 = arith.cmpi ne, %511, %514 : vector<1x16xi32>
    %c0_336 = arith.constant 0 : index
    %c0_337 = arith.constant 0 : index
    %516 = vector.load %arg41[%c0_336, %c0_337] : memref<32x290xf32, #tpu.memory_space<vmem>>, vector<32x16xf32>
    %cst_338 = arith.constant 0.000000e+00 : f32
    %517 = vector.shape_cast %513 : vector<1x16xi1> to vector<1x16xi1>
    %518 = vector.broadcast %517 : vector<1x16xi1> to vector<32x16xi1>
    %519 = vector.broadcast %cst_338 : f32 to vector<32x16xf32>
    %520 = arith.select %518, %516, %519 : vector<32x16xi1>, vector<32x16xf32>
    %c0_339 = arith.constant 0 : index
    %c1_340 = arith.constant 1 : index
    %521 = vector.load %arg41[%c0_339, %c1_340] : memref<32x290xf32, #tpu.memory_space<vmem>>, vector<32x16xf32>
    %c0_341 = arith.constant 0 : index
    %c2_342 = arith.constant 2 : index
    %522 = vector.load %arg41[%c0_341, %c2_342] : memref<32x290xf32, #tpu.memory_space<vmem>>, vector<32x16xf32>
    %cst_343 = arith.constant 0.000000e+00 : f32
    %523 = vector.shape_cast %515 : vector<1x16xi1> to vector<1x16xi1>
    %524 = vector.broadcast %523 : vector<1x16xi1> to vector<32x16xi1>
    %525 = vector.broadcast %cst_343 : f32 to vector<32x16xf32>
    %526 = arith.select %524, %522, %525 : vector<32x16xi1>, vector<32x16xf32>
    %c0_344 = arith.constant 0 : index
    %c4_345 = arith.constant 4 : index
    %527 = vector.load %arg41[%c0_344, %c4_345] : memref<32x290xf32, #tpu.memory_space<vmem>>, vector<32x16xf32>
    %cst_346 = arith.constant 0.000000e+00 : f32
    %528 = vector.shape_cast %513 : vector<1x16xi1> to vector<1x16xi1>
    %529 = vector.broadcast %528 : vector<1x16xi1> to vector<32x16xi1>
    %530 = vector.broadcast %cst_346 : f32 to vector<32x16xf32>
    %531 = arith.select %529, %527, %530 : vector<32x16xi1>, vector<32x16xf32>
    %c0_347 = arith.constant 0 : index
    %c5_348 = arith.constant 5 : index
    %532 = vector.load %arg41[%c0_347, %c5_348] : memref<32x290xf32, #tpu.memory_space<vmem>>, vector<32x16xf32>
    %c0_349 = arith.constant 0 : index
    %c6_350 = arith.constant 6 : index
    %533 = vector.load %arg41[%c0_349, %c6_350] : memref<32x290xf32, #tpu.memory_space<vmem>>, vector<32x16xf32>
    %cst_351 = arith.constant 0.000000e+00 : f32
    %534 = vector.shape_cast %515 : vector<1x16xi1> to vector<1x16xi1>
    %535 = vector.broadcast %534 : vector<1x16xi1> to vector<32x16xi1>
    %536 = vector.broadcast %cst_351 : f32 to vector<32x16xf32>
    %537 = arith.select %535, %533, %536 : vector<32x16xi1>, vector<32x16xf32>
    %c0_352 = arith.constant 0 : index
    %c8_353 = arith.constant 8 : index
    %538 = vector.load %arg41[%c0_352, %c8_353] : memref<32x290xf32, #tpu.memory_space<vmem>>, vector<32x16xf32>
    %cst_354 = arith.constant 0.000000e+00 : f32
    %539 = vector.shape_cast %513 : vector<1x16xi1> to vector<1x16xi1>
    %540 = vector.broadcast %539 : vector<1x16xi1> to vector<32x16xi1>
    %541 = vector.broadcast %cst_354 : f32 to vector<32x16xf32>
    %542 = arith.select %540, %538, %541 : vector<32x16xi1>, vector<32x16xf32>
    %c0_355 = arith.constant 0 : index
    %c9_356 = arith.constant 9 : index
    %543 = vector.load %arg41[%c0_355, %c9_356] : memref<32x290xf32, #tpu.memory_space<vmem>>, vector<32x16xf32>
    %c0_357 = arith.constant 0 : index
    %c10_358 = arith.constant 10 : index
    %544 = vector.load %arg41[%c0_357, %c10_358] : memref<32x290xf32, #tpu.memory_space<vmem>>, vector<32x16xf32>
    %cst_359 = arith.constant 0.000000e+00 : f32
    %545 = vector.shape_cast %515 : vector<1x16xi1> to vector<1x16xi1>
    %546 = vector.broadcast %545 : vector<1x16xi1> to vector<32x16xi1>
    %547 = vector.broadcast %cst_359 : f32 to vector<32x16xf32>
    %548 = arith.select %546, %544, %547 : vector<32x16xi1>, vector<32x16xf32>
    %549 = tpu.concatenate %520, %521, %526, %531, %532, %537, %542, %543, %548 in 0 : vector<32x16xf32>, vector<32x16xf32>, vector<32x16xf32>, vector<32x16xf32>, vector<32x16xf32>, vector<32x16xf32>, vector<32x16xf32>, vector<32x16xf32>, vector<32x16xf32> -> vector<288x16xf32>
    %550 = arith.truncf %549 : vector<288x16xf32> to vector<288x16xbf16>
    %c0_360 = arith.constant 0 : index
    %c0_361 = arith.constant 0 : index
    %551 = vector.load %arg16[%c0_360, %c0_361] : memref<32x288xbf16, #tpu.memory_space<vmem>>, vector<32x288xbf16>
    %cst_362 = arith.constant dense<0.000000e+00> : vector<32x16xf32>
    %552 = tpu.matmul %551, %550, %cst_362 {dimension_numbers = #tpu.dot_dimension_numbers<[1], [0], [0], [1], [0, 0, 1, 1], [], []>} : vector<32x288xbf16>, vector<288x16xbf16>, vector<32x16xf32> -> vector<32x16xf32>
    %c0_363 = arith.constant 0 : index
    %c0_364 = arith.constant 0 : index
    %553 = vector.load %arg17[%c0_363, %c0_364] : memref<32x1xf32, #tpu.memory_space<vmem>>, vector<32x1xf32>
    %554 = vector.broadcast %553 : vector<32x1xf32> to vector<32x16xf32>
    %555 = arith.addf %552, %554 : vector<32x16xf32>
    %cst_365 = arith.constant 0.000000e+00 : f32
    %556 = vector.broadcast %cst_365 : f32 to vector<32x16xf32>
    %557 = arith.maximumf %555, %556 : vector<32x16xf32>
    %cst_366 = arith.constant 0.000000e+00 : f32
    %558 = vector.broadcast %cst_366 : f32 to vector<32x5xf32>
    %c0_367 = arith.constant 0 : index
    %c0_368 = arith.constant 0 : index
    %559 = vector.load %arg41[%c0_367, %c0_368] : memref<32x290xf32, #tpu.memory_space<vmem>>, vector<32x5xf32>
    tpu.vector_store %arg41[%c0_367, %c0_368], %558 {strides = array<i32>} : memref<32x290xf32, #tpu.memory_space<vmem>>, vector<32x5xf32>,
    %c0_369 = arith.constant 0 : index
    %c21_370 = arith.constant 21 : index
    %560 = vector.load %arg41[%c0_369, %c21_370] : memref<32x290xf32, #tpu.memory_space<vmem>>, vector<32x5xf32>
    tpu.vector_store %arg41[%c0_369, %c21_370], %558 {strides = array<i32>} : memref<32x290xf32, #tpu.memory_space<vmem>>, vector<32x5xf32>,
    %c0_371 = arith.constant 0 : index
    %c5_372 = arith.constant 5 : index
    %561 = vector.load %arg41[%c0_371, %c5_372] : memref<32x290xf32, #tpu.memory_space<vmem>>, vector<32x16xf32>
    tpu.vector_store %arg41[%c0_371, %c5_372], %557 {strides = array<i32>} : memref<32x290xf32, #tpu.memory_space<vmem>>, vector<32x16xf32>,
    %562 = tpu.iota {dimensions = array<i32: 1>} : vector<1x16xi32>
    %c4_i32_373 = arith.constant 4 : i32
    %c0_i32_374 = arith.constant 0 : i32
    %563 = arith.cmpi eq, %c4_i32_373, %c0_i32_374 : i32
    %c1_i32_375 = arith.constant 1 : i32
    %564 = arith.select %563, %c1_i32_375, %c4_i32_373 : i32
    %565 = vector.broadcast %564 : i32 to vector<1x16xi32>
    %566 = arith.remsi %562, %565 : vector<1x16xi32>
    %c0_i32_376 = arith.constant 0 : i32
    %567 = vector.broadcast %c0_i32_376 : i32 to vector<1x16xi32>
    %568 = arith.cmpi ne, %566, %567 : vector<1x16xi32>
    %c0_i32_377 = arith.constant 0 : i32
    %569 = vector.broadcast %c0_i32_377 : i32 to vector<1x16xi32>
    %570 = arith.cmpi slt, %566, %569 : vector<1x16xi32>
    %c0_i32_378 = arith.constant 0 : i32
    %571 = arith.cmpi slt, %564, %c0_i32_378 : i32
    %572 = vector.broadcast %571 : i1 to vector<1x16xi1>
    %573 = vector.broadcast %572 : vector<1x16xi1> to vector<1x16xi1>
    %574 = arith.xori %570, %573 : vector<1x16xi1>
    %575 = arith.andi %574, %568 : vector<1x16xi1>
    %576 = vector.broadcast %564 : i32 to vector<1x16xi32>
    %577 = arith.addi %566, %576 : vector<1x16xi32>
    %578 = arith.select %575, %577, %566 : vector<1x16xi1>, vector<1x16xi32>
    %c0_i32_379 = arith.constant 0 : i32
    %579 = vector.broadcast %c0_i32_379 : i32 to vector<1x16xi32>
    %580 = arith.cmpi ne, %578, %579 : vector<1x16xi32>
    %c3_i32_380 = arith.constant 3 : i32
    %581 = vector.broadcast %c3_i32_380 : i32 to vector<1x16xi32>
    %582 = arith.cmpi ne, %578, %581 : vector<1x16xi32>
    %c0_381 = arith.constant 0 : index
    %c0_382 = arith.constant 0 : index
    %583 = vector.load %arg41[%c0_381, %c0_382] : memref<32x290xf32, #tpu.memory_space<vmem>>, vector<32x16xf32>
    %cst_383 = arith.constant 0.000000e+00 : f32
    %584 = vector.shape_cast %580 : vector<1x16xi1> to vector<1x16xi1>
    %585 = vector.broadcast %584 : vector<1x16xi1> to vector<32x16xi1>
    %586 = vector.broadcast %cst_383 : f32 to vector<32x16xf32>
    %587 = arith.select %585, %583, %586 : vector<32x16xi1>, vector<32x16xf32>
    %c0_384 = arith.constant 0 : index
    %c1_385 = arith.constant 1 : index
    %588 = vector.load %arg41[%c0_384, %c1_385] : memref<32x290xf32, #tpu.memory_space<vmem>>, vector<32x16xf32>
    %c0_386 = arith.constant 0 : index
    %c2_387 = arith.constant 2 : index
    %589 = vector.load %arg41[%c0_386, %c2_387] : memref<32x290xf32, #tpu.memory_space<vmem>>, vector<32x16xf32>
    %cst_388 = arith.constant 0.000000e+00 : f32
    %590 = vector.shape_cast %582 : vector<1x16xi1> to vector<1x16xi1>
    %591 = vector.broadcast %590 : vector<1x16xi1> to vector<32x16xi1>
    %592 = vector.broadcast %cst_388 : f32 to vector<32x16xf32>
    %593 = arith.select %591, %589, %592 : vector<32x16xi1>, vector<32x16xf32>
    %c0_389 = arith.constant 0 : index
    %c4_390 = arith.constant 4 : index
    %594 = vector.load %arg41[%c0_389, %c4_390] : memref<32x290xf32, #tpu.memory_space<vmem>>, vector<32x16xf32>
    %cst_391 = arith.constant 0.000000e+00 : f32
    %595 = vector.shape_cast %580 : vector<1x16xi1> to vector<1x16xi1>
    %596 = vector.broadcast %595 : vector<1x16xi1> to vector<32x16xi1>
    %597 = vector.broadcast %cst_391 : f32 to vector<32x16xf32>
    %598 = arith.select %596, %594, %597 : vector<32x16xi1>, vector<32x16xf32>
    %c0_392 = arith.constant 0 : index
    %c5_393 = arith.constant 5 : index
    %599 = vector.load %arg41[%c0_392, %c5_393] : memref<32x290xf32, #tpu.memory_space<vmem>>, vector<32x16xf32>
    %c0_394 = arith.constant 0 : index
    %c6_395 = arith.constant 6 : index
    %600 = vector.load %arg41[%c0_394, %c6_395] : memref<32x290xf32, #tpu.memory_space<vmem>>, vector<32x16xf32>
    %cst_396 = arith.constant 0.000000e+00 : f32
    %601 = vector.shape_cast %582 : vector<1x16xi1> to vector<1x16xi1>
    %602 = vector.broadcast %601 : vector<1x16xi1> to vector<32x16xi1>
    %603 = vector.broadcast %cst_396 : f32 to vector<32x16xf32>
    %604 = arith.select %602, %600, %603 : vector<32x16xi1>, vector<32x16xf32>
    %c0_397 = arith.constant 0 : index
    %c8_398 = arith.constant 8 : index
    %605 = vector.load %arg41[%c0_397, %c8_398] : memref<32x290xf32, #tpu.memory_space<vmem>>, vector<32x16xf32>
    %cst_399 = arith.constant 0.000000e+00 : f32
    %606 = vector.shape_cast %580 : vector<1x16xi1> to vector<1x16xi1>
    %607 = vector.broadcast %606 : vector<1x16xi1> to vector<32x16xi1>
    %608 = vector.broadcast %cst_399 : f32 to vector<32x16xf32>
    %609 = arith.select %607, %605, %608 : vector<32x16xi1>, vector<32x16xf32>
    %c0_400 = arith.constant 0 : index
    %c9_401 = arith.constant 9 : index
    %610 = vector.load %arg41[%c0_400, %c9_401] : memref<32x290xf32, #tpu.memory_space<vmem>>, vector<32x16xf32>
    %c0_402 = arith.constant 0 : index
    %c10_403 = arith.constant 10 : index
    %611 = vector.load %arg41[%c0_402, %c10_403] : memref<32x290xf32, #tpu.memory_space<vmem>>, vector<32x16xf32>
    %cst_404 = arith.constant 0.000000e+00 : f32
    %612 = vector.shape_cast %582 : vector<1x16xi1> to vector<1x16xi1>
    %613 = vector.broadcast %612 : vector<1x16xi1> to vector<32x16xi1>
    %614 = vector.broadcast %cst_404 : f32 to vector<32x16xf32>
    %615 = arith.select %613, %611, %614 : vector<32x16xi1>, vector<32x16xf32>
    %616 = tpu.concatenate %587, %588, %593, %598, %599, %604, %609, %610, %615 in 0 : vector<32x16xf32>, vector<32x16xf32>, vector<32x16xf32>, vector<32x16xf32>, vector<32x16xf32>, vector<32x16xf32>, vector<32x16xf32>, vector<32x16xf32>, vector<32x16xf32> -> vector<288x16xf32>
    %617 = arith.truncf %616 : vector<288x16xf32> to vector<288x16xbf16>
    %c0_405 = arith.constant 0 : index
    %c0_406 = arith.constant 0 : index
    %618 = vector.load %arg18[%c0_405, %c0_406] : memref<32x288xbf16, #tpu.memory_space<vmem>>, vector<32x288xbf16>
    %cst_407 = arith.constant dense<0.000000e+00> : vector<32x16xf32>
    %619 = tpu.matmul %618, %617, %cst_407 {dimension_numbers = #tpu.dot_dimension_numbers<[1], [0], [0], [1], [0, 0, 1, 1], [], []>} : vector<32x288xbf16>, vector<288x16xbf16>, vector<32x16xf32> -> vector<32x16xf32>
    %c0_408 = arith.constant 0 : index
    %c0_409 = arith.constant 0 : index
    %620 = vector.load %arg19[%c0_408, %c0_409] : memref<32x1xf32, #tpu.memory_space<vmem>>, vector<32x1xf32>
    %621 = vector.broadcast %620 : vector<32x1xf32> to vector<32x16xf32>
    %622 = arith.addf %619, %621 : vector<32x16xf32>
    %cst_410 = arith.constant 0.000000e+00 : f32
    %623 = vector.broadcast %cst_410 : f32 to vector<32x16xf32>
    %624 = arith.maximumf %622, %623 : vector<32x16xf32>
    %cst_411 = arith.constant 0.000000e+00 : f32
    %625 = vector.broadcast %cst_411 : f32 to vector<32x5xf32>
    %c0_412 = arith.constant 0 : index
    %c0_413 = arith.constant 0 : index
    %626 = vector.load %arg41[%c0_412, %c0_413] : memref<32x290xf32, #tpu.memory_space<vmem>>, vector<32x5xf32>
    tpu.vector_store %arg41[%c0_412, %c0_413], %625 {strides = array<i32>} : memref<32x290xf32, #tpu.memory_space<vmem>>, vector<32x5xf32>,
    %c0_414 = arith.constant 0 : index
    %c21_415 = arith.constant 21 : index
    %627 = vector.load %arg41[%c0_414, %c21_415] : memref<32x290xf32, #tpu.memory_space<vmem>>, vector<32x5xf32>
    tpu.vector_store %arg41[%c0_414, %c21_415], %625 {strides = array<i32>} : memref<32x290xf32, #tpu.memory_space<vmem>>, vector<32x5xf32>,
    %c0_416 = arith.constant 0 : index
    %c5_417 = arith.constant 5 : index
    %628 = vector.load %arg41[%c0_416, %c5_417] : memref<32x290xf32, #tpu.memory_space<vmem>>, vector<32x16xf32>
    tpu.vector_store %arg41[%c0_416, %c5_417], %624 {strides = array<i32>} : memref<32x290xf32, #tpu.memory_space<vmem>>, vector<32x16xf32>,
    %629 = tpu.iota {dimensions = array<i32: 1>} : vector<1x16xi32>
    %c4_i32_418 = arith.constant 4 : i32
    %c0_i32_419 = arith.constant 0 : i32
    %630 = arith.cmpi eq, %c4_i32_418, %c0_i32_419 : i32
    %c1_i32_420 = arith.constant 1 : i32
    %631 = arith.select %630, %c1_i32_420, %c4_i32_418 : i32
    %632 = vector.broadcast %631 : i32 to vector<1x16xi32>
    %633 = arith.remsi %629, %632 : vector<1x16xi32>
    %c0_i32_421 = arith.constant 0 : i32
    %634 = vector.broadcast %c0_i32_421 : i32 to vector<1x16xi32>
    %635 = arith.cmpi ne, %633, %634 : vector<1x16xi32>
    %c0_i32_422 = arith.constant 0 : i32
    %636 = vector.broadcast %c0_i32_422 : i32 to vector<1x16xi32>
    %637 = arith.cmpi slt, %633, %636 : vector<1x16xi32>
    %c0_i32_423 = arith.constant 0 : i32
    %638 = arith.cmpi slt, %631, %c0_i32_423 : i32
    %639 = vector.broadcast %638 : i1 to vector<1x16xi1>
    %640 = vector.broadcast %639 : vector<1x16xi1> to vector<1x16xi1>
    %641 = arith.xori %637, %640 : vector<1x16xi1>
    %642 = arith.andi %641, %635 : vector<1x16xi1>
    %643 = vector.broadcast %631 : i32 to vector<1x16xi32>
    %644 = arith.addi %633, %643 : vector<1x16xi32>
    %645 = arith.select %642, %644, %633 : vector<1x16xi1>, vector<1x16xi32>
    %c0_i32_424 = arith.constant 0 : i32
    %646 = vector.broadcast %c0_i32_424 : i32 to vector<1x16xi32>
    %647 = arith.cmpi ne, %645, %646 : vector<1x16xi32>
    %c3_i32_425 = arith.constant 3 : i32
    %648 = vector.broadcast %c3_i32_425 : i32 to vector<1x16xi32>
    %649 = arith.cmpi ne, %645, %648 : vector<1x16xi32>
    %c0_426 = arith.constant 0 : index
    %c0_427 = arith.constant 0 : index
    %650 = vector.load %arg41[%c0_426, %c0_427] : memref<32x290xf32, #tpu.memory_space<vmem>>, vector<32x16xf32>
    %cst_428 = arith.constant 0.000000e+00 : f32
    %651 = vector.shape_cast %647 : vector<1x16xi1> to vector<1x16xi1>
    %652 = vector.broadcast %651 : vector<1x16xi1> to vector<32x16xi1>
    %653 = vector.broadcast %cst_428 : f32 to vector<32x16xf32>
    %654 = arith.select %652, %650, %653 : vector<32x16xi1>, vector<32x16xf32>
    %c0_429 = arith.constant 0 : index
    %c1_430 = arith.constant 1 : index
    %655 = vector.load %arg41[%c0_429, %c1_430] : memref<32x290xf32, #tpu.memory_space<vmem>>, vector<32x16xf32>
    %c0_431 = arith.constant 0 : index
    %c2_432 = arith.constant 2 : index
    %656 = vector.load %arg41[%c0_431, %c2_432] : memref<32x290xf32, #tpu.memory_space<vmem>>, vector<32x16xf32>
    %cst_433 = arith.constant 0.000000e+00 : f32
    %657 = vector.shape_cast %649 : vector<1x16xi1> to vector<1x16xi1>
    %658 = vector.broadcast %657 : vector<1x16xi1> to vector<32x16xi1>
    %659 = vector.broadcast %cst_433 : f32 to vector<32x16xf32>
    %660 = arith.select %658, %656, %659 : vector<32x16xi1>, vector<32x16xf32>
    %c0_434 = arith.constant 0 : index
    %c4_435 = arith.constant 4 : index
    %661 = vector.load %arg41[%c0_434, %c4_435] : memref<32x290xf32, #tpu.memory_space<vmem>>, vector<32x16xf32>
    %cst_436 = arith.constant 0.000000e+00 : f32
    %662 = vector.shape_cast %647 : vector<1x16xi1> to vector<1x16xi1>
    %663 = vector.broadcast %662 : vector<1x16xi1> to vector<32x16xi1>
    %664 = vector.broadcast %cst_436 : f32 to vector<32x16xf32>
    %665 = arith.select %663, %661, %664 : vector<32x16xi1>, vector<32x16xf32>
    %c0_437 = arith.constant 0 : index
    %c5_438 = arith.constant 5 : index
    %666 = vector.load %arg41[%c0_437, %c5_438] : memref<32x290xf32, #tpu.memory_space<vmem>>, vector<32x16xf32>
    %c0_439 = arith.constant 0 : index
    %c6_440 = arith.constant 6 : index
    %667 = vector.load %arg41[%c0_439, %c6_440] : memref<32x290xf32, #tpu.memory_space<vmem>>, vector<32x16xf32>
    %cst_441 = arith.constant 0.000000e+00 : f32
    %668 = vector.shape_cast %649 : vector<1x16xi1> to vector<1x16xi1>
    %669 = vector.broadcast %668 : vector<1x16xi1> to vector<32x16xi1>
    %670 = vector.broadcast %cst_441 : f32 to vector<32x16xf32>
    %671 = arith.select %669, %667, %670 : vector<32x16xi1>, vector<32x16xf32>
    %c0_442 = arith.constant 0 : index
    %c8_443 = arith.constant 8 : index
    %672 = vector.load %arg41[%c0_442, %c8_443] : memref<32x290xf32, #tpu.memory_space<vmem>>, vector<32x16xf32>
    %cst_444 = arith.constant 0.000000e+00 : f32
    %673 = vector.shape_cast %647 : vector<1x16xi1> to vector<1x16xi1>
    %674 = vector.broadcast %673 : vector<1x16xi1> to vector<32x16xi1>
    %675 = vector.broadcast %cst_444 : f32 to vector<32x16xf32>
    %676 = arith.select %674, %672, %675 : vector<32x16xi1>, vector<32x16xf32>
    %c0_445 = arith.constant 0 : index
    %c9_446 = arith.constant 9 : index
    %677 = vector.load %arg41[%c0_445, %c9_446] : memref<32x290xf32, #tpu.memory_space<vmem>>, vector<32x16xf32>
    %c0_447 = arith.constant 0 : index
    %c10_448 = arith.constant 10 : index
    %678 = vector.load %arg41[%c0_447, %c10_448] : memref<32x290xf32, #tpu.memory_space<vmem>>, vector<32x16xf32>
    %cst_449 = arith.constant 0.000000e+00 : f32
    %679 = vector.shape_cast %649 : vector<1x16xi1> to vector<1x16xi1>
    %680 = vector.broadcast %679 : vector<1x16xi1> to vector<32x16xi1>
    %681 = vector.broadcast %cst_449 : f32 to vector<32x16xf32>
    %682 = arith.select %680, %678, %681 : vector<32x16xi1>, vector<32x16xf32>
    %683 = tpu.concatenate %654, %655, %660, %665, %666, %671, %676, %677, %682 in 0 : vector<32x16xf32>, vector<32x16xf32>, vector<32x16xf32>, vector<32x16xf32>, vector<32x16xf32>, vector<32x16xf32>, vector<32x16xf32>, vector<32x16xf32>, vector<32x16xf32> -> vector<288x16xf32>
    %684 = arith.truncf %683 : vector<288x16xf32> to vector<288x16xbf16>
    %c0_450 = arith.constant 0 : index
    %c0_451 = arith.constant 0 : index
    %685 = vector.load %arg20[%c0_450, %c0_451] : memref<32x288xbf16, #tpu.memory_space<vmem>>, vector<32x288xbf16>
    %cst_452 = arith.constant dense<0.000000e+00> : vector<32x16xf32>
    %686 = tpu.matmul %685, %684, %cst_452 {dimension_numbers = #tpu.dot_dimension_numbers<[1], [0], [0], [1], [0, 0, 1, 1], [], []>} : vector<32x288xbf16>, vector<288x16xbf16>, vector<32x16xf32> -> vector<32x16xf32>
    %c0_453 = arith.constant 0 : index
    %c0_454 = arith.constant 0 : index
    %687 = vector.load %arg21[%c0_453, %c0_454] : memref<32x1xf32, #tpu.memory_space<vmem>>, vector<32x1xf32>
    %688 = vector.broadcast %687 : vector<32x1xf32> to vector<32x16xf32>
    %689 = arith.addf %686, %688 : vector<32x16xf32>
    %cst_455 = arith.constant 0.000000e+00 : f32
    %690 = vector.broadcast %cst_455 : f32 to vector<32x16xf32>
    %691 = arith.maximumf %689, %690 : vector<32x16xf32>
    %cst_456 = arith.constant 0.000000e+00 : f32
    %692 = vector.broadcast %cst_456 : f32 to vector<32x5xf32>
    %c0_457 = arith.constant 0 : index
    %c0_458 = arith.constant 0 : index
    %693 = vector.load %arg41[%c0_457, %c0_458] : memref<32x290xf32, #tpu.memory_space<vmem>>, vector<32x5xf32>
    tpu.vector_store %arg41[%c0_457, %c0_458], %692 {strides = array<i32>} : memref<32x290xf32, #tpu.memory_space<vmem>>, vector<32x5xf32>,
    %c0_459 = arith.constant 0 : index
    %c21_460 = arith.constant 21 : index
    %694 = vector.load %arg41[%c0_459, %c21_460] : memref<32x290xf32, #tpu.memory_space<vmem>>, vector<32x5xf32>
    tpu.vector_store %arg41[%c0_459, %c21_460], %692 {strides = array<i32>} : memref<32x290xf32, #tpu.memory_space<vmem>>, vector<32x5xf32>,
    %c0_461 = arith.constant 0 : index
    %c5_462 = arith.constant 5 : index
    %695 = vector.load %arg41[%c0_461, %c5_462] : memref<32x290xf32, #tpu.memory_space<vmem>>, vector<32x16xf32>
    tpu.vector_store %arg41[%c0_461, %c5_462], %691 {strides = array<i32>} : memref<32x290xf32, #tpu.memory_space<vmem>>, vector<32x16xf32>,
    %696 = tpu.iota {dimensions = array<i32: 1>} : vector<1x16xi32>
    %c4_i32_463 = arith.constant 4 : i32
    %c0_i32_464 = arith.constant 0 : i32
    %697 = arith.cmpi eq, %c4_i32_463, %c0_i32_464 : i32
    %c1_i32_465 = arith.constant 1 : i32
    %698 = arith.select %697, %c1_i32_465, %c4_i32_463 : i32
    %699 = vector.broadcast %698 : i32 to vector<1x16xi32>
    %700 = arith.remsi %696, %699 : vector<1x16xi32>
    %c0_i32_466 = arith.constant 0 : i32
    %701 = vector.broadcast %c0_i32_466 : i32 to vector<1x16xi32>
    %702 = arith.cmpi ne, %700, %701 : vector<1x16xi32>
    %c0_i32_467 = arith.constant 0 : i32
    %703 = vector.broadcast %c0_i32_467 : i32 to vector<1x16xi32>
    %704 = arith.cmpi slt, %700, %703 : vector<1x16xi32>
    %c0_i32_468 = arith.constant 0 : i32
    %705 = arith.cmpi slt, %698, %c0_i32_468 : i32
    %706 = vector.broadcast %705 : i1 to vector<1x16xi1>
    %707 = vector.broadcast %706 : vector<1x16xi1> to vector<1x16xi1>
    %708 = arith.xori %704, %707 : vector<1x16xi1>
    %709 = arith.andi %708, %702 : vector<1x16xi1>
    %710 = vector.broadcast %698 : i32 to vector<1x16xi32>
    %711 = arith.addi %700, %710 : vector<1x16xi32>
    %712 = arith.select %709, %711, %700 : vector<1x16xi1>, vector<1x16xi32>
    %c0_i32_469 = arith.constant 0 : i32
    %713 = vector.broadcast %c0_i32_469 : i32 to vector<1x16xi32>
    %714 = arith.cmpi ne, %712, %713 : vector<1x16xi32>
    %c3_i32_470 = arith.constant 3 : i32
    %715 = vector.broadcast %c3_i32_470 : i32 to vector<1x16xi32>
    %716 = arith.cmpi ne, %712, %715 : vector<1x16xi32>
    %c0_471 = arith.constant 0 : index
    %c0_472 = arith.constant 0 : index
    %717 = vector.load %arg41[%c0_471, %c0_472] : memref<32x290xf32, #tpu.memory_space<vmem>>, vector<32x16xf32>
    %cst_473 = arith.constant 0.000000e+00 : f32
    %718 = vector.shape_cast %714 : vector<1x16xi1> to vector<1x16xi1>
    %719 = vector.broadcast %718 : vector<1x16xi1> to vector<32x16xi1>
    %720 = vector.broadcast %cst_473 : f32 to vector<32x16xf32>
    %721 = arith.select %719, %717, %720 : vector<32x16xi1>, vector<32x16xf32>
    %c0_474 = arith.constant 0 : index
    %c1_475 = arith.constant 1 : index
    %722 = vector.load %arg41[%c0_474, %c1_475] : memref<32x290xf32, #tpu.memory_space<vmem>>, vector<32x16xf32>
    %c0_476 = arith.constant 0 : index
    %c2_477 = arith.constant 2 : index
    %723 = vector.load %arg41[%c0_476, %c2_477] : memref<32x290xf32, #tpu.memory_space<vmem>>, vector<32x16xf32>
    %cst_478 = arith.constant 0.000000e+00 : f32
    %724 = vector.shape_cast %716 : vector<1x16xi1> to vector<1x16xi1>
    %725 = vector.broadcast %724 : vector<1x16xi1> to vector<32x16xi1>
    %726 = vector.broadcast %cst_478 : f32 to vector<32x16xf32>
    %727 = arith.select %725, %723, %726 : vector<32x16xi1>, vector<32x16xf32>
    %c0_479 = arith.constant 0 : index
    %c4_480 = arith.constant 4 : index
    %728 = vector.load %arg41[%c0_479, %c4_480] : memref<32x290xf32, #tpu.memory_space<vmem>>, vector<32x16xf32>
    %cst_481 = arith.constant 0.000000e+00 : f32
    %729 = vector.shape_cast %714 : vector<1x16xi1> to vector<1x16xi1>
    %730 = vector.broadcast %729 : vector<1x16xi1> to vector<32x16xi1>
    %731 = vector.broadcast %cst_481 : f32 to vector<32x16xf32>
    %732 = arith.select %730, %728, %731 : vector<32x16xi1>, vector<32x16xf32>
    %c0_482 = arith.constant 0 : index
    %c5_483 = arith.constant 5 : index
    %733 = vector.load %arg41[%c0_482, %c5_483] : memref<32x290xf32, #tpu.memory_space<vmem>>, vector<32x16xf32>
    %c0_484 = arith.constant 0 : index
    %c6_485 = arith.constant 6 : index
    %734 = vector.load %arg41[%c0_484, %c6_485] : memref<32x290xf32, #tpu.memory_space<vmem>>, vector<32x16xf32>
    %cst_486 = arith.constant 0.000000e+00 : f32
    %735 = vector.shape_cast %716 : vector<1x16xi1> to vector<1x16xi1>
    %736 = vector.broadcast %735 : vector<1x16xi1> to vector<32x16xi1>
    %737 = vector.broadcast %cst_486 : f32 to vector<32x16xf32>
    %738 = arith.select %736, %734, %737 : vector<32x16xi1>, vector<32x16xf32>
    %c0_487 = arith.constant 0 : index
    %c8_488 = arith.constant 8 : index
    %739 = vector.load %arg41[%c0_487, %c8_488] : memref<32x290xf32, #tpu.memory_space<vmem>>, vector<32x16xf32>
    %cst_489 = arith.constant 0.000000e+00 : f32
    %740 = vector.shape_cast %714 : vector<1x16xi1> to vector<1x16xi1>
    %741 = vector.broadcast %740 : vector<1x16xi1> to vector<32x16xi1>
    %742 = vector.broadcast %cst_489 : f32 to vector<32x16xf32>
    %743 = arith.select %741, %739, %742 : vector<32x16xi1>, vector<32x16xf32>
    %c0_490 = arith.constant 0 : index
    %c9_491 = arith.constant 9 : index
    %744 = vector.load %arg41[%c0_490, %c9_491] : memref<32x290xf32, #tpu.memory_space<vmem>>, vector<32x16xf32>
    %c0_492 = arith.constant 0 : index
    %c10_493 = arith.constant 10 : index
    %745 = vector.load %arg41[%c0_492, %c10_493] : memref<32x290xf32, #tpu.memory_space<vmem>>, vector<32x16xf32>
    %cst_494 = arith.constant 0.000000e+00 : f32
    %746 = vector.shape_cast %716 : vector<1x16xi1> to vector<1x16xi1>
    %747 = vector.broadcast %746 : vector<1x16xi1> to vector<32x16xi1>
    %748 = vector.broadcast %cst_494 : f32 to vector<32x16xf32>
    %749 = arith.select %747, %745, %748 : vector<32x16xi1>, vector<32x16xf32>
    %750 = tpu.concatenate %721, %722, %727, %732, %733, %738, %743, %744, %749 in 0 : vector<32x16xf32>, vector<32x16xf32>, vector<32x16xf32>, vector<32x16xf32>, vector<32x16xf32>, vector<32x16xf32>, vector<32x16xf32>, vector<32x16xf32>, vector<32x16xf32> -> vector<288x16xf32>
    %751 = arith.truncf %750 : vector<288x16xf32> to vector<288x16xbf16>
    %c0_495 = arith.constant 0 : index
    %c0_496 = arith.constant 0 : index
    %752 = vector.load %arg22[%c0_495, %c0_496] : memref<16x288xbf16, #tpu.memory_space<vmem>>, vector<16x288xbf16>
    %cst_497 = arith.constant dense<0.000000e+00> : vector<16x16xf32>
    %753 = tpu.matmul %752, %751, %cst_497 {dimension_numbers = #tpu.dot_dimension_numbers<[1], [0], [0], [1], [0, 0, 1, 1], [], []>} : vector<16x288xbf16>, vector<288x16xbf16>, vector<16x16xf32> -> vector<16x16xf32>
    %c0_498 = arith.constant 0 : index
    %c0_499 = arith.constant 0 : index
    %754 = vector.load %arg23[%c0_498, %c0_499] : memref<16x1xf32, #tpu.memory_space<vmem>>, vector<16x1xf32>
    %755 = vector.broadcast %754 : vector<16x1xf32> to vector<16x16xf32>
    %756 = arith.addf %753, %755 : vector<16x16xf32>
    %c0_500 = arith.constant 0 : index
    %c0_501 = arith.constant 0 : index
    %757 = vector.load %arg38[%c0_500, %c0_501] : memref<16x64xf32, #tpu.memory_space<vmem>>, vector<16x64xf32>
    %cst_502 = arith.constant dense<0.000000e+00> : vector<16x64xf32>
    %758 = tpu.matmul %756, %757, %cst_502 {dimension_numbers = #tpu.dot_dimension_numbers<[1], [0], [0], [1], [0, 0, 1, 1], [], []>} : vector<16x16xf32>, vector<16x64xf32>, vector<16x64xf32> -> vector<16x64xf32>
    %cst_503 = arith.constant 0.000000e+00 : f32
    %759 = vector.broadcast %cst_503 : f32 to vector<32x9xf32>
    %c0_504 = arith.constant 0 : index
    %c0_505 = arith.constant 0 : index
    %760 = vector.load %arg41[%c0_504, %c0_505] : memref<32x290xf32, #tpu.memory_space<vmem>>, vector<32x9xf32>
    tpu.vector_store %arg41[%c0_504, %c0_505], %759 {strides = array<i32>} : memref<32x290xf32, #tpu.memory_space<vmem>>, vector<32x9xf32>,
    %c0_506 = arith.constant 0 : index
    %c73_507 = arith.constant 73 : index
    %761 = vector.load %arg41[%c0_506, %c73_507] : memref<32x290xf32, #tpu.memory_space<vmem>>, vector<32x9xf32>
    tpu.vector_store %arg41[%c0_506, %c73_507], %759 {strides = array<i32>} : memref<32x290xf32, #tpu.memory_space<vmem>>, vector<32x9xf32>,
    %c0_508 = arith.constant 0 : index
    %c9_509 = arith.constant 9 : index
    %762 = vector.load %arg41[%c0_508, %c9_509] : memref<32x290xf32, #tpu.memory_space<vmem>>, vector<16x64xf32>
    tpu.vector_store %arg41[%c0_508, %c9_509], %758 {strides = array<i32>} : memref<32x290xf32, #tpu.memory_space<vmem>>, vector<16x64xf32>,
    %c16_510 = arith.constant 16 : index
    %c9_511 = arith.constant 9 : index
    %763 = vector.load %arg41[%c16_510, %c9_511] : memref<32x290xf32, #tpu.memory_space<vmem>>, vector<16x64xf32>
    tpu.vector_store %arg41[%c16_510, %c9_511], %411 {strides = array<i32>} : memref<32x290xf32, #tpu.memory_space<vmem>>, vector<16x64xf32>,
    %764 = tpu.iota {dimensions = array<i32: 1>} : vector<1x64xi32>
    %c8_i32_512 = arith.constant 8 : i32
    %c0_i32_513 = arith.constant 0 : i32
    %765 = arith.cmpi eq, %c8_i32_512, %c0_i32_513 : i32
    %c1_i32_514 = arith.constant 1 : i32
    %766 = arith.select %765, %c1_i32_514, %c8_i32_512 : i32
    %767 = vector.broadcast %766 : i32 to vector<1x64xi32>
    %768 = arith.remsi %764, %767 : vector<1x64xi32>
    %c0_i32_515 = arith.constant 0 : i32
    %769 = vector.broadcast %c0_i32_515 : i32 to vector<1x64xi32>
    %770 = arith.cmpi ne, %768, %769 : vector<1x64xi32>
    %c0_i32_516 = arith.constant 0 : i32
    %771 = vector.broadcast %c0_i32_516 : i32 to vector<1x64xi32>
    %772 = arith.cmpi slt, %768, %771 : vector<1x64xi32>
    %c0_i32_517 = arith.constant 0 : i32
    %773 = arith.cmpi slt, %766, %c0_i32_517 : i32
    %774 = vector.broadcast %773 : i1 to vector<1x64xi1>
    %775 = vector.broadcast %774 : vector<1x64xi1> to vector<1x64xi1>
    %776 = arith.xori %772, %775 : vector<1x64xi1>
    %777 = arith.andi %776, %770 : vector<1x64xi1>
    %778 = vector.broadcast %766 : i32 to vector<1x64xi32>
    %779 = arith.addi %768, %778 : vector<1x64xi32>
    %780 = arith.select %777, %779, %768 : vector<1x64xi1>, vector<1x64xi32>
    %c0_i32_518 = arith.constant 0 : i32
    %781 = vector.broadcast %c0_i32_518 : i32 to vector<1x64xi32>
    %782 = arith.cmpi ne, %780, %781 : vector<1x64xi32>
    %c7_i32_519 = arith.constant 7 : i32
    %783 = vector.broadcast %c7_i32_519 : i32 to vector<1x64xi32>
    %784 = arith.cmpi ne, %780, %783 : vector<1x64xi32>
    %c0_520 = arith.constant 0 : index
    %c0_521 = arith.constant 0 : index
    %785 = vector.load %arg41[%c0_520, %c0_521] : memref<32x290xf32, #tpu.memory_space<vmem>>, vector<32x64xf32>
    %cst_522 = arith.constant 0.000000e+00 : f32
    %786 = vector.shape_cast %782 : vector<1x64xi1> to vector<1x64xi1>
    %787 = vector.broadcast %786 : vector<1x64xi1> to vector<32x64xi1>
    %788 = vector.broadcast %cst_522 : f32 to vector<32x64xf32>
    %789 = arith.select %787, %785, %788 : vector<32x64xi1>, vector<32x64xf32>
    %c0_523 = arith.constant 0 : index
    %c1_524 = arith.constant 1 : index
    %790 = vector.load %arg41[%c0_523, %c1_524] : memref<32x290xf32, #tpu.memory_space<vmem>>, vector<32x64xf32>
    %c0_525 = arith.constant 0 : index
    %c2_526 = arith.constant 2 : index
    %791 = vector.load %arg41[%c0_525, %c2_526] : memref<32x290xf32, #tpu.memory_space<vmem>>, vector<32x64xf32>
    %cst_527 = arith.constant 0.000000e+00 : f32
    %792 = vector.shape_cast %784 : vector<1x64xi1> to vector<1x64xi1>
    %793 = vector.broadcast %792 : vector<1x64xi1> to vector<32x64xi1>
    %794 = vector.broadcast %cst_527 : f32 to vector<32x64xf32>
    %795 = arith.select %793, %791, %794 : vector<32x64xi1>, vector<32x64xf32>
    %c0_528 = arith.constant 0 : index
    %c8_529 = arith.constant 8 : index
    %796 = vector.load %arg41[%c0_528, %c8_529] : memref<32x290xf32, #tpu.memory_space<vmem>>, vector<32x64xf32>
    %cst_530 = arith.constant 0.000000e+00 : f32
    %797 = vector.shape_cast %782 : vector<1x64xi1> to vector<1x64xi1>
    %798 = vector.broadcast %797 : vector<1x64xi1> to vector<32x64xi1>
    %799 = vector.broadcast %cst_530 : f32 to vector<32x64xf32>
    %800 = arith.select %798, %796, %799 : vector<32x64xi1>, vector<32x64xf32>
    %c0_531 = arith.constant 0 : index
    %c9_532 = arith.constant 9 : index
    %801 = vector.load %arg41[%c0_531, %c9_532] : memref<32x290xf32, #tpu.memory_space<vmem>>, vector<32x64xf32>
    %c0_533 = arith.constant 0 : index
    %c10_534 = arith.constant 10 : index
    %802 = vector.load %arg41[%c0_533, %c10_534] : memref<32x290xf32, #tpu.memory_space<vmem>>, vector<32x64xf32>
    %cst_535 = arith.constant 0.000000e+00 : f32
    %803 = vector.shape_cast %784 : vector<1x64xi1> to vector<1x64xi1>
    %804 = vector.broadcast %803 : vector<1x64xi1> to vector<32x64xi1>
    %805 = vector.broadcast %cst_535 : f32 to vector<32x64xf32>
    %806 = arith.select %804, %802, %805 : vector<32x64xi1>, vector<32x64xf32>
    %c0_536 = arith.constant 0 : index
    %c16_537 = arith.constant 16 : index
    %807 = vector.load %arg41[%c0_536, %c16_537] : memref<32x290xf32, #tpu.memory_space<vmem>>, vector<32x64xf32>
    %cst_538 = arith.constant 0.000000e+00 : f32
    %808 = vector.shape_cast %782 : vector<1x64xi1> to vector<1x64xi1>
    %809 = vector.broadcast %808 : vector<1x64xi1> to vector<32x64xi1>
    %810 = vector.broadcast %cst_538 : f32 to vector<32x64xf32>
    %811 = arith.select %809, %807, %810 : vector<32x64xi1>, vector<32x64xf32>
    %c0_539 = arith.constant 0 : index
    %c17_540 = arith.constant 17 : index
    %812 = vector.load %arg41[%c0_539, %c17_540] : memref<32x290xf32, #tpu.memory_space<vmem>>, vector<32x64xf32>
    %c0_541 = arith.constant 0 : index
    %c18_542 = arith.constant 18 : index
    %813 = vector.load %arg41[%c0_541, %c18_542] : memref<32x290xf32, #tpu.memory_space<vmem>>, vector<32x64xf32>
    %cst_543 = arith.constant 0.000000e+00 : f32
    %814 = vector.shape_cast %784 : vector<1x64xi1> to vector<1x64xi1>
    %815 = vector.broadcast %814 : vector<1x64xi1> to vector<32x64xi1>
    %816 = vector.broadcast %cst_543 : f32 to vector<32x64xf32>
    %817 = arith.select %815, %813, %816 : vector<32x64xi1>, vector<32x64xf32>
    %818 = tpu.concatenate %789, %790, %795, %800, %801, %806, %811, %812, %817 in 0 : vector<32x64xf32>, vector<32x64xf32>, vector<32x64xf32>, vector<32x64xf32>, vector<32x64xf32>, vector<32x64xf32>, vector<32x64xf32>, vector<32x64xf32>, vector<32x64xf32> -> vector<288x64xf32>
    %819 = arith.truncf %818 : vector<288x64xf32> to vector<288x64xbf16>
    %c0_544 = arith.constant 0 : index
    %c0_545 = arith.constant 0 : index
    %820 = vector.load %arg24[%c0_544, %c0_545] : memref<16x288xbf16, #tpu.memory_space<vmem>>, vector<16x288xbf16>
    %cst_546 = arith.constant dense<0.000000e+00> : vector<16x64xf32>
    %821 = tpu.matmul %820, %819, %cst_546 {dimension_numbers = #tpu.dot_dimension_numbers<[1], [0], [0], [1], [0, 0, 1, 1], [], []>} : vector<16x288xbf16>, vector<288x64xbf16>, vector<16x64xf32> -> vector<16x64xf32>
    %c0_547 = arith.constant 0 : index
    %c0_548 = arith.constant 0 : index
    %822 = vector.load %arg25[%c0_547, %c0_548] : memref<16x1xf32, #tpu.memory_space<vmem>>, vector<16x1xf32>
    %823 = vector.broadcast %822 : vector<16x1xf32> to vector<16x64xf32>
    %824 = arith.addf %821, %823 : vector<16x64xf32>
    %cst_549 = arith.constant 0.000000e+00 : f32
    %825 = vector.broadcast %cst_549 : f32 to vector<16x64xf32>
    %826 = arith.maximumf %824, %825 : vector<16x64xf32>
    %cst_550 = arith.constant 0.000000e+00 : f32
    %827 = vector.broadcast %cst_550 : f32 to vector<16x9xf32>
    %c0_551 = arith.constant 0 : index
    %c0_552 = arith.constant 0 : index
    %828 = vector.load %arg41[%c0_551, %c0_552] : memref<32x290xf32, #tpu.memory_space<vmem>>, vector<16x9xf32>
    tpu.vector_store %arg41[%c0_551, %c0_552], %827 {strides = array<i32>} : memref<32x290xf32, #tpu.memory_space<vmem>>, vector<16x9xf32>,
    %c0_553 = arith.constant 0 : index
    %c73_554 = arith.constant 73 : index
    %829 = vector.load %arg41[%c0_553, %c73_554] : memref<32x290xf32, #tpu.memory_space<vmem>>, vector<16x9xf32>
    tpu.vector_store %arg41[%c0_553, %c73_554], %827 {strides = array<i32>} : memref<32x290xf32, #tpu.memory_space<vmem>>, vector<16x9xf32>,
    %c0_555 = arith.constant 0 : index
    %c9_556 = arith.constant 9 : index
    %830 = vector.load %arg41[%c0_555, %c9_556] : memref<32x290xf32, #tpu.memory_space<vmem>>, vector<16x64xf32>
    tpu.vector_store %arg41[%c0_555, %c9_556], %826 {strides = array<i32>} : memref<32x290xf32, #tpu.memory_space<vmem>>, vector<16x64xf32>,
    %831 = tpu.iota {dimensions = array<i32: 1>} : vector<1x64xi32>
    %c8_i32_557 = arith.constant 8 : i32
    %c0_i32_558 = arith.constant 0 : i32
    %832 = arith.cmpi eq, %c8_i32_557, %c0_i32_558 : i32
    %c1_i32_559 = arith.constant 1 : i32
    %833 = arith.select %832, %c1_i32_559, %c8_i32_557 : i32
    %834 = vector.broadcast %833 : i32 to vector<1x64xi32>
    %835 = arith.remsi %831, %834 : vector<1x64xi32>
    %c0_i32_560 = arith.constant 0 : i32
    %836 = vector.broadcast %c0_i32_560 : i32 to vector<1x64xi32>
    %837 = arith.cmpi ne, %835, %836 : vector<1x64xi32>
    %c0_i32_561 = arith.constant 0 : i32
    %838 = vector.broadcast %c0_i32_561 : i32 to vector<1x64xi32>
    %839 = arith.cmpi slt, %835, %838 : vector<1x64xi32>
    %c0_i32_562 = arith.constant 0 : i32
    %840 = arith.cmpi slt, %833, %c0_i32_562 : i32
    %841 = vector.broadcast %840 : i1 to vector<1x64xi1>
    %842 = vector.broadcast %841 : vector<1x64xi1> to vector<1x64xi1>
    %843 = arith.xori %839, %842 : vector<1x64xi1>
    %844 = arith.andi %843, %837 : vector<1x64xi1>
    %845 = vector.broadcast %833 : i32 to vector<1x64xi32>
    %846 = arith.addi %835, %845 : vector<1x64xi32>
    %847 = arith.select %844, %846, %835 : vector<1x64xi1>, vector<1x64xi32>
    %c0_i32_563 = arith.constant 0 : i32
    %848 = vector.broadcast %c0_i32_563 : i32 to vector<1x64xi32>
    %849 = arith.cmpi ne, %847, %848 : vector<1x64xi32>
    %c7_i32_564 = arith.constant 7 : i32
    %850 = vector.broadcast %c7_i32_564 : i32 to vector<1x64xi32>
    %851 = arith.cmpi ne, %847, %850 : vector<1x64xi32>
    %c0_565 = arith.constant 0 : index
    %c0_566 = arith.constant 0 : index
    %852 = vector.load %arg41[%c0_565, %c0_566] : memref<32x290xf32, #tpu.memory_space<vmem>>, vector<16x64xf32>
    %cst_567 = arith.constant 0.000000e+00 : f32
    %853 = vector.shape_cast %849 : vector<1x64xi1> to vector<1x64xi1>
    %854 = vector.broadcast %853 : vector<1x64xi1> to vector<16x64xi1>
    %855 = vector.broadcast %cst_567 : f32 to vector<16x64xf32>
    %856 = arith.select %854, %852, %855 : vector<16x64xi1>, vector<16x64xf32>
    %c0_568 = arith.constant 0 : index
    %c1_569 = arith.constant 1 : index
    %857 = vector.load %arg41[%c0_568, %c1_569] : memref<32x290xf32, #tpu.memory_space<vmem>>, vector<16x64xf32>
    %c0_570 = arith.constant 0 : index
    %c2_571 = arith.constant 2 : index
    %858 = vector.load %arg41[%c0_570, %c2_571] : memref<32x290xf32, #tpu.memory_space<vmem>>, vector<16x64xf32>
    %cst_572 = arith.constant 0.000000e+00 : f32
    %859 = vector.shape_cast %851 : vector<1x64xi1> to vector<1x64xi1>
    %860 = vector.broadcast %859 : vector<1x64xi1> to vector<16x64xi1>
    %861 = vector.broadcast %cst_572 : f32 to vector<16x64xf32>
    %862 = arith.select %860, %858, %861 : vector<16x64xi1>, vector<16x64xf32>
    %c0_573 = arith.constant 0 : index
    %c8_574 = arith.constant 8 : index
    %863 = vector.load %arg41[%c0_573, %c8_574] : memref<32x290xf32, #tpu.memory_space<vmem>>, vector<16x64xf32>
    %cst_575 = arith.constant 0.000000e+00 : f32
    %864 = vector.shape_cast %849 : vector<1x64xi1> to vector<1x64xi1>
    %865 = vector.broadcast %864 : vector<1x64xi1> to vector<16x64xi1>
    %866 = vector.broadcast %cst_575 : f32 to vector<16x64xf32>
    %867 = arith.select %865, %863, %866 : vector<16x64xi1>, vector<16x64xf32>
    %c0_576 = arith.constant 0 : index
    %c9_577 = arith.constant 9 : index
    %868 = vector.load %arg41[%c0_576, %c9_577] : memref<32x290xf32, #tpu.memory_space<vmem>>, vector<16x64xf32>
    %c0_578 = arith.constant 0 : index
    %c10_579 = arith.constant 10 : index
    %869 = vector.load %arg41[%c0_578, %c10_579] : memref<32x290xf32, #tpu.memory_space<vmem>>, vector<16x64xf32>
    %cst_580 = arith.constant 0.000000e+00 : f32
    %870 = vector.shape_cast %851 : vector<1x64xi1> to vector<1x64xi1>
    %871 = vector.broadcast %870 : vector<1x64xi1> to vector<16x64xi1>
    %872 = vector.broadcast %cst_580 : f32 to vector<16x64xf32>
    %873 = arith.select %871, %869, %872 : vector<16x64xi1>, vector<16x64xf32>
    %c0_581 = arith.constant 0 : index
    %c16_582 = arith.constant 16 : index
    %874 = vector.load %arg41[%c0_581, %c16_582] : memref<32x290xf32, #tpu.memory_space<vmem>>, vector<16x64xf32>
    %cst_583 = arith.constant 0.000000e+00 : f32
    %875 = vector.shape_cast %849 : vector<1x64xi1> to vector<1x64xi1>
    %876 = vector.broadcast %875 : vector<1x64xi1> to vector<16x64xi1>
    %877 = vector.broadcast %cst_583 : f32 to vector<16x64xf32>
    %878 = arith.select %876, %874, %877 : vector<16x64xi1>, vector<16x64xf32>
    %c0_584 = arith.constant 0 : index
    %c17_585 = arith.constant 17 : index
    %879 = vector.load %arg41[%c0_584, %c17_585] : memref<32x290xf32, #tpu.memory_space<vmem>>, vector<16x64xf32>
    %c0_586 = arith.constant 0 : index
    %c18_587 = arith.constant 18 : index
    %880 = vector.load %arg41[%c0_586, %c18_587] : memref<32x290xf32, #tpu.memory_space<vmem>>, vector<16x64xf32>
    %cst_588 = arith.constant 0.000000e+00 : f32
    %881 = vector.shape_cast %851 : vector<1x64xi1> to vector<1x64xi1>
    %882 = vector.broadcast %881 : vector<1x64xi1> to vector<16x64xi1>
    %883 = vector.broadcast %cst_588 : f32 to vector<16x64xf32>
    %884 = arith.select %882, %880, %883 : vector<16x64xi1>, vector<16x64xf32>
    %885 = tpu.concatenate %856, %857, %862, %867, %868, %873, %878, %879, %884 in 0 : vector<16x64xf32>, vector<16x64xf32>, vector<16x64xf32>, vector<16x64xf32>, vector<16x64xf32>, vector<16x64xf32>, vector<16x64xf32>, vector<16x64xf32>, vector<16x64xf32> -> vector<144x64xf32>
    %886 = arith.truncf %885 : vector<144x64xf32> to vector<144x64xbf16>
    %c0_589 = arith.constant 0 : index
    %c0_590 = arith.constant 0 : index
    %887 = vector.load %arg26[%c0_589, %c0_590] : memref<16x144xbf16, #tpu.memory_space<vmem>>, vector<16x144xbf16>
    %cst_591 = arith.constant dense<0.000000e+00> : vector<16x64xf32>
    %888 = tpu.matmul %887, %886, %cst_591 {dimension_numbers = #tpu.dot_dimension_numbers<[1], [0], [0], [1], [0, 0, 1, 1], [], []>} : vector<16x144xbf16>, vector<144x64xbf16>, vector<16x64xf32> -> vector<16x64xf32>
    %c0_592 = arith.constant 0 : index
    %c0_593 = arith.constant 0 : index
    %889 = vector.load %arg27[%c0_592, %c0_593] : memref<16x1xf32, #tpu.memory_space<vmem>>, vector<16x1xf32>
    %890 = vector.broadcast %889 : vector<16x1xf32> to vector<16x64xf32>
    %891 = arith.addf %888, %890 : vector<16x64xf32>
    %cst_594 = arith.constant 0.000000e+00 : f32
    %892 = vector.broadcast %cst_594 : f32 to vector<16x64xf32>
    %893 = arith.maximumf %891, %892 : vector<16x64xf32>
    %cst_595 = arith.constant 0.000000e+00 : f32
    %894 = vector.broadcast %cst_595 : f32 to vector<16x9xf32>
    %c0_596 = arith.constant 0 : index
    %c0_597 = arith.constant 0 : index
    %895 = vector.load %arg41[%c0_596, %c0_597] : memref<32x290xf32, #tpu.memory_space<vmem>>, vector<16x9xf32>
    tpu.vector_store %arg41[%c0_596, %c0_597], %894 {strides = array<i32>} : memref<32x290xf32, #tpu.memory_space<vmem>>, vector<16x9xf32>,
    %c0_598 = arith.constant 0 : index
    %c73_599 = arith.constant 73 : index
    %896 = vector.load %arg41[%c0_598, %c73_599] : memref<32x290xf32, #tpu.memory_space<vmem>>, vector<16x9xf32>
    tpu.vector_store %arg41[%c0_598, %c73_599], %894 {strides = array<i32>} : memref<32x290xf32, #tpu.memory_space<vmem>>, vector<16x9xf32>,
    %c0_600 = arith.constant 0 : index
    %c9_601 = arith.constant 9 : index
    %897 = vector.load %arg41[%c0_600, %c9_601] : memref<32x290xf32, #tpu.memory_space<vmem>>, vector<16x64xf32>
    tpu.vector_store %arg41[%c0_600, %c9_601], %893 {strides = array<i32>} : memref<32x290xf32, #tpu.memory_space<vmem>>, vector<16x64xf32>,
    %898 = tpu.iota {dimensions = array<i32: 1>} : vector<1x64xi32>
    %c8_i32_602 = arith.constant 8 : i32
    %c0_i32_603 = arith.constant 0 : i32
    %899 = arith.cmpi eq, %c8_i32_602, %c0_i32_603 : i32
    %c1_i32_604 = arith.constant 1 : i32
    %900 = arith.select %899, %c1_i32_604, %c8_i32_602 : i32
    %901 = vector.broadcast %900 : i32 to vector<1x64xi32>
    %902 = arith.remsi %898, %901 : vector<1x64xi32>
    %c0_i32_605 = arith.constant 0 : i32
    %903 = vector.broadcast %c0_i32_605 : i32 to vector<1x64xi32>
    %904 = arith.cmpi ne, %902, %903 : vector<1x64xi32>
    %c0_i32_606 = arith.constant 0 : i32
    %905 = vector.broadcast %c0_i32_606 : i32 to vector<1x64xi32>
    %906 = arith.cmpi slt, %902, %905 : vector<1x64xi32>
    %c0_i32_607 = arith.constant 0 : i32
    %907 = arith.cmpi slt, %900, %c0_i32_607 : i32
    %908 = vector.broadcast %907 : i1 to vector<1x64xi1>
    %909 = vector.broadcast %908 : vector<1x64xi1> to vector<1x64xi1>
    %910 = arith.xori %906, %909 : vector<1x64xi1>
    %911 = arith.andi %910, %904 : vector<1x64xi1>
    %912 = vector.broadcast %900 : i32 to vector<1x64xi32>
    %913 = arith.addi %902, %912 : vector<1x64xi32>
    %914 = arith.select %911, %913, %902 : vector<1x64xi1>, vector<1x64xi32>
    %c0_i32_608 = arith.constant 0 : i32
    %915 = vector.broadcast %c0_i32_608 : i32 to vector<1x64xi32>
    %916 = arith.cmpi ne, %914, %915 : vector<1x64xi32>
    %c7_i32_609 = arith.constant 7 : i32
    %917 = vector.broadcast %c7_i32_609 : i32 to vector<1x64xi32>
    %918 = arith.cmpi ne, %914, %917 : vector<1x64xi32>
    %c0_610 = arith.constant 0 : index
    %c0_611 = arith.constant 0 : index
    %919 = vector.load %arg41[%c0_610, %c0_611] : memref<32x290xf32, #tpu.memory_space<vmem>>, vector<16x64xf32>
    %cst_612 = arith.constant 0.000000e+00 : f32
    %920 = vector.shape_cast %916 : vector<1x64xi1> to vector<1x64xi1>
    %921 = vector.broadcast %920 : vector<1x64xi1> to vector<16x64xi1>
    %922 = vector.broadcast %cst_612 : f32 to vector<16x64xf32>
    %923 = arith.select %921, %919, %922 : vector<16x64xi1>, vector<16x64xf32>
    %c0_613 = arith.constant 0 : index
    %c1_614 = arith.constant 1 : index
    %924 = vector.load %arg41[%c0_613, %c1_614] : memref<32x290xf32, #tpu.memory_space<vmem>>, vector<16x64xf32>
    %c0_615 = arith.constant 0 : index
    %c2_616 = arith.constant 2 : index
    %925 = vector.load %arg41[%c0_615, %c2_616] : memref<32x290xf32, #tpu.memory_space<vmem>>, vector<16x64xf32>
    %cst_617 = arith.constant 0.000000e+00 : f32
    %926 = vector.shape_cast %918 : vector<1x64xi1> to vector<1x64xi1>
    %927 = vector.broadcast %926 : vector<1x64xi1> to vector<16x64xi1>
    %928 = vector.broadcast %cst_617 : f32 to vector<16x64xf32>
    %929 = arith.select %927, %925, %928 : vector<16x64xi1>, vector<16x64xf32>
    %c0_618 = arith.constant 0 : index
    %c8_619 = arith.constant 8 : index
    %930 = vector.load %arg41[%c0_618, %c8_619] : memref<32x290xf32, #tpu.memory_space<vmem>>, vector<16x64xf32>
    %cst_620 = arith.constant 0.000000e+00 : f32
    %931 = vector.shape_cast %916 : vector<1x64xi1> to vector<1x64xi1>
    %932 = vector.broadcast %931 : vector<1x64xi1> to vector<16x64xi1>
    %933 = vector.broadcast %cst_620 : f32 to vector<16x64xf32>
    %934 = arith.select %932, %930, %933 : vector<16x64xi1>, vector<16x64xf32>
    %c0_621 = arith.constant 0 : index
    %c9_622 = arith.constant 9 : index
    %935 = vector.load %arg41[%c0_621, %c9_622] : memref<32x290xf32, #tpu.memory_space<vmem>>, vector<16x64xf32>
    %c0_623 = arith.constant 0 : index
    %c10_624 = arith.constant 10 : index
    %936 = vector.load %arg41[%c0_623, %c10_624] : memref<32x290xf32, #tpu.memory_space<vmem>>, vector<16x64xf32>
    %cst_625 = arith.constant 0.000000e+00 : f32
    %937 = vector.shape_cast %918 : vector<1x64xi1> to vector<1x64xi1>
    %938 = vector.broadcast %937 : vector<1x64xi1> to vector<16x64xi1>
    %939 = vector.broadcast %cst_625 : f32 to vector<16x64xf32>
    %940 = arith.select %938, %936, %939 : vector<16x64xi1>, vector<16x64xf32>
    %c0_626 = arith.constant 0 : index
    %c16_627 = arith.constant 16 : index
    %941 = vector.load %arg41[%c0_626, %c16_627] : memref<32x290xf32, #tpu.memory_space<vmem>>, vector<16x64xf32>
    %cst_628 = arith.constant 0.000000e+00 : f32
    %942 = vector.shape_cast %916 : vector<1x64xi1> to vector<1x64xi1>
    %943 = vector.broadcast %942 : vector<1x64xi1> to vector<16x64xi1>
    %944 = vector.broadcast %cst_628 : f32 to vector<16x64xf32>
    %945 = arith.select %943, %941, %944 : vector<16x64xi1>, vector<16x64xf32>
    %c0_629 = arith.constant 0 : index
    %c17_630 = arith.constant 17 : index
    %946 = vector.load %arg41[%c0_629, %c17_630] : memref<32x290xf32, #tpu.memory_space<vmem>>, vector<16x64xf32>
    %c0_631 = arith.constant 0 : index
    %c18_632 = arith.constant 18 : index
    %947 = vector.load %arg41[%c0_631, %c18_632] : memref<32x290xf32, #tpu.memory_space<vmem>>, vector<16x64xf32>
    %cst_633 = arith.constant 0.000000e+00 : f32
    %948 = vector.shape_cast %918 : vector<1x64xi1> to vector<1x64xi1>
    %949 = vector.broadcast %948 : vector<1x64xi1> to vector<16x64xi1>
    %950 = vector.broadcast %cst_633 : f32 to vector<16x64xf32>
    %951 = arith.select %949, %947, %950 : vector<16x64xi1>, vector<16x64xf32>
    %952 = tpu.concatenate %923, %924, %929, %934, %935, %940, %945, %946, %951 in 0 : vector<16x64xf32>, vector<16x64xf32>, vector<16x64xf32>, vector<16x64xf32>, vector<16x64xf32>, vector<16x64xf32>, vector<16x64xf32>, vector<16x64xf32>, vector<16x64xf32> -> vector<144x64xf32>
    %953 = arith.truncf %952 : vector<144x64xf32> to vector<144x64xbf16>
    %c0_634 = arith.constant 0 : index
    %c0_635 = arith.constant 0 : index
    %954 = vector.load %arg28[%c0_634, %c0_635] : memref<8x144xbf16, #tpu.memory_space<vmem>>, vector<8x144xbf16>
    %cst_636 = arith.constant dense<0.000000e+00> : vector<8x64xf32>
    %955 = tpu.matmul %954, %953, %cst_636 {dimension_numbers = #tpu.dot_dimension_numbers<[1], [0], [0], [1], [0, 0, 1, 1], [], []>} : vector<8x144xbf16>, vector<144x64xbf16>, vector<8x64xf32> -> vector<8x64xf32>
    %c0_637 = arith.constant 0 : index
    %c0_638 = arith.constant 0 : index
    %956 = vector.load %arg29[%c0_637, %c0_638] : memref<8x1xf32, #tpu.memory_space<vmem>>, vector<8x1xf32>
    %957 = vector.broadcast %956 : vector<8x1xf32> to vector<8x64xf32>
    %958 = arith.addf %955, %957 : vector<8x64xf32>
    %cst_639 = arith.constant 0.000000e+00 : f32
    %959 = vector.broadcast %cst_639 : f32 to vector<8x64xf32>
    %960 = arith.maximumf %958, %959 : vector<8x64xf32>
    %c0_640 = arith.constant 0 : index
    %c0_641 = arith.constant 0 : index
    %961 = vector.load %arg39[%c0_640, %c0_641] : memref<64x256xf32, #tpu.memory_space<vmem>>, vector<64x256xf32>
    %cst_642 = arith.constant dense<0.000000e+00> : vector<8x256xf32>
    %962 = tpu.matmul %960, %961, %cst_642 {dimension_numbers = #tpu.dot_dimension_numbers<[1], [0], [0], [1], [0, 0, 1, 1], [], []>} : vector<8x64xf32>, vector<64x256xf32>, vector<8x256xf32> -> vector<8x256xf32>
    %cst_643 = arith.constant 0.000000e+00 : f32
    %963 = vector.broadcast %cst_643 : f32 to vector<16x17xf32>
    %c0_644 = arith.constant 0 : index
    %c0_645 = arith.constant 0 : index
    %964 = vector.load %arg41[%c0_644, %c0_645] : memref<32x290xf32, #tpu.memory_space<vmem>>, vector<16x17xf32>
    tpu.vector_store %arg41[%c0_644, %c0_645], %963 {strides = array<i32>} : memref<32x290xf32, #tpu.memory_space<vmem>>, vector<16x17xf32>,
    %c0_646 = arith.constant 0 : index
    %c273_647 = arith.constant 273 : index
    %965 = vector.load %arg41[%c0_646, %c273_647] : memref<32x290xf32, #tpu.memory_space<vmem>>, vector<16x17xf32>
    tpu.vector_store %arg41[%c0_646, %c273_647], %963 {strides = array<i32>} : memref<32x290xf32, #tpu.memory_space<vmem>>, vector<16x17xf32>,
    %c0_648 = arith.constant 0 : index
    %c17_649 = arith.constant 17 : index
    %966 = vector.load %arg41[%c0_648, %c17_649] : memref<32x290xf32, #tpu.memory_space<vmem>>, vector<8x256xf32>
    tpu.vector_store %arg41[%c0_648, %c17_649], %962 {strides = array<i32>} : memref<32x290xf32, #tpu.memory_space<vmem>>, vector<8x256xf32>,
    %c8_650 = arith.constant 8 : index
    %c17_651 = arith.constant 17 : index
    %967 = vector.load %arg41[%c8_650, %c17_651] : memref<32x290xf32, #tpu.memory_space<vmem>>, vector<8x256xf32>
    tpu.vector_store %arg41[%c8_650, %c17_651], %200 {strides = array<i32>} : memref<32x290xf32, #tpu.memory_space<vmem>>, vector<8x256xf32>,
    %968 = tpu.iota {dimensions = array<i32: 1>} : vector<1x256xi32>
    %c16_i32_652 = arith.constant 16 : i32
    %c0_i32_653 = arith.constant 0 : i32
    %969 = arith.cmpi eq, %c16_i32_652, %c0_i32_653 : i32
    %c1_i32_654 = arith.constant 1 : i32
    %970 = arith.select %969, %c1_i32_654, %c16_i32_652 : i32
    %971 = vector.broadcast %970 : i32 to vector<1x256xi32>
    %972 = arith.remsi %968, %971 : vector<1x256xi32>
    %c0_i32_655 = arith.constant 0 : i32
    %973 = vector.broadcast %c0_i32_655 : i32 to vector<1x256xi32>
    %974 = arith.cmpi ne, %972, %973 : vector<1x256xi32>
    %c0_i32_656 = arith.constant 0 : i32
    %975 = vector.broadcast %c0_i32_656 : i32 to vector<1x256xi32>
    %976 = arith.cmpi slt, %972, %975 : vector<1x256xi32>
    %c0_i32_657 = arith.constant 0 : i32
    %977 = arith.cmpi slt, %970, %c0_i32_657 : i32
    %978 = vector.broadcast %977 : i1 to vector<1x256xi1>
    %979 = vector.broadcast %978 : vector<1x256xi1> to vector<1x256xi1>
    %980 = arith.xori %976, %979 : vector<1x256xi1>
    %981 = arith.andi %980, %974 : vector<1x256xi1>
    %982 = vector.broadcast %970 : i32 to vector<1x256xi32>
    %983 = arith.addi %972, %982 : vector<1x256xi32>
    %984 = arith.select %981, %983, %972 : vector<1x256xi1>, vector<1x256xi32>
    %c0_i32_658 = arith.constant 0 : i32
    %985 = vector.broadcast %c0_i32_658 : i32 to vector<1x256xi32>
    %986 = arith.cmpi ne, %984, %985 : vector<1x256xi32>
    %c15_i32_659 = arith.constant 15 : i32
    %987 = vector.broadcast %c15_i32_659 : i32 to vector<1x256xi32>
    %988 = arith.cmpi ne, %984, %987 : vector<1x256xi32>
    %c0_660 = arith.constant 0 : index
    %c0_661 = arith.constant 0 : index
    %989 = vector.load %arg41[%c0_660, %c0_661] : memref<32x290xf32, #tpu.memory_space<vmem>>, vector<16x256xf32>
    %cst_662 = arith.constant 0.000000e+00 : f32
    %990 = vector.shape_cast %986 : vector<1x256xi1> to vector<1x256xi1>
    %991 = vector.broadcast %990 : vector<1x256xi1> to vector<16x256xi1>
    %992 = vector.broadcast %cst_662 : f32 to vector<16x256xf32>
    %993 = arith.select %991, %989, %992 : vector<16x256xi1>, vector<16x256xf32>
    %c0_663 = arith.constant 0 : index
    %c1_664 = arith.constant 1 : index
    %994 = vector.load %arg41[%c0_663, %c1_664] : memref<32x290xf32, #tpu.memory_space<vmem>>, vector<16x256xf32>
    %c0_665 = arith.constant 0 : index
    %c2_666 = arith.constant 2 : index
    %995 = vector.load %arg41[%c0_665, %c2_666] : memref<32x290xf32, #tpu.memory_space<vmem>>, vector<16x256xf32>
    %cst_667 = arith.constant 0.000000e+00 : f32
    %996 = vector.shape_cast %988 : vector<1x256xi1> to vector<1x256xi1>
    %997 = vector.broadcast %996 : vector<1x256xi1> to vector<16x256xi1>
    %998 = vector.broadcast %cst_667 : f32 to vector<16x256xf32>
    %999 = arith.select %997, %995, %998 : vector<16x256xi1>, vector<16x256xf32>
    %c0_668 = arith.constant 0 : index
    %c16_669 = arith.constant 16 : index
    %1000 = vector.load %arg41[%c0_668, %c16_669] : memref<32x290xf32, #tpu.memory_space<vmem>>, vector<16x256xf32>
    %cst_670 = arith.constant 0.000000e+00 : f32
    %1001 = vector.shape_cast %986 : vector<1x256xi1> to vector<1x256xi1>
    %1002 = vector.broadcast %1001 : vector<1x256xi1> to vector<16x256xi1>
    %1003 = vector.broadcast %cst_670 : f32 to vector<16x256xf32>
    %1004 = arith.select %1002, %1000, %1003 : vector<16x256xi1>, vector<16x256xf32>
    %c0_671 = arith.constant 0 : index
    %c17_672 = arith.constant 17 : index
    %1005 = vector.load %arg41[%c0_671, %c17_672] : memref<32x290xf32, #tpu.memory_space<vmem>>, vector<16x256xf32>
    %c0_673 = arith.constant 0 : index
    %c18_674 = arith.constant 18 : index
    %1006 = vector.load %arg41[%c0_673, %c18_674] : memref<32x290xf32, #tpu.memory_space<vmem>>, vector<16x256xf32>
    %cst_675 = arith.constant 0.000000e+00 : f32
    %1007 = vector.shape_cast %988 : vector<1x256xi1> to vector<1x256xi1>
    %1008 = vector.broadcast %1007 : vector<1x256xi1> to vector<16x256xi1>
    %1009 = vector.broadcast %cst_675 : f32 to vector<16x256xf32>
    %1010 = arith.select %1008, %1006, %1009 : vector<16x256xi1>, vector<16x256xf32>
    %c0_676 = arith.constant 0 : index
    %c32_677 = arith.constant 32 : index
    %1011 = vector.load %arg41[%c0_676, %c32_677] : memref<32x290xf32, #tpu.memory_space<vmem>>, vector<16x256xf32>
    %cst_678 = arith.constant 0.000000e+00 : f32
    %1012 = vector.shape_cast %986 : vector<1x256xi1> to vector<1x256xi1>
    %1013 = vector.broadcast %1012 : vector<1x256xi1> to vector<16x256xi1>
    %1014 = vector.broadcast %cst_678 : f32 to vector<16x256xf32>
    %1015 = arith.select %1013, %1011, %1014 : vector<16x256xi1>, vector<16x256xf32>
    %c0_679 = arith.constant 0 : index
    %c33_680 = arith.constant 33 : index
    %1016 = vector.load %arg41[%c0_679, %c33_680] : memref<32x290xf32, #tpu.memory_space<vmem>>, vector<16x256xf32>
    %c0_681 = arith.constant 0 : index
    %c34_682 = arith.constant 34 : index
    %1017 = vector.load %arg41[%c0_681, %c34_682] : memref<32x290xf32, #tpu.memory_space<vmem>>, vector<16x256xf32>
    %cst_683 = arith.constant 0.000000e+00 : f32
    %1018 = vector.shape_cast %988 : vector<1x256xi1> to vector<1x256xi1>
    %1019 = vector.broadcast %1018 : vector<1x256xi1> to vector<16x256xi1>
    %1020 = vector.broadcast %cst_683 : f32 to vector<16x256xf32>
    %1021 = arith.select %1019, %1017, %1020 : vector<16x256xi1>, vector<16x256xf32>
    %1022 = tpu.concatenate %993, %994, %999, %1004, %1005, %1010, %1015, %1016, %1021 in 0 : vector<16x256xf32>, vector<16x256xf32>, vector<16x256xf32>, vector<16x256xf32>, vector<16x256xf32>, vector<16x256xf32>, vector<16x256xf32>, vector<16x256xf32>, vector<16x256xf32> -> vector<144x256xf32>
    %1023 = arith.truncf %1022 : vector<144x256xf32> to vector<144x256xbf16>
    %c0_684 = arith.constant 0 : index
    %c0_685 = arith.constant 0 : index
    %1024 = vector.load %arg30[%c0_684, %c0_685] : memref<8x144xbf16, #tpu.memory_space<vmem>>, vector<8x144xbf16>
    %cst_686 = arith.constant dense<0.000000e+00> : vector<8x256xf32>
    %1025 = tpu.matmul %1024, %1023, %cst_686 {dimension_numbers = #tpu.dot_dimension_numbers<[1], [0], [0], [1], [0, 0, 1, 1], [], []>} : vector<8x144xbf16>, vector<144x256xbf16>, vector<8x256xf32> -> vector<8x256xf32>
    %c0_687 = arith.constant 0 : index
    %c0_688 = arith.constant 0 : index
    %1026 = vector.load %arg31[%c0_687, %c0_688] : memref<8x1xf32, #tpu.memory_space<vmem>>, vector<8x1xf32>
    %1027 = vector.broadcast %1026 : vector<8x1xf32> to vector<8x256xf32>
    %1028 = arith.addf %1025, %1027 : vector<8x256xf32>
    %cst_689 = arith.constant 0.000000e+00 : f32
    %1029 = vector.broadcast %cst_689 : f32 to vector<8x256xf32>
    %1030 = arith.maximumf %1028, %1029 : vector<8x256xf32>
    %cst_690 = arith.constant 0.000000e+00 : f32
    %1031 = vector.broadcast %cst_690 : f32 to vector<8x17xf32>
    %c0_691 = arith.constant 0 : index
    %c0_692 = arith.constant 0 : index
    %1032 = vector.load %arg41[%c0_691, %c0_692] : memref<32x290xf32, #tpu.memory_space<vmem>>, vector<8x17xf32>
    tpu.vector_store %arg41[%c0_691, %c0_692], %1031 {strides = array<i32>} : memref<32x290xf32, #tpu.memory_space<vmem>>, vector<8x17xf32>,
    %c0_693 = arith.constant 0 : index
    %c273_694 = arith.constant 273 : index
    %1033 = vector.load %arg41[%c0_693, %c273_694] : memref<32x290xf32, #tpu.memory_space<vmem>>, vector<8x17xf32>
    tpu.vector_store %arg41[%c0_693, %c273_694], %1031 {strides = array<i32>} : memref<32x290xf32, #tpu.memory_space<vmem>>, vector<8x17xf32>,
    %c0_695 = arith.constant 0 : index
    %c17_696 = arith.constant 17 : index
    %1034 = vector.load %arg41[%c0_695, %c17_696] : memref<32x290xf32, #tpu.memory_space<vmem>>, vector<8x256xf32>
    tpu.vector_store %arg41[%c0_695, %c17_696], %1030 {strides = array<i32>} : memref<32x290xf32, #tpu.memory_space<vmem>>, vector<8x256xf32>,
    %1035 = tpu.iota {dimensions = array<i32: 1>} : vector<1x256xi32>
    %c16_i32_697 = arith.constant 16 : i32
    %c0_i32_698 = arith.constant 0 : i32
    %1036 = arith.cmpi eq, %c16_i32_697, %c0_i32_698 : i32
    %c1_i32_699 = arith.constant 1 : i32
    %1037 = arith.select %1036, %c1_i32_699, %c16_i32_697 : i32
    %1038 = vector.broadcast %1037 : i32 to vector<1x256xi32>
    %1039 = arith.remsi %1035, %1038 : vector<1x256xi32>
    %c0_i32_700 = arith.constant 0 : i32
    %1040 = vector.broadcast %c0_i32_700 : i32 to vector<1x256xi32>
    %1041 = arith.cmpi ne, %1039, %1040 : vector<1x256xi32>
    %c0_i32_701 = arith.constant 0 : i32
    %1042 = vector.broadcast %c0_i32_701 : i32 to vector<1x256xi32>
    %1043 = arith.cmpi slt, %1039, %1042 : vector<1x256xi32>
    %c0_i32_702 = arith.constant 0 : i32
    %1044 = arith.cmpi slt, %1037, %c0_i32_702 : i32
    %1045 = vector.broadcast %1044 : i1 to vector<1x256xi1>
    %1046 = vector.broadcast %1045 : vector<1x256xi1> to vector<1x256xi1>
    %1047 = arith.xori %1043, %1046 : vector<1x256xi1>
    %1048 = arith.andi %1047, %1041 : vector<1x256xi1>
    %1049 = vector.broadcast %1037 : i32 to vector<1x256xi32>
    %1050 = arith.addi %1039, %1049 : vector<1x256xi32>
    %1051 = arith.select %1048, %1050, %1039 : vector<1x256xi1>, vector<1x256xi32>
    %c0_i32_703 = arith.constant 0 : i32
    %1052 = vector.broadcast %c0_i32_703 : i32 to vector<1x256xi32>
    %1053 = arith.cmpi ne, %1051, %1052 : vector<1x256xi32>
    %c15_i32_704 = arith.constant 15 : i32
    %1054 = vector.broadcast %c15_i32_704 : i32 to vector<1x256xi32>
    %1055 = arith.cmpi ne, %1051, %1054 : vector<1x256xi32>
    %c0_705 = arith.constant 0 : index
    %c0_706 = arith.constant 0 : index
    %1056 = vector.load %arg41[%c0_705, %c0_706] : memref<32x290xf32, #tpu.memory_space<vmem>>, vector<8x256xf32>
    %cst_707 = arith.constant 0.000000e+00 : f32
    %1057 = vector.shape_cast %1053 : vector<1x256xi1> to vector<1x256xi1>
    %1058 = vector.broadcast %1057 : vector<1x256xi1> to vector<8x256xi1>
    %1059 = vector.broadcast %cst_707 : f32 to vector<8x256xf32>
    %1060 = arith.select %1058, %1056, %1059 : vector<8x256xi1>, vector<8x256xf32>
    %c0_708 = arith.constant 0 : index
    %c1_709 = arith.constant 1 : index
    %1061 = vector.load %arg41[%c0_708, %c1_709] : memref<32x290xf32, #tpu.memory_space<vmem>>, vector<8x256xf32>
    %c0_710 = arith.constant 0 : index
    %c2_711 = arith.constant 2 : index
    %1062 = vector.load %arg41[%c0_710, %c2_711] : memref<32x290xf32, #tpu.memory_space<vmem>>, vector<8x256xf32>
    %cst_712 = arith.constant 0.000000e+00 : f32
    %1063 = vector.shape_cast %1055 : vector<1x256xi1> to vector<1x256xi1>
    %1064 = vector.broadcast %1063 : vector<1x256xi1> to vector<8x256xi1>
    %1065 = vector.broadcast %cst_712 : f32 to vector<8x256xf32>
    %1066 = arith.select %1064, %1062, %1065 : vector<8x256xi1>, vector<8x256xf32>
    %c0_713 = arith.constant 0 : index
    %c16_714 = arith.constant 16 : index
    %1067 = vector.load %arg41[%c0_713, %c16_714] : memref<32x290xf32, #tpu.memory_space<vmem>>, vector<8x256xf32>
    %cst_715 = arith.constant 0.000000e+00 : f32
    %1068 = vector.shape_cast %1053 : vector<1x256xi1> to vector<1x256xi1>
    %1069 = vector.broadcast %1068 : vector<1x256xi1> to vector<8x256xi1>
    %1070 = vector.broadcast %cst_715 : f32 to vector<8x256xf32>
    %1071 = arith.select %1069, %1067, %1070 : vector<8x256xi1>, vector<8x256xf32>
    %c0_716 = arith.constant 0 : index
    %c17_717 = arith.constant 17 : index
    %1072 = vector.load %arg41[%c0_716, %c17_717] : memref<32x290xf32, #tpu.memory_space<vmem>>, vector<8x256xf32>
    %c0_718 = arith.constant 0 : index
    %c18_719 = arith.constant 18 : index
    %1073 = vector.load %arg41[%c0_718, %c18_719] : memref<32x290xf32, #tpu.memory_space<vmem>>, vector<8x256xf32>
    %cst_720 = arith.constant 0.000000e+00 : f32
    %1074 = vector.shape_cast %1055 : vector<1x256xi1> to vector<1x256xi1>
    %1075 = vector.broadcast %1074 : vector<1x256xi1> to vector<8x256xi1>
    %1076 = vector.broadcast %cst_720 : f32 to vector<8x256xf32>
    %1077 = arith.select %1075, %1073, %1076 : vector<8x256xi1>, vector<8x256xf32>
    %c0_721 = arith.constant 0 : index
    %c32_722 = arith.constant 32 : index
    %1078 = vector.load %arg41[%c0_721, %c32_722] : memref<32x290xf32, #tpu.memory_space<vmem>>, vector<8x256xf32>
    %cst_723 = arith.constant 0.000000e+00 : f32
    %1079 = vector.shape_cast %1053 : vector<1x256xi1> to vector<1x256xi1>
    %1080 = vector.broadcast %1079 : vector<1x256xi1> to vector<8x256xi1>
    %1081 = vector.broadcast %cst_723 : f32 to vector<8x256xf32>
    %1082 = arith.select %1080, %1078, %1081 : vector<8x256xi1>, vector<8x256xf32>
    %c0_724 = arith.constant 0 : index
    %c33_725 = arith.constant 33 : index
    %1083 = vector.load %arg41[%c0_724, %c33_725] : memref<32x290xf32, #tpu.memory_space<vmem>>, vector<8x256xf32>
    %c0_726 = arith.constant 0 : index
    %c34_727 = arith.constant 34 : index
    %1084 = vector.load %arg41[%c0_726, %c34_727] : memref<32x290xf32, #tpu.memory_space<vmem>>, vector<8x256xf32>
    %cst_728 = arith.constant 0.000000e+00 : f32
    %1085 = vector.shape_cast %1055 : vector<1x256xi1> to vector<1x256xi1>
    %1086 = vector.broadcast %1085 : vector<1x256xi1> to vector<8x256xi1>
    %1087 = vector.broadcast %cst_728 : f32 to vector<8x256xf32>
    %1088 = arith.select %1086, %1084, %1087 : vector<8x256xi1>, vector<8x256xf32>
    %1089 = tpu.concatenate %1060, %1061, %1066, %1071, %1072, %1077, %1082, %1083, %1088 in 0 : vector<8x256xf32>, vector<8x256xf32>, vector<8x256xf32>, vector<8x256xf32>, vector<8x256xf32>, vector<8x256xf32>, vector<8x256xf32>, vector<8x256xf32>, vector<8x256xf32> -> vector<72x256xf32>
    %1090 = arith.truncf %1089 : vector<72x256xf32> to vector<72x256xbf16>
    %c0_729 = arith.constant 0 : index
    %c0_730 = arith.constant 0 : index
    %1091 = vector.load %arg32[%c0_729, %c0_730] : memref<8x72xbf16, #tpu.memory_space<vmem>>, vector<8x72xbf16>
    %cst_731 = arith.constant dense<0.000000e+00> : vector<8x256xf32>
    %1092 = tpu.matmul %1091, %1090, %cst_731 {dimension_numbers = #tpu.dot_dimension_numbers<[1], [0], [0], [1], [0, 0, 1, 1], [], []>} : vector<8x72xbf16>, vector<72x256xbf16>, vector<8x256xf32> -> vector<8x256xf32>
    %c0_732 = arith.constant 0 : index
    %c0_733 = arith.constant 0 : index
    %1093 = vector.load %arg33[%c0_732, %c0_733] : memref<8x1xf32, #tpu.memory_space<vmem>>, vector<8x1xf32>
    %1094 = vector.broadcast %1093 : vector<8x1xf32> to vector<8x256xf32>
    %1095 = arith.addf %1092, %1094 : vector<8x256xf32>
    %cst_734 = arith.constant 0.000000e+00 : f32
    %1096 = vector.broadcast %cst_734 : f32 to vector<8x256xf32>
    %1097 = arith.maximumf %1095, %1096 : vector<8x256xf32>
    %cst_735 = arith.constant 0.000000e+00 : f32
    %1098 = vector.broadcast %cst_735 : f32 to vector<8x17xf32>
    %c0_736 = arith.constant 0 : index
    %c0_737 = arith.constant 0 : index
    %1099 = vector.load %arg41[%c0_736, %c0_737] : memref<32x290xf32, #tpu.memory_space<vmem>>, vector<8x17xf32>
    tpu.vector_store %arg41[%c0_736, %c0_737], %1098 {strides = array<i32>} : memref<32x290xf32, #tpu.memory_space<vmem>>, vector<8x17xf32>,
    %c0_738 = arith.constant 0 : index
    %c273_739 = arith.constant 273 : index
    %1100 = vector.load %arg41[%c0_738, %c273_739] : memref<32x290xf32, #tpu.memory_space<vmem>>, vector<8x17xf32>
    tpu.vector_store %arg41[%c0_738, %c273_739], %1098 {strides = array<i32>} : memref<32x290xf32, #tpu.memory_space<vmem>>, vector<8x17xf32>,
    %c0_740 = arith.constant 0 : index
    %c17_741 = arith.constant 17 : index
    %1101 = vector.load %arg41[%c0_740, %c17_741] : memref<32x290xf32, #tpu.memory_space<vmem>>, vector<8x256xf32>
    tpu.vector_store %arg41[%c0_740, %c17_741], %1097 {strides = array<i32>} : memref<32x290xf32, #tpu.memory_space<vmem>>, vector<8x256xf32>,
    %1102 = tpu.iota {dimensions = array<i32: 1>} : vector<1x256xi32>
    %c16_i32_742 = arith.constant 16 : i32
    %c0_i32_743 = arith.constant 0 : i32
    %1103 = arith.cmpi eq, %c16_i32_742, %c0_i32_743 : i32
    %c1_i32_744 = arith.constant 1 : i32
    %1104 = arith.select %1103, %c1_i32_744, %c16_i32_742 : i32
    %1105 = vector.broadcast %1104 : i32 to vector<1x256xi32>
    %1106 = arith.remsi %1102, %1105 : vector<1x256xi32>
    %c0_i32_745 = arith.constant 0 : i32
    %1107 = vector.broadcast %c0_i32_745 : i32 to vector<1x256xi32>
    %1108 = arith.cmpi ne, %1106, %1107 : vector<1x256xi32>
    %c0_i32_746 = arith.constant 0 : i32
    %1109 = vector.broadcast %c0_i32_746 : i32 to vector<1x256xi32>
    %1110 = arith.cmpi slt, %1106, %1109 : vector<1x256xi32>
    %c0_i32_747 = arith.constant 0 : i32
    %1111 = arith.cmpi slt, %1104, %c0_i32_747 : i32
    %1112 = vector.broadcast %1111 : i1 to vector<1x256xi1>
    %1113 = vector.broadcast %1112 : vector<1x256xi1> to vector<1x256xi1>
    %1114 = arith.xori %1110, %1113 : vector<1x256xi1>
    %1115 = arith.andi %1114, %1108 : vector<1x256xi1>
    %1116 = vector.broadcast %1104 : i32 to vector<1x256xi32>
    %1117 = arith.addi %1106, %1116 : vector<1x256xi32>
    %1118 = arith.select %1115, %1117, %1106 : vector<1x256xi1>, vector<1x256xi32>
    %c0_i32_748 = arith.constant 0 : i32
    %1119 = vector.broadcast %c0_i32_748 : i32 to vector<1x256xi32>
    %1120 = arith.cmpi ne, %1118, %1119 : vector<1x256xi32>
    %c15_i32_749 = arith.constant 15 : i32
    %1121 = vector.broadcast %c15_i32_749 : i32 to vector<1x256xi32>
    %1122 = arith.cmpi ne, %1118, %1121 : vector<1x256xi32>
    %c0_750 = arith.constant 0 : index
    %c0_751 = arith.constant 0 : index
    %1123 = vector.load %arg41[%c0_750, %c0_751] : memref<32x290xf32, #tpu.memory_space<vmem>>, vector<8x256xf32>
    %cst_752 = arith.constant 0.000000e+00 : f32
    %1124 = vector.shape_cast %1120 : vector<1x256xi1> to vector<1x256xi1>
    %1125 = vector.broadcast %1124 : vector<1x256xi1> to vector<8x256xi1>
    %1126 = vector.broadcast %cst_752 : f32 to vector<8x256xf32>
    %1127 = arith.select %1125, %1123, %1126 : vector<8x256xi1>, vector<8x256xf32>
    %c0_753 = arith.constant 0 : index
    %c1_754 = arith.constant 1 : index
    %1128 = vector.load %arg41[%c0_753, %c1_754] : memref<32x290xf32, #tpu.memory_space<vmem>>, vector<8x256xf32>
    %c0_755 = arith.constant 0 : index
    %c2_756 = arith.constant 2 : index
    %1129 = vector.load %arg41[%c0_755, %c2_756] : memref<32x290xf32, #tpu.memory_space<vmem>>, vector<8x256xf32>
    %cst_757 = arith.constant 0.000000e+00 : f32
    %1130 = vector.shape_cast %1122 : vector<1x256xi1> to vector<1x256xi1>
    %1131 = vector.broadcast %1130 : vector<1x256xi1> to vector<8x256xi1>
    %1132 = vector.broadcast %cst_757 : f32 to vector<8x256xf32>
    %1133 = arith.select %1131, %1129, %1132 : vector<8x256xi1>, vector<8x256xf32>
    %c0_758 = arith.constant 0 : index
    %c16_759 = arith.constant 16 : index
    %1134 = vector.load %arg41[%c0_758, %c16_759] : memref<32x290xf32, #tpu.memory_space<vmem>>, vector<8x256xf32>
    %cst_760 = arith.constant 0.000000e+00 : f32
    %1135 = vector.shape_cast %1120 : vector<1x256xi1> to vector<1x256xi1>
    %1136 = vector.broadcast %1135 : vector<1x256xi1> to vector<8x256xi1>
    %1137 = vector.broadcast %cst_760 : f32 to vector<8x256xf32>
    %1138 = arith.select %1136, %1134, %1137 : vector<8x256xi1>, vector<8x256xf32>
    %c0_761 = arith.constant 0 : index
    %c17_762 = arith.constant 17 : index
    %1139 = vector.load %arg41[%c0_761, %c17_762] : memref<32x290xf32, #tpu.memory_space<vmem>>, vector<8x256xf32>
    %c0_763 = arith.constant 0 : index
    %c18_764 = arith.constant 18 : index
    %1140 = vector.load %arg41[%c0_763, %c18_764] : memref<32x290xf32, #tpu.memory_space<vmem>>, vector<8x256xf32>
    %cst_765 = arith.constant 0.000000e+00 : f32
    %1141 = vector.shape_cast %1122 : vector<1x256xi1> to vector<1x256xi1>
    %1142 = vector.broadcast %1141 : vector<1x256xi1> to vector<8x256xi1>
    %1143 = vector.broadcast %cst_765 : f32 to vector<8x256xf32>
    %1144 = arith.select %1142, %1140, %1143 : vector<8x256xi1>, vector<8x256xf32>
    %c0_766 = arith.constant 0 : index
    %c32_767 = arith.constant 32 : index
    %1145 = vector.load %arg41[%c0_766, %c32_767] : memref<32x290xf32, #tpu.memory_space<vmem>>, vector<8x256xf32>
    %cst_768 = arith.constant 0.000000e+00 : f32
    %1146 = vector.shape_cast %1120 : vector<1x256xi1> to vector<1x256xi1>
    %1147 = vector.broadcast %1146 : vector<1x256xi1> to vector<8x256xi1>
    %1148 = vector.broadcast %cst_768 : f32 to vector<8x256xf32>
    %1149 = arith.select %1147, %1145, %1148 : vector<8x256xi1>, vector<8x256xf32>
    %c0_769 = arith.constant 0 : index
    %c33_770 = arith.constant 33 : index
    %1150 = vector.load %arg41[%c0_769, %c33_770] : memref<32x290xf32, #tpu.memory_space<vmem>>, vector<8x256xf32>
    %c0_771 = arith.constant 0 : index
    %c34_772 = arith.constant 34 : index
    %1151 = vector.load %arg41[%c0_771, %c34_772] : memref<32x290xf32, #tpu.memory_space<vmem>>, vector<8x256xf32>
    %cst_773 = arith.constant 0.000000e+00 : f32
    %1152 = vector.shape_cast %1122 : vector<1x256xi1> to vector<1x256xi1>
    %1153 = vector.broadcast %1152 : vector<1x256xi1> to vector<8x256xi1>
    %1154 = vector.broadcast %cst_773 : f32 to vector<8x256xf32>
    %1155 = arith.select %1153, %1151, %1154 : vector<8x256xi1>, vector<8x256xf32>
    %1156 = tpu.concatenate %1127, %1128, %1133, %1138, %1139, %1144, %1149, %1150, %1155 in 0 : vector<8x256xf32>, vector<8x256xf32>, vector<8x256xf32>, vector<8x256xf32>, vector<8x256xf32>, vector<8x256xf32>, vector<8x256xf32>, vector<8x256xf32>, vector<8x256xf32> -> vector<72x256xf32>
    %1157 = arith.truncf %1156 : vector<72x256xf32> to vector<72x256xbf16>
    %c0_774 = arith.constant 0 : index
    %c0_775 = arith.constant 0 : index
    %1158 = vector.load %arg34[%c0_774, %c0_775] : memref<4x72xbf16, #tpu.memory_space<vmem>>, vector<4x72xbf16>
    %cst_776 = arith.constant dense<0.000000e+00> : vector<4x256xf32>
    %1159 = tpu.matmul %1158, %1157, %cst_776 {dimension_numbers = #tpu.dot_dimension_numbers<[1], [0], [0], [1], [0, 0, 1, 1], [], []>} : vector<4x72xbf16>, vector<72x256xbf16>, vector<4x256xf32> -> vector<4x256xf32>
    %c0_777 = arith.constant 0 : index
    %c0_778 = arith.constant 0 : index
    %1160 = vector.load %arg35[%c0_777, %c0_778] : memref<4x1xf32, #tpu.memory_space<vmem>>, vector<4x1xf32>
    %1161 = vector.broadcast %1160 : vector<4x1xf32> to vector<4x256xf32>
    %1162 = arith.addf %1159, %1161 : vector<4x256xf32>
    %c0_779 = arith.constant 0 : index
    %c0_780 = arith.constant 0 : index
    %c0_781 = arith.constant 0 : index
    %1163 = vector.load %arg40[%c0_779, %c0_780, %c0_781] : memref<1x4x256xf32, #tpu.memory_space<vmem>>, vector<1x4x256xf32>
    %1164 = vector.shape_cast %1163 : vector<1x4x256xf32> to vector<4x256xf32>
    %1165 = vector.shape_cast %1162 : vector<4x256xf32> to vector<1x4x256xf32>
    tpu.vector_store %arg40[%c0_779, %c0_780, %c0_781], %1165 {strides = array<i32>} : memref<1x4x256xf32, #tpu.memory_space<vmem>>, vector<1x4x256xf32>,
    return
  }
  func.func @transform_0(%arg0: i32) -> (i32, i32, i32) {
    %c0_i32 = arith.constant 0 : i32
    %c0_i32_0 = arith.constant 0 : i32
    %c0_i32_1 = arith.constant 0 : i32
    return %arg0, %c0_i32, %c0_i32_0 : i32, i32, i32
  }
  func.func @transform_1(%arg0: i32) -> (i32, i32) {
    %c0_i32 = arith.constant 0 : i32
    %c0_i32_0 = arith.constant 0 : i32
    %c0_i32_1 = arith.constant 0 : i32
    return %c0_i32, %c0_i32_0 : i32, i32
  }
  func.func @transform_2(%arg0: i32) -> (i32, i32) {
    %c0_i32 = arith.constant 0 : i32
    %c0_i32_0 = arith.constant 0 : i32
    %c0_i32_1 = arith.constant 0 : i32
    return %c0_i32, %c0_i32_0 : i32, i32
  }
  func.func @transform_3(%arg0: i32) -> (i32, i32) {
    %c0_i32 = arith.constant 0 : i32
    %c0_i32_0 = arith.constant 0 : i32
    %c0_i32_1 = arith.constant 0 : i32
    return %c0_i32, %c0_i32_0 : i32, i32
  }
  func.func @transform_4(%arg0: i32) -> (i32, i32) {
    %c0_i32 = arith.constant 0 : i32
    %c0_i32_0 = arith.constant 0 : i32
    %c0_i32_1 = arith.constant 0 : i32
    return %c0_i32, %c0_i32_0 : i32, i32
  }
  func.func @transform_5(%arg0: i32) -> (i32, i32) {
    %c0_i32 = arith.constant 0 : i32
    %c0_i32_0 = arith.constant 0 : i32
    %c0_i32_1 = arith.constant 0 : i32
    return %c0_i32, %c0_i32_0 : i32, i32
  }
  func.func @transform_6(%arg0: i32) -> (i32, i32) {
    %c0_i32 = arith.constant 0 : i32
    %c0_i32_0 = arith.constant 0 : i32
    %c0_i32_1 = arith.constant 0 : i32
    return %c0_i32, %c0_i32_0 : i32, i32
  }
  func.func @transform_7(%arg0: i32) -> (i32, i32) {
    %c0_i32 = arith.constant 0 : i32
    %c0_i32_0 = arith.constant 0 : i32
    %c0_i32_1 = arith.constant 0 : i32
    return %c0_i32, %c0_i32_0 : i32, i32
  }
  func.func @transform_8(%arg0: i32) -> (i32, i32) {
    %c0_i32 = arith.constant 0 : i32
    %c0_i32_0 = arith.constant 0 : i32
    %c0_i32_1 = arith.constant 0 : i32
    return %c0_i32, %c0_i32_0 : i32, i32
  }
  func.func @transform_9(%arg0: i32) -> (i32, i32) {
    %c0_i32 = arith.constant 0 : i32
    %c0_i32_0 = arith.constant 0 : i32
    %c0_i32_1 = arith.constant 0 : i32
    return %c0_i32, %c0_i32_0 : i32, i32
  }
  func.func @transform_10(%arg0: i32) -> (i32, i32) {
    %c0_i32 = arith.constant 0 : i32
    %c0_i32_0 = arith.constant 0 : i32
    %c0_i32_1 = arith.constant 0 : i32
    return %c0_i32, %c0_i32_0 : i32, i32
  }
  func.func @transform_11(%arg0: i32) -> (i32, i32) {
    %c0_i32 = arith.constant 0 : i32
    %c0_i32_0 = arith.constant 0 : i32
    %c0_i32_1 = arith.constant 0 : i32
    return %c0_i32, %c0_i32_0 : i32, i32
  }
  func.func @transform_12(%arg0: i32) -> (i32, i32) {
    %c0_i32 = arith.constant 0 : i32
    %c0_i32_0 = arith.constant 0 : i32
    %c0_i32_1 = arith.constant 0 : i32
    return %c0_i32, %c0_i32_0 : i32, i32
  }
  func.func @transform_13(%arg0: i32) -> (i32, i32) {
    %c0_i32 = arith.constant 0 : i32
    %c0_i32_0 = arith.constant 0 : i32
    %c0_i32_1 = arith.constant 0 : i32
    return %c0_i32, %c0_i32_0 : i32, i32
  }
  func.func @transform_14(%arg0: i32) -> (i32, i32) {
    %c0_i32 = arith.constant 0 : i32
    %c0_i32_0 = arith.constant 0 : i32
    %c0_i32_1 = arith.constant 0 : i32
    return %c0_i32, %c0_i32_0 : i32, i32
  }
  func.func @transform_15(%arg0: i32) -> (i32, i32) {
    %c0_i32 = arith.constant 0 : i32
    %c0_i32_0 = arith.constant 0 : i32
    %c0_i32_1 = arith.constant 0 : i32
    return %c0_i32, %c0_i32_0 : i32, i32
  }
  func.func @transform_16(%arg0: i32) -> (i32, i32) {
    %c0_i32 = arith.constant 0 : i32
    %c0_i32_0 = arith.constant 0 : i32
    %c0_i32_1 = arith.constant 0 : i32
    return %c0_i32, %c0_i32_0 : i32, i32
  }
  func.func @transform_17(%arg0: i32) -> (i32, i32) {
    %c0_i32 = arith.constant 0 : i32
    %c0_i32_0 = arith.constant 0 : i32
    %c0_i32_1 = arith.constant 0 : i32
    return %c0_i32, %c0_i32_0 : i32, i32
  }
  func.func @transform_18(%arg0: i32) -> (i32, i32) {
    %c0_i32 = arith.constant 0 : i32
    %c0_i32_0 = arith.constant 0 : i32
    %c0_i32_1 = arith.constant 0 : i32
    return %c0_i32, %c0_i32_0 : i32, i32
  }
  func.func @transform_19(%arg0: i32) -> (i32, i32) {
    %c0_i32 = arith.constant 0 : i32
    %c0_i32_0 = arith.constant 0 : i32
    %c0_i32_1 = arith.constant 0 : i32
    return %c0_i32, %c0_i32_0 : i32, i32
  }
  func.func @transform_20(%arg0: i32) -> (i32, i32) {
    %c0_i32 = arith.constant 0 : i32
    %c0_i32_0 = arith.constant 0 : i32
    %c0_i32_1 = arith.constant 0 : i32
    return %c0_i32, %c0_i32_0 : i32, i32
  }
  func.func @transform_21(%arg0: i32) -> (i32, i32) {
    %c0_i32 = arith.constant 0 : i32
    %c0_i32_0 = arith.constant 0 : i32
    %c0_i32_1 = arith.constant 0 : i32
    return %c0_i32, %c0_i32_0 : i32, i32
  }
  func.func @transform_22(%arg0: i32) -> (i32, i32) {
    %c0_i32 = arith.constant 0 : i32
    %c0_i32_0 = arith.constant 0 : i32
    %c0_i32_1 = arith.constant 0 : i32
    return %c0_i32, %c0_i32_0 : i32, i32
  }
  func.func @transform_23(%arg0: i32) -> (i32, i32) {
    %c0_i32 = arith.constant 0 : i32
    %c0_i32_0 = arith.constant 0 : i32
    %c0_i32_1 = arith.constant 0 : i32
    return %c0_i32, %c0_i32_0 : i32, i32
  }
  func.func @transform_24(%arg0: i32) -> (i32, i32) {
    %c0_i32 = arith.constant 0 : i32
    %c0_i32_0 = arith.constant 0 : i32
    %c0_i32_1 = arith.constant 0 : i32
    return %c0_i32, %c0_i32_0 : i32, i32
  }
  func.func @transform_25(%arg0: i32) -> (i32, i32) {
    %c0_i32 = arith.constant 0 : i32
    %c0_i32_0 = arith.constant 0 : i32
    %c0_i32_1 = arith.constant 0 : i32
    return %c0_i32, %c0_i32_0 : i32, i32
  }
  func.func @transform_26(%arg0: i32) -> (i32, i32) {
    %c0_i32 = arith.constant 0 : i32
    %c0_i32_0 = arith.constant 0 : i32
    %c0_i32_1 = arith.constant 0 : i32
    return %c0_i32, %c0_i32_0 : i32, i32
  }
  func.func @transform_27(%arg0: i32) -> (i32, i32) {
    %c0_i32 = arith.constant 0 : i32
    %c0_i32_0 = arith.constant 0 : i32
    %c0_i32_1 = arith.constant 0 : i32
    return %c0_i32, %c0_i32_0 : i32, i32
  }
  func.func @transform_28(%arg0: i32) -> (i32, i32) {
    %c0_i32 = arith.constant 0 : i32
    %c0_i32_0 = arith.constant 0 : i32
    %c0_i32_1 = arith.constant 0 : i32
    return %c0_i32, %c0_i32_0 : i32, i32
  }
  func.func @transform_29(%arg0: i32) -> (i32, i32) {
    %c0_i32 = arith.constant 0 : i32
    %c0_i32_0 = arith.constant 0 : i32
    %c0_i32_1 = arith.constant 0 : i32
    return %c0_i32, %c0_i32_0 : i32, i32
  }
  func.func @transform_30(%arg0: i32) -> (i32, i32) {
    %c0_i32 = arith.constant 0 : i32
    %c0_i32_0 = arith.constant 0 : i32
    %c0_i32_1 = arith.constant 0 : i32
    return %c0_i32, %c0_i32_0 : i32, i32
  }
  func.func @transform_31(%arg0: i32) -> (i32, i32) {
    %c0_i32 = arith.constant 0 : i32
    %c0_i32_0 = arith.constant 0 : i32
    %c0_i32_1 = arith.constant 0 : i32
    return %c0_i32, %c0_i32_0 : i32, i32
  }
  func.func @transform_32(%arg0: i32) -> (i32, i32) {
    %c0_i32 = arith.constant 0 : i32
    %c0_i32_0 = arith.constant 0 : i32
    %c0_i32_1 = arith.constant 0 : i32
    return %c0_i32, %c0_i32_0 : i32, i32
  }
  func.func @transform_33(%arg0: i32) -> (i32, i32) {
    %c0_i32 = arith.constant 0 : i32
    %c0_i32_0 = arith.constant 0 : i32
    %c0_i32_1 = arith.constant 0 : i32
    return %c0_i32, %c0_i32_0 : i32, i32
  }
  func.func @transform_34(%arg0: i32) -> (i32, i32) {
    %c0_i32 = arith.constant 0 : i32
    %c0_i32_0 = arith.constant 0 : i32
    %c0_i32_1 = arith.constant 0 : i32
    return %c0_i32, %c0_i32_0 : i32, i32
  }
  func.func @transform_35(%arg0: i32) -> (i32, i32) {
    %c0_i32 = arith.constant 0 : i32
    %c0_i32_0 = arith.constant 0 : i32
    %c0_i32_1 = arith.constant 0 : i32
    return %c0_i32, %c0_i32_0 : i32, i32
  }
  func.func @transform_36(%arg0: i32) -> (i32, i32) {
    %c0_i32 = arith.constant 0 : i32
    %c0_i32_0 = arith.constant 0 : i32
    %c0_i32_1 = arith.constant 0 : i32
    return %c0_i32, %c0_i32_0 : i32, i32
  }
  func.func @transform_37(%arg0: i32) -> (i32, i32) {
    %c0_i32 = arith.constant 0 : i32
    %c0_i32_0 = arith.constant 0 : i32
    %c0_i32_1 = arith.constant 0 : i32
    return %c0_i32, %c0_i32_0 : i32, i32
  }
  func.func @transform_38(%arg0: i32) -> (i32, i32) {
    %c0_i32 = arith.constant 0 : i32
    %c0_i32_0 = arith.constant 0 : i32
    %c0_i32_1 = arith.constant 0 : i32
    return %c0_i32, %c0_i32_0 : i32, i32
  }
  func.func @transform_39(%arg0: i32) -> (i32, i32, i32) {
    %c0_i32 = arith.constant 0 : i32
    %c0_i32_0 = arith.constant 0 : i32
    %c0_i32_1 = arith.constant 0 : i32
    return %arg0, %c0_i32, %c0_i32_0 : i32, i32, i32
  }
}

</mosaic_0001>

<bundles_post_ra>
// kernel: encoder_unet_forward.1
= control target key start
LH: loop header
LB: loop body
LE: loop exit
PB: predicated region body
PF: predicated region fallthrough
CT: control target
= control target key end

     0   :  { %s6456_s6 = smov 1   ;;  %s6457_s10 = smov 2   ;;  %s8396_s0 = inlined_call_operand.smem [shape: u32[40], index: -1, kind: input, shape index: {}] }
   0x1   :  { %s6523_s5 = sld [smem:[%s8396_s0]]   ;;  %s6458_s14 = smov 3  }
   0x2   :  { %s6528_s9 = sld [smem:[%s8396_s0 + %s6456_s6]]   ;;  %s6459_s18 = smov 4  }
   0x3   :  { %s6533_s13 = sld [smem:[%s8396_s0 + %s6457_s10]]   ;;  %s6460_s22 = smov 5  }
   0x4   :  { %s6538_s17 = sld [smem:[%s8396_s0 + %s6458_s14]]   ;;  %s6461_s26 = smov 6  }
   0x5   :  { %s6543_s21 = sld [smem:[%s8396_s0 + %s6459_s18]]   ;;  %s6462_s30 = smov 7  }
   0x6   :  { %s6548_s25 = sld [smem:[%s8396_s0 + %s6460_s22]]   ;;  %s6463_s4 = smov 8  }
   0x7   :  { %8473 = sst [smem:[#allocation3_spill]] %s6523_s5  ;;  %s6464_s10 = smov 9  }
   0x8   :  { %s6553_s29 = sld [smem:[%s8396_s0 + %s6461_s26]]   ;;  %s6465_s15 = smov 10  }
   0x9   :  { %s6558_s3 = sld [smem:[%s8396_s0 + %s6462_s30]]   ;;  %s6466_s20 = smov 11  }
   0xa   :  { %s6563_s8 = sld [smem:[%s8396_s0 + %s6463_s4]]   ;;  %s6467_s26 = smov 12  }
   0xb   :  { %s6568_s14 = sld [smem:[%s8396_s0 + %s6464_s10]]   ;;  %s6468_s1 = smov 13  }
   0xc   :  { %s6573_s19 = sld [smem:[%s8396_s0 + %s6465_s15]]   ;;  %s6469_s7 = smov 14  }
   0xd   :  { %s6578_s24 = sld [smem:[%s8396_s0 + %s6466_s20]]   ;;  %s6470_s15 = smov 15  }
   0xe   :  { %s6583_s30 = sld [smem:[%s8396_s0 + %s6467_s26]]   ;;  %s6471_s22 = smov 16  }
   0xf   :  { %8474 = sst [smem:[#allocation4_spill]] %s6558_s3  ;;  %s6472_s28 = smov 17  }
  0x10   :  { %8475 = sst [smem:[#allocation5_spill]] %s6563_s8 }
  0x11   :  { %s6588_s6 = sld [smem:[%s8396_s0 + %s6468_s1]]  }
  0x12   :  { %s6593_s12 = sld [smem:[%s8396_s0 + %s6469_s7]]   ;;  %s6473_s7 = smov 18  }
  0x13   :  { %s6598_s20 = sld [smem:[%s8396_s0 + %s6470_s15]]   ;;  %s6474_s15 = smov 19  }
  0x14   :  { %s6603_s27 = sld [smem:[%s8396_s0 + %s6471_s22]]   ;;  %s6475_s22 = smov 20  }
  0x15   :  { %s6608_s4 = sld [smem:[%s8396_s0 + %s6472_s28]]   ;;  %s6476_s28 = smov 21  }
  0x17   :  { %8476 = sst [smem:[#allocation6_spill]] %s6588_s6 }
  0x18   :  { %8477 = sst [smem:[#allocation7_spill]] %s6593_s12 }
  0x19   :  { %8478 = sst [smem:[#allocation8_spill]] %s6598_s20 }
  0x1a   :  { %8479 = sst [smem:[#allocation9_spill]] %s6603_s27 }
  0x1b   :  { %8480 = sst [smem:[#allocation10_spill]] %s6608_s4 }
  0x1c   :  { %s6613_s6 = sld [smem:[%s8396_s0 + %s6473_s7]]   ;;  %s6477_s7 = smov 22  }
  0x1d   :  { %s6618_s20 = sld [smem:[%s8396_s0 + %s6474_s15]]   ;;  %s6478_s15 = smov 23  }
  0x1e   :  { %s6623_s27 = sld [smem:[%s8396_s0 + %s6475_s22]]   ;;  %s6479_s22 = smov 24  }
  0x1f   :  { %s6628_s4 = sld [smem:[%s8396_s0 + %s6476_s28]]   ;;  %s6480_s28 = smov 25  }
  0x22   :  { %8481 = sst [smem:[#allocation11_spill]] %s6613_s6 }
  0x23   :  { %8482 = sst [smem:[#allocation12_spill]] %s6618_s20 }
  0x24   :  { %8483 = sst [smem:[#allocation13_spill]] %s6623_s27 }
  0x25   :  { %8484 = sst [smem:[#allocation14_spill]] %s6628_s4 }
  0x26   :  { %s6633_s6 = sld [smem:[%s8396_s0 + %s6477_s7]]   ;;  %s6481_s7 = smov 26  }
  0x27   :  { %s6638_s20 = sld [smem:[%s8396_s0 + %s6478_s15]]   ;;  %s6482_s15 = smov 27  }
  0x28   :  { %s6643_s27 = sld [smem:[%s8396_s0 + %s6479_s22]]   ;;  %s6483_s22 = smov 28  }
  0x29   :  { %s6648_s4 = sld [smem:[%s8396_s0 + %s6480_s28]]   ;;  %s6484_s28 = smov 29  }
  0x2c   :  { %8485 = sst [smem:[#allocation15_spill]] %s6633_s6 }
  0x2d   :  { %8486 = sst [smem:[#allocation16_spill]] %s6638_s20 }
  0x2e   :  { %8487 = sst [smem:[#allocation17_spill]] %s6643_s27 }
  0x2f   :  { %8488 = sst [smem:[#allocation18_spill]] %s6648_s4 }
  0x30   :  { %s6653_s6 = sld [smem:[%s8396_s0 + %s6481_s7]]   ;;  %s6485_s7 = smov 30  }
  0x31   :  { %s6658_s20 = sld [smem:[%s8396_s0 + %s6482_s15]]   ;;  %s6486_s15 = smov 31  }
  0x32   :  { %s6663_s27 = sld [smem:[%s8396_s0 + %s6483_s22]]   ;;  %s6487_s22 = smov 32  }
  0x33   :  { %s6668_s4 = sld [smem:[%s8396_s0 + %s6484_s28]]   ;;  %s6488_s28 = smov 33  }
  0x36   :  { %8489 = sst [smem:[#allocation19_spill]] %s6653_s6 }
  0x37   :  { %8490 = sst [smem:[#allocation20_spill]] %s6658_s20 }
  0x38   :  { %8491 = sst [smem:[#allocation21_spill]] %s6663_s27 }
  0x39   :  { %8492 = sst [smem:[#allocation22_spill]] %s6668_s4 }
  0x3a   :  { %s6673_s6 = sld [smem:[%s8396_s0 + %s6485_s7]]   ;;  %s6489_s7 = smov 34  }
  0x3b   :  { %s6678_s20 = sld [smem:[%s8396_s0 + %s6486_s15]]   ;;  %s6490_s15 = smov 35  }
  0x3c   :  { %s6683_s27 = sld [smem:[%s8396_s0 + %s6487_s22]]   ;;  %s6491_s22 = smov 36  }
  0x3d   :  { %s6688_s4 = sld [smem:[%s8396_s0 + %s6488_s28]]   ;;  %s6492_s28 = smov 37  }
  0x40   :  { %8493 = sst [smem:[#allocation23_spill]] %s6673_s6 }
  0x41   :  { %8494 = sst [smem:[#allocation24_spill]] %s6678_s20 }
  0x42   :  { %8495 = sst [smem:[#allocation25_spill]] %s6683_s27 }
  0x43   :  { %8496 = sst [smem:[#allocation26_spill]] %s6688_s4 }
  0x44   :  { %s6693_s6 = sld [smem:[%s8396_s0 + %s6489_s7]]   ;;  %s6493_s7 = smov 38  }
  0x45   :  { %s6698_s20 = sld [smem:[%s8396_s0 + %s6490_s15]]   ;;  %s6494_s15 = smov 39  }
  0x46   :  { %s6703_s27 = sld [smem:[%s8396_s0 + %s6491_s22]]   ;;  %s6720_s22 = smov 0  }
  0x47   :  { %s6708_s4 = sld [smem:[%s8396_s0 + %s6492_s28]]  }
  0x48   :  { %s6718_s12 = sld [smem:[%s8396_s0 + %s6494_s15]]  }
  0x4a   :  { %8497 = sst [smem:[#allocation27_spill]] %s6693_s6 }
  0x4b   :  { %s6713_s6 = sld [smem:[%s8396_s0 + %s6493_s7]]  }
  0x4d   :  { %8498 = sst [smem:[#allocation28_spill]] %s6708_s4 }
  0x4e LB: > { %s8499_s4 = sld [smem:[#allocation28_spill]]  ;;  %s4968_s23 = sadd.s32 4294967295, %s6454_s22   ;;  %s6454_s22 = sphi %s6720_s22, %s89_s22  }
  0x4f   : > { %p4972_p0 = scmp.ge.s32.totalorder %s6454_s22, 1  ;;  %p1077_p1 = scmp.lt.s32.totalorder %s6454_s22, 3 }
  0x51   : > { %p1078_p2 = pnand %p4972_p0, %p1077_p1 }
  0x52   : > { %p1173_p3 = scmp.lt.s32.totalorder (!%p1078_p2), %s4968_s23, 1  ;;  %s8500_s5 = sld [smem:[#allocation3_spill]] (!%p1078_p2) }
  0x53   : > { %1081 = sbr.rel (%p1078_p2) target bundleno = 8464 (0x2110), region = 176  ;;  %s8418_s28 = smov (!%p1078_p2), 17  }
  0x54   : > { %s8443_s1 = smov (!%p1078_p2), 111   ;;  %s8433_s2 = smov (!%p1078_p2), 110  }
  0x55   : > { %s8428_s7 = smov (!%p1078_p2), 94   ;;  %s8431_s10 = smov (!%p1078_p2), 96  }
  0x56   : > { %s8437_s11 = smov (!%p1078_p2), 112   ;;  %s8460_s15 = smov (!%p1078_p2), 126  }
  0x57   : > { %s8416_s16 = smov (!%p1078_p2), 95   ;;  %s8451_s18 = smov (!%p1078_p2), 127  }
  0x58   : > { %vm1185_vm0 = vcmask 134144   ;;  %v6495_v0 = vmov 0.0   ;;  %s8691_s23 = smov (!%p1173_p3, %s4968_s23), 1  ;;  %vm1187_vm1 = vcmask 273544   ;;  %vm1202_vm2 = vcmask 1043592   ;;  %s8522_s8 = sld [smem:[#allocation5_spill]] }
  0x59   : > { %1186 = vst.msk [vmem:[#allocation2] sm:$0xf] %vm1185_vm0, %v6495_v0  ;;  %s8415_s0 = sshll.u32 %s8691_s23, 3  ;;  %vm8442_vm3 = vcmask 138240   ;;  %v1206_v21 = vlaneseq  ;;  %v1382_v26 = vld [vmem:[%s6533_s13] sm:$0xf] }
  0x5a   : > { %s1177_s26 = scalar_lea.vmem %s8500_s5, %s8415_s0  ;;  %1188 = vst.msk [vmem:[#allocation2 + $0x10] sm:$0xf] %vm1187_vm1, %v6495_v0  ;;  %v6505_v27 = vmov 0   ;;  %vm8421_vm4 = vcmask 900096   ;;  %vm8424_vm5 = vcmask 769024   ;;  %vm8411_vm8 = vcmask 908288  }
  0x5b   : > { %v1184_v1 = vld [vmem:[%s1177_s26] sm:$0xff]  ;;  %v6773_v24 = vand.u32 127, %v1206_v21  ;;  %5630 = vset.pattern.permute.xlu0 %v6505_v27  ;;  %5671 = vset.pattern.permute.xlu2 %v6505_v27  ;;  %vm8414_vm11 = vcmask 1041408   ;;  %vm8422_vm12 = vcmask 785408   ;;  %vm8439_vm13 = vcmask 1043456   ;;  %s8435_s26 = smov 9  }
  0x5c   : > { %1190 = vst [vmem:[#allocation1] ss:$2 sm:$0xff] %v1184_v1  ;;  %5727 = vset.pattern.permute.xlu1 %v6505_v27  ;;  %vm8412_vm14 = vcmask 916480   ;;  %vm8423_vm15 = vcmask 777216   ;;  %s8455_s0 = smov 119   ;;  %s8529_s3 = sld [smem:[#allocation4_spill]] }
  0x5d   : > { %v1208_v25 = vadd.s32 128, %v6773_v24  ;;  %v1213_v32 = vand.u32 15, %v6773_v24  ;;  %s8552_s5 = smov 126  }
  0x5f   : > { %v1220_v31 = vand.u32 15, %v1208_v25  ;;  %vm6784_vm7 = vcmp.ne.s32.totalorder %v1213_v32, 15  ;;  %vm6790_vm9 = vcmp.ne.s32.totalorder %v1213_v32, 0 }
  0x61   : > { %vm6780_vm6 = vcmp.ne.s32.totalorder %v1220_v31, 15  ;;  %vm6794_vm10 = vcmp.ne.s32.totalorder %v1220_v31, 0 }
  0x63   : > { %v1191_v2 = vld.sshfl [vmem:[#allocation1] sm:$0xff pattern:$0x75316420]  ;;  %v1192_v3 = vld.sshfl [vmem:[#allocation1 + $0x8] sm:$0xff pattern:$0x75316420] }
  0x64   : > { %1193 = vrot.lane.b32.xlu0 %v1191_v2, %s8418_s28 }
  0x6c   : > { %1195 = vrot.lane.b32.xlu0 %v1192_v3, %s8418_s28 }
  0xd6   : > { %v1194_v4 = vpop.permute.xlu0 %1193 }
  0xd7   : > { %1203 = vst.msk [vmem:[#allocation2] sm:$0xf] %vm1202_vm2, %v1194_v4 }
  0xde   : > { %v6741_v5 = vld [vmem:[#allocation2] sm:$0xf]  ;;  %v1196_v6 = vpop.permute.xlu0 %1195 }
  0xdf   : > { %1427 = vst.msk [vmem:[#allocation2] sm:$0xf] %vm1185_vm0, %v6495_v0  ;;  %v1198_v7 = vsel %vm8442_vm3, %v1194_v4, %v1196_v6  ;;  %v1318_v12 = vrot.slane %v6741_v5, 4 }
  0xe0   : > { %1204 = vst [vmem:[#allocation2 + $0x8] sm:$0xf] %v1198_v7 }
  0xe1   : > { %1205 = vst.msk [vmem:[#allocation2 + $0x10] sm:$0xf] %vm1185_vm0, %v1196_v6 }
  0xe7   : > { %v6752_v9 = vld [vmem:[#allocation2 + $0x8] sm:$0xf] }
  0xe8   : > { %v1245_v8 = vld [vmem:[#allocation2 + $0x10] sm:$0xf]  ;;  %v5600_v10 = vpack.i.bf16 %v6752_v9, %v6741_v5  ;;  %v1319_v11 = vrot.slane %v6752_v9, 4 }
  0xe9   : > { %1342 = vrot.lane.b32.xlu0 %v1245_v8, %s8443_s1  ;;  %1428 = vst.msk [vmem:[#allocation2 + $0x10] sm:$0xf] %vm1187_vm1, %v6495_v0  ;;  %1283 = vrot.lane.b32.xlu2 %v1245_v8, %s8433_s2  ;;  %v1320_v13 = vrot.slane %v1245_v8, 4 }
  0xea   : > { %1309 = vrot.lane.b32.xlu1 %v1245_v8, %s8428_s7  ;;  %v5620_v14 = vpack.i.bf16 %v1319_v11, %v1318_v12 }
  0xf1   : > { %5601 = vrot.lane.b32.xlu0 %v5600_v10, %s8431_s10  ;;  %5596 = vrot.lane.b32.xlu2 %v5600_v10, %s8433_s2 }
  0xf2   : > { %1296 = vrot.lane.b32.xlu1 %v1245_v8, %s8431_s10 }
  0xf9   : > { %5611 = vrot.lane.b32.xlu0 %v5600_v10, %s8437_s11  ;;  %5606 = vrot.lane.b32.xlu2 %v5600_v10, %s8443_s1 }
  0xfa   : > { %1270 = vrot.lane.b32.xlu1 %v1245_v8, %s8437_s11 }
 0x101   : > { %1257 = vrot.lane.b32.xlu0 %v1245_v8, %s8460_s15  ;;  %5616 = vrot.lane.b32.xlu2 %v5600_v10, %s8460_s15 }
 0x102   : > { %5591 = vrot.lane.b32.xlu1 %v5600_v10, %s8428_s7 }
 0x109   : > { %1359 = vrot.lane.b32.xlu2 %v1320_v13, %s8416_s16  ;;  %1385 = vperm.xlu0 %5630, %v1382_v26  }
 0x10a   : > { %5621 = vrot.lane.b32.xlu1 %v5620_v14, %s8416_s16 }
 0x111   : > { %1325 = vrot.lane.b32.xlu2 %v1320_v13, %s8451_s18 }
 0x112   : > { %5626 = vrot.lane.b32.xlu1 %v5620_v14, %s8451_s18 }
 0x143   : > { %v1284_v15 = vpop.permute.xlu2 %1283 }
 0x14b   : > { %v5597_v17 = vpop.permute.xlu2 %5596 }
 0x14c   : > { %v5599_v28 = vunpack.i.h.bf16 %v5597_v17  ;;  %v5598_v29 = vunpack.i.l.bf16 %v5597_v17 }
 0x14e   : > { %v1287_v39 = vsel %vm8421_vm4, %v5599_v28, %v1284_v15  ;;  %v1286_v40 = vsel %vm8421_vm4, %v5598_v29, %v5599_v28 }
 0x14f   : > { %v1290_v53 = vsel %vm6784_vm7, %v1286_v40, 0.0  ;;  %v1291_v56 = vsel %vm6780_vm6, %v1287_v39, 0.0  ;;  %v1244_v40 = vsel %vm6794_vm10, %v6752_v9, 0.0 }
 0x150   : > { %v1351_v63 = vrot.slane %v1290_v53, 4  ;;  %v1352_v6 = vrot.slane %v1291_v56, 4 }
 0x153   : > { %v5607_v20 = vpop.permute.xlu2 %5606 }
 0x154   : > { %v5609_v41 = vunpack.i.h.bf16 %v5607_v20  ;;  %v5608_v44 = vunpack.i.l.bf16 %v5607_v20 }
 0x156   : > { %v1345_v59 = vsel %vm8411_vm8, %v5608_v44, %v5609_v41 }
 0x157   : > { %v1371_v11 = vsel %vm8439_vm13, %v1345_v59, %v1351_v63 }
 0x15b   : > { %v1343_v18 = vpop.permute.xlu0 %1342  ;;  %v6777_v30 = vpop.permute.xlu2 %5616 }
 0x15c   : > { %v1310_v16 = vpop.permute.xlu1 %1309  ;;  %v1346_v2 = vsel %vm8411_vm8, %v5609_v41, %v1343_v18  ;;  %v5619_v7 = vunpack.i.h.bf16 %v6777_v30  ;;  %v5618_v8 = vunpack.i.l.bf16 %v6777_v30  ;;  %vm8413_vm8 = vcmask 1031168  }
 0x15e   : > { %v1260_v28 = vsel %vm8413_vm8, %v5618_v8, %v5619_v7 }
 0x163   : > { %v5602_v22 = vpop.permute.xlu0 %5601  ;;  %v1360_v60 = vpop.permute.xlu2 %1359 }
 0x164   : > { %v1297_v19 = vpop.permute.xlu1 %1296  ;;  %v5604_v47 = vunpack.i.h.bf16 %v5602_v22  ;;  %v5603_v48 = vunpack.i.l.bf16 %v5602_v22 }
 0x166   : > { %v1299_v62 = vsel %vm8422_vm12, %v5603_v48, %v5604_v47  ;;  %v1300_v1 = vsel %vm8422_vm12, %v5604_v47, %v1297_v19  ;;  %v1372_v19 = vsel %vm8439_vm13, %v1346_v2, %v1352_v6 }
 0x167   : > { %v1303_v13 = vsel %vm6790_vm9, %v1299_v62, 0.0  ;;  %v1304_v15 = vsel %vm6794_vm10, %v1300_v1, 0.0 }
 0x16b   : > { %v5612_v34 = vpop.permute.xlu0 %5611 }
 0x16c   : > { %v6771_v23 = vpop.permute.xlu1 %1270  ;;  %v5614_v54 = vunpack.i.h.bf16 %v5612_v34  ;;  %v5613_v55 = vunpack.i.l.bf16 %v5612_v34  ;;  %v1243_v34 = vsel %vm6790_vm9, %v6741_v5, 0.0 }
 0x16e   : > { %v1273_v10 = vsel %vm8412_vm14, %v5613_v55, %v5614_v54  ;;  %v1274_v17 = vsel %vm8412_vm14, %v5614_v54, %v6771_v23  ;;  %vm8420_vm14 = vcmask 1039360  }
 0x16f   : > { %v1277_v25 = vsel %vm6790_vm9, %v1273_v10, 0.0  ;;  %v1278_v27 = vsel %vm6794_vm10, %v1274_v17, 0.0 }
 0x170   : > { %v1334_v29 = vrot.slane %v1277_v25, 4 }
 0x173   : > { %v1258_v12 = vpop.permute.xlu0 %1257 }
 0x174   : > { %v5592_v33 = vpop.permute.xlu1 %5591  ;;  %v1261_v26 = vsel %vm8413_vm8, %v5619_v7, %v1258_v12  ;;  %vm1388_vm8 = vcmask 293888  }
 0x175   : > { %v5594_v36 = vunpack.i.h.bf16 %v5592_v33  ;;  %v5593_v37 = vunpack.i.l.bf16 %v5592_v33  ;;  %v1265_v30 = vsel %vm6780_vm6, %v1261_v26, 0.0  ;;  %v1326_v33 = vpop.permute.xlu2 %1325 }
 0x177   : > { %v1312_v45 = vsel %vm8424_vm5, %v5593_v37, %v5594_v36  ;;  %v1313_v46 = vsel %vm8424_vm5, %v5594_v36, %v1310_v16  ;;  %v1335_v36 = vrot.slane %v1278_v27, 4  ;;  %v1264_v37 = vsel %vm6784_vm7, %v1260_v28, 0.0 }
 0x178   : > { %v1316_v49 = vsel %vm6784_vm7, %v1312_v45, 0.0  ;;  %v1317_v50 = vsel %vm6780_vm6, %v1313_v46, 0.0  ;;  %v1369_v45 = vsel %vm8439_vm13, %v1264_v37, %v1334_v29 }
 0x179   : > { %v1379_v51 = vpack.c.bf16 %v1316_v49, %v1316_v49  ;;  %v1380_v52 = vpack.c.bf16 %v1317_v50, %v1317_v50  ;;  %v1370_v5 = vsel %vm8439_vm13, %v1265_v30, %v1335_v36  ;;  %v1381_v49 = vld [vmem:[%s6528_s9] sm:$0x3] }
 0x17b   : > { %v1394_v57 = vsel %vm8414_vm11, %v1379_v51, 0  ;;  %v1397_v58 = vsel %vm8414_vm11, %v1380_v52, 0  ;;  %v1386_v9 = vpop.permute.xlu0 %1385 }
 0x17c   : > { %1404 = vmatpush.bf16.msra.mxu0 %v1394_v57  ;;  %1417 = vmatpush.bf16.msra.mxu1 %v1397_v58  ;;  %v5622_v61 = vpop.permute.xlu1 %5621 }
 0x17d   : > { %v5624_v3 = vunpack.i.h.bf16 %v5622_v61  ;;  %v5623_v4 = vunpack.i.l.bf16 %v5622_v61 }
 0x17f   : > { %v1362_v14 = vsel %vm8423_vm15, %v5623_v4, %v5624_v3  ;;  %v1363_v16 = vsel %vm8423_vm15, %v5624_v3, %v1360_v60 }
 0x180   : > { %v1373_v18 = vsel %vm8439_vm13, %v1303_v13, %v1362_v14  ;;  %v1374_v20 = vsel %vm8439_vm13, %v1304_v15, %v1363_v16 }
 0x181   : > { %v1377_v21 = vpack.c.bf16 %v1373_v18, %v1371_v11  ;;  %v1378_v22 = vpack.c.bf16 %v1374_v20, %v1372_v19 }
 0x183   : > { %1405 = vmatpush.bf16.msra.mxu0 %v1377_v21  ;;  %1418 = vmatpush.bf16.msra.mxu1 %v1378_v22 }
 0x184   : > { %v5627_v23 = vpop.permute.xlu1 %5626 }
 0x185   : > { %v5629_v31 = vunpack.i.h.bf16 %v5627_v23  ;;  %v5628_v32 = vunpack.i.l.bf16 %v5627_v23 }
 0x187   : > { %v1328_v39 = vsel %vm8420_vm14, %v5628_v32, %v5629_v31  ;;  %v1329_v41 = vsel %vm8420_vm14, %v5629_v31, %v1326_v33 }
 0x188   : > { %v1367_v44 = vsel %vm8439_vm13, %v1243_v34, %v1328_v39  ;;  %v1368_v46 = vsel %vm8439_vm13, %v1244_v40, %v1329_v41  ;;  %v1570_v41 = vld [vmem:[%s6543_s21] sm:$0xf] }
 0x189   : > { %v1375_v47 = vpack.c.bf16 %v1369_v45, %v1367_v44  ;;  %v1376_v48 = vpack.c.bf16 %v1370_v5, %v1368_v46 }
 0x18b   : > { %1406 = vmatpush.bf16.msra.mxu0 %v1375_v47  ;;  %1419 = vmatpush.bf16.msra.mxu1 %v1376_v48 }
 0x18e   : > { %4977 = vmatmul.msk.bf16.vlgmr.msra.gmra.mxu0 %vm1388_vm8, %v1381_v49  ;;  %4978 = vmatmul.msk.bf16.vlgmr.msra.gmra.mxu1 %vm1388_vm8, %v1381_v49 }
 0x20b   : > { %v1408_v50 = vpop.f32.mrf.mxu0  ;;  %v1421_v51 = vpop.f32.mrf.mxu1 }
 0x20c   : > { %v1409_v52 = vadd.f32 %v1408_v50, %v1386_v9  ;;  %v1422_v53 = vadd.f32 %v1421_v51, %v1386_v9 }
 0x20e   : > { %v1425_v54 = vmax.f32 %v1409_v52, 0.0  ;;  %v1426_v55 = vmax.f32 %v1422_v53, 0.0 }
 0x210   : > { %1431 = vrot.lane.b32.xlu1 %v1425_v54, %s8418_s28  ;;  %1433 = vrot.lane.b32.xlu2 %v1426_v55, %s8418_s28 }
 0x213   : > { %v1410_v56 = vpop.f32.mrf.mxu0  ;;  %v1423_v57 = vpop.f32.mrf.mxu1 }
 0x26a   : > { %v1434_v58 = vpop.permute.xlu2 %1433 }
 0x26b   : > { %1441 = vst.msk [vmem:[#allocation2 + $0x10] sm:$0xf] %vm1185_vm0, %v1434_v58 }
 0x272   : > { %v1446_v59 = vld [vmem:[#allocation2 + $0x10] sm:$0xf] }
 0x273   : > { %1614 = vst.msk [vmem:[#allocation2 + $0x10] sm:$0xf] %vm1187_vm1, %v6495_v0  ;;  %1490 = vrot.lane.b32.xlu0 %v1446_v59, %s8431_s10  ;;  %1478 = vrot.lane.b32.xlu1 %v1446_v59, %s8433_s2  ;;  %v1512_v6 = vrot.slane %v1446_v59, 4  ;;  %vm8509_vm1 = vcmask 908288  }
 0x274   : > { %1502 = vrot.lane.b32.xlu2 %v1446_v59, %s8428_s7 }
 0x27b   : > { %1466 = vrot.lane.b32.xlu0 %v1446_v59, %s8437_s11 }
 0x27c   : > { %1533 = vrot.lane.b32.xlu2 %v1446_v59, %s8443_s1 }
 0x282   : > { %v1432_v60 = vpop.permute.xlu1 %1431 }
 0x283   : > { %v1435_v61 = vsel %vm8442_vm3, %v1432_v60, %v1434_v58  ;;  %1439 = vst.msk [vmem:[#allocation2] sm:$0xf] %vm1202_vm2, %v1432_v60 }
 0x284   : > { %1440 = vst [vmem:[#allocation2 + $0x8] sm:$0xf] %v1435_v61 }
 0x28a   : > { %v6866_v62 = vld [vmem:[#allocation2] sm:$0xf] }
 0x28b   : > { %1613 = vst.msk [vmem:[#allocation2] sm:$0xf] %vm1185_vm0, %v6495_v0  ;;  %v6870_v63 = vld [vmem:[#allocation2 + $0x8] sm:$0xf]  ;;  %v1510_v2 = vrot.slane %v6866_v62, 4 }
 0x28c   : > { %v5641_v1 = vpack.i.bf16 %v6870_v63, %v6866_v62  ;;  %v1511_v3 = vrot.slane %v6870_v63, 4 }
 0x28e   : > { %5642 = vrot.lane.b32.xlu2 %v5641_v1, %s8431_s10  ;;  %5637 = vrot.lane.b32.xlu0 %v5641_v1, %s8433_s2  ;;  %v5661_v4 = vpack.i.bf16 %v1511_v3, %v1510_v2 }
 0x28f   : > { %5632 = vrot.lane.b32.xlu1 %v5641_v1, %s8428_s7 }
 0x296   : > { %5652 = vrot.lane.b32.xlu2 %v5641_v1, %s8437_s11  ;;  %5662 = vrot.lane.b32.xlu0 %v5661_v4, %s8416_s16 }
 0x297   : > { %5647 = vrot.lane.b32.xlu1 %v5641_v1, %s8443_s1 }
 0x29e   : > { %1454 = vrot.lane.b32.xlu2 %v1446_v59, %s8460_s15  ;;  %5667 = vrot.lane.b32.xlu0 %v5661_v4, %s8451_s18 }
 0x29f   : > { %5657 = vrot.lane.b32.xlu1 %v5641_v1, %s8460_s15  ;;  %v1444_v1 = vsel %vm6790_vm9, %v6866_v62, 0.0 }
 0x2a6   : > { %1573 = vperm.xlu2 %5671, %v1570_v41  }
 0x2a7   : > { %1549 = vrot.lane.b32.xlu1 %v1512_v6, %s8416_s16 }
 0x2af   : > { %1517 = vrot.lane.b32.xlu1 %v1512_v6, %s8451_s18 }
 0x2ce   : > { %v1503_v7 = vpop.permute.xlu2 %1502 }
 0x2d6   : > { %v6889_v10 = vpop.permute.xlu2 %1533 }
 0x2e5   : > { %v6887_v8 = vpop.permute.xlu0 %1490  ;;  %v1479_v12 = vpop.permute.xlu1 %1478 }
 0x2e8   : > { %v5643_v13 = vpop.permute.xlu2 %5642 }
 0x2e9   : > { %v5645_v20 = vunpack.i.h.bf16 %v5643_v13  ;;  %v5644_v21 = vunpack.i.l.bf16 %v5643_v13 }
 0x2eb   : > { %v1492_v36 = vsel %vm8422_vm12, %v5644_v21, %v5645_v20 }
 0x2ec   : > { %v1496_v47 = vsel %vm6790_vm9, %v1492_v36, 0.0 }
 0x2ed   : > { %v6891_v11 = vpop.permute.xlu0 %1466 }
 0x2f0   : > { %v5653_v30 = vpop.permute.xlu2 %5652 }
 0x2f1   : > { %v5655_v44 = vunpack.i.h.bf16 %v5653_v30  ;;  %v5654_v45 = vunpack.i.l.bf16 %v5653_v30  ;;  %v1445_v30 = vsel %vm6794_vm10, %v6870_v63, 0.0 }
 0x300   : > { %v5638_v14 = vpop.permute.xlu0 %5637 }
 0x301   : > { %v5640_v15 = vunpack.i.h.bf16 %v5638_v14  ;;  %v5639_v16 = vunpack.i.l.bf16 %v5638_v14  ;;  %v5633_v17 = vpop.permute.xlu1 %5632 }
 0x302   : > { %v5635_v18 = vunpack.i.h.bf16 %v5633_v17  ;;  %v5634_v19 = vunpack.i.l.bf16 %v5633_v17 }
 0x303   : > { %v1480_v26 = vsel %vm8421_vm4, %v5639_v16, %v5640_v15  ;;  %v1481_v61 = vsel %vm8421_vm4, %v5640_v15, %v1479_v12  ;;  %v1493_v15 = vsel %vm8422_vm12, %v5645_v20, %v6887_v8  ;;  %v1455_v8 = vpop.permute.xlu2 %1454 }
 0x304   : > { %v1504_v22 = vsel %vm8424_vm5, %v5634_v19, %v5635_v18  ;;  %v1505_v25 = vsel %vm8424_vm5, %v5635_v18, %v1503_v7  ;;  %v1484_v34 = vsel %vm6784_vm7, %v1480_v26, 0.0  ;;  %v1485_v14 = vsel %vm6780_vm6, %v1481_v61, 0.0  ;;  %v1569_v18 = vld [vmem:[%s6538_s17] sm:$0x3] }
 0x305   : > { %v1508_v27 = vsel %vm6784_vm7, %v1504_v22, 0.0  ;;  %v1509_v23 = vsel %vm6780_vm6, %v1505_v25, 0.0  ;;  %v1541_v48 = vrot.slane %v1484_v34, 4  ;;  %v1542_v17 = vrot.slane %v1485_v14, 4 }
 0x306   : > { %v1567_v28 = vpack.c.bf16 %v1508_v27, %v1508_v27  ;;  %v1568_v29 = vpack.c.bf16 %v1509_v23, %v1509_v23  ;;  %v1497_v21 = vsel %vm6794_vm10, %v1493_v15, 0.0 }
 0x308   : > { %v1580_v31 = vsel %vm8414_vm11, %v1567_v28, 0  ;;  %v1583_v32 = vsel %vm8414_vm11, %v1568_v29, 0  ;;  %v5663_v33 = vpop.permute.xlu0 %5662  ;;  %vm8510_vm11 = vcmask 916480  }
 0x309   : > { %v5648_v37 = vpop.permute.xlu1 %5647  ;;  %1590 = vmatpush.bf16.msra.mxu2 %v1580_v31  ;;  %1603 = vmatpush.bf16.msra.mxu3 %v1583_v32  ;;  %v5665_v39 = vunpack.i.h.bf16 %v5663_v33  ;;  %v5664_v40 = vunpack.i.l.bf16 %v5663_v33  ;;  %v1468_v52 = vsel %vm8510_vm11, %v5654_v45, %v5655_v44  ;;  %vm8511_vm11 = vcmask 1031168  }
 0x30a   : > { %v5650_v46 = vunpack.i.h.bf16 %v5648_v37  ;;  %v5649_v5 = vunpack.i.l.bf16 %v5648_v37  ;;  %v1472_v58 = vsel %vm6790_vm9, %v1468_v52, 0.0 }
 0x30b   : > { %v1551_v49 = vsel %vm8423_vm15, %v5664_v40, %v5665_v39  ;;  %v1525_v4 = vrot.slane %v1472_v58, 4  ;;  %v1574_v34 = vpop.permute.xlu2 %1573 }
 0x30c   : > { %v1535_v9 = vsel %vm8509_vm1, %v5649_v5, %v5650_v46  ;;  %v1561_v50 = vsel %vm8439_vm13, %v1496_v47, %v1551_v49  ;;  %v1536_v62 = vsel %vm8509_vm1, %v5650_v46, %v6889_v10  ;;  %vm8513_vm1 = vcmask 1031168  }
 0x30d   : > { %v1559_v51 = vsel %vm8439_vm13, %v1535_v9, %v1541_v48  ;;  %v1560_v25 = vsel %vm8439_vm13, %v1536_v62, %v1542_v17 }
 0x30e   : > { %v1565_v53 = vpack.c.bf16 %v1561_v50, %v1559_v51 }
 0x310   : > { %1591 = vmatpush.bf16.msra.mxu2 %v1565_v53  ;;  %v5668_v54 = vpop.permute.xlu0 %5667 }
 0x311   : > { %v5658_v55 = vpop.permute.xlu1 %5657  ;;  %v5670_v56 = vunpack.i.h.bf16 %v5668_v54  ;;  %v5669_v57 = vunpack.i.l.bf16 %v5668_v54 }
 0x312   : > { %v5660_v59 = vunpack.i.h.bf16 %v5658_v55  ;;  %v5659_v60 = vunpack.i.l.bf16 %v5658_v55  ;;  %v1756_v55 = vld [vmem:[%s6553_s29] sm:$0xff] }
 0x313   : > { %v1519_v2 = vsel %vm8420_vm14, %v5669_v57, %v5670_v56 }
 0x314   : > { %v1456_v3 = vsel %vm8511_vm11, %v5659_v60, %v5660_v59  ;;  %v1555_v6 = vsel %vm8439_vm13, %v1444_v1, %v1519_v2  ;;  %vm8512_vm11 = vcmask 916480   ;;  %v1457_v10 = vsel %vm8513_vm1, %v5660_v59, %v1455_v8 }
 0x315   : > { %v1460_v7 = vsel %vm6784_vm7, %v1456_v3, 0.0  ;;  %v1469_v22 = vsel %vm8512_vm11, %v5655_v44, %v6891_v11  ;;  %v1461_v23 = vsel %vm6780_vm6, %v1457_v10, 0.0  ;;  %vm8516_vm11 = vcmask 908288  }
 0x316   : > { %v1557_v13 = vsel %vm8439_vm13, %v1460_v7, %v1525_v4  ;;  %v1473_v27 = vsel %vm6794_vm10, %v1469_v22, 0.0  ;;  %vm8517_vm1 = vmmov %vm8516_vm11 }
 0x317   : > { %v1563_v12 = vpack.c.bf16 %v1557_v13, %v1555_v6  ;;  %v1526_v29 = vrot.slane %v1473_v27, 4 }
 0x319   : > { %v1550_v16 = vpop.permute.xlu1 %1549  ;;  %1592 = vmatpush.bf16.msra.mxu2 %v1563_v12  ;;  %v1558_v32 = vsel %vm8439_vm13, %v1461_v23, %v1526_v29 }
 0x31a   : > { %v1552_v19 = vsel %vm8423_vm15, %v5665_v39, %v1550_v16 }
 0x31b   : > { %v1562_v26 = vsel %vm8439_vm13, %v1497_v21, %v1552_v19 }
 0x31c   : > { %v1566_v20 = vpack.c.bf16 %v1562_v26, %v1560_v25  ;;  %4979 = vmatmul.msk.bf16.vlgmr.msra.gmra.mxu2 %vm1388_vm8, %v1569_v18 }
 0x31e   : > { %1604 = vmatpush.bf16.msra.mxu3 %v1566_v20 }
 0x321   : > { %v1518_v28 = vpop.permute.xlu1 %1517 }
 0x322   : > { %v1520_v11 = vsel %vm8420_vm14, %v5670_v56, %v1518_v28 }
 0x323   : > { %v1556_v31 = vsel %vm8439_vm13, %v1445_v30, %v1520_v11 }
 0x324   : > { %v1564_v33 = vpack.c.bf16 %v1558_v32, %v1556_v31 }
 0x326   : > { %1605 = vmatpush.bf16.msra.mxu3 %v1564_v33 }
 0x329   : > { %4980 = vmatmul.msk.bf16.vlgmr.msra.gmra.mxu3 %vm1388_vm8, %v1569_v18 }
 0x39f   : > { %v1594_v36 = vpop.f32.mrf.mxu2 }
 0x3a0   : > { %v1595_v37 = vadd.f32 %v1594_v36, %v1574_v34 }
 0x3a2   : > { %v1611_v39 = vmax.f32 %v1595_v37, 0.0 }
 0x3a4   : > { %1617 = vrot.lane.b32.xlu0 %v1611_v39, %s8418_s28 }
 0x3a7   : > { %v1596_v40 = vpop.f32.mrf.mxu2 }
 0x3ac   : > { %v1607_v41 = vpop.f32.mrf.mxu3 }
 0x3ad   : > { %v1608_v44 = vadd.f32 %v1607_v41, %v1574_v34 }
 0x3af   : > { %v1612_v45 = vmax.f32 %v1608_v44, 0.0 }
 0x3b1   : > { %1619 = vrot.lane.b32.xlu1 %v1612_v45, %s8418_s28 }
 0x3b4   : > { %v1609_v63 = vpop.f32.mrf.mxu3 }
 0x416   : > { %v1618_v46 = vpop.permute.xlu0 %1617 }
 0x417   : > { %1625 = vst.msk [vmem:[#allocation2] sm:$0xf] %vm1202_vm2, %v1618_v46 }
 0x41e   : > { %v6955_v5 = vld [vmem:[#allocation2] sm:$0xf] }
 0x41f   : > { %1797 = vst.msk [vmem:[#allocation2] sm:$0xff] %vm8442_vm3, %v6495_v0  ;;  %v1696_v51 = vrot.slane %v6955_v5, 4 }
 0x423   : > { %v1620_v47 = vpop.permute.xlu1 %1619 }
 0x424   : > { %v1621_v48 = vsel %vm8442_vm3, %v1618_v46, %v1620_v47  ;;  %1627 = vst.msk [vmem:[#allocation2 + $0x10] sm:$0xf] %vm1185_vm0, %v1620_v47  ;;  %vm8514_vm0 = vcmask 1041408  }
 0x425   : > { %1626 = vst [vmem:[#allocation2 + $0x8] sm:$0xf] %v1621_v48  ;;  %vm8515_vm2 = vmmov %vm8514_vm0 }
 0x42b   : > { %v1632_v49 = vld [vmem:[#allocation2 + $0x10] sm:$0xf] }
 0x42c   : > { %1676 = vrot.lane.b32.xlu1 %v1632_v49, %s8431_s10  ;;  %1664 = vrot.lane.b32.xlu2 %v1632_v49, %s8433_s2  ;;  %v6964_v9 = vld [vmem:[#allocation2 + $0x8] sm:$0xf]  ;;  %v1698_v54 = vrot.slane %v1632_v49, 4 }
 0x42d   : > { %1688 = vrot.lane.b32.xlu0 %v1632_v49, %s8428_s7  ;;  %v5672_v50 = vpack.i.bf16 %v6964_v9, %v6955_v5  ;;  %v1697_v52 = vrot.slane %v6964_v9, 4 }
 0x42f   : > { %v5702_v53 = vpack.i.bf16 %v1697_v52, %v1696_v51 }
 0x434   : > { %1652 = vrot.lane.b32.xlu1 %v1632_v49, %s8437_s11  ;;  %5673 = vrot.lane.b32.xlu2 %v5672_v50, %s8428_s7  ;;  %s8445_s7 = smov 5  }
 0x435   : > { %1719 = vrot.lane.b32.xlu0 %v1632_v49, %s8443_s1 }
 0x43c   : > { %5678 = vrot.lane.b32.xlu1 %v5672_v50, %s8433_s2  ;;  %5688 = vrot.lane.b32.xlu2 %v5672_v50, %s8443_s1 }
 0x43d   : > { %5683 = vrot.lane.b32.xlu0 %v5672_v50, %s8431_s10  ;;  %s8534_s10 = sld [smem:[#allocation7_spill]] }
 0x444   : > { %5698 = vrot.lane.b32.xlu2 %v5672_v50, %s8460_s15  ;;  %5703 = vrot.lane.b32.xlu1 %v5702_v53, %s8416_s16 }
 0x445   : > { %5693 = vrot.lane.b32.xlu0 %v5672_v50, %s8437_s11 }
 0x44c   : > { %1735 = vrot.lane.b32.xlu2 %v1698_v54, %s8416_s16  ;;  %5708 = vrot.lane.b32.xlu1 %v5702_v53, %s8451_s18 }
 0x44d   : > { %1640 = vrot.lane.b32.xlu0 %v1632_v49, %s8460_s15 }
 0x454   : > { %1703 = vrot.lane.b32.xlu2 %v1698_v54, %s8451_s18 }
 0x455   : > { %1759 = vperm.xlu0 %5630, %v1756_v55  }
 0x486   : > { %v1665_v56 = vpop.permute.xlu2 %1664 }
 0x48e   : > { %v5674_v57 = vpop.permute.xlu2 %5673 }
 0x48f   : > { %v5676_v58 = vunpack.i.h.bf16 %v5674_v57  ;;  %v5675_v59 = vunpack.i.l.bf16 %v5674_v57 }
 0x491   : > { %v1690_v60 = vsel %vm8424_vm5, %v5675_v59, %v5676_v58 }
 0x492   : > { %v1694_v61 = vsel %vm6784_vm7, %v1690_v60, 0.0 }
 0x493   : > { %v1753_v1 = vpack.c.bf16 %v1694_v61, %v1694_v61 }
 0x495   : > { %v1766_v2 = vsel %vm8514_vm0, %v1753_v1, 0  ;;  %vm8518_vm0 = vcmask 916480  }
 0x496   : > { %1776 = vmatpush.bf16.msrb.mxu0 %v1766_v2  ;;  %v5689_v13 = vpop.permute.xlu2 %5688 }
 0x497   : > { %v5691_v20 = vunpack.i.h.bf16 %v5689_v13  ;;  %v5690_v10 = vunpack.i.l.bf16 %v5689_v13  ;;  %v1631_v13 = vsel %vm6794_vm10, %v6964_v9, 0.0 }
 0x499   : > { %v1721_v34 = vsel %vm8516_vm11, %v5690_v10, %v5691_v20  ;;  %vm8520_vm11 = vcmask 1031168  }
 0x49e   : > { %v1677_v3 = vpop.permute.xlu1 %1676  ;;  %v5699_v16 = vpop.permute.xlu2 %5698 }
 0x49f   : > { %v1689_v4 = vpop.permute.xlu0 %1688  ;;  %v5701_v31 = vunpack.i.h.bf16 %v5699_v16  ;;  %v5700_v36 = vunpack.i.l.bf16 %v5699_v16 }
 0x4a0   : > { %v1691_v6 = vsel %vm8424_vm5, %v5676_v58, %v1689_v4 }
 0x4a1   : > { %v1695_v7 = vsel %vm6780_vm6, %v1691_v6, 0.0  ;;  %v1642_v60 = vsel %vm8520_vm11, %v5700_v36, %v5701_v31 }
 0x4a2   : > { %v1754_v14 = vpack.c.bf16 %v1695_v7, %v1695_v7  ;;  %v1630_v7 = vsel %vm6790_vm9, %v6955_v5, 0.0 }
 0x4a4   : > { %v1769_v12 = vsel %vm8515_vm2, %v1754_v14, 0  ;;  %vm8519_vm2 = vmmov %vm8518_vm0 }
 0x4a5   : > { %1789 = vmatpush.bf16.msrb.mxu1 %v1769_v12 }
 0x4a6   : > { %v1653_v15 = vpop.permute.xlu1 %1652  ;;  %v1736_v32 = vpop.permute.xlu2 %1735 }
 0x4a7   : > { %v1720_v62 = vpop.permute.xlu0 %1719 }
 0x4a8   : > { %v1722_v37 = vsel %vm8517_vm1, %v5691_v20, %v1720_v62  ;;  %vm8521_vm1 = vmmov %vm8520_vm11  ;;  %vm1935_vm11 = vcmask 671304  }
 0x4ae   : > { %v5679_v17 = vpop.permute.xlu1 %5678  ;;  %v1704_v4 = vpop.permute.xlu2 %1703 }
 0x4af   : > { %v5684_v18 = vpop.permute.xlu0 %5683  ;;  %v5681_v19 = vunpack.i.h.bf16 %v5679_v17  ;;  %v5680_v21 = vunpack.i.l.bf16 %v5679_v17 }
 0x4b0   : > { %v5686_v22 = vunpack.i.h.bf16 %v5684_v18  ;;  %v5685_v25 = vunpack.i.l.bf16 %v5684_v18 }
 0x4b1   : > { %v1667_v26 = vsel %vm8421_vm4, %v5681_v19, %v1665_v56  ;;  %v1666_v8 = vsel %vm8421_vm4, %v5680_v21, %v5681_v19 }
 0x4b2   : > { %v1670_v27 = vsel %vm6784_vm7, %v1666_v8, 0.0  ;;  %v1671_v23 = vsel %vm6780_vm6, %v1667_v26, 0.0  ;;  %v1678_v28 = vsel %vm8422_vm12, %v5685_v25, %v5686_v22  ;;  %v1679_v11 = vsel %vm8422_vm12, %v5686_v22, %v1677_v3  ;;  %v1755_v22 = vld [vmem:[%s6548_s25] sm:$0xf] }
 0x4b3   : > { %v1727_v29 = vrot.slane %v1670_v27, 4  ;;  %v1728_v30 = vrot.slane %v1671_v23, 4  ;;  %v1682_v63 = vsel %vm6790_vm9, %v1678_v28, 0.0  ;;  %v1683_v46 = vsel %vm6794_vm10, %v1679_v11, 0.0 }
 0x4b4   : > { %vm8426_vm12 = vmmov 1  }
 0x4b5   : > { %v1745_v48 = vsel %vm8439_vm13, %v1721_v34, %v1727_v29  ;;  %v1746_v50 = vsel %vm8439_vm13, %v1722_v37, %v1728_v30 }
 0x4b6   : > { %v5704_v33 = vpop.permute.xlu1 %5703 }
 0x4b7   : > { %v5694_v39 = vpop.permute.xlu0 %5693  ;;  %v5706_v40 = vunpack.i.h.bf16 %v5704_v33  ;;  %v5705_v41 = vunpack.i.l.bf16 %v5704_v33 }
 0x4b8   : > { %v5696_v44 = vunpack.i.h.bf16 %v5694_v39  ;;  %v5695_v45 = vunpack.i.l.bf16 %v5694_v39 }
 0x4b9   : > { %v1737_v47 = vsel %vm8423_vm15, %v5705_v41, %v5706_v40  ;;  %v1738_v49 = vsel %vm8423_vm15, %v5706_v40, %v1736_v32 }
 0x4ba   : > { %v1655_v51 = vsel %vm8518_vm0, %v5696_v44, %v1653_v15  ;;  %v1654_v52 = vsel %vm8519_vm2, %v5695_v45, %v5696_v44  ;;  %v1747_v53 = vsel %vm8439_vm13, %v1682_v63, %v1737_v47  ;;  %v1748_v54 = vsel %vm8439_vm13, %v1683_v46, %v1738_v49  ;;  %v1876_v46 = vld [vmem:[%s6698_s20 + $0x78] sm:$0xff]  ;;  %v1891_v49 = vld [vmem:[%s6698_s20 + $0xf0] sm:$0xff] }
 0x4bb   : > { %v1751_v55 = vpack.c.bf16 %v1747_v53, %v1745_v48  ;;  %v1752_v56 = vpack.c.bf16 %v1748_v54, %v1746_v50  ;;  %v1658_v57 = vsel %vm6790_vm9, %v1654_v52, 0.0  ;;  %v1659_v58 = vsel %vm6794_vm10, %v1655_v51, 0.0  ;;  %v1892_v47 = vld [vmem:[%s6698_s20 + $0xf8] sm:$0xff]  ;;  %v1875_v48 = vld [vmem:[%s6698_s20 + $0x70] sm:$0xff]  ;;  %1893 = vmatpush.msrb.mxu2 %v1876_v46  ;;  %v1874_v50 = vld [vmem:[%s6698_s20 + $0x68] sm:$0xff] }
 0x4bc   : > { %v1711_v61 = vrot.slane %v1658_v57, 4  ;;  %v1712_v14 = vrot.slane %v1659_v58, 4  ;;  %v1646_v15 = vsel %vm6784_vm7, %v1642_v60, 0.0  ;;  %vm8425_vm0 = vcmask 277640   ;;  %1913 = vmatpush.msrb.mxu3 %v1892_v47  ;;  %v1890_v51 = vld [vmem:[%s6698_s20 + $0xe8] sm:$0xff]  ;;  %v1873_v52 = vld [vmem:[%s6698_s20 + $0x60] sm:$0xff] }
 0x4bd   : > { %1777 = vmatpush.bf16.msrb.mxu0 %v1751_v55  ;;  %1790 = vmatpush.bf16.msrb.mxu1 %v1752_v56  ;;  %1799 = vst.msk [vmem:[#allocation2 + $0x10] sm:$0xff] %vm8425_vm0, %v6495_v0  ;;  %v1889_v53 = vld [vmem:[%s6698_s20 + $0xe0] sm:$0xff]  ;;  %v1872_v54 = vld [vmem:[%s6698_s20 + $0x58] sm:$0xff]  ;;  %v1871_v56 = vld [vmem:[%s6698_s20 + $0x50] sm:$0xff]  ;;  %vm1933_vm2 = vcmask 72704  }
 0x4be   : > { %v5709_v59 = vpop.permute.xlu1 %5708  ;;  %v1743_v18 = vsel %vm8439_vm13, %v1646_v15, %v1711_v61  ;;  %4235 = vst.msk [vmem:[#allocation2 + $0x28] sm:$0xff] %vm8425_vm0, %v6495_v0  ;;  %1894 = vmatpush.msrb.mxu2 %v1875_v48  ;;  %1914 = vmatpush.msrb.mxu3 %v1891_v49  ;;  %v1888_v55 = vld [vmem:[%s6698_s20 + $0xd8] sm:$0xff]  ;;  %v1887_v57 = vld [vmem:[%s6698_s20 + $0xd0] sm:$0xff]  ;;  %v1870_v58 = vld [vmem:[%s6698_s20 + $0x48] sm:$0xff] }
 0x4bf   : > { %v1641_v1 = vpop.permute.xlu0 %1640  ;;  %v5711_v2 = vunpack.i.h.bf16 %v5709_v59  ;;  %v5710_v3 = vunpack.i.l.bf16 %v5709_v59  ;;  %v1886_v59 = vld [vmem:[%s6698_s20 + $0xc8] sm:$0xff]  ;;  %v1869_v60 = vld [vmem:[%s6698_s20 + $0x40] sm:$0xff]  ;;  %v1880_v15 = vld [vmem:[%s6698_s20 + $0x98] sm:$0xff]  ;;  %2181 = vst.msk [vmem:[#allocation2 + $0x18] sm:$0xff] %vm1933_vm2, %v6495_v0 }
 0x4c0   : > { %v1643_v6 = vsel %vm8521_vm1, %v5701_v31, %v1641_v1  ;;  %1895 = vmatpush.msrb.mxu2 %v1874_v50  ;;  %1915 = vmatpush.msrb.mxu3 %v1890_v51  ;;  %v1885_v61 = vld [vmem:[%s6698_s20 + $0xc0] sm:$0xff]  ;;  %v1868_v1 = vld [vmem:[%s6698_s20 + $0x38] sm:$0xff]  ;;  %2183 = vst.msk [vmem:[#allocation2 + $0x18] sm:$0xff] %vm1935_vm11, %v6495_v0  ;;  %vm1941_vm1 = vcmask 597064  }
 0x4c1   : > { %v1647_v12 = vsel %vm6780_vm6, %v1643_v6, 0.0  ;;  %v1705_v62 = vsel %vm8420_vm14, %v5710_v3, %v5711_v2  ;;  %v1706_v16 = vsel %vm8420_vm14, %v5711_v2, %v1704_v4  ;;  %v1884_v2 = vld [vmem:[%s6698_s20 + $0xb8] sm:$0xff]  ;;  %v1867_v3 = vld [vmem:[%s6698_s20 + $0x30] sm:$0xff]  ;;  %v1866_v6 = vld [vmem:[%s6698_s20 + $0x28] sm:$0xff] }
 0x4c2   : > { %v1741_v17 = vsel %vm8439_vm13, %v1630_v7, %v1705_v62  ;;  %v1742_v5 = vsel %vm8439_vm13, %v1631_v13, %v1706_v16  ;;  %v1744_v19 = vsel %vm8439_vm13, %v1647_v12, %v1712_v14  ;;  %1896 = vmatpush.msrb.mxu2 %v1873_v52  ;;  %1916 = vmatpush.msrb.mxu3 %v1889_v53  ;;  %v1883_v4 = vld [vmem:[%s6698_s20 + $0xb0] sm:$0xff]  ;;  %v1882_v7 = vld [vmem:[%s6698_s20 + $0xa8] sm:$0xff]  ;;  %v1865_v13 = vld [vmem:[%s6698_s20 + $0x20] sm:$0xff] }
 0x4c3   : > { %v1749_v9 = vpack.c.bf16 %v1743_v18, %v1741_v17  ;;  %v1750_v21 = vpack.c.bf16 %v1744_v19, %v1742_v5  ;;  %v1881_v14 = vld [vmem:[%s6698_s20 + $0xa0] sm:$0xff]  ;;  %v1864_v12 = vld [vmem:[%s6698_s20 + $0x18] sm:$0xff]  ;;  %v1863_v62 = vld [vmem:[%s6698_s20 + $0x10] sm:$0xff] }
 0x4c4   : > { %1897 = vmatpush.msrb.mxu2 %v1872_v54  ;;  %1917 = vmatpush.msrb.mxu3 %v1888_v55  ;;  %v1879_v16 = vld [vmem:[%s6698_s20 + $0x90] sm:$0xff]  ;;  %v1862_v17 = vld [vmem:[%s6698_s20 + $0x8] sm:$0xff]  ;;  %v1861_v5 = vld [vmem:[%s6698_s20] sm:$0xff] }
 0x4c5   : > { %1778 = vmatpush.bf16.msrb.mxu0 %v1749_v9  ;;  %1791 = vmatpush.bf16.msrb.mxu1 %v1750_v21  ;;  %v1878_v18 = vld [vmem:[%s6698_s20 + $0x88] sm:$0xff]  ;;  %v1877_v19 = vld [vmem:[%s6698_s20 + $0x80] sm:$0xff] }
 0x4c6   : > { %1898 = vmatpush.msrb.mxu2 %v1871_v56  ;;  %1918 = vmatpush.msrb.mxu3 %v1887_v57 }
 0x4c7   : > { %v1760_v25 = vpop.permute.xlu0 %1759 }
 0x4c8   : > { %4981 = vmatmul.msk.bf16.vlgmr.msrb.gmra.mxu0 %vm1388_vm8, %v1755_v22  ;;  %4982 = vmatmul.msk.bf16.vlgmr.msrb.gmra.mxu1 %vm1388_vm8, %v1755_v22  ;;  %vm8441_vm8 = vcmask 1047688  }
 0x4c9   : > { %1899 = vmatpush.msrb.mxu2 %v1870_v58  ;;  %1919 = vmatpush.msrb.mxu3 %v1886_v59 }
 0x4cb   : > { %1900 = vmatpush.msrb.mxu2 %v1869_v60  ;;  %1920 = vmatpush.msrb.mxu3 %v1885_v61 }
 0x4cd   : > { %1901 = vmatpush.msrb.mxu2 %v1868_v1  ;;  %1921 = vmatpush.msrb.mxu3 %v1884_v2 }
 0x4cf   : > { %1902 = vmatpush.msrb.mxu2 %v1867_v3  ;;  %1922 = vmatpush.msrb.mxu3 %v1883_v4  ;;  %v1998_v3 = vld [vmem:[%s8529_s3] sm:$0xf]  ;;  %s8551_s3 = smov 120  }
 0x4d1   : > { %1903 = vmatpush.msrb.mxu2 %v1866_v6  ;;  %1923 = vmatpush.msrb.mxu3 %v1882_v7 }
 0x4d3   : > { %1904 = vmatpush.msrb.mxu2 %v1865_v13  ;;  %1924 = vmatpush.msrb.mxu3 %v1881_v14 }
 0x4d5   : > { %1905 = vmatpush.msrb.mxu2 %v1864_v12  ;;  %1925 = vmatpush.msrb.mxu3 %v1880_v15 }
 0x4d7   : > { %1906 = vmatpush.msrb.mxu2 %v1863_v62  ;;  %1926 = vmatpush.msrb.mxu3 %v1879_v16 }
 0x4d9   : > { %1907 = vmatpush.msrb.mxu2 %v1862_v17  ;;  %1927 = vmatpush.msrb.mxu3 %v1878_v18 }
 0x4db   : > { %1908 = vmatpush.msrb.mxu2 %v1861_v5  ;;  %1928 = vmatpush.msrb.mxu3 %v1877_v19  ;;  %v2071_v5 = vld [vmem:[%s6573_s19] sm:$0xff] }
 0x545   : > { %v1780_v26 = vpop.f32.mrf.mxu0  ;;  %v1793_v8 = vpop.f32.mrf.mxu1 }
 0x546   : > { %v7043_v20 = vadd.f32 %v1780_v26, %v1760_v25  ;;  %v7045_v10 = vadd.f32 %v1793_v8, %v1760_v25 }
 0x548   : > { %1802 = vrot.lane.b32.xlu1 %v7043_v20, %s8418_s28  ;;  %1804 = vrot.lane.b32.xlu2 %v7045_v10, %s8418_s28  ;;  %s8462_s28 = smov 120  }
 0x54d   : > { %v1782_v27 = vpop.f32.mrf.mxu0  ;;  %v1795_v23 = vpop.f32.mrf.mxu1 }
 0x5a2   : > { %v1805_v28 = vpop.permute.xlu2 %1804 }
 0x5a3   : > { %1813 = vst.msk [vmem:[#allocation2 + $0x10] sm:$0xff] %vm8442_vm3, %v1805_v28 }
 0x5a4   : > { %4251 = vst.msk [vmem:[#allocation2 + $0x28] sm:$0xff] %vm8442_vm3, %v1805_v28 }
 0x5aa   : > { %v1816_v29 = vld [vmem:[#allocation2 + $0x10] sm:$0xff] }
 0x5ab   : > { %1836 = vrot.lane.b32.xlu1 %v1816_v29, %s8451_s18  ;;  %4234 = vst.msk [vmem:[#allocation2 + $0x10] sm:$0xff] %vm8425_vm0, %v6495_v0 }
 0x5ba   : > { %v7056_v11 = vpop.permute.xlu1 %1802 }
 0x5bb   : > { %v1806_v30 = vsel %vm8442_vm3, %v7056_v11, %v1805_v28  ;;  %1811 = vst.msk [vmem:[#allocation2] sm:$0xff] %vm8441_vm8, %v7056_v11 }
 0x5bc   : > { %4250 = vst [vmem:[#allocation2 + $0x20] sm:$0xff] %v1806_v30 }
 0x5c2   : > { %v1814_v31 = vld [vmem:[#allocation2] sm:$0xff] }
 0x5c3   : > { %v5717_v32 = vpack.i.bf16 %v1806_v30, %v1814_v31  ;;  %1934 = vst.msk [vmem:[#allocation2] sm:$0xff] %vm1933_vm2, %v6495_v0 }
 0x5c4   : > { %1936 = vst.msk [vmem:[#allocation2] sm:$0xff] %vm1935_vm11, %v6495_v0 }
 0x5c5   : > { %5718 = vrot.lane.b32.xlu2 %v5717_v32, %s8433_s2  ;;  %5713 = vrot.lane.b32.xlu0 %v5717_v32, %s8451_s18 }
 0x5cd   : > { %1824 = vrot.lane.b32.xlu0 %v1816_v29, %s8433_s2 }
 0x61d   : > { %v1837_v33 = vpop.permute.xlu1 %1836 }
 0x61e   : > { %v1845_v34 = vmax.f32 %v1816_v29, %v1837_v33 }
 0x61f   : > { %v5719_v9 = vpop.permute.xlu2 %5718 }
 0x620   : > { %1853 = vrot.lane.b32.xlu2 %v1845_v34, %s8416_s16  ;;  %v5721_v21 = vunpack.i.h.bf16 %v5719_v9  ;;  %v5720_v22 = vunpack.i.l.bf16 %v5719_v9 }
 0x622   : > { %v1826_v8 = vsel %vm8421_vm4, %v5720_v22, %v5721_v21 }
 0x637   : > { %v5714_v36 = vpop.permute.xlu0 %5713 }
 0x638   : > { %v5716_v37 = vunpack.i.h.bf16 %v5714_v36  ;;  %v5715_v39 = vunpack.i.l.bf16 %v5714_v36 }
 0x63a   : > { %v1838_v40 = vsel %vm8420_vm14, %v5715_v39, %v5716_v37  ;;  %v1839_v41 = vsel %vm8420_vm14, %v5716_v37, %v1837_v33 }
 0x63b   : > { %v1843_v44 = vmax.f32 %v1814_v31, %v1838_v40  ;;  %v1844_v45 = vmax.f32 %v1806_v30, %v1839_v41  ;;  %v1830_v31 = vmax.f32 %v7043_v20, %v1826_v8  ;;  %v1999_v41 = vld [vmem:[%s8522_s8] sm:$0xff]  ;;  %s8568_s8 = sld [smem:[#allocation18_spill]] }
 0x63d   : > { %v5722_v63 = vpack.i.bf16 %v1844_v45, %v1843_v44  ;;  %v1947_v44 = vand.u32 7, %v6773_v24 }
 0x63f   : > { %5723 = vrot.lane.b32.xlu1 %v5722_v63, %s8416_s16  ;;  %v1825_v25 = vpop.permute.xlu0 %1824  ;;  %s8447_s16 = smov 118   ;;  %vm7131_vm14 = vcmp.ne.s32.totalorder %v1947_v44, 7 }
 0x640   : > { %v1827_v26 = vsel %vm8421_vm4, %v5721_v21, %v1825_v25  ;;  %vm7137_vm4 = vcmp.ne.s32.totalorder %v1947_v44, 0  ;;  %vm7154_vm5 = vmpackc.low %vm7131_vm14, %vm8426_vm12 }
 0x641   : > { %v1831_v29 = vmax.f32 %v7045_v10, %v1827_v26  ;;  %vm7164_vm0 = vmpackc.low %vm7137_vm4, %vm7131_vm14 }
 0x67a   : > { %v1854_v30 = vpop.permute.xlu2 %1853 }
 0x6b1   : > { %v5724_v27 = vpop.permute.xlu1 %5723 }
 0x6b2   : > { %v5726_v23 = vunpack.i.h.bf16 %v5724_v27  ;;  %v5725_v28 = vunpack.i.l.bf16 %v5724_v27 }
 0x6b4   : > { %v1855_v32 = vsel %vm8423_vm15, %v5725_v28, %v5726_v23  ;;  %v1856_v33 = vsel %vm8423_vm15, %v5726_v23, %v1854_v30  ;;  %vm7145_vm15 = vmpackc.low %vm8426_vm12, %vm7137_vm4  ;;  %vm8430_vm12 = vcmask 588800   ;;  %v2070_v30 = vld [vmem:[%s6568_s14] sm:$0xf] }
 0x6b5   : > { %v1859_v34 = vmax.f32 %v1830_v31, %v1855_v32  ;;  %v1860_v36 = vmax.f32 %v1831_v29, %v1856_v33 }
 0x6b7   : > { %1909 = vmatmul.f32.vlgmr.msrb.gmra.mxu2 %v1859_v34  ;;  %1929 = vmatmul.f32.vlgmr.msrb.gmra.mxu3 %v1860_v36 }
 0x73a   : > { %v1910_v20 = vpop.f32.mrf.mxu2  ;;  %v1930_v10 = vpop.f32.mrf.mxu3 }
 0x73b   : > { %v1931_v37 = vadd.f32 %v1930_v10, %v1910_v20 }
 0x73d   : > { %1938 = vrot.lane.b32.xlu0 %v1931_v37, %s8435_s26  ;;  %v2143_v37 = vld [vmem:[%s6583_s30] sm:$0xff] }
 0x7af   : > { %v1939_v39 = vpop.permute.xlu0 %1938 }
 0x7b0   : > { %1942 = vst.msk [vmem:[#allocation2] sm:$0xff] %vm1941_vm1, %v1939_v39  ;;  %v2144_v39 = vld [vmem:[%s6583_s30 + $0x8] sm:$0xff] }
 0x7b7   : > { %v1957_v40 = vld [vmem:[#allocation2] sm:$0xff] }
 0x7b8   : > { %2026 = vst.msk [vmem:[#allocation2] sm:$0xff] %vm1933_vm2, %v6495_v0  ;;  %1990 = vrot.lane.b32.xlu0 %v1957_v40, %s8443_s1  ;;  %1976 = vrot.lane.b32.xlu2 %v1957_v40, %s8437_s11 }
 0x7b9   : > { %2027 = vst.msk [vmem:[#allocation2] sm:$0xff] %vm1935_vm11, %v6495_v0  ;;  %1980 = vrot.lane.b32.xlu1 %v1957_v40, %s8433_s2 }
 0x7c0   : > { %1964 = vrot.lane.b32.xlu0 %v1957_v40, %s8460_s15  ;;  %1987 = vrot.lane.b32.xlu2 %v1957_v40, %s8455_s0 }
 0x7c1   : > { %1972 = vrot.lane.b32.xlu1 %v1957_v40, %s8447_s16 }
 0x7c8   : > { %2002 = vperm.xlu0 %5630, %v1999_v41   ;;  %1984 = vrot.lane.b32.xlu2 %v1957_v40, %s8451_s18 }
 0x7c9   : > { %1968 = vrot.lane.b32.xlu1 %v1957_v40, %s8462_s28 }
 0x812   : > { %v1977_v45 = vpop.permute.xlu2 %1976 }
 0x81a   : > { %v1988_v54 = vpop.permute.xlu2 %1987 }
 0x822   : > { %v1985_v1 = vpop.permute.xlu2 %1984 }
 0x823   : > { %v4993_v2 = vpack.c.bf16 %v1985_v1, %v1957_v40 }
 0x82a   : > { %v1991_v50 = vpop.permute.xlu0 %1990 }
 0x82b   : > { %v1981_v46 = vpop.permute.xlu1 %1980  ;;  %v4984_v53 = vpack.c.bf16 %v1991_v50, %v1977_v45 }
 0x82c   : > { %v1983_v47 = vsel %vm7131_vm14, %v1981_v46, 0.0 }
 0x82d   : > { %v1997_v48 = vpack.c.bf16 %v1983_v47, %v1983_v47 }
 0x82f   : > { %v2010_v51 = vsel %vm8439_vm13, %v1997_v48, 0 }
 0x830   : > { %2015 = vmatpush.bf16.msra.mxu0 %v2010_v51 }
 0x832   : > { %v1965_v58 = vpop.permute.xlu0 %1964 }
 0x833   : > { %v1973_v55 = vpop.permute.xlu1 %1972 }
 0x834   : > { %4985 = vmatpush.bf16.msk.msra.mxu0 %vm7145_vm15, %v4984_v53  ;;  %v4987_v57 = vpack.c.bf16 %v1973_v55, %v1988_v54 }
 0x838   : > { %4988 = vmatpush.bf16.msk.msra.mxu0 %vm7154_vm5, %v4987_v57 }
 0x83a   : > { %v2003_v4 = vpop.permute.xlu0 %2002 }
 0x83b   : > { %v1969_v59 = vpop.permute.xlu1 %1968 }
 0x83c   : > { %v4990_v61 = vpack.c.bf16 %v1969_v59, %v1965_v58 }
 0x83e   : > { %4991 = vmatpush.bf16.msk.msra.mxu0 %vm7164_vm0, %v4990_v61  ;;  %v5492_v61 = vld [vmem:[%s6578_s24] sm:$0xff] }
 0x842   : > { %4994 = vmatpush.bf16.msk.msra.mxu0 %vm7145_vm15, %v4993_v2 }
 0x845   : > { %4995 = vmatmul.msk.bf16.vlgmr.msra.gmra.mxu0 %vm8430_vm12, %v1998_v3 }
 0x8c2   : > { %v2021_v6 = vpop.f32.mrf.mxu0 }
 0x8c3   : > { %v2022_v7 = vadd.f32 %v2021_v6, %v2003_v4 }
 0x8c5   : > { %v2025_v13 = vmax.f32 %v2022_v7, 0.0 }
 0x8c7   : > { %2029 = vrot.lane.b32.xlu1 %v2025_v13, %s8435_s26 }
 0x8ca   : > { %v2023_v14 = vpop.f32.mrf.mxu0 }
 0x939   : > { %v2030_v12 = vpop.permute.xlu1 %2029 }
 0x93a   : > { %2032 = vst.msk [vmem:[#allocation2] sm:$0xff] %vm1941_vm1, %v2030_v12 }
 0x941   : > { %v2033_v15 = vld [vmem:[#allocation2] sm:$0xff] }
 0x942   : > { %2097 = vst.msk [vmem:[#allocation2] sm:$0xff] %vm1933_vm2, %v6495_v0  ;;  %2062 = vrot.lane.b32.xlu1 %v2033_v15, %s8443_s1  ;;  %2048 = vrot.lane.b32.xlu0 %v2033_v15, %s8437_s11 }
 0x943   : > { %2098 = vst.msk [vmem:[#allocation2] sm:$0xff] %vm1935_vm11, %v6495_v0  ;;  %2052 = vrot.lane.b32.xlu2 %v2033_v15, %s8433_s2 }
 0x94a   : > { %2036 = vrot.lane.b32.xlu1 %v2033_v15, %s8460_s15  ;;  %2059 = vrot.lane.b32.xlu0 %v2033_v15, %s8455_s0 }
 0x94b   : > { %2044 = vrot.lane.b32.xlu2 %v2033_v15, %s8447_s16 }
 0x952   : > { %2056 = vrot.lane.b32.xlu0 %v2033_v15, %s8451_s18  ;;  %2074 = vperm.xlu1 %5727, %v2071_v5   ;;  %v2228_v5 = vld [vmem:[%s6703_s27 + $0x20] sm:$0xff] }
 0x953   : > { %2040 = vrot.lane.b32.xlu2 %v2033_v15, %s8462_s28 }
 0x99d   : > { %v2053_v62 = vpop.permute.xlu2 %2052 }
 0x99e   : > { %v2055_v16 = vsel %vm7131_vm14, %v2053_v62, 0.0 }
 0x99f   : > { %v2069_v17 = vpack.c.bf16 %v2055_v16, %v2055_v16  ;;  %v2231_v16 = vld [vmem:[%s6703_s27 + $0x38] sm:$0xff] }
 0x9a0   : > { %2247 = vmatpush.msra.mxu3 %v2231_v16 }
 0x9a1   : > { %v2081_v18 = vsel %vm8439_vm13, %v2069_v17, 0  ;;  %v2230_v17 = vld [vmem:[%s6703_s27 + $0x30] sm:$0xff] }
 0x9a2   : > { %2086 = vmatpush.bf16.msra.mxu1 %v2081_v18  ;;  %v2229_v18 = vld [vmem:[%s6703_s27 + $0x28] sm:$0xff]  ;;  %2248 = vmatpush.msra.mxu3 %v2230_v17 }
 0x9a4   : > { %2249 = vmatpush.msra.mxu3 %v2229_v18 }
 0x9a5   : > { %v2045_v22 = vpop.permute.xlu2 %2044 }
 0x9a6   : > { %2250 = vmatpush.msra.mxu3 %v2228_v5 }
 0x9ad   : > { %v2041_v27 = vpop.permute.xlu2 %2040 }
 0x9b4   : > { %v2063_v19 = vpop.permute.xlu1 %2062  ;;  %v2049_v9 = vpop.permute.xlu0 %2048 }
 0x9b5   : > { %v4997_v21 = vpack.c.bf16 %v2063_v19, %v2049_v9  ;;  %v2227_v19 = vld [vmem:[%s6703_s27 + $0x18] sm:$0xff]  ;;  %v2226_v9 = vld [vmem:[%s6703_s27 + $0x10] sm:$0xff] }
 0x9b6   : > { %2251 = vmatpush.msra.mxu3 %v2227_v19 }
 0x9b7   : > { %4998 = vmatpush.bf16.msk.msra.mxu1 %vm7145_vm15, %v4997_v21  ;;  %v2225_v21 = vld [vmem:[%s6703_s27 + $0x8] sm:$0xff] }
 0x9b8   : > { %2252 = vmatpush.msra.mxu3 %v2226_v9 }
 0x9ba   : > { %2253 = vmatpush.msra.mxu3 %v2225_v21 }
 0x9bc   : > { %v2060_v25 = vpop.permute.xlu0 %2059  ;;  %v2037_v8 = vpop.permute.xlu1 %2036 }
 0x9bd   : > { %v5000_v26 = vpack.c.bf16 %v2045_v22, %v2060_v25  ;;  %v5003_v23 = vpack.c.bf16 %v2041_v27, %v2037_v8  ;;  %v2224_v22 = vld [vmem:[%s6703_s27] sm:$0xff] }
 0x9be   : > { %2254 = vmatpush.msra.mxu3 %v2224_v22 }
 0x9bf   : > { %5001 = vmatpush.bf16.msk.msra.mxu1 %vm7154_vm5, %v5000_v26 }
 0x9c3   : > { %5004 = vmatpush.bf16.msk.msra.mxu1 %vm7164_vm0, %v5003_v23 }
 0x9c4   : > { %v2057_v28 = vpop.permute.xlu0 %2056  ;;  %v2075_v31 = vpop.permute.xlu1 %2074 }
 0x9c5   : > { %v5006_v29 = vpack.c.bf16 %v2057_v28, %v2033_v15 }
 0x9c7   : > { %5007 = vmatpush.bf16.msk.msra.mxu1 %vm7145_vm15, %v5006_v29 }
 0x9ca   : > { %5008 = vmatmul.msk.bf16.vlgmr.msra.gmra.mxu1 %vm8430_vm12, %v2070_v30 }
 0xa47   : > { %v2092_v32 = vpop.f32.mrf.mxu1 }
 0xa48   : > { %v2093_v33 = vadd.f32 %v2092_v32, %v2075_v31 }
 0xa4a   : > { %v2096_v34 = vmax.f32 %v2093_v33, 0.0 }
 0xa4c   : > { %2100 = vrot.lane.b32.xlu2 %v2096_v34, %s8435_s26 }
 0xa4f   : > { %v2094_v36 = vpop.f32.mrf.mxu1 }
 0xaa6   : > { %v2101_v20 = vpop.permute.xlu2 %2100 }
 0xaa7   : > { %2103 = vst.msk [vmem:[#allocation2] sm:$0xff] %vm1941_vm1, %v2101_v20 }
 0xaae   : > { %v2104_v10 = vld [vmem:[#allocation2] sm:$0xff] }
 0xaaf   : > { %2180 = vst.msk [vmem:[#allocation2] sm:$0xff] %vm1933_vm2, %v6495_v0  ;;  %2133 = vrot.lane.b32.xlu2 %v2104_v10, %s8443_s1  ;;  %2119 = vrot.lane.b32.xlu1 %v2104_v10, %s8437_s11  ;;  %s8449_s11 = smov 123  }
 0xab0   : > { %2182 = vst.msk [vmem:[#allocation2] sm:$0xff] %vm1935_vm11, %v6495_v0  ;;  %2123 = vrot.lane.b32.xlu0 %v2104_v10, %s8433_s2  ;;  %s8458_s2 = smov 122  }
 0xab7   : > { %2107 = vrot.lane.b32.xlu2 %v2104_v10, %s8460_s15  ;;  %2130 = vrot.lane.b32.xlu1 %v2104_v10, %s8455_s0 }
 0xab8   : > { %2115 = vrot.lane.b32.xlu0 %v2104_v10, %s8447_s16 }
 0xabf   : > { %2147 = vperm.xlu2 %5671, %v2143_v37   ;;  %2127 = vrot.lane.b32.xlu1 %v2104_v10, %s8451_s18 }
 0xac0   : > { %2111 = vrot.lane.b32.xlu0 %v2104_v10, %s8462_s28 }
 0xac8   : > { %2152 = vperm.xlu0 %5630, %v2144_v39   ;;  %v2376_v39 = vld [vmem:[%s8534_s10 + $0x10] sm:$0xff] }
 0xb09   : > { %v2134_v47 = vpop.permute.xlu2 %2133 }
 0xb11   : > { %v2108_v54 = vpop.permute.xlu2 %2107 }
 0xb19   : > { %v2148_v1 = vpop.permute.xlu2 %2147 }
 0xb21   : > { %v2120_v40 = vpop.permute.xlu1 %2119 }
 0xb22   : > { %v2124_v41 = vpop.permute.xlu0 %2123  ;;  %v5014_v48 = vpack.c.bf16 %v2134_v47, %v2120_v40  ;;  %v2375_v40 = vld [vmem:[%s8534_s10 + $0x8] sm:$0xff] }
 0xb23   : > { %v2126_v44 = vsel %vm7131_vm14, %v2124_v41, 0.0  ;;  %v2374_v41 = vld [vmem:[%s8534_s10] sm:$0xff] }
 0xb24   : > { %v2140_v45 = vpack.c.bf16 %v2126_v44, %v2126_v44  ;;  %v2377_v44 = vld [vmem:[%s8534_s10 + $0x18] sm:$0xff] }
 0xb26   : > { %v2164_v46 = vsel %vm8439_vm13, %v2140_v45, 0 }
 0xb27   : > { %2169 = vmatpush.bf16.msra.mxu2 %v2164_v46 }
 0xb29   : > { %v2131_v50 = vpop.permute.xlu1 %2130 }
 0xb2a   : > { %v2116_v51 = vpop.permute.xlu0 %2115 }
 0xb2b   : > { %5015 = vmatpush.bf16.msk.msra.mxu2 %vm7145_vm15, %v5014_v48  ;;  %v5017_v53 = vpack.c.bf16 %v2116_v51, %v2131_v50  ;;  %v2283_v50 = vand.u32 3, %v6773_v24 }
 0xb2d   : > { %vm2291_vm13 = vcmp.ne.s32.totalorder %v2283_v50, 0  ;;  %vm2292_vm8 = vcmp.ne.s32.totalorder %v2283_v50, 3 }
 0xb2e   : > { %vm7312_vm3 = vmpackc.low %vm2292_vm8, %vm2292_vm8  ;;  %vm2701_vm8 = vcmask 261120  }
 0xb2f   : > { %5018 = vmatpush.bf16.msk.msra.mxu2 %vm7154_vm5, %v5017_v53  ;;  %vm8440_vm5 = vcmask 523264  }
 0xb31   : > { %v2128_v58 = vpop.permute.xlu1 %2127 }
 0xb32   : > { %v2112_v55 = vpop.permute.xlu0 %2111  ;;  %v5023_v59 = vpack.c.bf16 %v2128_v58, %v2104_v10 }
 0xb33   : > { %v5020_v57 = vpack.c.bf16 %v2112_v55, %v2108_v54 }
 0xb35   : > { %5021 = vmatpush.bf16.msk.msra.mxu2 %vm7164_vm0, %v5020_v57  ;;  %vm2265_vm0 = vcmask 212136  }
 0xb39   : > { %5024 = vmatpush.bf16.msk.msra.mxu2 %vm7145_vm15, %v5023_v59  ;;  %vm2262_vm15 = vcmask 39936  }
 0xb3a   : > { %v2153_v56 = vpop.permute.xlu0 %2152  ;;  %2467 = vst.msk [vmem:[#allocation2 + $0x30] sm:$0xff] %vm2262_vm15, %v6495_v0 }
 0xb3b   : > { %2468 = vst.msk [vmem:[#allocation2 + $0x48] sm:$0xff] %vm2262_vm15, %v6495_v0 }
 0xb3c   : > { %5025 = vmatmul.msk.bf16.vlgmr.msra.gmra.mxu2 %vm8430_vm12, %v5492_v61  ;;  %2471 = vst.msk [vmem:[#allocation2 + $0x30] sm:$0xff] %vm2265_vm0, %v6495_v0  ;;  %vm2276_vm12 = vcmask 171048  }
 0xb3d   : > { %2472 = vst.msk [vmem:[#allocation2 + $0x48] sm:$0xff] %vm2265_vm0, %v6495_v0 }
 0xbbf   : > { %v2175_v2 = vpop.f32.mrf.mxu2 }
 0xbc0   : > { %v2176_v3 = vadd.f32 %v2175_v2, %v2148_v1  ;;  %v3626_v2 = vld [vmem:[%s8499_s4 + $0x8] sm:$0xff] }
 0xbc2   : > { %2186 = vrot.lane.b32.xlu1 %v2176_v3, %s8435_s26 }
 0xbc7   : > { %v2177_v4 = vpop.f32.mrf.mxu2 }
 0xbc8   : > { %v2178_v6 = vadd.f32 %v2177_v4, %v2153_v56 }
 0xbca   : > { %2188 = vrot.lane.b32.xlu2 %v2178_v6, %s8435_s26  ;;  %s8453_s26 = smov 124  }
 0xc24   : > { %v7233_v7 = vpop.permute.xlu2 %2188 }
 0xc25   : > { %2193 = vst.msk [vmem:[#allocation2 + $0x18] sm:$0xff] %vm1941_vm1, %v7233_v7 }
 0xc2c   : > { %v2195_v52 = vld [vmem:[#allocation2 + $0x18] sm:$0xff] }
 0xc2d   : > { %2208 = vrot.lane.b32.xlu1 %v2195_v52, %s8451_s18  ;;  %2264 = vst.msk [vmem:[#allocation2 + $0x18] sm:$0xff] %vm2262_vm15, %v6495_v0 }
 0xc2e   : > { %2267 = vst.msk [vmem:[#allocation2 + $0x18] sm:$0xff] %vm2265_vm0, %v6495_v0 }
 0xc34   : > { %v7238_v60 = vpop.permute.xlu1 %2186 }
 0xc35   : > { %2192 = vst.msk [vmem:[#allocation2] sm:$0xff] %vm1941_vm1, %v7238_v60  ;;  %2200 = vrot.lane.b32.xlu1 %v2195_v52, %s8447_s16 }
 0xc3c   : > { %v2194_v13 = vld [vmem:[#allocation2] sm:$0xff] }
 0xc3d   : > { %2198 = vrot.lane.b32.xlu2 %v2194_v13, %s8447_s16  ;;  %2206 = vrot.lane.b32.xlu0 %v2194_v13, %s8451_s18  ;;  %2263 = vst.msk [vmem:[#allocation2] sm:$0xff] %vm2262_vm15, %v6495_v0 }
 0xc3e   : > { %2266 = vst.msk [vmem:[#allocation2] sm:$0xff] %vm2265_vm0, %v6495_v0 }
 0xc97   : > { %v2199_v25 = vpop.permute.xlu2 %2198 }
 0xc98   : > { %v2204_v26 = vmax.f32 %v2176_v3, %v2199_v25 }
 0xc9f   : > { %v2209_v14 = vpop.permute.xlu1 %2208 }
 0xca0   : > { %v2213_v12 = vmax.f32 %v2195_v52, %v2209_v14 }
 0xca2   : > { %2218 = vrot.lane.b32.xlu2 %v2213_v12, %s8443_s1 }
 0xca7   : > { %v2201_v23 = vpop.permute.xlu1 %2200 }
 0xca8   : > { %v2205_v29 = vmax.f32 %v2178_v6, %v2201_v23 }
 0xcaf   : > { %v2207_v15 = vpop.permute.xlu0 %2206 }
 0xcb0   : > { %v2212_v62 = vmax.f32 %v2194_v13, %v2207_v15 }
 0xcb2   : > { %2216 = vrot.lane.b32.xlu0 %v2212_v62, %s8443_s1  ;;  %s8539_s1 = sld [smem:[#allocation6_spill]] }
 0xcb8   : > { %v5493_v19 = vld [vmem:[%s8539_s1 + $0x4] sm:$0xf]  ;;  %v5032_v9 = vld [vmem:[%s8539_s1 + $0x8] sm:$0xf0]  ;;  %v5030_v23 = vld [vmem:[%s8539_s1] sm:$0xf] }
 0xcfc   : > { %v2219_v28 = vpop.permute.xlu2 %2218 }
 0xcfd   : > { %v2223_v30 = vmax.f32 %v2205_v29, %v2219_v28  ;;  %v5494_v28 = vld [vmem:[%s8539_s1 + $0x4] sm:$0xf0] }
 0xcfe   : > { %v5031_v29 = vor.u32 %v5494_v28, %v5030_v23 }
 0xd24   : > { %v2217_v8 = vpop.permute.xlu0 %2216 }
 0xd25   : > { %v2222_v27 = vmax.f32 %v2204_v26, %v2217_v8  ;;  %v5035_v8 = vor.u32 %v5493_v19, %v5032_v9 }
 0xd27   : > { %5026 = vmatmul.msk.f32.vlgmr.msra.gmra.mxu3 %vm8440_vm5, %v2222_v27 }
 0xd2f   : > { %5027 = vmatmul.msk.f32.gmra.mxu3 %vm8440_vm5, %v2223_v30  ;;  %vm7306_vm5 = vmpackc.low %vm2291_vm13, %vm2291_vm13  ;;  %vm2416_vm13 = vcmask 130048   ;;  %v5495_v30 = vld [vmem:[%s8539_s1 + $0x14] sm:$0xf] }
 0xdaa   : > { %v2256_v31 = vpop.f32.mrf.mxu3 }
 0xdab   : > { %2270 = vrot.lane.b32.xlu0 %v2256_v31, %s8445_s7  ;;  %v5040_v31 = vld [vmem:[%s8539_s1 + $0x18] sm:$0xf0] }
 0xdb2   : > { %v2259_v32 = vpop.f32.mrf.mxu3 }
 0xdb3   : > { %2272 = vrot.lane.b32.xlu1 %v2259_v32, %s8445_s7  ;;  %v5043_v32 = vor.u32 %v5495_v30, %v5040_v31 }
 0xe1d   : > { %v2271_v33 = vpop.permute.xlu0 %2270 }
 0xe1e   : > { %2277 = vst.msk [vmem:[#allocation2] sm:$0xff] %vm2276_vm12, %v2271_v33  ;;  %v5038_v33 = vld [vmem:[%s8539_s1 + $0x10] sm:$0xf] }
 0xe25   : > { %v7276_v34 = vld [vmem:[#allocation2] sm:$0xff]  ;;  %v2273_v36 = vpop.permute.xlu1 %2272 }
 0xe26   : > { %2465 = vst.msk [vmem:[#allocation2] sm:$0xff] %vm2262_vm15, %v6495_v0 }
 0xe27   : > { %2469 = vst.msk [vmem:[#allocation2] sm:$0xff] %vm2265_vm0, %v6495_v0 }
 0xe28   : > { %2278 = vst.msk [vmem:[#allocation2 + $0x18] sm:$0xff] %vm2276_vm12, %v2273_v36  ;;  %v5496_v36 = vld [vmem:[%s8539_s1 + $0x14] sm:$0xf0]  ;;  %s8546_s1 = smov 118  }
 0xe2f   : > { %v7283_v20 = vld [vmem:[#allocation2 + $0x18] sm:$0xff] }
 0xe30   : > { %2466 = vst.msk [vmem:[#allocation2 + $0x18] sm:$0xff] %vm2262_vm15, %v6495_v0  ;;  %v5738_v10 = vpack.i.bf16 %v7283_v20, %v7276_v34  ;;  %v5057_v37 = vpack.c.bf16 %v7283_v20, %v7276_v34 }
 0xe31   : > { %2470 = vst.msk [vmem:[#allocation2 + $0x18] sm:$0xff] %vm2265_vm0, %v6495_v0 }
 0xe32   : > { %5739 = vrot.lane.b32.xlu1 %v5738_v10, %s8458_s2  ;;  %5734 = vrot.lane.b32.xlu0 %v5738_v10, %s8462_s28 }
 0xe33   : > { %5729 = vrot.lane.b32.xlu2 %v5738_v10, %s8455_s0 }
 0xe3a   : > { %5754 = vrot.lane.b32.xlu1 %v5738_v10, %s8460_s15  ;;  %5749 = vrot.lane.b32.xlu0 %v5738_v10, %s8453_s26 }
 0xe3b   : > { %5744 = vrot.lane.b32.xlu2 %v5738_v10, %s8449_s11 }
 0xe42   : > { %2390 = vperm.xlu1 %5727, %v2376_v39   ;;  %5764 = vrot.lane.b32.xlu0 %v5738_v10, %s8447_s16 }
 0xe43   : > { %5759 = vrot.lane.b32.xlu2 %v5738_v10, %s8451_s18  ;;  %v5039_v10 = vor.u32 %v5496_v36, %v5038_v33 }
 0xe4a   : > { %2385 = vperm.xlu1 %5727, %v2375_v40   ;;  %2380 = vperm.xlu0 %5630, %v2374_v41  }
 0xe4b   : > { %2395 = vperm.xlu2 %5671, %v2377_v44  }
 0xe8d   : > { %v5730_v45 = vpop.permute.xlu2 %5729 }
 0xe8e   : > { %v5732_v46 = vunpack.i.h.bf16 %v5730_v45  ;;  %v5731_v47 = vunpack.i.l.bf16 %v5730_v45 }
 0xe90   : > { %v2368_v48 = vpack.c.bf16 %v5732_v46, %v5731_v47 }
 0xe92   : > { %2423 = vmatpush.bf16.msrb.mxu0 %v2368_v48 }
 0xe95   : > { %v5745_v1 = vpop.permute.xlu2 %5744 }
 0xe96   : > { %v5747_v24 = vunpack.i.h.bf16 %v5745_v1  ;;  %v5746_v3 = vunpack.i.l.bf16 %v5745_v1 }
 0xe98   : > { %v2365_v13 = vpack.c.bf16 %v5747_v24, %v5746_v3 }
 0xe9d   : > { %v5760_v16 = vpop.permute.xlu2 %5759 }
 0xe9e   : > { %v5762_v21 = vunpack.i.h.bf16 %v5760_v16  ;;  %v5761_v22 = vunpack.i.l.bf16 %v5760_v16 }
 0xea0   : > { %v2362_v27 = vpack.c.bf16 %v5762_v21, %v5761_v22 }
 0xea4   : > { %v5740_v51 = vpop.permute.xlu1 %5739  ;;  %v5735_v53 = vpop.permute.xlu0 %5734 }
 0xea5   : > { %v5737_v54 = vunpack.i.h.bf16 %v5735_v53  ;;  %v5736_v55 = vunpack.i.l.bf16 %v5735_v53  ;;  %v5742_v58 = vunpack.i.h.bf16 %v5740_v51  ;;  %v5741_v59 = vunpack.i.l.bf16 %v5740_v51 }
 0xea7   : > { %v5045_v61 = vpack.c.bf16 %v5737_v54, %v5736_v55  ;;  %v5048_v56 = vpack.c.bf16 %v5742_v58, %v5741_v59  ;;  %v2396_v58 = vpop.permute.xlu2 %2395 }
 0xea9   : > { %5046 = vmatpush.bf16.msk.msrb.mxu0 %vm7306_vm5, %v5045_v61 }
 0xeac   : > { %v5750_v4 = vpop.permute.xlu0 %5749  ;;  %v5755_v14 = vpop.permute.xlu1 %5754 }
 0xead   : > { %5049 = vmatpush.bf16.msk.msrb.mxu0 %vm7312_vm3, %v5048_v56  ;;  %v5752_v6 = vunpack.i.h.bf16 %v5750_v4  ;;  %v5751_v52 = vunpack.i.l.bf16 %v5750_v4  ;;  %v5757_v12 = vunpack.i.h.bf16 %v5755_v14  ;;  %v5756_v15 = vunpack.i.l.bf16 %v5755_v14 }
 0xeaf   : > { %v5051_v62 = vpack.c.bf16 %v5752_v6, %v5751_v52  ;;  %v5054_v25 = vpack.c.bf16 %v5757_v12, %v5756_v15 }
 0xeb1   : > { %2426 = vmatpush.bf16.msrb.mxu0 %v2365_v13 }
 0xeb4   : > { %v5765_v17 = vpop.permute.xlu0 %5764 }
 0xeb5   : > { %v5767_v18 = vunpack.i.h.bf16 %v5765_v17  ;;  %v5766_v5 = vunpack.i.l.bf16 %v5765_v17  ;;  %5052 = vmatpush.bf16.msk.msrb.mxu0 %vm7306_vm5, %v5051_v62 }
 0xeb7   : > { %v5060_v26 = vpack.c.bf16 %v5767_v18, %v5766_v5 }
 0xeb9   : > { %5055 = vmatpush.bf16.msk.msrb.mxu0 %vm7312_vm3, %v5054_v25  ;;  %5061 = vmatpush.bf16.msk.msrb.mxu1 %vm7312_vm3, %v5060_v26 }
 0xebc   : > { %5062 = vmatmul.msk.bf16.vlgmr.msrb.gmra.mxu1 %vm2416_vm13, %v5035_v8  ;;  %v2381_v40 = vpop.permute.xlu0 %2380 }
 0xebd   : > { %2429 = vmatpush.bf16.msrb.mxu0 %v2362_v27 }
 0xec1   : > { %5058 = vmatpush.bf16.msk.msrb.mxu0 %vm7306_vm5, %v5057_v37  ;;  %v2391_v37 = vpop.permute.xlu1 %2390 }
 0xec4   : > { %2431 = vmatmul.bf16.vlgmr.msrb.gmra.mxu0 %v5031_v29 }
 0xec9   : > { %v2386_v53 = vpop.permute.xlu1 %2385 }
 0xecc   : > { %5063 = vmatmul.msk.bf16.gmra.mxu1 %vm2416_vm13, %v5043_v32 }
 0xed4   : > { %2436 = vmatmul.bf16.gmra.mxu0 %v5039_v10 }
 0xf39   : > { %v2451_v39 = vpop.f32.mrf.mxu1 }
 0xf41   : > { %v2432_v41 = vpop.f32.mrf.mxu0  ;;  %v2453_v34 = vpop.f32.mrf.mxu1 }
 0xf42   : > { %v2433_v44 = vadd.f32 %v2432_v41, %v2381_v40 }
 0xf44   : > { %v2452_v45 = vadd.f32 %v2451_v39, %v2433_v44 }
 0xf46   : > { %v2461_v46 = vmax.f32 %v2452_v45, 0.0 }
 0xf48   : > { %2477 = vrot.lane.b32.xlu1 %v2461_v46, %s8445_s7 }
 0xf49   : > { %v2434_v20 = vpop.f32.mrf.mxu0  ;;  %v2456_v47 = vpop.f32.mrf.mxu1 }
 0xf4a   : > { %v2435_v54 = vadd.f32 %v2434_v20, %v2386_v53 }
 0xf4c   : > { %v2454_v61 = vadd.f32 %v2453_v34, %v2435_v54 }
 0xf4e   : > { %v2462_v56 = vmax.f32 %v2454_v61, 0.0 }
 0xf51   : > { %v2437_v48 = vpop.f32.mrf.mxu0  ;;  %v2458_v24 = vpop.f32.mrf.mxu1 }
 0xf52   : > { %v2438_v50 = vadd.f32 %v2437_v48, %v2391_v37 }
 0xf54   : > { %v2457_v51 = vadd.f32 %v2456_v47, %v2438_v50 }
 0xf56   : > { %v2463_v55 = vmax.f32 %v2457_v51, 0.0 }
 0xf58   : > { %2481 = vrot.lane.b32.xlu2 %v2463_v55, %s8445_s7 }
 0xf59   : > { %v2439_v59 = vpop.f32.mrf.mxu0 }
 0xf5a   : > { %v2440_v1 = vadd.f32 %v2439_v59, %v2396_v58 }
 0xf5c   : > { %v2459_v3 = vadd.f32 %v2458_v24, %v2440_v1 }
 0xf5e   : > { %v2464_v4 = vmax.f32 %v2459_v3, 0.0 }
 0xf60   : > { %2483 = vrot.lane.b32.xlu0 %v2464_v4, %s8445_s7  ;;  %2479 = vrot.lane.b32.xlu2 %v2462_v56, %s8445_s7  ;;  %s8540_s7 = sld [smem:[#allocation9_spill]] }
 0xf66   : > { %v2649_v9 = vld [vmem:[%s8540_s7 + $0x10] sm:$0xff]  ;;  %v2650_v21 = vld [vmem:[%s8540_s7 + $0x18] sm:$0xff]  ;;  %v2648_v22 = vld [vmem:[%s8540_s7 + $0x8] sm:$0xff] }
 0xf67   : > { %v2647_v25 = vld [vmem:[%s8540_s7] sm:$0xff]  ;;  %s8553_s7 = smov 122  }
 0xfb2   : > { %v2482_v6 = vpop.permute.xlu2 %2481 }
 0xfb3   : > { %2491 = vst.msk [vmem:[#allocation2 + $0x30] sm:$0xff] %vm2276_vm12, %v2482_v6 }
 0xfba   : > { %v7344_v52 = vld [vmem:[#allocation2 + $0x30] sm:$0xff]  ;;  %v2480_v13 = vpop.permute.xlu2 %2479  ;;  %v2478_v14 = vpop.permute.xlu1 %2477 }
 0xfbb   : > { %2771 = vst.msk [vmem:[#allocation2 + $0x30] sm:$0xff] %vm2262_vm15, %v6495_v0 }
 0xfbc   : > { %2775 = vst.msk [vmem:[#allocation2 + $0x30] sm:$0xff] %vm2265_vm0, %v6495_v0 }
 0xfbd   : > { %2490 = vst.msk [vmem:[#allocation2 + $0x18] sm:$0xff] %vm2276_vm12, %v2480_v13 }
 0xfbe   : > { %2489 = vst.msk [vmem:[#allocation2] sm:$0xff] %vm2276_vm12, %v2478_v14 }
 0xfc4   : > { %v7352_v12 = vld [vmem:[#allocation2 + $0x18] sm:$0xff] }
 0xfc5   : > { %2770 = vst.msk [vmem:[#allocation2 + $0x18] sm:$0xff] %vm2262_vm15, %v6495_v0  ;;  %v7356_v15 = vld [vmem:[#allocation2] sm:$0xff] }
 0xfc6   : > { %2774 = vst.msk [vmem:[#allocation2 + $0x18] sm:$0xff] %vm2265_vm0, %v6495_v0  ;;  %v5778_v62 = vpack.i.bf16 %v7352_v12, %v7356_v15  ;;  %v5104_v16 = vpack.c.bf16 %v7352_v12, %v7356_v15 }
 0xfc7   : > { %2769 = vst.msk [vmem:[#allocation2] sm:$0xff] %vm2262_vm15, %v6495_v0 }
 0xfc8   : > { %2773 = vst.msk [vmem:[#allocation2] sm:$0xff] %vm2265_vm0, %v6495_v0  ;;  %5779 = vrot.lane.b32.xlu2 %v5778_v62, %s8455_s0  ;;  %5769 = vrot.lane.b32.xlu1 %v5778_v62, %s8453_s26 }
 0xfd0   : > { %5774 = vrot.lane.b32.xlu1 %v5778_v62, %s8460_s15 }
 0xfd2   : > { %v2484_v17 = vpop.permute.xlu0 %2483 }
 0xfd3   : > { %2492 = vst.msk [vmem:[#allocation2 + $0x48] sm:$0xff] %vm2276_vm12, %v2484_v17 }
 0xfda   : > { %v7372_v18 = vld [vmem:[#allocation2 + $0x48] sm:$0xff] }
 0xfdb   : > { %2772 = vst.msk [vmem:[#allocation2 + $0x48] sm:$0xff] %vm2262_vm15, %v6495_v0  ;;  %v5783_v5 = vpack.i.bf16 %v7372_v18, %v7344_v52  ;;  %v5101_v19 = vpack.c.bf16 %v7372_v18, %v7344_v52 }
 0xfdc   : > { %2776 = vst.msk [vmem:[#allocation2 + $0x48] sm:$0xff] %vm2265_vm0, %v6495_v0 }
 0xfdd   : > { %5784 = vrot.lane.b32.xlu0 %v5783_v5, %s8453_s26  ;;  %5789 = vrot.lane.b32.xlu2 %v5783_v5, %s8460_s15 }
 0xfde   : > { %5819 = vrot.lane.b32.xlu1 %v5783_v5, %s8451_s18 }
 0xfe5   : > { %5799 = vrot.lane.b32.xlu0 %v5783_v5, %s8455_s0  ;;  %5794 = vrot.lane.b32.xlu2 %v5778_v62, %s8462_s28 }
 0xfe6   : > { %5824 = vrot.lane.b32.xlu1 %v5783_v5, %s8458_s2 }
 0xfed   : > { %5804 = vrot.lane.b32.xlu0 %v5783_v5, %s8462_s28  ;;  %5814 = vrot.lane.b32.xlu2 %v5778_v62, %s8458_s2 }
 0xfee   : > { %5829 = vrot.lane.b32.xlu1 %v5778_v62, %s8447_s16 }
 0xff5   : > { %5809 = vrot.lane.b32.xlu0 %v5778_v62, %s8451_s18  ;;  %5839 = vrot.lane.b32.xlu2 %v5783_v5, %s8449_s11  ;;  %s8543_s18 = sld [smem:[#allocation11_spill]] }
 0xff6   : > { %2663 = vperm.xlu1 %5727, %v2649_v9  }
 0xffd   : > { %5834 = vrot.lane.b32.xlu0 %v5783_v5, %s8447_s16  ;;  %2668 = vperm.xlu2 %5671, %v2650_v21   ;;  %s8541_s16 = sld [smem:[#allocation8_spill]] }
 0xffe   : > { %2658 = vperm.xlu1 %5727, %v2648_v22  }
0x1003   : > { %v5074_v52 = vld [vmem:[%s8541_s16 + $0x8] sm:$0xf]  ;;  %v5499_v18 = vld [vmem:[%s8541_s16 + $0x10] sm:$0xf0]  ;;  %v5497_v12 = vld [vmem:[%s8541_s16 + $0x4] sm:$0xf] }
0x1004   : > { %v5068_v15 = vld [vmem:[%s8541_s16 + $0xc] sm:$0xf0] }
0x1005   : > { %5844 = vrot.lane.b32.xlu0 %v5778_v62, %s8449_s11  ;;  %s8542_s11 = smov 5  }
0x100d   : > { %2653 = vperm.xlu0 %5630, %v2647_v25  }
0x1022   : > { %v5780_v26 = vpop.permute.xlu2 %5779 }
0x1023   : > { %v5782_v46 = vunpack.i.h.bf16 %v5780_v26  ;;  %v5781_v34 = vunpack.i.l.bf16 %v5780_v26 }
0x1025   : > { %v2635_v55 = vpack.c.bf16 %v5782_v46, %v5781_v34 }
0x1037   : > { %v5790_v27 = vpop.permute.xlu2 %5789 }
0x1038   : > { %v5792_v36 = vunpack.i.h.bf16 %v5790_v27  ;;  %v5791_v10 = vunpack.i.l.bf16 %v5790_v27 }
0x103a   : > { %v5770_v8 = vpop.permute.xlu1 %5769  ;;  %v5095_v37 = vpack.c.bf16 %v5792_v36, %v5791_v10  ;;  %v5498_v36 = vld [vmem:[%s8541_s16 + $0x8] sm:$0xf0] }
0x103b   : > { %v5772_v31 = vunpack.i.h.bf16 %v5770_v8  ;;  %v5771_v32 = vunpack.i.l.bf16 %v5770_v8 }
0x103d   : > { %v5092_v39 = vpack.c.bf16 %v5772_v31, %v5771_v32 }
0x103f   : > { %v5795_v40 = vpop.permute.xlu2 %5794 }
0x1040   : > { %v5797_v24 = vunpack.i.h.bf16 %v5795_v40  ;;  %v5796_v3 = vunpack.i.l.bf16 %v5795_v40 }
0x1042   : > { %v5775_v30 = vpop.permute.xlu1 %5774  ;;  %v5110_v13 = vpack.c.bf16 %v5797_v24, %v5796_v3 }
0x1043   : > { %v5777_v47 = vunpack.i.h.bf16 %v5775_v30  ;;  %v5776_v48 = vunpack.i.l.bf16 %v5775_v30 }
0x1045   : > { %v5098_v51 = vpack.c.bf16 %v5777_v47, %v5776_v48  ;;  %v5078_v47 = vld [vmem:[%s8541_s16 + $0x18] sm:$0xf]  ;;  %v5501_v48 = vld [vmem:[%s8541_s16 + $0x20] sm:$0xf0] }
0x1047   : > { %v5815_v1 = vpop.permute.xlu2 %5814 }
0x1048   : > { %v5817_v21 = vunpack.i.h.bf16 %v5815_v1  ;;  %v5816_v22 = vunpack.i.l.bf16 %v5815_v1 }
0x104a   : > { %v5116_v27 = vpack.c.bf16 %v5817_v21, %v5816_v22 }
0x104f   : > { %v5785_v23 = vpop.permute.xlu0 %5784  ;;  %v5840_v8 = vpop.permute.xlu2 %5839 }
0x1050   : > { %v5787_v28 = vunpack.i.h.bf16 %v5785_v23  ;;  %v5786_v29 = vunpack.i.l.bf16 %v5785_v23  ;;  %v5820_v20 = vpop.permute.xlu1 %5819  ;;  %v5842_v23 = vunpack.i.h.bf16 %v5840_v8 }
0x1051   : > { %v5822_v53 = vunpack.i.h.bf16 %v5820_v20  ;;  %v5821_v54 = vunpack.i.l.bf16 %v5820_v20  ;;  %v5075_v20 = vor.u32 %v5499_v18, %v5074_v52 }
0x1052   : > { %v5089_v33 = vpack.c.bf16 %v5787_v28, %v5786_v29  ;;  %v5841_v28 = vunpack.i.l.bf16 %v5840_v8 }
0x1053   : > { %v2624_v4 = vpack.c.bf16 %v5822_v53, %v5821_v54  ;;  %v5502_v53 = vld [vmem:[%s8541_s16 + $0x28] sm:$0xf0] }
0x1054   : > { %5090 = vmatpush.bf16.msk.msrb.mxu3 %vm7306_vm5, %v5089_v33  ;;  %v5066_v33 = vld [vmem:[%s8541_s16] sm:$0xf] }
0x1057   : > { %v5800_v41 = vpop.permute.xlu0 %5799 }
0x1058   : > { %v5802_v44 = vunpack.i.h.bf16 %v5800_v41  ;;  %v5801_v45 = vunpack.i.l.bf16 %v5800_v41  ;;  %5093 = vmatpush.bf16.msk.msrb.mxu3 %vm7306_vm5, %v5092_v39  ;;  %v5825_v6 = vpop.permute.xlu1 %5824  ;;  %v2630_v39 = vpack.c.bf16 %v5842_v23, %v5841_v28  ;;  %v2669_v28 = vpop.permute.xlu2 %2668 }
0x1059   : > { %v5827_v14 = vunpack.i.h.bf16 %v5825_v6  ;;  %v5826_v62 = vunpack.i.l.bf16 %v5825_v6 }
0x105a   : > { %v2636_v50 = vpack.c.bf16 %v5802_v44, %v5801_v45  ;;  %v5067_v44 = vor.u32 %v5498_v36, %v5066_v33 }
0x105b   : > { %v5113_v25 = vpack.c.bf16 %v5827_v14, %v5826_v62 }
0x105c   : > { %5096 = vmatpush.bf16.msk.msrb.mxu3 %vm7312_vm3, %v5095_v37  ;;  %2727 = vmatpush.bf16.msra.mxu1 %v2636_v50  ;;  %v5071_v37 = vor.u32 %v5497_v12, %v5068_v15  ;;  %v5079_v50 = vor.u32 %v5501_v48, %v5078_v47  ;;  %v2954_v48 = vld [vmem:[%s8543_s18 + $0x18] sm:$0xff] }
0x105f   : > { %v5805_v58 = vpop.permute.xlu0 %5804 }
0x1060   : > { %v5807_v59 = vunpack.i.h.bf16 %v5805_v58  ;;  %v5806_v61 = vunpack.i.l.bf16 %v5805_v58  ;;  %5099 = vmatpush.bf16.msk.msrb.mxu3 %vm7312_vm3, %v5098_v51  ;;  %2728 = vmatpush.bf16.msra.mxu1 %v2635_v55  ;;  %v5830_v30 = vpop.permute.xlu1 %5829  ;;  %v5086_v51 = vld [vmem:[%s8541_s16 + $0x20] sm:$0xf]  ;;  %v5500_v55 = vld [vmem:[%s8541_s16 + $0x1c] sm:$0xf]  ;;  %v5080_v58 = vld [vmem:[%s8541_s16 + $0x24] sm:$0xf0] }
0x1061   : > { %v5832_v40 = vunpack.i.h.bf16 %v5830_v30  ;;  %v5831_v41 = vunpack.i.l.bf16 %v5830_v30  ;;  %v5087_v54 = vor.u32 %v5502_v53, %v5086_v51  ;;  %v2951_v51 = vld [vmem:[%s8543_s18] sm:$0xff]  ;;  %v2952_v53 = vld [vmem:[%s8543_s18 + $0x8] sm:$0xff] }
0x1062   : > { %v5107_v56 = vpack.c.bf16 %v5807_v59, %v5806_v61  ;;  %v5083_v59 = vor.u32 %v5500_v55, %v5080_v58 }
0x1064   : > { %2712 = vmatpush.bf16.msrb.mxu3 %v2624_v4  ;;  %5108 = vmatpush.bf16.msk.msra.mxu1 %vm7306_vm5, %v5107_v56 }
0x1067   : > { %v5810_v17 = vpop.permute.xlu0 %5809 }
0x1068   : > { %v5812_v5 = vunpack.i.h.bf16 %v5810_v17  ;;  %v5811_v9 = vunpack.i.l.bf16 %v5810_v17  ;;  %5111 = vmatpush.bf16.msk.msra.mxu1 %vm7306_vm5, %v5110_v13  ;;  %v2664_v62 = vpop.permute.xlu1 %2663 }
0x106a   : > { %v2623_v26 = vpack.c.bf16 %v5812_v5, %v5811_v9 }
0x106c   : > { %2713 = vmatpush.bf16.msrb.mxu3 %v2623_v26  ;;  %5114 = vmatpush.bf16.msk.msra.mxu1 %vm7312_vm3, %v5113_v25 }
0x106f   : > { %v5835_v29 = vpop.permute.xlu0 %5834 }
0x1070   : > { %v5837_v31 = vunpack.i.h.bf16 %v5835_v29  ;;  %v5836_v32 = vunpack.i.l.bf16 %v5835_v29  ;;  %5102 = vmatpush.bf16.msk.msrb.mxu3 %vm7306_vm5, %v5101_v19  ;;  %5117 = vmatpush.bf16.msk.msra.mxu1 %vm7312_vm3, %v5116_v27  ;;  %v5122_v19 = vpack.c.bf16 %v5832_v40, %v5831_v41  ;;  %v2659_v25 = vpop.permute.xlu1 %2658 }
0x1072   : > { %v5119_v10 = vpack.c.bf16 %v5837_v31, %v5836_v32 }
0x1074   : > { %5105 = vmatpush.bf16.msk.msrb.mxu3 %vm7306_vm5, %v5104_v16  ;;  %2733 = vmatpush.bf16.msra.mxu1 %v2630_v39 }
0x1075   : > { %5120 = vmatpush.bf16.msk.msrb.mxu2 %vm7312_vm3, %v5119_v10 }
0x1077   : > { %v5845_v45 = vpop.permute.xlu0 %5844  ;;  %2716 = vmatmul.bf16.vlgmr.msrb.gmra.mxu3 %v5067_v44 }
0x1078   : > { %v5847_v46 = vunpack.i.h.bf16 %v5845_v45  ;;  %v5846_v34 = vunpack.i.l.bf16 %v5845_v45 }
0x1079   : > { %5123 = vmatpush.bf16.msk.msrb.mxu2 %vm7312_vm3, %v5122_v19 }
0x107a   : > { %v2629_v16 = vpack.c.bf16 %v5847_v46, %v5846_v34 }
0x107c   : > { %5124 = vmatmul.msk.bf16.vlgmr.msrb.gmra.mxu2 %vm2701_vm8, %v5075_v20  ;;  %2734 = vmatpush.bf16.msra.mxu1 %v2629_v16 }
0x107f   : > { %2735 = vmatmul.bf16.vlgmr.msra.gmra.mxu1 %v5071_v37  ;;  %v2654_v61 = vpop.permute.xlu0 %2653 }
0x1087   : > { %2721 = vmatmul.bf16.gmra.mxu3 %v5079_v50  ;;  %v2953_v50 = vld [vmem:[%s8543_s18 + $0x10] sm:$0xff] }
0x108c   : > { %5125 = vmatmul.msk.bf16.gmra.mxu2 %vm2701_vm8, %v5087_v54 }
0x108f   : > { %2740 = vmatmul.bf16.gmra.mxu1 %v5083_v59 }
0x10fa   : > { %v2717_v1 = vpop.f32.mrf.mxu3 }
0x10fb   : > { %v2718_v24 = vadd.f32 %v2717_v1, %v2654_v61 }
0x10fc   : > { %v2736_v3 = vpop.f32.mrf.mxu1 }
0x10fd   : > { %v2737_v56 = vadd.f32 %v2736_v3, %v2718_v24 }
0x10ff   : > { %v2755_v4 = vpop.f32.mrf.mxu2 }
0x1100   : > { %v2756_v6 = vadd.f32 %v2755_v4, %v2737_v56 }
0x1102   : > { %v2765_v13 = vmax.f32 %v2756_v6, 0.0  ;;  %v2719_v14 = vpop.f32.mrf.mxu3 }
0x1103   : > { %v2720_v8 = vadd.f32 %v2719_v14, %v2659_v25 }
0x1104   : > { %2781 = vrot.lane.b32.xlu1 %v2765_v13, %s8542_s11  ;;  %v2738_v17 = vpop.f32.mrf.mxu1 }
0x1105   : > { %v2739_v29 = vadd.f32 %v2738_v17, %v2720_v8 }
0x1107   : > { %v2757_v5 = vpop.f32.mrf.mxu2 }
0x1108   : > { %v2758_v10 = vadd.f32 %v2757_v5, %v2739_v29 }
0x110a   : > { %v2722_v9 = vpop.f32.mrf.mxu3  ;;  %v2766_v41 = vmax.f32 %v2758_v10, 0.0 }
0x110b   : > { %v2723_v21 = vadd.f32 %v2722_v9, %v2664_v62 }
0x110c   : > { %v2741_v22 = vpop.f32.mrf.mxu1 }
0x110d   : > { %v2742_v26 = vadd.f32 %v2741_v22, %v2723_v21 }
0x110f   : > { %v2760_v27 = vpop.f32.mrf.mxu2 }
0x1110   : > { %v2761_v23 = vadd.f32 %v2760_v27, %v2742_v26 }
0x1112   : > { %v2767_v30 = vmax.f32 %v2761_v23, 0.0  ;;  %v2724_v31 = vpop.f32.mrf.mxu3 }
0x1113   : > { %v2725_v32 = vadd.f32 %v2724_v31, %v2669_v28 }
0x1114   : > { %2785 = vrot.lane.b32.xlu2 %v2767_v30, %s8542_s11  ;;  %v2743_v33 = vpop.f32.mrf.mxu1 }
0x1115   : > { %v2744_v36 = vadd.f32 %v2743_v33, %v2725_v32 }
0x1117   : > { %v2762_v39 = vpop.f32.mrf.mxu2 }
0x1118   : > { %v2763_v40 = vadd.f32 %v2762_v39, %v2744_v36 }
0x111a   : > { %v2768_v44 = vmax.f32 %v2763_v40, 0.0 }
0x111c   : > { %2787 = vrot.lane.b32.xlu0 %v2768_v44, %s8542_s11  ;;  %2783 = vrot.lane.b32.xlu2 %v2766_v41, %s8542_s11 }
0x116e   : > { %v2786_v52 = vpop.permute.xlu2 %2785 }
0x116f   : > { %2795 = vst.msk [vmem:[#allocation2 + $0x30] sm:$0xff] %vm2276_vm12, %v2786_v52 }
0x1176   : > { %v7448_v18 = vld [vmem:[#allocation2 + $0x30] sm:$0xff]  ;;  %v2784_v19 = vpop.permute.xlu2 %2783  ;;  %v2782_v45 = vpop.permute.xlu1 %2781 }
0x1177   : > { %3074 = vst.msk [vmem:[#allocation2 + $0x30] sm:$0xff] %vm2262_vm15, %v6495_v0 }
0x1178   : > { %3078 = vst.msk [vmem:[#allocation2 + $0x30] sm:$0xff] %vm2265_vm0, %v6495_v0 }
0x1179   : > { %2794 = vst.msk [vmem:[#allocation2 + $0x18] sm:$0xff] %vm2276_vm12, %v2784_v19 }
0x117a   : > { %2793 = vst.msk [vmem:[#allocation2] sm:$0xff] %vm2276_vm12, %v2782_v45 }
0x1180   : > { %v7456_v46 = vld [vmem:[#allocation2 + $0x18] sm:$0xff] }
0x1181   : > { %3073 = vst.msk [vmem:[#allocation2 + $0x18] sm:$0xff] %vm2262_vm15, %v6495_v0  ;;  %v7460_v34 = vld [vmem:[#allocation2] sm:$0xff] }
0x1182   : > { %3077 = vst.msk [vmem:[#allocation2 + $0x18] sm:$0xff] %vm2265_vm0, %v6495_v0  ;;  %v5853_v20 = vpack.i.bf16 %v7456_v46, %v7460_v34  ;;  %v5166_v12 = vpack.c.bf16 %v7456_v46, %v7460_v34 }
0x1183   : > { %3072 = vst.msk [vmem:[#allocation2] sm:$0xff] %vm2262_vm15, %v6495_v0 }
0x1184   : > { %3076 = vst.msk [vmem:[#allocation2] sm:$0xff] %vm2265_vm0, %v6495_v0  ;;  %5854 = vrot.lane.b32.xlu0 %v5853_v20, %s8453_s26  ;;  %5849 = vrot.lane.b32.xlu2 %v5853_v20, %s8455_s0 }
0x118e   : > { %v2788_v15 = vpop.permute.xlu0 %2787 }
0x118f   : > { %2796 = vst.msk [vmem:[#allocation2 + $0x48] sm:$0xff] %vm2276_vm12, %v2788_v15 }
0x1196   : > { %v7475_v16 = vld [vmem:[#allocation2 + $0x48] sm:$0xff] }
0x1197   : > { %3075 = vst.msk [vmem:[#allocation2 + $0x48] sm:$0xff] %vm2262_vm15, %v6495_v0  ;;  %v5868_v37 = vpack.i.bf16 %v7475_v16, %v7448_v18  ;;  %v5163_v47 = vpack.c.bf16 %v7475_v16, %v7448_v18 }
0x1198   : > { %3079 = vst.msk [vmem:[#allocation2 + $0x48] sm:$0xff] %vm2265_vm0, %v6495_v0 }
0x1199   : > { %5869 = vrot.lane.b32.xlu1 %v5868_v37, %s8453_s26  ;;  %5859 = vrot.lane.b32.xlu0 %v5868_v37, %s8455_s0  ;;  %s8544_s26 = smov 127   ;;  %s8545_s0 = smov 123  }
0x119a   : > { %5889 = vrot.lane.b32.xlu2 %v5868_v37, %s8460_s15 }
0x11a1   : > { %5874 = vrot.lane.b32.xlu1 %v5868_v37, %s8462_s28  ;;  %5864 = vrot.lane.b32.xlu0 %v5853_v20, %s8462_s28  ;;  %s8549_s28 = smov 124  }
0x11a2   : > { %5894 = vrot.lane.b32.xlu2 %v5868_v37, %s8458_s2 }
0x11a9   : > { %5879 = vrot.lane.b32.xlu1 %v5853_v20, %s8460_s15  ;;  %5884 = vrot.lane.b32.xlu0 %v5853_v20, %s8458_s2  ;;  %s8547_s2 = sld [smem:[#allocation10_spill]]  ;;  %s8548_s15 = smov 119  }
0x11aa   : > { %5899 = vrot.lane.b32.xlu2 %v5853_v20, %s8544_s26 }
0x11af   : > { %v5506_v18 = vld [vmem:[%s8547_s2 + $0x1c] sm:$0xf]  ;;  %v5142_v16 = vld [vmem:[%s8547_s2 + $0x24] sm:$0xf0] }
0x11b1   : > { %5904 = vrot.lane.b32.xlu1 %v5868_v37, %s8544_s26  ;;  %5909 = vrot.lane.b32.xlu0 %v5868_v37, %s8545_s0 }
0x11b2   : > { %5919 = vrot.lane.b32.xlu2 %v5853_v20, %s8545_s0 }
0x11b9   : > { %5914 = vrot.lane.b32.xlu1 %v5868_v37, %s8546_s1  ;;  %5924 = vrot.lane.b32.xlu0 %v5853_v20, %s8546_s1 }
0x11ba   : > { %2972 = vperm.xlu2 %5671, %v2954_v48  }
0x11c1   : > { %2967 = vperm.xlu1 %5727, %v2953_v50   ;;  %2957 = vperm.xlu0 %5630, %v2951_v51  }
0x11c9   : > { %2962 = vperm.xlu1 %5727, %v2952_v53  }
0x11de   : > { %v5850_v54 = vpop.permute.xlu2 %5849 }
0x11df   : > { %v5852_v4 = vunpack.i.h.bf16 %v5850_v54  ;;  %v5851_v6 = vunpack.i.l.bf16 %v5850_v54 }
0x11e1   : > { %v2939_v25 = vpack.c.bf16 %v5852_v4, %v5851_v6  ;;  %v5130_v4 = vld [vmem:[%s8547_s2 + $0xc] sm:$0xf0] }
0x11f4   : > { %v5890_v58 = vpop.permute.xlu2 %5889 }
0x11f5   : > { %v5892_v21 = vunpack.i.h.bf16 %v5890_v58  ;;  %v5891_v22 = vunpack.i.l.bf16 %v5890_v58 }
0x11f6   : > { %v5855_v55 = vpop.permute.xlu0 %5854 }
0x11f7   : > { %v5857_v13 = vunpack.i.h.bf16 %v5855_v55  ;;  %v5856_v14 = vunpack.i.l.bf16 %v5855_v55  ;;  %v5157_v28 = vpack.c.bf16 %v5892_v21, %v5891_v22 }
0x11f9   : > { %v5154_v9 = vpack.c.bf16 %v5857_v13, %v5856_v14 }
0x11fc   : > { %v5895_v62 = vpop.permute.xlu2 %5894 }
0x11fd   : > { %v5897_v33 = vunpack.i.h.bf16 %v5895_v62  ;;  %v5896_v36 = vunpack.i.l.bf16 %v5895_v62 }
0x11ff   : > { %v5175_v52 = vpack.c.bf16 %v5897_v33, %v5896_v36  ;;  %v5148_v33 = vld [vmem:[%s8547_s2 + $0x20] sm:$0xf]  ;;  %v5508_v36 = vld [vmem:[%s8547_s2 + $0x28] sm:$0xf0] }
0x1204   : > { %v5900_v32 = vpop.permute.xlu2 %5899 }
0x1205   : > { %v5902_v58 = vunpack.i.h.bf16 %v5900_v32 }
0x120b   : > { %v5860_v59 = vpop.permute.xlu0 %5859  ;;  %v5870_v61 = vpop.permute.xlu1 %5869 }
0x120c   : > { %v5862_v1 = vunpack.i.h.bf16 %v5860_v59  ;;  %v5861_v24 = vunpack.i.l.bf16 %v5860_v59  ;;  %v5872_v3 = vunpack.i.h.bf16 %v5870_v61  ;;  %v5871_v56 = vunpack.i.l.bf16 %v5870_v61  ;;  %v5920_v15 = vpop.permute.xlu2 %5919 }
0x120d   : > { %v5901_v59 = vunpack.i.l.bf16 %v5900_v32  ;;  %v5922_v61 = vunpack.i.h.bf16 %v5920_v15  ;;  %v5507_v32 = vld [vmem:[%s8547_s2 + $0x20] sm:$0xf0] }
0x120e   : > { %v2940_v17 = vpack.c.bf16 %v5862_v1, %v5861_v24  ;;  %v5151_v5 = vpack.c.bf16 %v5872_v3, %v5871_v56  ;;  %v5921_v1 = vunpack.i.l.bf16 %v5920_v15  ;;  %v5503_v56 = vld [vmem:[%s8547_s2 + $0x4] sm:$0xf] }
0x120f   : > { %v2927_v6 = vpack.c.bf16 %v5902_v58, %v5901_v59 }
0x1210   : > { %5152 = vmatpush.bf16.msk.msra.mxu0 %vm7306_vm5, %v5151_v5  ;;  %3030 = vmatpush.bf16.msra.mxu2 %v2940_v17  ;;  %v2933_v13 = vpack.c.bf16 %v5922_v61, %v5921_v1  ;;  %v5133_v17 = vor.u32 %v5503_v56, %v5130_v4 }
0x1213   : > { %v5865_v26 = vpop.permute.xlu0 %5864  ;;  %v5875_v8 = vpop.permute.xlu1 %5874 }
0x1214   : > { %v5877_v27 = vunpack.i.h.bf16 %v5875_v8  ;;  %v5876_v23 = vunpack.i.l.bf16 %v5875_v8  ;;  %5155 = vmatpush.bf16.msk.msra.mxu0 %vm7306_vm5, %v5154_v9  ;;  %3031 = vmatpush.bf16.msra.mxu2 %v2939_v25  ;;  %v5867_v29 = vunpack.i.h.bf16 %v5865_v26  ;;  %v5866_v30 = vunpack.i.l.bf16 %v5865_v26  ;;  %v5128_v26 = vld [vmem:[%s8547_s2] sm:$0xf]  ;;  %v5504_v8 = vld [vmem:[%s8547_s2 + $0x8] sm:$0xf0]  ;;  %v2973_v61 = vpop.permute.xlu2 %2972 }
0x1216   : > { %v5169_v31 = vpack.c.bf16 %v5877_v27, %v5876_v23  ;;  %v5172_v10 = vpack.c.bf16 %v5867_v29, %v5866_v30  ;;  %v5136_v27 = vld [vmem:[%s8547_s2 + $0x8] sm:$0xf]  ;;  %v5505_v23 = vld [vmem:[%s8547_s2 + $0x10] sm:$0xf0]  ;;  %v5129_v29 = vor.u32 %v5504_v8, %v5128_v26 }
0x1217   : > { %v5137_v30 = vor.u32 %v5505_v23, %v5136_v27 }
0x1218   : > { %5158 = vmatpush.bf16.msk.msra.mxu0 %vm7312_vm3, %v5157_v28  ;;  %5170 = vmatpush.bf16.msk.msra.mxu2 %vm7306_vm5, %v5169_v31  ;;  %v5140_v31 = vld [vmem:[%s8547_s2 + $0x18] sm:$0xf]  ;;  %s8550_s2 = sld [smem:[#allocation13_spill]] }
0x121b   : > { %v5885_v39 = vpop.permute.xlu0 %5884  ;;  %v5880_v40 = vpop.permute.xlu1 %5879 }
0x121c   : > { %v5882_v41 = vunpack.i.h.bf16 %v5880_v40  ;;  %v5881_v44 = vunpack.i.l.bf16 %v5880_v40  ;;  %5173 = vmatpush.bf16.msk.msra.mxu2 %vm7306_vm5, %v5172_v10  ;;  %v5887_v19 = vunpack.i.h.bf16 %v5885_v39  ;;  %v5886_v45 = vunpack.i.l.bf16 %v5885_v39 }
0x121d   : > { %v5141_v10 = vor.u32 %v5507_v32, %v5140_v31  ;;  %v5149_v39 = vor.u32 %v5508_v36, %v5148_v33 }
0x121e   : > { %v5160_v20 = vpack.c.bf16 %v5882_v41, %v5881_v44  ;;  %v5178_v37 = vpack.c.bf16 %v5887_v19, %v5886_v45  ;;  %v3254_v31 = vld [vmem:[%s8550_s2] sm:$0xff]  ;;  %v3255_v32 = vld [vmem:[%s8550_s2 + $0x8] sm:$0xff] }
0x1220   : > { %5161 = vmatpush.bf16.msk.msra.mxu0 %vm7312_vm3, %v5160_v20  ;;  %5176 = vmatpush.bf16.msk.msra.mxu2 %vm7312_vm3, %v5175_v52 }
0x1223   : > { %v5910_v48 = vpop.permute.xlu0 %5909  ;;  %v5905_v50 = vpop.permute.xlu1 %5904 }
0x1224   : > { %v5912_v51 = vunpack.i.h.bf16 %v5910_v48  ;;  %v5911_v53 = vunpack.i.l.bf16 %v5910_v48  ;;  %v5907_v54 = vunpack.i.h.bf16 %v5905_v50  ;;  %v5906_v55 = vunpack.i.l.bf16 %v5905_v50  ;;  %5179 = vmatpush.bf16.msk.msra.mxu2 %vm7312_vm3, %v5178_v37 }
0x1226   : > { %v2928_v24 = vpack.c.bf16 %v5907_v54, %v5906_v55  ;;  %v2934_v3 = vpack.c.bf16 %v5912_v51, %v5911_v53 }
0x1228   : > { %3015 = vmatpush.bf16.msra.mxu0 %v2928_v24  ;;  %3036 = vmatpush.bf16.msra.mxu2 %v2934_v3 }
0x122b   : > { %v5925_v14 = vpop.permute.xlu0 %5924  ;;  %v5915_v62 = vpop.permute.xlu1 %5914 }
0x122c   : > { %v5917_v5 = vunpack.i.h.bf16 %v5915_v62  ;;  %v5916_v9 = vunpack.i.l.bf16 %v5915_v62  ;;  %3016 = vmatpush.bf16.msra.mxu0 %v2927_v6  ;;  %3037 = vmatpush.bf16.msra.mxu2 %v2933_v13  ;;  %v5927_v21 = vunpack.i.h.bf16 %v5925_v14  ;;  %v5926_v22 = vunpack.i.l.bf16 %v5925_v14 }
0x122e   : > { %v5181_v25 = vpack.c.bf16 %v5917_v5, %v5916_v9  ;;  %v5184_v28 = vpack.c.bf16 %v5927_v21, %v5926_v22 }
0x122f   : > { %3038 = vmatmul.bf16.vlgmr.msra.gmra.mxu2 %v5133_v17 }
0x1230   : > { %5164 = vmatpush.bf16.msk.msra.mxu0 %vm7306_vm5, %v5163_v47  ;;  %5182 = vmatpush.bf16.msk.msra.mxu3 %vm7312_vm3, %v5181_v25  ;;  %v5145_v47 = vor.u32 %v5506_v18, %v5142_v16  ;;  %v3257_v16 = vld [vmem:[%s8550_s2 + $0x18] sm:$0xff] }
0x1233   : > { %v2958_v34 = vpop.permute.xlu0 %2957  ;;  %v2968_v15 = vpop.permute.xlu1 %2967 }
0x1234   : > { %5167 = vmatpush.bf16.msk.msra.mxu0 %vm7306_vm5, %v5166_v12  ;;  %5185 = vmatpush.bf16.msk.msra.mxu3 %vm7312_vm3, %v5184_v28 }
0x1237   : > { %3019 = vmatmul.bf16.vlgmr.msra.gmra.mxu0 %v5129_v29  ;;  %5186 = vmatmul.msk.bf16.vlgmr.msra.gmra.mxu3 %vm2701_vm8, %v5137_v30 }
0x123b   : > { %v2963_v54 = vpop.permute.xlu1 %2962 }
0x123f   : > { %3043 = vmatmul.bf16.gmra.mxu2 %v5145_v47  ;;  %v3256_v47 = vld [vmem:[%s8550_s2 + $0x10] sm:$0xff]  ;;  %s8554_s2 = sld [smem:[#allocation12_spill]] }
0x1247   : > { %3024 = vmatmul.bf16.gmra.mxu0 %v5141_v10  ;;  %5187 = vmatmul.msk.bf16.gmra.mxu3 %vm2701_vm8, %v5149_v39 }
0x12b2   : > { %v3039_v46 = vpop.f32.mrf.mxu2 }
0x12b4   : > { %v3020_v12 = vpop.f32.mrf.mxu0 }
0x12b5   : > { %v3021_v40 = vadd.f32 %v3020_v12, %v2958_v34 }
0x12b7   : > { %v3040_v41 = vadd.f32 %v3039_v46, %v3021_v40 }
0x12ba   : > { %v3058_v44 = vpop.f32.mrf.mxu3  ;;  %v3041_v45 = vpop.f32.mrf.mxu2 }
0x12bb   : > { %v3059_v52 = vadd.f32 %v3058_v44, %v3040_v41 }
0x12bc   : > { %v3022_v19 = vpop.f32.mrf.mxu0 }
0x12bd   : > { %v3068_v20 = vmax.f32 %v3059_v52, 0.0  ;;  %v3023_v58 = vadd.f32 %v3022_v19, %v2963_v54 }
0x12bf   : > { %3084 = vrot.lane.b32.xlu1 %v3068_v20, %s8542_s11  ;;  %v3042_v56 = vadd.f32 %v3041_v45, %v3023_v58 }
0x12c2   : > { %v3060_v37 = vpop.f32.mrf.mxu3  ;;  %v3044_v51 = vpop.f32.mrf.mxu2 }
0x12c3   : > { %v3061_v6 = vadd.f32 %v3060_v37, %v3042_v56 }
0x12c4   : > { %v3025_v48 = vpop.f32.mrf.mxu0 }
0x12c5   : > { %v3026_v50 = vadd.f32 %v3025_v48, %v2968_v15  ;;  %v3069_v17 = vmax.f32 %v3061_v6, 0.0 }
0x12c7   : > { %v3045_v53 = vadd.f32 %v3044_v51, %v3026_v50 }
0x12ca   : > { %v3063_v55 = vpop.f32.mrf.mxu3  ;;  %v3046_v4 = vpop.f32.mrf.mxu2 }
0x12cb   : > { %v3064_v59 = vadd.f32 %v3063_v55, %v3045_v53 }
0x12cc   : > { %v3027_v1 = vpop.f32.mrf.mxu0 }
0x12cd   : > { %v3070_v24 = vmax.f32 %v3064_v59, 0.0  ;;  %v3028_v3 = vadd.f32 %v3027_v1, %v2973_v61 }
0x12cf   : > { %3088 = vrot.lane.b32.xlu2 %v3070_v24, %s8542_s11  ;;  %v3047_v13 = vadd.f32 %v3046_v4, %v3028_v3 }
0x12d2   : > { %v3065_v14 = vpop.f32.mrf.mxu3 }
0x12d3   : > { %v3066_v62 = vadd.f32 %v3065_v14, %v3047_v13 }
0x12d5   : > { %v3071_v5 = vmax.f32 %v3066_v62, 0.0 }
0x12d7   : > { %3090 = vrot.lane.b32.xlu0 %v3071_v5, %s8542_s11  ;;  %3086 = vrot.lane.b32.xlu2 %v3069_v17, %s8542_s11 }
0x1329   : > { %v3089_v9 = vpop.permute.xlu2 %3088 }
0x132a   : > { %3098 = vst.msk [vmem:[#allocation2 + $0x30] sm:$0xff] %vm2276_vm12, %v3089_v9 }
0x1331   : > { %v7552_v21 = vld [vmem:[#allocation2 + $0x30] sm:$0xff]  ;;  %v3087_v22 = vpop.permute.xlu2 %3086  ;;  %v3085_v25 = vpop.permute.xlu1 %3084 }
0x1332   : > { %3377 = vst.msk [vmem:[#allocation2 + $0x30] sm:$0xff] %vm2262_vm15, %v6495_v0 }
0x1333   : > { %3381 = vst.msk [vmem:[#allocation2 + $0x30] sm:$0xff] %vm2265_vm0, %v6495_v0 }
0x1334   : > { %3097 = vst.msk [vmem:[#allocation2 + $0x18] sm:$0xff] %vm2276_vm12, %v3087_v22 }
0x1335   : > { %3096 = vst.msk [vmem:[#allocation2] sm:$0xff] %vm2276_vm12, %v3085_v25 }
0x133b   : > { %v7560_v26 = vld [vmem:[#allocation2 + $0x18] sm:$0xff] }
0x133c   : > { %3376 = vst.msk [vmem:[#allocation2 + $0x18] sm:$0xff] %vm2262_vm15, %v6495_v0  ;;  %v7564_v8 = vld [vmem:[#allocation2] sm:$0xff] }
0x133d   : > { %3380 = vst.msk [vmem:[#allocation2 + $0x18] sm:$0xff] %vm2265_vm0, %v6495_v0  ;;  %v5933_v27 = vpack.i.bf16 %v7560_v26, %v7564_v8  ;;  %v5228_v23 = vpack.c.bf16 %v7560_v26, %v7564_v8 }
0x133e   : > { %3375 = vst.msk [vmem:[#allocation2] sm:$0xff] %vm2262_vm15, %v6495_v0 }
0x133f   : > { %3379 = vst.msk [vmem:[#allocation2] sm:$0xff] %vm2265_vm0, %v6495_v0  ;;  %5934 = vrot.lane.b32.xlu0 %v5933_v27, %s8548_s15  ;;  %5929 = vrot.lane.b32.xlu2 %v5933_v27, %s8549_s28 }
0x1349   : > { %v3091_v28 = vpop.permute.xlu0 %3090 }
0x134a   : > { %3099 = vst.msk [vmem:[#allocation2 + $0x48] sm:$0xff] %vm2276_vm12, %v3091_v28 }
0x1351   : > { %v7579_v29 = vld [vmem:[#allocation2 + $0x48] sm:$0xff] }
0x1352   : > { %3378 = vst.msk [vmem:[#allocation2 + $0x48] sm:$0xff] %vm2262_vm15, %v6495_v0  ;;  %v5948_v30 = vpack.i.bf16 %v7579_v29, %v7552_v21  ;;  %v5225_v18 = vpack.c.bf16 %v7579_v29, %v7552_v21  ;;  %v5202_v29 = vld [vmem:[%s8554_s2 + $0x18] sm:$0xf]  ;;  %vm8581_vm15 = vcmask 277640  }
0x1353   : > { %3382 = vst.msk [vmem:[#allocation2 + $0x48] sm:$0xff] %vm2265_vm0, %v6495_v0 }
0x1354   : > { %5949 = vrot.lane.b32.xlu1 %v5948_v30, %s8548_s15  ;;  %5939 = vrot.lane.b32.xlu0 %v5948_v30, %s8549_s28 }
0x1355   : > { %5969 = vrot.lane.b32.xlu2 %v5948_v30, %s8551_s3 }
0x135c   : > { %5954 = vrot.lane.b32.xlu1 %v5948_v30, %s8552_s5  ;;  %5944 = vrot.lane.b32.xlu0 %v5933_v27, %s8552_s5 }
0x135d   : > { %5974 = vrot.lane.b32.xlu2 %v5948_v30, %s8544_s26 }
0x1364   : > { %5959 = vrot.lane.b32.xlu1 %v5933_v27, %s8551_s3  ;;  %5989 = vrot.lane.b32.xlu0 %v5948_v30, %s8553_s7 }
0x1365   : > { %5979 = vrot.lane.b32.xlu2 %v5933_v27, %s8553_s7 }
0x136c   : > { %5964 = vrot.lane.b32.xlu1 %v5933_v27, %s8544_s26  ;;  %5994 = vrot.lane.b32.xlu0 %v5948_v30, %s8546_s1 }
0x136d   : > { %5999 = vrot.lane.b32.xlu2 %v5948_v30, %s8545_s0 }
0x1374   : > { %5984 = vrot.lane.b32.xlu1 %v5933_v27, %s8546_s1  ;;  %6004 = vrot.lane.b32.xlu0 %v5933_v27, %s8545_s0 }
0x1375   : > { %3275 = vperm.xlu2 %5671, %v3257_v16  }
0x137c   : > { %3270 = vperm.xlu1 %5727, %v3256_v47   ;;  %3260 = vperm.xlu0 %5630, %v3254_v31  }
0x1384   : > { %3265 = vperm.xlu1 %5727, %v3255_v32  }
0x1399   : > { %v5930_v33 = vpop.permute.xlu2 %5929 }
0x139a   : > { %v5932_v44 = vunpack.i.h.bf16 %v5930_v33  ;;  %v5931_v52 = vunpack.i.l.bf16 %v5930_v33 }
0x139c   : > { %v5216_v48 = vpack.c.bf16 %v5932_v44, %v5931_v52 }
0x13af   : > { %v5970_v10 = vpop.permute.xlu2 %5969 }
0x13b0   : > { %v5972_v50 = vunpack.i.h.bf16 %v5970_v10  ;;  %v5971_v51 = vunpack.i.l.bf16 %v5970_v10 }
0x13b1   : > { %v5935_v36 = vpop.permute.xlu0 %5934 }
0x13b2   : > { %v5937_v19 = vunpack.i.h.bf16 %v5935_v36  ;;  %v5936_v45 = vunpack.i.l.bf16 %v5935_v36  ;;  %v5231_v61 = vpack.c.bf16 %v5972_v50, %v5971_v51  ;;  %v5510_v50 = vld [vmem:[%s8554_s2 + $0x8] sm:$0xf0]  ;;  %v5509_v51 = vld [vmem:[%s8554_s2 + $0x4] sm:$0xf] }
0x13b4   : > { %v3242_v53 = vpack.c.bf16 %v5937_v19, %v5936_v45  ;;  %v5190_v45 = vld [vmem:[%s8554_s2] sm:$0xf] }
0x13b7   : > { %v5975_v20 = vpop.permute.xlu2 %5974 }
0x13b8   : > { %v5977_v4 = vunpack.i.h.bf16 %v5975_v20  ;;  %v5976_v6 = vunpack.i.l.bf16 %v5975_v20 }
0x13ba   : > { %v3231_v9 = vpack.c.bf16 %v5977_v4, %v5976_v6  ;;  %v5514_v4 = vld [vmem:[%s8554_s2 + $0x28] sm:$0xf0] }
0x13bf   : > { %v5980_v56 = vpop.permute.xlu2 %5979 }
0x13c0   : > { %v5982_v28 = vunpack.i.h.bf16 %v5980_v56  ;;  %v5981_v30 = vunpack.i.l.bf16 %v5980_v56  ;;  %v5210_v56 = vld [vmem:[%s8554_s2 + $0x20] sm:$0xf] }
0x13c1   : > { %v5211_v8 = vor.u32 %v5514_v4, %v5210_v56 }
0x13c6   : > { %v5940_v39 = vpop.permute.xlu0 %5939  ;;  %v5950_v46 = vpop.permute.xlu1 %5949 }
0x13c7   : > { %v5942_v34 = vunpack.i.h.bf16 %v5940_v39  ;;  %v5941_v12 = vunpack.i.l.bf16 %v5940_v39  ;;  %v5952_v40 = vunpack.i.h.bf16 %v5950_v46  ;;  %v5951_v41 = vunpack.i.l.bf16 %v5950_v46  ;;  %v6000_v16 = vpop.permute.xlu2 %5999 }
0x13c8   : > { %v5240_v46 = vpack.c.bf16 %v5982_v28, %v5981_v30 }
0x13c9   : > { %v5213_v15 = vpack.c.bf16 %v5942_v34, %v5941_v12  ;;  %v3243_v37 = vpack.c.bf16 %v5952_v40, %v5951_v41  ;;  %v6002_v34 = vunpack.i.h.bf16 %v6000_v16  ;;  %v6001_v12 = vunpack.i.l.bf16 %v6000_v16 }
0x13cb   : > { %5214 = vmatpush.bf16.msk.msrb.mxu1 %vm7306_vm5, %v5213_v15  ;;  %3333 = vmatpush.bf16.msrb.mxu0 %v3243_v37  ;;  %v3237_v44 = vpack.c.bf16 %v6002_v34, %v6001_v12 }
0x13ce   : > { %v5945_v54 = vpop.permute.xlu0 %5944  ;;  %v5955_v55 = vpop.permute.xlu1 %5954 }
0x13cf   : > { %v5957_v58 = vunpack.i.h.bf16 %v5955_v55  ;;  %v5956_v59 = vunpack.i.l.bf16 %v5955_v55  ;;  %5217 = vmatpush.bf16.msk.msrb.mxu1 %vm7306_vm5, %v5216_v48  ;;  %3334 = vmatpush.bf16.msrb.mxu0 %v3242_v53  ;;  %v5947_v1 = vunpack.i.h.bf16 %v5945_v54  ;;  %v5946_v24 = vunpack.i.l.bf16 %v5945_v54  ;;  %v5192_v53 = vld [vmem:[%s8554_s2 + $0xc] sm:$0xf0]  ;;  %v5198_v54 = vld [vmem:[%s8554_s2 + $0x8] sm:$0xf]  ;;  %v5511_v55 = vld [vmem:[%s8554_s2 + $0x10] sm:$0xf0]  ;;  %v3276_v34 = vpop.permute.xlu2 %3275 }
0x13d0   : > { %v5199_v21 = vor.u32 %v5511_v55, %v5198_v54 }
0x13d1   : > { %v5219_v3 = vpack.c.bf16 %v5957_v58, %v5956_v59  ;;  %v5222_v13 = vpack.c.bf16 %v5947_v1, %v5946_v24  ;;  %v5195_v1 = vor.u32 %v5509_v51, %v5192_v53  ;;  %v5512_v24 = vld [vmem:[%s8554_s2 + $0x1c] sm:$0xf] }
0x13d3   : > { %5220 = vmatpush.bf16.msk.msrb.mxu1 %vm7312_vm3, %v5219_v3  ;;  %5232 = vmatpush.bf16.msk.msrb.mxu0 %vm7306_vm5, %v5231_v61  ;;  %v5191_v61 = vor.u32 %v5510_v50, %v5190_v45  ;;  %v5204_v3 = vld [vmem:[%s8554_s2 + $0x24] sm:$0xf0] }
0x13d4   : > { %v5207_v26 = vor.u32 %v5512_v24, %v5204_v3 }
0x13d6   : > { %v5990_v14 = vpop.permute.xlu0 %5989  ;;  %v5960_v62 = vpop.permute.xlu1 %5959 }
0x13d7   : > { %v5962_v17 = vunpack.i.h.bf16 %v5960_v62  ;;  %v5961_v5 = vunpack.i.l.bf16 %v5960_v62  ;;  %5223 = vmatpush.bf16.msk.msrb.mxu1 %vm7312_vm3, %v5222_v13  ;;  %v5992_v22 = vunpack.i.h.bf16 %v5990_v14  ;;  %v5991_v25 = vunpack.i.l.bf16 %v5990_v14 }
0x13d9   : > { %v5234_v27 = vpack.c.bf16 %v5962_v17, %v5961_v5  ;;  %v5237_v47 = vpack.c.bf16 %v5992_v22, %v5991_v25 }
0x13db   : > { %3318 = vmatpush.bf16.msrb.mxu1 %v3231_v9  ;;  %5235 = vmatpush.bf16.msk.msrb.mxu0 %vm7306_vm5, %v5234_v27 }
0x13de   : > { %v5995_v31 = vpop.permute.xlu0 %5994  ;;  %v5965_v32 = vpop.permute.xlu1 %5964 }
0x13df   : > { %v5997_v33 = vunpack.i.h.bf16 %v5995_v31  ;;  %v5996_v36 = vunpack.i.l.bf16 %v5995_v31  ;;  %v5967_v10 = vunpack.i.h.bf16 %v5965_v32  ;;  %v5966_v39 = vunpack.i.l.bf16 %v5965_v32  ;;  %5238 = vmatpush.bf16.msk.msrb.mxu0 %vm7312_vm3, %v5237_v47 }
0x13e1   : > { %v5243_v40 = vpack.c.bf16 %v5997_v33, %v5996_v36  ;;  %v3230_v41 = vpack.c.bf16 %v5967_v10, %v5966_v39 }
0x13e3   : > { %3319 = vmatpush.bf16.msrb.mxu1 %v3230_v41  ;;  %5241 = vmatpush.bf16.msk.msrb.mxu0 %vm7312_vm3, %v5240_v46 }
0x13e4   : > { %5244 = vmatpush.bf16.msk.msrb.mxu2 %vm7312_vm3, %v5243_v40 }
0x13e6   : > { %v6005_v52 = vpop.permute.xlu0 %6004  ;;  %v5985_v19 = vpop.permute.xlu1 %5984 }
0x13e7   : > { %v6007_v20 = vunpack.i.h.bf16 %v6005_v52  ;;  %v6006_v15 = vunpack.i.l.bf16 %v6005_v52  ;;  %v5987_v37 = vunpack.i.h.bf16 %v5985_v19  ;;  %v5986_v48 = vunpack.i.l.bf16 %v5985_v19  ;;  %5226 = vmatpush.bf16.msk.msrb.mxu1 %vm7306_vm5, %v5225_v18  ;;  %3339 = vmatpush.bf16.msrb.mxu0 %v3237_v44  ;;  %v5513_v18 = vld [vmem:[%s8554_s2 + $0x20] sm:$0xf0]  ;;  %s8562_s2 = sld [smem:[#allocation17_spill]] }
0x13e8   : > { %v5203_v6 = vor.u32 %v5513_v18, %v5202_v29 }
0x13e9   : > { %v3236_v58 = vpack.c.bf16 %v6007_v20, %v6006_v15  ;;  %v5246_v59 = vpack.c.bf16 %v5987_v37, %v5986_v48 }
0x13eb   : > { %5229 = vmatpush.bf16.msk.msrb.mxu1 %vm7306_vm5, %v5228_v23  ;;  %3340 = vmatpush.bf16.msrb.mxu0 %v3236_v58 }
0x13ec   : > { %5247 = vmatpush.bf16.msk.msrb.mxu2 %vm7312_vm3, %v5246_v59 }
0x13ee   : > { %3322 = vmatmul.bf16.vlgmr.msrb.gmra.mxu1 %v5191_v61  ;;  %3341 = vmatmul.bf16.vlgmr.msrb.gmra.mxu0 %v5195_v1  ;;  %v3261_v14 = vpop.permute.xlu0 %3260  ;;  %v3271_v28 = vpop.permute.xlu1 %3270 }
0x13ef   : > { %5248 = vmatmul.msk.bf16.vlgmr.msrb.gmra.mxu2 %vm2701_vm8, %v5199_v21  ;;  %3647 = vmatpush.msra.mxu0 %v3626_v2 }
0x13f6   : > { %v3266_v33 = vpop.permute.xlu1 %3265 }
0x13fe   : > { %3327 = vmatmul.bf16.gmra.mxu1 %v5203_v6  ;;  %3346 = vmatmul.bf16.gmra.mxu0 %v5207_v26 }
0x13ff   : > { %5249 = vmatmul.msk.bf16.gmra.mxu2 %vm2701_vm8, %v5211_v8 }
0x146b   : > { %v3323_v23 = vpop.f32.mrf.mxu1  ;;  %v3342_v13 = vpop.f32.mrf.mxu0 }
0x146c   : > { %v3324_v62 = vadd.f32 %v3323_v23, %v3261_v14 }
0x146e   : > { %v3343_v17 = vadd.f32 %v3342_v13, %v3324_v62 }
0x1472   : > { %v3361_v5 = vpop.f32.mrf.mxu2 }
0x1473   : > { %v3362_v9 = vadd.f32 %v3361_v5, %v3343_v17  ;;  %v3325_v22 = vpop.f32.mrf.mxu1  ;;  %v3344_v25 = vpop.f32.mrf.mxu0 }
0x1474   : > { %v3326_v10 = vadd.f32 %v3325_v22, %v3266_v33 }
0x1475   : > { %v3371_v27 = vmax.f32 %v3362_v9, 0.0 }
0x1476   : > { %v3345_v41 = vadd.f32 %v3344_v25, %v3326_v10 }
0x1477   : > { %3387 = vrot.lane.b32.xlu1 %v3371_v27, %s8542_s11 }
0x147a   : > { %v3363_v30 = vpop.f32.mrf.mxu2 }
0x147b   : > { %v3328_v16 = vpop.f32.mrf.mxu1  ;;  %v3347_v31 = vpop.f32.mrf.mxu0  ;;  %v3364_v52 = vadd.f32 %v3363_v30, %v3345_v41 }
0x147c   : > { %v3329_v47 = vadd.f32 %v3328_v16, %v3271_v28 }
0x147d   : > { %v3372_v15 = vmax.f32 %v3364_v52, 0.0 }
0x147e   : > { %v3348_v32 = vadd.f32 %v3347_v31, %v3329_v47 }
0x1482   : > { %v3366_v36 = vpop.f32.mrf.mxu2 }
0x1483   : > { %v3367_v39 = vadd.f32 %v3366_v36, %v3348_v32  ;;  %v3330_v46 = vpop.f32.mrf.mxu1  ;;  %v3349_v44 = vpop.f32.mrf.mxu0 }
0x1484   : > { %v3331_v40 = vadd.f32 %v3330_v46, %v3276_v34 }
0x1485   : > { %v3373_v12 = vmax.f32 %v3367_v39, 0.0 }
0x1486   : > { %v3350_v19 = vadd.f32 %v3349_v44, %v3331_v40 }
0x1487   : > { %3391 = vrot.lane.b32.xlu2 %v3373_v12, %s8542_s11 }
0x148a   : > { %v3368_v45 = vpop.f32.mrf.mxu2 }
0x148b   : > { %v3369_v20 = vadd.f32 %v3368_v45, %v3350_v19 }
0x148d   : > { %v3374_v37 = vmax.f32 %v3369_v20, 0.0 }
0x148f   : > { %3393 = vrot.lane.b32.xlu0 %v3374_v37, %s8542_s11  ;;  %3389 = vrot.lane.b32.xlu2 %v3372_v15, %s8542_s11  ;;  %s8555_s11 = sld [smem:[#allocation15_spill]] }
0x1495   : > { %v3553_v3 = vld [vmem:[%s8555_s11] sm:$0xff]  ;;  %v3554_v56 = vld [vmem:[%s8555_s11 + $0x8] sm:$0xff] }
0x14e1   : > { %v3392_v48 = vpop.permute.xlu2 %3391 }
0x14e2   : > { %3401 = vst.msk [vmem:[#allocation2 + $0x30] sm:$0xff] %vm2276_vm12, %v3392_v48 }
0x14e9   : > { %v7656_v50 = vld [vmem:[#allocation2 + $0x30] sm:$0xff]  ;;  %v3390_v51 = vpop.permute.xlu2 %3389  ;;  %v3388_v53 = vpop.permute.xlu1 %3387 }
0x14ea   : > { %3658 = vst.msk [vmem:[#allocation2 + $0x30] sm:$0xff] %vm1933_vm2, %v6495_v0 }
0x14eb   : > { %3662 = vst.msk [vmem:[#allocation2 + $0x30] sm:$0xff] %vm1935_vm11, %v6495_v0 }
0x14ec   : > { %3674 = vst.msk [vmem:[#allocation2 + $0x30] sm:$0xff] %vm1941_vm1, %v7238_v60 }
0x14ed   : > { %3400 = vst.msk [vmem:[#allocation2 + $0x18] sm:$0xff] %vm2276_vm12, %v3390_v51 }
0x14ee   : > { %3399 = vst.msk [vmem:[#allocation2] sm:$0xff] %vm2276_vm12, %v3388_v53 }
0x14f3   : > { %v7703_v18 = vld [vmem:[#allocation2 + $0x30] sm:$0xff] }
0x14f4   : > { %v7666_v54 = vld [vmem:[#allocation2 + $0x18] sm:$0xff] }
0x14f5   : > { %3657 = vst.msk [vmem:[#allocation2 + $0x18] sm:$0xff] %vm1933_vm2, %v6495_v0  ;;  %v7670_v55 = vld [vmem:[#allocation2] sm:$0xff] }
0x14f6   : > { %3661 = vst.msk [vmem:[#allocation2 + $0x18] sm:$0xff] %vm1935_vm11, %v6495_v0  ;;  %v6013_v58 = vpack.i.bf16 %v7666_v54, %v7670_v55  ;;  %v5278_v60 = vpack.c.bf16 %v7666_v54, %v7670_v55 }
0x14f7   : > { %3656 = vst.msk [vmem:[#allocation2] sm:$0xff] %vm1933_vm2, %v6495_v0 }
0x14f8   : > { %3660 = vst.msk [vmem:[#allocation2] sm:$0xff] %vm1935_vm11, %v6495_v0  ;;  %6014 = vrot.lane.b32.xlu1 %v6013_v58, %s8549_s28 }
0x1501   : > { %v3394_v59 = vpop.permute.xlu0 %3393 }
0x1502   : > { %3402 = vst.msk [vmem:[#allocation2 + $0x48] sm:$0xff] %vm2276_vm12, %v3394_v59  ;;  %vm7746_vm12 = vmpackc.low %vm7137_vm4, %vm7137_vm4  ;;  %vm8570_vm4 = vcmask 138240  }
0x1503   : > { %vm8582_vm0 = vmmov %vm8570_vm4 }
0x1509   : > { %v7684_v61 = vld [vmem:[#allocation2 + $0x48] sm:$0xff] }
0x150a   : > { %3659 = vst.msk [vmem:[#allocation2 + $0x48] sm:$0xff] %vm1933_vm2, %v6495_v0  ;;  %v6008_v1 = vpack.i.bf16 %v7684_v61, %v7656_v50  ;;  %v5275_v21 = vpack.c.bf16 %v7684_v61, %v7656_v50 }
0x150b   : > { %3663 = vst.msk [vmem:[#allocation2 + $0x48] sm:$0xff] %vm1935_vm11, %v6495_v0 }
0x150c   : > { %3675 = vst.msk [vmem:[#allocation2 + $0x48] sm:$0xff] %vm1941_vm1, %v7233_v7  ;;  %6009 = vrot.lane.b32.xlu0 %v6008_v1, %s8549_s28  ;;  %6019 = vrot.lane.b32.xlu2 %v6008_v1, %s8552_s5  ;;  %s8556_s28 = smov 111  }
0x150d   : > { %6034 = vrot.lane.b32.xlu1 %v6008_v1, %s8544_s26 }
0x1513   : > { %v7699_v29 = vld [vmem:[#allocation2 + $0x48] sm:$0xff] }
0x1514   : > { %6029 = vrot.lane.b32.xlu2 %v6013_v58, %s8544_s26  ;;  %6024 = vrot.lane.b32.xlu0 %v6013_v58, %s8552_s5  ;;  %v7708_v7 = vpack.i.bf16 %v7699_v29, %v7703_v18  ;;  %v5326_v24 = vpack.c.bf16 %v7699_v29, %v7703_v18 }
0x1515   : > { %6044 = vrot.lane.b32.xlu1 %v6013_v58, %s8548_s15 }
0x151c   : > { %6054 = vrot.lane.b32.xlu2 %v6008_v1, %s8551_s3  ;;  %6039 = vrot.lane.b32.xlu0 %v6008_v1, %s8548_s15 }
0x151d   : > { %6064 = vrot.lane.b32.xlu1 %v6008_v1, %s8553_s7 }
0x1524   : > { %6059 = vrot.lane.b32.xlu2 %v6013_v58, %s8553_s7  ;;  %6049 = vrot.lane.b32.xlu0 %v6013_v58, %s8551_s3  ;;  %s8557_s7 = smov 112  }
0x1525   : > { %6069 = vrot.lane.b32.xlu1 %v6013_v58, %s8546_s1 }
0x152c   : > { %6079 = vrot.lane.b32.xlu2 %v6008_v1, %s8545_s0  ;;  %6074 = vrot.lane.b32.xlu0 %v6008_v1, %s8546_s1 }
0x152d   : > { %3557 = vperm.xlu1 %5727, %v3553_v3  }
0x1534   : > { %3562 = vperm.xlu2 %5671, %v3554_v56   ;;  %6084 = vrot.lane.b32.xlu0 %v6013_v58, %s8545_s0  ;;  %s8558_s0 = sld [smem:[#allocation14_spill]]  ;;  %v4174_v56 = vld [vmem:[%s6713_s6 + $0x8] sm:$0xff] }
0x153a   : > { %v5516_v49 = vld [vmem:[%s8558_s0 + $0x8] sm:$0xf0] }
0x153c   : > { %6089 = vrot.lane.b32.xlu2 %v7708_v7, %s8551_s3 }
0x1544   : > { %6099 = vrot.lane.b32.xlu2 %v7708_v7, %s8556_s28 }
0x154c   : > { %6104 = vrot.lane.b32.xlu2 %v7708_v7, %s8557_s7 }
0x1566   : > { %v6020_v4 = vpop.permute.xlu2 %6019 }
0x1567   : > { %v6022_v25 = vunpack.i.h.bf16 %v6020_v4  ;;  %v6021_v27 = vunpack.i.l.bf16 %v6020_v4 }
0x1569   : > { %v5269_v47 = vpack.c.bf16 %v6022_v25, %v6021_v27 }
0x156a   : > { %v6015_v8 = vpop.permute.xlu1 %6014 }
0x156b   : > { %v6017_v5 = vunpack.i.h.bf16 %v6015_v8  ;;  %v6016_v9 = vunpack.i.l.bf16 %v6015_v8 }
0x156d   : > { %v5266_v28 = vpack.c.bf16 %v6017_v5, %v6016_v9 }
0x156e   : > { %v6030_v6 = vpop.permute.xlu2 %6029 }
0x156f   : > { %v6032_v41 = vunpack.i.h.bf16 %v6030_v6  ;;  %v6031_v44 = vunpack.i.l.bf16 %v6030_v6 }
0x1571   : > { %v3533_v37 = vpack.c.bf16 %v6032_v41, %v6031_v44 }
0x1576   : > { %v6055_v26 = vpop.permute.xlu2 %6054 }
0x1577   : > { %v6057_v48 = vunpack.i.h.bf16 %v6055_v26  ;;  %v6056_v51 = vunpack.i.l.bf16 %v6055_v26  ;;  %v5252_v26 = vld [vmem:[%s8558_s0] sm:$0xf] }
0x1579   : > { %v5281_v4 = vpack.c.bf16 %v6057_v48, %v6056_v51 }
0x157e   : > { %v6010_v23 = vpop.permute.xlu0 %6009  ;;  %v7729_v13 = vpop.permute.xlu2 %6059 }
0x157f   : > { %v6012_v14 = vunpack.i.h.bf16 %v6010_v23  ;;  %v6011_v62 = vunpack.i.l.bf16 %v6010_v23  ;;  %v6035_v17 = vpop.permute.xlu1 %6034  ;;  %v6062_v50 = vunpack.i.h.bf16 %v7729_v13  ;;  %v6061_v61 = vunpack.i.l.bf16 %v7729_v13 }
0x1580   : > { %v6037_v36 = vunpack.i.h.bf16 %v6035_v17  ;;  %v6036_v10 = vunpack.i.l.bf16 %v6035_v17 }
0x1581   : > { %v5263_v22 = vpack.c.bf16 %v6012_v14, %v6011_v62  ;;  %v5290_v54 = vpack.c.bf16 %v6062_v50, %v6061_v61 }
0x1582   : > { %v3534_v52 = vpack.c.bf16 %v6037_v36, %v6036_v10 }
0x1583   : > { %5264 = vmatpush.bf16.msk.msrb.mxu3 %vm7306_vm5, %v5263_v22  ;;  %v5253_v22 = vor.u32 %v5516_v49, %v5252_v26 }
0x1586   : > { %v7733_v30 = vpop.permute.xlu2 %6079  ;;  %v6025_v16 = vpop.permute.xlu0 %6024 }
0x1587   : > { %5267 = vmatpush.bf16.msk.msrb.mxu3 %vm7306_vm5, %v5266_v28  ;;  %v6027_v31 = vunpack.i.h.bf16 %v6025_v16  ;;  %v6026_v32 = vunpack.i.l.bf16 %v6025_v16  ;;  %v6045_v33 = vpop.permute.xlu1 %6044  ;;  %v6082_v57 = vunpack.i.h.bf16 %v7733_v30  ;;  %v6081_v55 = vunpack.i.l.bf16 %v7733_v30  ;;  %v5260_v30 = vld [vmem:[%s8558_s0 + $0x8] sm:$0xf] }
0x1588   : > { %v6047_v19 = vunpack.i.h.bf16 %v6045_v33  ;;  %v6046_v45 = vunpack.i.l.bf16 %v6045_v33 }
0x1589   : > { %v5272_v39 = vpack.c.bf16 %v6027_v31, %v6026_v32  ;;  %v3540_v32 = vpack.c.bf16 %v6082_v57, %v6081_v55 }
0x158a   : > { %v3545_v53 = vpack.c.bf16 %v6047_v19, %v6046_v45  ;;  %v3625_v45 = vld [vmem:[%s8499_s4] sm:$0xff]  ;;  %s8563_s4 = smov 110  }
0x158b   : > { %5270 = vmatpush.bf16.msk.msrb.mxu3 %vm7312_vm3, %v5269_v47  ;;  %3648 = vmatpush.msra.mxu0 %v3625_v45 }
0x158e   : > { %v7739_v46 = vpop.permute.xlu2 %3562  ;;  %v6040_v34 = vpop.permute.xlu0 %6039 }
0x158f   : > { %v6042_v12 = vunpack.i.h.bf16 %v6040_v34  ;;  %v6041_v40 = vunpack.i.l.bf16 %v6040_v34  ;;  %5273 = vmatpush.bf16.msk.msrb.mxu3 %vm7312_vm3, %v5272_v39  ;;  %v6065_v15 = vpop.permute.xlu1 %6064  ;;  %v5515_v34 = vld [vmem:[%s8558_s0 + $0x4] sm:$0xf] }
0x1590   : > { %v6067_v14 = vunpack.i.h.bf16 %v6065_v15  ;;  %v6066_v62 = vunpack.i.l.bf16 %v6065_v15 }
0x1591   : > { %v3546_v20 = vpack.c.bf16 %v6042_v12, %v6041_v40  ;;  %v5254_v12 = vld [vmem:[%s8558_s0 + $0xc] sm:$0xf0]  ;;  %v5517_v40 = vld [vmem:[%s8558_s0 + $0x10] sm:$0xf0]  ;;  %s8561_s0 = smov 9  }
0x1592   : > { %v5261_v19 = vor.u32 %v5517_v40, %v5260_v30 }
0x1593   : > { %3587 = vmatpush.bf16.msrb.mxu3 %v3534_v52  ;;  %3597 = vmatpush.bf16.msra.mxu1 %v3546_v20  ;;  %v5257_v52 = vor.u32 %v5515_v34, %v5254_v12 }
0x1596   : > { %v6090_v58 = vpop.permute.xlu2 %6089  ;;  %v6050_v59 = vpop.permute.xlu0 %6049 }
0x1597   : > { %v6092_v1 = vunpack.i.h.bf16 %v6090_v58  ;;  %v6091_v3 = vunpack.i.l.bf16 %v6090_v58  ;;  %3588 = vmatpush.bf16.msrb.mxu3 %v3533_v37  ;;  %3598 = vmatpush.bf16.msra.mxu1 %v3545_v53  ;;  %v6052_v8 = vunpack.i.h.bf16 %v6050_v59  ;;  %v6051_v23 = vunpack.i.l.bf16 %v6050_v59  ;;  %v6070_v5 = vpop.permute.xlu1 %6069 }
0x1598   : > { %v6072_v28 = vunpack.i.h.bf16 %v6070_v5  ;;  %v6071_v16 = vunpack.i.l.bf16 %v6070_v5 }
0x1599   : > { %v5314_v6 = vpack.c.bf16 %v6092_v1, %v6091_v3  ;;  %v5284_v17 = vpack.c.bf16 %v6052_v8, %v6051_v23 }
0x159b   : > { %5276 = vmatpush.bf16.msk.msrb.mxu3 %vm7306_vm5, %v5275_v21  ;;  %5282 = vmatpush.bf16.msk.msra.mxu1 %vm7306_vm5, %v5281_v4  ;;  %v5287_v21 = vpack.c.bf16 %v6067_v14, %v6066_v62 }
0x159c   : > { %5315 = vmatpush.bf16.msk.msra.mxu2 %vm7746_vm12, %v5314_v6 }
0x159e   : > { %v6075_v9 = vpop.permute.xlu0 %6074  ;;  %v6100_v31 = vpop.permute.xlu2 %6099 }
0x159f   : > { %v6077_v25 = vunpack.i.h.bf16 %v6075_v9  ;;  %v6076_v27 = vunpack.i.l.bf16 %v6075_v9  ;;  %5279 = vmatpush.bf16.msk.msrb.mxu3 %vm7306_vm5, %v5278_v60  ;;  %5285 = vmatpush.bf16.msk.msra.mxu1 %vm7306_vm5, %v5284_v17  ;;  %v5296_v60 = vpack.c.bf16 %v6072_v28, %v6071_v16  ;;  %v6102_v10 = vunpack.i.h.bf16 %v6100_v31  ;;  %v3558_v48 = vpop.permute.xlu1 %3557  ;;  %v3827_v9 = vld [vmem:[%s8562_s2 + $0x8] sm:$0xff]  ;;  %v4177_v28 = vld [vmem:[%s6713_s6 + $0x20] sm:$0xff]  ;;  %vm8580_vm5 = vmmov %vm8570_vm4 }
0x15a0   : > { %v6101_v39 = vunpack.i.l.bf16 %v6100_v31 }
0x15a1   : > { %v5293_v47 = vpack.c.bf16 %v6077_v25, %v6076_v27 }
0x15a2   : > { %3591 = vmatmul.bf16.vlgmr.msrb.gmra.mxu3 %v5253_v22  ;;  %v3819_v44 = vpack.c.bf16 %v6102_v10, %v6101_v39  ;;  %v3826_v22 = vld [vmem:[%s8562_s2] sm:$0xff]  ;;  %s8566_s2 = sld [smem:[#allocation16_spill]] }
0x15a3   : > { %5288 = vmatpush.bf16.msk.msra.mxu1 %vm7312_vm3, %v5287_v21  ;;  %5294 = vmatpush.bf16.msk.msra.mxu3 %vm7312_vm3, %v5293_v47 }
0x15a6   : > { %v6085_v13 = vpop.permute.xlu0 %6084  ;;  %v6105_v25 = vpop.permute.xlu2 %6104 }
0x15a7   : > { %5291 = vmatpush.bf16.msk.msra.mxu1 %vm7312_vm3, %v5290_v54  ;;  %5297 = vmatpush.bf16.msk.msra.mxu3 %vm7312_vm3, %v5296_v60  ;;  %v6087_v33 = vunpack.i.h.bf16 %v6085_v13  ;;  %v6086_v36 = vunpack.i.l.bf16 %v6085_v13  ;;  %vm7833_vm3 = vmpackc.low %vm7131_vm14, %vm7131_vm14  ;;  %v6107_v31 = vunpack.i.h.bf16 %v6105_v25 }
0x15a8   : > { %v5311_v29 = vld [vmem:[%s8566_s2 + $0x8] sm:$0xf]  ;;  %v5520_v18 = vld [vmem:[%s8566_s2 + $0x10] sm:$0xf0]  ;;  %vm8571_vm14 = vmmov %vm8570_vm4 }
0x15a9   : > { %v3539_v41 = vpack.c.bf16 %v6087_v33, %v6086_v36 }
0x15ab   : > { %3603 = vmatpush.bf16.msra.mxu1 %v3540_v32  ;;  %v6106_v32 = vunpack.i.l.bf16 %v6105_v25 }
0x15ad   : > { %v5332_v39 = vpack.c.bf16 %v6107_v31, %v6106_v32 }
0x15af   : > { %3604 = vmatpush.bf16.msra.mxu1 %v3539_v41 }
0x15b2   : > { %3605 = vmatmul.bf16.vlgmr.msra.gmra.mxu1 %v5257_v52  ;;  %5298 = vmatmul.msk.bf16.vlgmr.msra.gmra.mxu3 %vm2701_vm8, %v5261_v19 }
0x15b3   : > { %3870 = vmatpush.bf16.msrb.mxu1 %v3819_v44 }
0x1625   : > { %v3592_v20 = vpop.f32.mrf.mxu3 }
0x1626   : > { %v3593_v51 = vadd.f32 %v3592_v20, %v3558_v48 }
0x162d   : > { %v3594_v15 = vpop.f32.mrf.mxu3 }
0x162e   : > { %v3595_v3 = vadd.f32 %v3594_v15, %v7739_v46 }
0x162f   : > { %v3606_v37 = vpop.f32.mrf.mxu1 }
0x1630   : > { %v3607_v53 = vadd.f32 %v3606_v37, %v3593_v51 }
0x1635   : > { %v3620_v58 = vpop.f32.mrf.mxu3 }
0x1636   : > { %v3621_v59 = vadd.f32 %v3620_v58, %v3607_v53 }
0x1637   : > { %v3608_v1 = vpop.f32.mrf.mxu1 }
0x1638   : > { %5299 = vmatmul.msk.f32.vlgmr.msra.gmra.mxu0 %vm2416_vm13, %v3621_v59  ;;  %v3609_v4 = vadd.f32 %v3608_v1, %v3595_v3 }
0x163d   : > { %v3622_v6 = vpop.f32.mrf.mxu3 }
0x163e   : > { %v3623_v8 = vadd.f32 %v3622_v6, %v3609_v4 }
0x1640   : > { %5300 = vmatmul.msk.f32.gmra.mxu0 %vm2416_vm13, %v3623_v8 }
0x16b5   : > { %v3650_v23 = vpop.f32.mrf.mxu0 }
0x16b6   : > { %3666 = vrot.lane.b32.xlu0 %v3650_v23, %s8561_s0 }
0x16bd   : > { %v3653_v26 = vpop.f32.mrf.mxu0 }
0x16be   : > { %3668 = vrot.lane.b32.xlu1 %v3653_v26, %s8561_s0  ;;  %v5303_v26 = vld [vmem:[%s8566_s2] sm:$0xf] }
0x16c6   : > { %6094 = vrot.lane.b32.xlu1 %v7708_v7, %s8552_s5 }
0x1728   : > { %v3667_v49 = vpop.permute.xlu0 %3666 }
0x1729   : > { %3672 = vst.msk [vmem:[#allocation2] sm:$0xff] %vm1941_vm1, %v3667_v49  ;;  %v5519_v49 = vld [vmem:[%s8566_s2 + $0x8] sm:$0xf0] }
0x1730   : > { %v7795_v14 = vld [vmem:[#allocation2] sm:$0xff]  ;;  %v3669_v46 = vpop.permute.xlu1 %3668 }
0x1731   : > { %3900 = vst.msk [vmem:[#allocation2] sm:$0xff] %vm1933_vm2, %v6495_v0 }
0x1732   : > { %3902 = vst.msk [vmem:[#allocation2] sm:$0xff] %vm1935_vm11, %v6495_v0 }
0x1733   : > { %3673 = vst.msk [vmem:[#allocation2 + $0x18] sm:$0xff] %vm1941_vm1, %v3669_v46 }
0x173a   : > { %v7802_v62 = vld [vmem:[#allocation2 + $0x18] sm:$0xff] }
0x173b   : > { %3901 = vst.msk [vmem:[#allocation2 + $0x18] sm:$0xff] %vm1933_vm2, %v6495_v0  ;;  %v6138_v17 = vpack.i.bf16 %v7802_v62, %v7795_v14  ;;  %v5329_v5 = vpack.c.bf16 %v7802_v62, %v7795_v14  ;;  %v5305_v14 = vld [vmem:[%s8566_s2 + $0xc] sm:$0xf0] }
0x173c   : > { %3903 = vst.msk [vmem:[#allocation2 + $0x18] sm:$0xff] %vm1935_vm11, %v6495_v0 }
0x173d   : > { %6139 = vrot.lane.b32.xlu2 %v6138_v17, %s8544_s26  ;;  %6129 = vrot.lane.b32.xlu1 %v6138_v17, %s8556_s28 }
0x173e   : > { %6109 = vrot.lane.b32.xlu0 %v6138_v17, %s8551_s3 }
0x1745   : > { %6144 = vrot.lane.b32.xlu2 %v7708_v7, %s8563_s4  ;;  %6134 = vrot.lane.b32.xlu1 %v6138_v17, %s8557_s7 }
0x1746   : > { %6114 = vrot.lane.b32.xlu0 %v6138_v17, %s8552_s5 }
0x174d   : > { %6164 = vrot.lane.b32.xlu2 %v6138_v17, %s8548_s15  ;;  %6149 = vrot.lane.b32.xlu1 %v6138_v17, %s8546_s1 }
0x174e   : > { %6119 = vrot.lane.b32.xlu0 %v7708_v7, %s8544_s26 }
0x1755   : > { %6159 = vrot.lane.b32.xlu1 %v7708_v7, %s8548_s15 }
0x1756   : > { %6124 = vrot.lane.b32.xlu0 %v7708_v7, %s8546_s1  ;;  %v6095_v7 = vpop.permute.xlu1 %6094 }
0x1757   : > { %v6097_v63 = vunpack.i.h.bf16 %v6095_v7  ;;  %v6096_v36 = vunpack.i.l.bf16 %v6095_v7 }
0x1759   : > { %v5320_v34 = vpack.c.bf16 %v6097_v63, %v6096_v36 }
0x175d   : > { %3835 = vperm.xlu1 %5727, %v3827_v9  }
0x175e   : > { %6154 = vrot.lane.b32.xlu0 %v6138_v17, %s8563_s4 }
0x1766   : > { %3830 = vperm.xlu0 %5630, %v3826_v22  }
0x1797   : > { %v6140_v27 = vpop.permute.xlu2 %6139 }
0x1798   : > { %v6142_v48 = vunpack.i.h.bf16 %v6140_v27  ;;  %v6141_v51 = vunpack.i.l.bf16 %v6140_v27  ;;  %v5304_v27 = vor.u32 %v5519_v49, %v5303_v26 }
0x179a   : > { %v3806_v58 = vpack.c.bf16 %v6142_v48, %v6141_v51 }
0x179f   : > { %v6145_v50 = vpop.permute.xlu2 %6144 }
0x17a0   : > { %v6147_v61 = vunpack.i.h.bf16 %v6145_v50  ;;  %v6146_v21 = vunpack.i.l.bf16 %v6145_v50 }
0x17a2   : > { %v5344_v16 = vpack.c.bf16 %v6147_v61, %v6146_v21 }
0x17a4   : > { %5345 = vmatpush.bf16.msk.msrb.mxu3 %vm7833_vm3, %v5344_v16 }
0x17a7   : > { %v6165_v22 = vpop.permute.xlu2 %6164 }
0x17a8   : > { %v6166_v21 = vunpack.i.l.bf16 %v6165_v22 }
0x17af   : > { %v6130_v47 = vpop.permute.xlu1 %6129 }
0x17b0   : > { %v6110_v54 = vpop.permute.xlu0 %6109  ;;  %v6132_v57 = vunpack.i.h.bf16 %v6130_v47  ;;  %v6131_v55 = vunpack.i.l.bf16 %v6130_v47  ;;  %v5312_v47 = vor.u32 %v5520_v18, %v5311_v29 }
0x17b1   : > { %v6112_v60 = vunpack.i.h.bf16 %v6110_v54  ;;  %v6111_v13 = vunpack.i.l.bf16 %v6110_v54  ;;  %v5518_v54 = vld [vmem:[%s8566_s2 + $0x4] sm:$0xf]  ;;  %s8567_s2 = sld [smem:[#allocation19_spill]] }
0x17b2   : > { %v3818_v33 = vpack.c.bf16 %v6132_v57, %v6131_v55 }
0x17b3   : > { %v5317_v10 = vpack.c.bf16 %v6112_v60, %v6111_v13 }
0x17b4   : > { %3871 = vmatpush.bf16.msrb.mxu1 %v3818_v33 }
0x17b5   : > { %5318 = vmatpush.bf16.msk.msra.mxu2 %vm7746_vm12, %v5317_v10 }
0x17b7   : > { %v6135_v12 = vpop.permute.xlu1 %6134 }
0x17b8   : > { %v6115_v30 = vpop.permute.xlu0 %6114  ;;  %v6137_v40 = vunpack.i.h.bf16 %v6135_v12  ;;  %v6136_v41 = vunpack.i.l.bf16 %v6135_v12  ;;  %5333 = vmatpush.bf16.msk.msrb.mxu1 %vm7746_vm12, %v5332_v39 }
0x17b9   : > { %v6117_v44 = vunpack.i.h.bf16 %v6115_v30  ;;  %v6116_v52 = vunpack.i.l.bf16 %v6115_v30  ;;  %5321 = vmatpush.bf16.msk.msra.mxu2 %vm7833_vm3, %v5320_v34 }
0x17ba   : > { %v5335_v19 = vpack.c.bf16 %v6137_v40, %v6136_v41 }
0x17bb   : > { %v5323_v2 = vpack.c.bf16 %v6117_v44, %v6116_v52 }
0x17bc   : > { %5336 = vmatpush.bf16.msk.msrb.mxu1 %vm7746_vm12, %v5335_v19 }
0x17bd   : > { %5324 = vmatpush.bf16.msk.msra.mxu2 %vm7833_vm3, %v5323_v2 }
0x17bf   : > { %v6150_v37 = vpop.permute.xlu1 %6149 }
0x17c0   : > { %v6120_v45 = vpop.permute.xlu0 %6119  ;;  %v6152_v4 = vunpack.i.h.bf16 %v6150_v37  ;;  %v6151_v6 = vunpack.i.l.bf16 %v6150_v37  ;;  %v3990_v37 = vld [vmem:[%s8567_s2 + $0x8] sm:$0xff] }
0x17c1   : > { %v6122_v20 = vunpack.i.h.bf16 %v6120_v45  ;;  %v6121_v15 = vunpack.i.l.bf16 %v6120_v45 }
0x17c2   : > { %v5341_v46 = vpack.c.bf16 %v6152_v4, %v6151_v6 }
0x17c3   : > { %v3807_v53 = vpack.c.bf16 %v6122_v20, %v6121_v15  ;;  %v3989_v15 = vld [vmem:[%s8567_s2] sm:$0xff]  ;;  %s8569_s2 = sld [smem:[#allocation21_spill]] }
0x17c5   : > { %3860 = vmatpush.bf16.msra.mxu2 %v3807_v53 }
0x17c7   : > { %v6160_v23 = vpop.permute.xlu1 %6159 }
0x17c8   : > { %v6125_v59 = vpop.permute.xlu0 %6124  ;;  %v6162_v17 = vunpack.i.h.bf16 %v6160_v23  ;;  %v6161_v9 = vunpack.i.l.bf16 %v6160_v23 }
0x17c9   : > { %v6127_v1 = vunpack.i.h.bf16 %v6125_v59  ;;  %v6126_v3 = vunpack.i.l.bf16 %v6125_v59  ;;  %3861 = vmatpush.bf16.msra.mxu2 %v3806_v58 }
0x17ca   : > { %v3813_v16 = vpack.c.bf16 %v6162_v17, %v6161_v9 }
0x17cb   : > { %v5338_v8 = vpack.c.bf16 %v6127_v1, %v6126_v3 }
0x17cd   : > { %5327 = vmatpush.bf16.msk.msra.mxu2 %vm7746_vm12, %v5326_v24  ;;  %5339 = vmatpush.bf16.msk.msrb.mxu1 %vm7833_vm3, %v5338_v8  ;;  %v6167_v24 = vunpack.i.h.bf16 %v6165_v22 }
0x17cf   : > { %v3812_v62 = vpack.c.bf16 %v6167_v24, %v6166_v21  ;;  %v3836_v36 = vpop.permute.xlu1 %3835  ;;  %v5521_v24 = vld [vmem:[%s8568_s8 + $0x4] sm:$0xf]  ;;  %v5354_v21 = vld [vmem:[%s8568_s8 + $0x8] sm:$0xf0] }
0x17d0   : > { %v6155_v25 = vpop.permute.xlu0 %6154 }
0x17d1   : > { %v6157_v50 = vunpack.i.h.bf16 %v6155_v25  ;;  %v6156_v61 = vunpack.i.l.bf16 %v6155_v25  ;;  %5330 = vmatpush.bf16.msk.msra.mxu2 %vm7746_vm12, %v5329_v5  ;;  %5342 = vmatpush.bf16.msk.msrb.mxu1 %vm7833_vm3, %v5341_v46  ;;  %v5308_v5 = vor.u32 %v5518_v54, %v5305_v14 }
0x17d3   : > { %v5347_v7 = vpack.c.bf16 %v6157_v50, %v6156_v61 }
0x17d4   : > { %3864 = vmatmul.bf16.vlgmr.msra.gmra.mxu2 %v5304_v27 }
0x17d5   : > { %3876 = vmatpush.bf16.msrb.mxu1 %v3813_v16  ;;  %5348 = vmatpush.bf16.msk.msrb.mxu3 %vm7833_vm3, %v5347_v7 }
0x17d8   : > { %5349 = vmatmul.msk.bf16.vlgmr.msrb.gmra.mxu3 %vm2701_vm8, %v5312_v47  ;;  %v3831_v57 = vpop.permute.xlu0 %3830 }
0x17d9   : > { %3877 = vmatpush.bf16.msrb.mxu1 %v3812_v62  ;;  %v5357_v62 = vor.u32 %v5521_v24, %v5354_v21 }
0x17dc   : > { %3878 = vmatmul.bf16.vlgmr.msrb.gmra.mxu1 %v5308_v5 }
0x1857   : > { %v3865_v55 = vpop.f32.mrf.mxu2 }
0x1858   : > { %v3866_v60 = vadd.f32 %v3865_v55, %v3831_v57 }
0x1859   : > { %v3879_v13 = vpop.f32.mrf.mxu1 }
0x185a   : > { %v3880_v31 = vadd.f32 %v3879_v13, %v3866_v60  ;;  %v5352_v13 = vld [vmem:[%s8568_s8] sm:$0xf] }
0x185b   : > { %v3893_v32 = vpop.f32.mrf.mxu3 }
0x185c   : > { %v3894_v33 = vadd.f32 %v3893_v32, %v3880_v31  ;;  %v5522_v31 = vld [vmem:[%s8568_s8 + $0x4] sm:$0xf0] }
0x185d   : > { %v5353_v32 = vor.u32 %v5522_v31, %v5352_v13 }
0x185e   : > { %v3898_v63 = vmax.f32 %v3894_v33, 0.0 }
0x185f   : > { %v3867_v10 = vpop.f32.mrf.mxu2 }
0x1860   : > { %v3868_v39 = vadd.f32 %v3867_v10, %v3836_v36  ;;  %3906 = vrot.lane.b32.xlu2 %v3898_v63, %s8561_s0 }
0x1861   : > { %v3881_v34 = vpop.f32.mrf.mxu1 }
0x1862   : > { %v3882_v12 = vadd.f32 %v3881_v34, %v3868_v39 }
0x1863   : > { %v3895_v30 = vpop.f32.mrf.mxu3 }
0x1864   : > { %v3896_v40 = vadd.f32 %v3895_v30, %v3882_v12 }
0x1866   : > { %v3899_v41 = vmax.f32 %v3896_v40, 0.0 }
0x1868   : > { %3908 = vrot.lane.b32.xlu0 %v3899_v41, %s8561_s0 }
0x18ba   : > { %v3907_v44 = vpop.permute.xlu2 %3906 }
0x18bb   : > { %3912 = vst.msk [vmem:[#allocation2] sm:$0xff] %vm1941_vm1, %v3907_v44 }
0x18c2   : > { %v7875_v52 = vld [vmem:[#allocation2] sm:$0xff] }
0x18c3   : > { %4043 = vst.msk [vmem:[#allocation2] sm:$0xff] %vm1933_vm2, %v6495_v0 }
0x18c4   : > { %4045 = vst.msk [vmem:[#allocation2] sm:$0xff] %vm1935_vm11, %v6495_v0 }
0x18da   : > { %v3909_v19 = vpop.permute.xlu0 %3908 }
0x18db   : > { %3913 = vst.msk [vmem:[#allocation2 + $0x18] sm:$0xff] %vm1941_vm1, %v3909_v19 }
0x18e2   : > { %v7882_v2 = vld [vmem:[#allocation2 + $0x18] sm:$0xff] }
0x18e3   : > { %4044 = vst.msk [vmem:[#allocation2 + $0x18] sm:$0xff] %vm1933_vm2, %v6495_v0  ;;  %v6178_v45 = vpack.i.bf16 %v7882_v2, %v7875_v52  ;;  %v5371_v20 = vpack.c.bf16 %v7882_v2, %v7875_v52  ;;  %vm8572_vm2 = vcmask 1047688  }
0x18e4   : > { %4046 = vst.msk [vmem:[#allocation2 + $0x18] sm:$0xff] %vm1935_vm11, %v6495_v0  ;;  %vm8576_vm11 = vcmask 523264   ;;  %vm8583_vm8 = vmmov %vm8572_vm2 }
0x18e5   : > { %6179 = vrot.lane.b32.xlu0 %v6178_v45, %s8546_s1  ;;  %6174 = vrot.lane.b32.xlu2 %v6178_v45, %s8557_s7 }
0x18e6   : > { %6169 = vrot.lane.b32.xlu1 %v6178_v45, %s8556_s28 }
0x18ed   : > { %6194 = vrot.lane.b32.xlu0 %v6178_v45, %s8552_s5  ;;  %6189 = vrot.lane.b32.xlu2 %v6178_v45, %s8551_s3 }
0x18ee   : > { %6184 = vrot.lane.b32.xlu1 %v6178_v45, %s8548_s15 }
0x18f5   : > { %3993 = vperm.xlu0 %5630, %v3989_v15   ;;  %6204 = vrot.lane.b32.xlu2 %v6178_v45, %s8544_s26 }
0x18f6   : > { %6199 = vrot.lane.b32.xlu1 %v6178_v45, %s8563_s4 }
0x18fe   : > { %3998 = vperm.xlu1 %5727, %v3990_v37  }
0x193f   : > { %v6175_v48 = vpop.permute.xlu2 %6174 }
0x1940   : > { %v6177_v59 = vunpack.i.h.bf16 %v6175_v48  ;;  %v6176_v1 = vunpack.i.l.bf16 %v6175_v48  ;;  %v4131_v48 = vld [vmem:[%s8569_s2] sm:$0xff]  ;;  %s8578_s2 = smov 17  }
0x1942   : > { %v5359_v6 = vpack.c.bf16 %v6177_v59, %v6176_v1 }
0x1947   : > { %v6190_v49 = vpop.permute.xlu2 %6189 }
0x1948   : > { %v6192_v22 = vunpack.i.h.bf16 %v6190_v49  ;;  %v6191_v25 = vunpack.i.l.bf16 %v6190_v49 }
0x194a   : > { %v5365_v16 = vpack.c.bf16 %v6192_v22, %v6191_v25 }
0x194f   : > { %v6205_v14 = vpop.permute.xlu2 %6204 }
0x1950   : > { %v6207_v5 = vunpack.i.h.bf16 %v6205_v14  ;;  %v6206_v57 = vunpack.i.l.bf16 %v6205_v14 }
0x1952   : > { %v3979_v60 = vpack.c.bf16 %v6207_v5, %v6206_v57  ;;  %v4186_v5 = vld [vmem:[%s6713_s6 + $0x68] sm:$0xff]  ;;  %v4183_v57 = vld [vmem:[%s6713_s6 + $0x50] sm:$0xff] }
0x1957   : > { %v6180_v4 = vpop.permute.xlu0 %6179 }
0x1958   : > { %v6170_v51 = vpop.permute.xlu1 %6169  ;;  %v6182_v8 = vunpack.i.h.bf16 %v6180_v4  ;;  %v6181_v23 = vunpack.i.l.bf16 %v6180_v4 }
0x1959   : > { %v6172_v53 = vunpack.i.h.bf16 %v6170_v51  ;;  %v6171_v58 = vunpack.i.l.bf16 %v6170_v51  ;;  %v7948_v51 = vld [vmem:[#allocation2 + $0x28] sm:$0xff] }
0x195a   : > { %v5362_v46 = vpack.c.bf16 %v6182_v8, %v6181_v23 }
0x195b   : > { %v3985_v3 = vpack.c.bf16 %v6172_v53, %v6171_v58 }
0x195d   : > { %4013 = vmatpush.bf16.msrb.mxu0 %v3985_v3 }
0x195f   : > { %v6195_v50 = vpop.permute.xlu0 %6194 }
0x1960   : > { %v6185_v26 = vpop.permute.xlu1 %6184  ;;  %v6197_v7 = vunpack.i.h.bf16 %v6195_v50  ;;  %v6196_v47 = vunpack.i.l.bf16 %v6195_v50 }
0x1961   : > { %5360 = vmatpush.bf16.msk.msrb.mxu0 %vm7746_vm12, %v5359_v6  ;;  %v6187_v17 = vunpack.i.h.bf16 %v6185_v26  ;;  %v6186_v9 = vunpack.i.l.bf16 %v6185_v26 }
0x1962   : > { %v5368_v55 = vpack.c.bf16 %v6197_v7, %v6196_v47  ;;  %v4188_v7 = vld [vmem:[%s6713_s6 + $0x78] sm:$0xff]  ;;  %v4185_v47 = vld [vmem:[%s6713_s6 + $0x60] sm:$0xff] }
0x1963   : > { %v3982_v27 = vpack.c.bf16 %v6187_v17, %v6186_v9 }
0x1965   : > { %5363 = vmatpush.bf16.msk.msrb.mxu0 %vm7833_vm3, %v5362_v46 }
0x1967   : > { %v3994_v33 = vpop.permute.xlu0 %3993 }
0x1968   : > { %v6200_v61 = vpop.permute.xlu1 %6199 }
0x1969   : > { %v6202_v29 = vunpack.i.h.bf16 %v6200_v61  ;;  %v6201_v18 = vunpack.i.l.bf16 %v6200_v61  ;;  %4016 = vmatpush.bf16.msrb.mxu0 %v3982_v27 }
0x196b   : > { %v5374_v54 = vpack.c.bf16 %v6202_v29, %v6201_v18 }
0x196d   : > { %5366 = vmatpush.bf16.msk.msrb.mxu0 %vm7746_vm12, %v5365_v16  ;;  %5375 = vmatpush.bf16.msk.msrb.mxu2 %vm7833_vm3, %v5374_v54  ;;  %v4187_v16 = vld [vmem:[%s6713_s6 + $0x70] sm:$0xff] }
0x1970   : > { %5376 = vmatmul.msk.bf16.vlgmr.msrb.gmra.mxu2 %vm2416_vm13, %v5357_v62  ;;  %v3999_v12 = vpop.permute.xlu1 %3998 }
0x1971   : > { %5369 = vmatpush.bf16.msk.msrb.mxu0 %vm7833_vm3, %v5368_v55  ;;  %4200 = vmatpush.msra.mxu2 %v4187_v16  ;;  %v4184_v55 = vld [vmem:[%s6713_s6 + $0x58] sm:$0xff] }
0x1973   : > { %4201 = vmatpush.msra.mxu2 %v4185_v47 }
0x1975   : > { %4019 = vmatpush.bf16.msrb.mxu0 %v3979_v60  ;;  %v4181_v60 = vld [vmem:[%s6713_s6 + $0x40] sm:$0xff]  ;;  %4202 = vmatpush.msra.mxu2 %v4183_v57 }
0x1977   : > { %4203 = vmatpush.msra.mxu2 %v4181_v60 }
0x1979   : > { %5372 = vmatpush.bf16.msk.msrb.mxu0 %vm7746_vm12, %v5371_v20 }
0x197c   : > { %4021 = vmatmul.bf16.vlgmr.msrb.gmra.mxu0 %v5353_v32 }
0x197d   : > { %4220 = vmatpush.msra.mxu0 %v4188_v7 }
0x197f   : > { %4221 = vmatpush.msra.mxu0 %v4186_v5 }
0x1981   : > { %4222 = vmatpush.msra.mxu0 %v4184_v55 }
0x19f3   : > { %v4036_v36 = vpop.f32.mrf.mxu2 }
0x19f9   : > { %v4022_v63 = vpop.f32.mrf.mxu0 }
0x19fa   : > { %v4023_v10 = vadd.f32 %v4022_v63, %v3994_v33  ;;  %v4182_v33 = vld [vmem:[%s6713_s6 + $0x48] sm:$0xff] }
0x19fb   : > { %v4038_v41 = vpop.f32.mrf.mxu2  ;;  %4223 = vmatpush.msra.mxu0 %v4182_v33 }
0x19fc   : > { %v4037_v39 = vadd.f32 %v4036_v36, %v4023_v10 }
0x19fe   : > { %v4041_v34 = vmax.f32 %v4037_v39, 0.0 }
0x1a00   : > { %4049 = vrot.lane.b32.xlu2 %v4041_v34, %s8561_s0 }
0x1a01   : > { %v4024_v30 = vpop.f32.mrf.mxu0 }
0x1a02   : > { %v4025_v40 = vadd.f32 %v4024_v30, %v3999_v12 }
0x1a04   : > { %v4039_v44 = vadd.f32 %v4038_v41, %v4025_v40 }
0x1a06   : > { %v4042_v52 = vmax.f32 %v4039_v44, 0.0 }
0x1a08   : > { %4051 = vrot.lane.b32.xlu0 %v4042_v52, %s8561_s0  ;;  %s8574_s0 = smov 96  }
0x1a5a   : > { %v4050_v19 = vpop.permute.xlu2 %4049 }
0x1a5b   : > { %4055 = vst.msk [vmem:[#allocation2] sm:$0xff] %vm1941_vm1, %v4050_v19 }
0x1a62   : > { %v7922_v2 = vld [vmem:[#allocation2] sm:$0xff] }
0x1a63   : > { %4232 = vst.msk [vmem:[#allocation2] sm:$0xff] %vm8570_vm4, %v6495_v0 }
0x1a7a   : > { %v4052_v45 = vpop.permute.xlu0 %4051 }
0x1a7b   : > { %4056 = vst.msk [vmem:[#allocation2 + $0x18] sm:$0xff] %vm1941_vm1, %v4052_v45  ;;  %v4179_v45 = vld [vmem:[%s6713_s6 + $0x30] sm:$0xff]  ;;  %vm8577_vm1 = vmmov %vm8576_vm11 }
0x1a7c   : > { %4204 = vmatpush.msra.mxu2 %v4179_v45 }
0x1a7e   : > { %4205 = vmatpush.msra.mxu2 %v4177_v28 }
0x1a82   : > { %v7927_v20 = vld [vmem:[#allocation2 + $0x18] sm:$0xff] }
0x1a83   : > { %4233 = vst.msk [vmem:[#allocation2 + $0x18] sm:$0xff] %vm8571_vm14, %v6495_v0  ;;  %v6218_v15 = vpack.i.bf16 %v7927_v20, %v7922_v2  ;;  %v5390_v37 = vpack.c.bf16 %v7927_v20, %v7922_v2  ;;  %v4173_v2 = vld [vmem:[%s6713_s6] sm:$0xff]  ;;  %vm8073_vm14 = vmpackc.low %vm6784_vm7, %vm6784_vm7 }
0x1a84   : > { %4249 = vst.msk [vmem:[#allocation2 + $0x18] sm:$0xff] %vm8572_vm2, %v7056_v11  ;;  %v7946_v11 = vld [vmem:[#allocation2 + $0x20] sm:$0xff]  ;;  %vm8590_vm2 = vcmask 777216  }
0x1a85   : > { %6219 = vrot.lane.b32.xlu0 %v6218_v15, %s8546_s1  ;;  %6214 = vrot.lane.b32.xlu2 %v6218_v15, %s8557_s7  ;;  %s8573_s1 = sld [smem:[#allocation20_spill]]  ;;  %v7952_v53 = vpack.i.bf16 %v7948_v51, %v7946_v11 }
0x1a86   : > { %6209 = vrot.lane.b32.xlu1 %v6218_v15, %s8556_s28 }
0x1a8b   : > { %v7958_v58 = vld [vmem:[#allocation2 + $0x18] sm:$0xff] }
0x1a8c   : > { %v6263_v59 = vpack.i.bf16 %v7946_v11, %v7958_v58  ;;  %v4130_v49 = vld [vmem:[%s8573_s1] sm:$0xff]  ;;  %s8584_s1 = sld [smem:[#allocation23_spill]] }
0x1a8d   : > { %6234 = vrot.lane.b32.xlu0 %v6218_v15, %s8552_s5  ;;  %6229 = vrot.lane.b32.xlu2 %v6218_v15, %s8551_s3  ;;  %s8575_s3 = smov 94   ;;  %v4139_v9 = vunpack.c.h.b16 %v4130_v49  ;;  %v4138_v44 = vunpack.c.l.b16 %v4130_v49 }
0x1a8e   : > { %6224 = vrot.lane.b32.xlu1 %v6218_v15, %s8548_s15  ;;  %s8579_s15 = smov 95  }
0x1a8f   : > { %v4141_v50 = vpack.c.b16 %v4139_v9, %v4139_v9  ;;  %v4140_v52 = vpack.c.b16 %v4138_v44, %v4138_v44 }
0x1a95   : > { %4134 = vperm.xlu0 %5630, %v4131_v48   ;;  %6244 = vrot.lane.b32.xlu2 %v6218_v15, %s8563_s4  ;;  %v4178_v48 = vld [vmem:[%s6713_s6 + $0x28] sm:$0xff] }
0x1a96   : > { %6239 = vrot.lane.b32.xlu1 %v6218_v15, %s8544_s26  ;;  %v4180_v15 = vld [vmem:[%s6713_s6 + $0x38] sm:$0xff] }
0x1a97   : > { %4224 = vmatpush.msra.mxu0 %v4180_v15 }
0x1a99   : > { %4225 = vmatpush.msra.mxu0 %v4178_v48 }
0x1a9d   : > { %6254 = vrot.lane.b32.xlu0 %v7952_v53, %s8574_s0 }
0x1aa5   : > { %6259 = vrot.lane.b32.xlu0 %v7952_v53, %s8563_s4 }
0x1aad   : > { %6264 = vrot.lane.b32.xlu0 %v6263_v59, %s8575_s3 }
0x1adf   : > { %v6215_v1 = vpop.permute.xlu2 %6214 }
0x1ae0   : > { %v6217_v22 = vunpack.i.h.bf16 %v6215_v1  ;;  %v6216_v25 = vunpack.i.l.bf16 %v6215_v1  ;;  %v4175_v1 = vld [vmem:[%s6713_s6 + $0x10] sm:$0xff] }
0x1ae1   : > { %4206 = vmatpush.msra.mxu2 %v4175_v1 }
0x1ae2   : > { %v5378_v29 = vpack.c.bf16 %v6217_v22, %v6216_v25 }
0x1ae3   : > { %4207 = vmatpush.msra.mxu2 %v4173_v2 }
0x1ae7   : > { %v6230_v3 = vpop.permute.xlu2 %6229 }
0x1ae8   : > { %v6232_v13 = vunpack.i.h.bf16 %v6230_v3  ;;  %v6231_v31 = vunpack.i.l.bf16 %v6230_v3  ;;  %v4176_v3 = vld [vmem:[%s6713_s6 + $0x18] sm:$0xff] }
0x1ae9   : > { %4226 = vmatpush.msra.mxu0 %v4176_v3 }
0x1aea   : > { %v5384_v36 = vpack.c.bf16 %v6232_v13, %v6231_v31 }
0x1aeb   : > { %4227 = vmatpush.msra.mxu0 %v4174_v56 }
0x1aef   : > { %v6245_v4 = vpop.permute.xlu2 %6244 }
0x1af0   : > { %v6247_v6 = vunpack.i.h.bf16 %v6245_v4  ;;  %v6246_v8 = vunpack.i.l.bf16 %v6245_v4 }
0x1af2   : > { %v5393_v23 = vpack.c.bf16 %v6247_v6, %v6246_v8 }
0x1af4   : > { %5394 = vmatpush.bf16.msk.msra.mxu1 %vm7833_vm3, %v5393_v23 }
0x1af7   : > { %v6220_v61 = vpop.permute.xlu0 %6219  ;;  %5395 = vmatmul.msk.bf16.vlgmr.msra.gmra.mxu1 %vm2416_vm13, %v4141_v50 }
0x1af8   : > { %v6210_v26 = vpop.permute.xlu1 %6209  ;;  %v6222_v18 = vunpack.i.h.bf16 %v6220_v61  ;;  %v6221_v24 = vunpack.i.l.bf16 %v6220_v61 }
0x1af9   : > { %v6212_v46 = vunpack.i.h.bf16 %v6210_v26  ;;  %v6211_v17 = vunpack.i.l.bf16 %v6210_v26 }
0x1afa   : > { %v5381_v54 = vpack.c.bf16 %v6222_v18, %v6221_v24 }
0x1afb   : > { %v4128_v27 = vpack.c.bf16 %v6212_v46, %v6211_v17 }
0x1afd   : > { %4146 = vmatpush.bf16.msra.mxu3 %v4128_v27 }
0x1aff   : > { %v6235_v63 = vpop.permute.xlu0 %6234 }
0x1b00   : > { %v6225_v21 = vpop.permute.xlu1 %6224  ;;  %v6237_v10 = vunpack.i.h.bf16 %v6235_v63  ;;  %v6236_v39 = vunpack.i.l.bf16 %v6235_v63 }
0x1b01   : > { %5379 = vmatpush.bf16.msk.msra.mxu3 %vm7746_vm12, %v5378_v29  ;;  %v6227_v14 = vunpack.i.h.bf16 %v6225_v21  ;;  %v6226_v62 = vunpack.i.l.bf16 %v6225_v21  ;;  %v4467_v29 = vld [vmem:[%s8584_s1] sm:$0xff]  ;;  %s8593_s1 = sld [smem:[#allocation22_spill]] }
0x1b02   : > { %v5387_v12 = vpack.c.bf16 %v6237_v10, %v6236_v39 }
0x1b03   : > { %v4125_v32 = vpack.c.bf16 %v6227_v14, %v6226_v62 }
0x1b05   : > { %5382 = vmatpush.bf16.msk.msra.mxu3 %vm7833_vm3, %v5381_v54 }
0x1b07   : > { %v4135_v20 = vpop.permute.xlu0 %4134 }
0x1b08   : > { %v6240_v34 = vpop.permute.xlu1 %6239 }
0x1b09   : > { %4149 = vmatpush.bf16.msra.mxu3 %v4125_v32  ;;  %v6242_v30 = vunpack.i.h.bf16 %v6240_v34  ;;  %v6241_v40 = vunpack.i.l.bf16 %v6240_v34 }
0x1b0b   : > { %v4122_v41 = vpack.c.bf16 %v6242_v30, %v6241_v40 }
0x1b0d   : > { %5385 = vmatpush.bf16.msk.msra.mxu3 %vm7746_vm12, %v5384_v36 }
0x1b0f   : > { %v8046_v21 = vpop.permute.xlu0 %6254 }
0x1b10   : > { %v6257_v40 = vunpack.i.h.bf16 %v8046_v21 }
0x1b11   : > { %5388 = vmatpush.bf16.msk.msra.mxu3 %vm7833_vm3, %v5387_v12  ;;  %vm8586_vm3 = vcmask 769024  }
0x1b12   : > { %vm8587_vm4 = vmmov %vm8586_vm3 }
0x1b15   : > { %4152 = vmatpush.bf16.msra.mxu3 %v4122_v41  ;;  %v6256_v41 = vunpack.i.l.bf16 %v8046_v21 }
0x1b17   : > { %v8052_v7 = vpop.permute.xlu0 %6259 }
0x1b18   : > { %v6261_v1 = vunpack.i.l.bf16 %v8052_v7 }
0x1b19   : > { %5391 = vmatpush.bf16.msk.msra.mxu3 %vm7746_vm12, %v5390_v37  ;;  %vm8585_vm12 = vmmov %vm8582_vm0 }
0x1b1c   : > { %4154 = vmatmul.bf16.vlgmr.msra.gmra.mxu3 %v4140_v52 }
0x1b1f   : > { %v8056_v47 = vpop.permute.xlu0 %6264 }
0x1b20   : > { %v6267_v54 = vunpack.i.h.bf16 %v8056_v47  ;;  %v6266_v14 = vunpack.i.l.bf16 %v8056_v47 }
0x1b22   : > { %v4378_v55 = vsel %vm8586_vm3, %v6266_v14, %v6267_v54 }
0x1b74   : > { %v4168_v19 = vpop.f32.mrf.mxu1 }
0x1b7c   : > { %v4170_v59 = vpop.f32.mrf.mxu1 }
0x1b7d   : > { %v6262_v59 = vunpack.i.h.bf16 %v8052_v7 }
0x1b9f   : > { %v4155_v37 = vpop.f32.mrf.mxu3 }
0x1ba0   : > { %v4156_v4 = vadd.f32 %v4155_v37, %v4135_v20 }
0x1ba2   : > { %v4169_v6 = vadd.f32 %v4168_v19, %v4156_v4 }
0x1ba4   : > { %v4172_v8 = vmax.f32 %v4169_v6, 0.0 }
0x1ba6   : > { %5396 = vmatmul.msk.f32.vlgmr.msra.gmra.mxu2 %vm8576_vm11, %v4172_v8  ;;  %5397 = vmatmul.msk.f32.vlgmr.msra.gmra.mxu0 %vm8577_vm1, %v4172_v8  ;;  %vm8591_vm11 = vmmov %vm8590_vm2  ;;  %vm8592_vm1 = vcmask 785408  }
0x1ba7   : > { %v4157_v23 = vpop.f32.mrf.mxu3 }
0x1ba8   : > { %v8104_v23 = vld [vmem:[%s8593_s1] sm:$0xff]  ;;  %s8631_s1 = sld [smem:[#allocation25_spill]] }
0x1c23   : > { %v4229_v26 = vpop.f32.mrf.mxu0 }
0x1c24   : > { %4240 = vrot.lane.b32.xlu2 %v4229_v26, %s8578_s2 }
0x1c29   : > { %v4209_v49 = vpop.f32.mrf.mxu2 }
0x1c2a   : > { %4238 = vrot.lane.b32.xlu1 %v4209_v49, %s8578_s2 }
0x1c2c   : > { %6269 = vrot.lane.b32.xlu2 %v7952_v53, %s8556_s28 }
0x1c32   : > { %6249 = vrot.lane.b32.xlu1 %v7952_v53, %s8579_s15 }
0x1c34   : > { %6294 = vrot.lane.b32.xlu2 %v7952_v53, %s8557_s7 }
0x1c7e   : > { %v4241_v46 = vpop.permute.xlu2 %4240 }
0x1c7f   : > { %4248 = vst.msk [vmem:[#allocation2 + $0x10] sm:$0xff] %vm8580_vm5, %v4241_v46  ;;  %vm8594_vm5 = vmmov %vm8592_vm1 }
0x1c80   : > { %v4355_v48 = vsel %vm8594_vm5, %v6256_v41, %v6257_v40  ;;  %vm8607_vm5 = vcmask 769024  }
0x1c86   : > { %v4260_v17 = vld [vmem:[#allocation2 + $0x10] sm:$0xff]  ;;  %v8044_v24 = vpop.permute.xlu2 %6269 }
0x1c87   : > { %4537 = vst.msk [vmem:[#allocation2 + $0x10] sm:$0xff] %vm8581_vm15, %v6495_v0  ;;  %v6363_v18 = vpack.i.bf16 %v7948_v51, %v4260_v17  ;;  %vm8096_vm15 = vmpackc.low %vm6794_vm10, %vm6794_vm10  ;;  %v6271_v40 = vunpack.i.l.bf16 %v8044_v24 }
0x1c8e   : > { %v8048_v16 = vpop.permute.xlu2 %6294 }
0x1c9c   : > { %v4239_v9 = vpop.permute.xlu1 %4238 }
0x1c9d   : > { %v8010_v22 = vsel %vm8582_vm0, %v4239_v9, %v4241_v46  ;;  %4246 = vst.msk [vmem:[#allocation2] sm:$0xff] %vm8583_vm8, %v4239_v9  ;;  %vm8597_vm0 = vcmask 900096   ;;  %vm8598_vm8 = vmmov %vm8590_vm2  ;;  %v4475_v46 = vunpack.c.h.b16 %v8104_v23 }
0x1c9e   : > { %v6303_v25 = vpack.i.bf16 %v4260_v17, %v8010_v22  ;;  %vm8600_vm3 = vmmov %vm8597_vm0  ;;  %v5430_v13 = vpack.c.bf16 %v7946_v11, %v8010_v22 }
0x1c9f   : > { %v4331_v17 = vsel %vm8600_vm3, %v6261_v1, %v6262_v59  ;;  %v6297_v59 = vunpack.i.h.bf16 %v8048_v16 }
0x1ca0   : > { %6304 = vrot.lane.b32.xlu2 %v6303_v25, %s8574_s0  ;;  %6284 = vrot.lane.b32.xlu0 %v6303_v25, %s8579_s15 }
0x1ca4   : > { %v8016_v27 = vld [vmem:[#allocation2] sm:$0xff]  ;;  %v6250_v31 = vpop.permute.xlu1 %6249 }
0x1ca5   : > { %v6273_v50 = vpack.i.bf16 %v7958_v58, %v8016_v27  ;;  %4536 = vst.msk [vmem:[#allocation2] sm:$0xff] %vm8585_vm12, %v6495_v0  ;;  %v6313_v61 = vpack.i.bf16 %v8010_v22, %v8016_v27  ;;  %v6252_v33 = vunpack.i.h.bf16 %v6250_v31  ;;  %v6251_v63 = vunpack.i.l.bf16 %v6250_v31  ;;  %vm8599_vm12 = vmmov %vm8590_vm2 }
0x1ca7   : > { %6274 = vrot.lane.b32.xlu1 %v6273_v50, %s8579_s15  ;;  %v4443_v44 = vsel %vm8590_vm2, %v6251_v63, %v6252_v33  ;;  %vm8603_vm2 = vmmov %vm8592_vm1 }
0x1ca8   : > { %6309 = vrot.lane.b32.xlu2 %v6303_v25, %s8563_s4  ;;  %6289 = vrot.lane.b32.xlu0 %v6273_v50, %s8563_s4 }
0x1caf   : > { %6279 = vrot.lane.b32.xlu1 %v6273_v50, %s8574_s0 }
0x1cb0   : > { %6314 = vrot.lane.b32.xlu2 %v6313_v61, %s8575_s3  ;;  %6299 = vrot.lane.b32.xlu0 %v6273_v50, %s8556_s28  ;;  %v4477_v61 = vpack.c.b16 %v4475_v46, %v4475_v46 }
0x1cb7   : > { %6339 = vrot.lane.b32.xlu1 %v6303_v25, %s8556_s28 }
0x1cb8   : > { %6319 = vrot.lane.b32.xlu2 %v7952_v53, %s8552_s5  ;;  %6324 = vrot.lane.b32.xlu0 %v6273_v50, %s8557_s7 }
0x1cbf   : > { %6344 = vrot.lane.b32.xlu1 %v6303_v25, %s8557_s7 }
0x1cc0   : > { %6329 = vrot.lane.b32.xlu2 %v7952_v53, %s8544_s26  ;;  %6334 = vrot.lane.b32.xlu0 %v6273_v50, %s8552_s5 }
0x1cc7   : > { %6349 = vrot.lane.b32.xlu1 %v6303_v25, %s8552_s5 }
0x1cc8   : > { %6364 = vrot.lane.b32.xlu2 %v6363_v18, %s8575_s3  ;;  %4470 = vperm.xlu0 %5630, %v4467_v29  }
0x1ccf   : > { %6354 = vrot.lane.b32.xlu1 %v6303_v25, %s8544_s26 }
0x1cd7   : > { %6359 = vrot.lane.b32.xlu1 %v6273_v50, %s8544_s26 }
0x1cfa   : > { %v8050_v53 = vpop.permute.xlu2 %6304 }
0x1cfb   : > { %v6307_v39 = vunpack.i.h.bf16 %v8050_v53  ;;  %v6306_v34 = vunpack.i.l.bf16 %v8050_v53 }
0x1cfd   : > { %v4353_v45 = vsel %vm8592_vm1, %v6306_v34, %v6307_v39 }
0x1cfe   : > { %v5418_v56 = vpack.c.bf16 %v4355_v48, %v4353_v45 }
0x1d02   : > { %v8054_v51 = vpop.permute.xlu2 %6309 }
0x1d03   : > { %v6312_v15 = vunpack.i.h.bf16 %v8054_v51  ;;  %v6311_v28 = vunpack.i.l.bf16 %v8054_v51 }
0x1d05   : > { %v4329_v8 = vsel %vm8597_vm0, %v6311_v28, %v6312_v15  ;;  %vm8608_vm0 = vmmov %vm8607_vm5 }
0x1d06   : > { %v5421_v50 = vpack.c.bf16 %v4331_v17, %v4329_v8 }
0x1d0a   : > { %v8060_v62 = vpop.permute.xlu2 %6314 }
0x1d0b   : > { %v6317_v5 = vunpack.i.h.bf16 %v8060_v62  ;;  %v6316_v57 = vunpack.i.l.bf16 %v8060_v62 }
0x1d0d   : > { %v4376_v60 = vsel %vm8587_vm4, %v6316_v57, %v6317_v5  ;;  %vm8115_vm4 = vmpackc.low %vm6780_vm6, %vm6780_vm6 }
0x1d0e   : > { %v5414_v32 = vpack.c.bf16 %v4378_v55, %v4376_v60 }
0x1d10   : > { %5415 = vmatpush.bf16.msk.msrb.mxu2 %vm8073_vm14, %v5414_v32 }
0x1d12   : > { %v8079_v36 = vpop.permute.xlu2 %6319  ;;  %v6285_v10 = vpop.permute.xlu0 %6284 }
0x1d13   : > { %v6287_v12 = vunpack.i.h.bf16 %v6285_v10  ;;  %v6286_v30 = vunpack.i.l.bf16 %v6285_v10  ;;  %5416 = vmatmul.msk.bf16.vlgmr.msrb.gmra.mxu2 %vm2416_vm13, %v4477_v61 }
0x1d15   : > { %v4441_v52 = vsel %vm8591_vm11, %v6286_v30, %v6287_v12  ;;  %vm8604_vm11 = vmmov %vm8592_vm1 }
0x1d16   : > { %v4463_v19 = vpack.c.bf16 %v4443_v44, %v4441_v52  ;;  %vm8127_vm1 = vmpackc.low %vm6790_vm9, %vm6790_vm9 }
0x1d18   : > { %4508 = vmatpush.bf16.msra.mxu2 %v4463_v19 }
0x1d19   : > { %v6275_v3 = vpop.permute.xlu1 %6274 }
0x1d1a   : > { %v6277_v20 = vunpack.i.h.bf16 %v6275_v3  ;;  %v6276_v37 = vunpack.i.l.bf16 %v6275_v3  ;;  %v8100_v4 = vpop.permute.xlu2 %6329  ;;  %v6290_v6 = vpop.permute.xlu0 %6289 }
0x1d1b   : > { %v6292_v53 = vunpack.i.h.bf16 %v6290_v6  ;;  %v6291_v7 = vunpack.i.l.bf16 %v6290_v6 }
0x1d1c   : > { %v4442_v26 = vsel %vm8598_vm8, %v6277_v20, %v6251_v63  ;;  %v4440_v49 = vsel %vm8599_vm12, %v6276_v37, %v6286_v30  ;;  %5419 = vmatpush.bf16.msk.msra.mxu2 %vm8096_vm15, %v5418_v56  ;;  %vm8609_vm8 = vmmov %vm8600_vm3  ;;  %v6272_v30 = vunpack.i.h.bf16 %v8044_v24 }
0x1d1d   : > { %v4462_v9 = vpack.c.bf16 %v4442_v26, %v4440_v49  ;;  %v4330_v39 = vsel %vm8609_vm8, %v6292_v53, %v6261_v1  ;;  %vm8610_vm12 = vmmov %vm8600_vm3  ;;  %vm8611_vm3 = vcmask 908288   ;;  %v6296_v1 = vunpack.i.l.bf16 %v8048_v16 }
0x1d1e   : > { %v6322_v16 = vunpack.i.h.bf16 %v8079_v36 }
0x1d1f   : > { %4482 = vmatpush.bf16.msrb.mxu1 %v4462_v9 }
0x1d20   : > { %5422 = vmatpush.bf16.msk.msra.mxu2 %vm8115_vm4, %v5421_v50 }
0x1d21   : > { %v6280_v29 = vpop.permute.xlu1 %6279 }
0x1d22   : > { %v6282_v18 = vunpack.i.h.bf16 %v6280_v29  ;;  %v6281_v21 = vunpack.i.l.bf16 %v6280_v29  ;;  %v6365_v51 = vpop.permute.xlu2 %6364  ;;  %v6300_v14 = vpop.permute.xlu0 %6299 }
0x1d23   : > { %v6367_v57 = vunpack.i.h.bf16 %v6365_v51  ;;  %v6366_v55 = vunpack.i.l.bf16 %v6365_v51  ;;  %v6301_v44 = vunpack.i.l.bf16 %v6300_v14 }
0x1d24   : > { %v4354_v60 = vsel %vm8603_vm2, %v6282_v18, %v6256_v41  ;;  %v4352_v31 = vsel %vm8604_vm11, %v6281_v21, %v6306_v34  ;;  %v4328_v34 = vsel %vm8610_vm12, %v6291_v7, %v6311_v28  ;;  %v6302_v41 = vunpack.i.h.bf16 %v6300_v14  ;;  %vm8612_vm2 = vmmov %vm8611_vm3 }
0x1d25   : > { %v5399_v33 = vpack.c.bf16 %v4354_v60, %v4352_v31  ;;  %v4379_v63 = vsel %vm8607_vm5, %v6267_v54, %v6367_v57  ;;  %v4377_v10 = vsel %vm8608_vm0, %v6317_v5, %v6366_v55  ;;  %v5402_v47 = vpack.c.bf16 %v4330_v39, %v4328_v34  ;;  %vm8613_vm11 = vmmov %vm8612_vm2 }
0x1d26   : > { %v5433_v12 = vpack.c.bf16 %v4379_v63, %v4377_v10  ;;  %v4423_v45 = vsel %vm8612_vm2, %v6271_v40, %v6272_v30  ;;  %vm8614_vm5 = vmmov %vm8612_vm2 }
0x1d27   : > { %5400 = vmatpush.bf16.msk.msrb.mxu1 %vm8127_vm1, %v5399_v33  ;;  %v4422_v15 = vsel %vm8614_vm5, %v6302_v41, %v6271_v40  ;;  %v6331_v33 = vunpack.i.l.bf16 %v8100_v4  ;;  %v4474_v40 = vunpack.c.l.b16 %v8104_v23  ;;  %v5411_v23 = vpack.c.bf16 %v7958_v58, %v8016_v27 }
0x1d28   : > { %5434 = vmatpush.bf16.msk.msrb.mxu0 %vm8115_vm4, %v5433_v12 }
0x1d29   : > { %v6340_v54 = vpop.permute.xlu1 %6339 }
0x1d2a   : > { %v6342_v62 = vunpack.i.h.bf16 %v6340_v54  ;;  %v6341_v5 = vunpack.i.l.bf16 %v6340_v54  ;;  %v6325_v52 = vpop.permute.xlu0 %6324  ;;  %v4476_v54 = vpack.c.b16 %v4474_v40, %v4474_v40 }
0x1d2b   : > { %5403 = vmatpush.bf16.msk.msrb.mxu1 %vm8073_vm14, %v5402_v47  ;;  %5435 = vmatmul.msk.bf16.vlgmr.msrb.gmra.mxu0 %vm2416_vm13, %v4477_v61  ;;  %v6327_v3 = vunpack.i.h.bf16 %v6325_v52  ;;  %v6326_v6 = vunpack.i.l.bf16 %v6325_v52  ;;  %vm8615_vm13 = vcmask 916480   ;;  %v6321_v61 = vunpack.i.l.bf16 %v8079_v36 }
0x1d2c   : > { %v4421_v19 = vsel %vm8611_vm3, %v6341_v5, %v6342_v62  ;;  %v4420_v24 = vsel %vm8613_vm11, %v6301_v44, %v6341_v5  ;;  %v4307_v8 = vsel %vm8615_vm13, %v6296_v1, %v6297_v59  ;;  %vm8616_vm0 = vmmov %vm8615_vm13  ;;  %vm8619_vm3 = vcmask 1031168  }
0x1d2d   : > { %v4457_v28 = vpack.c.bf16 %v4423_v45, %v4421_v19  ;;  %v4456_v48 = vpack.c.bf16 %v4422_v15, %v4420_v24  ;;  %vm8617_vm8 = vmmov %vm8616_vm0  ;;  %v4283_v51 = vsel %vm8619_vm3, %v6321_v61, %v6322_v16  ;;  %v6332_v36 = vunpack.i.h.bf16 %v8100_v4 }
0x1d2e   : > { %v4306_v49 = vsel %vm8617_vm8, %v6327_v3, %v6296_v1  ;;  %vm8618_vm12 = vmmov %vm8616_vm0  ;;  %vm8623_vm13 = vcmask 1039360   ;;  %vm8629_vm8 = vcmask 1047688  }
0x1d2f   : > { %4511 = vmatpush.bf16.msra.mxu2 %v4457_v28  ;;  %4485 = vmatpush.bf16.msrb.mxu1 %v4456_v48  ;;  %vm8620_vm2 = vmmov %vm8619_vm3 }
0x1d30   : > { %vm8621_vm11 = vmmov %vm8620_vm2 }
0x1d31   : > { %v6345_v56 = vpop.permute.xlu1 %6344  ;;  %vm8622_vm5 = vmmov %vm8620_vm2 }
0x1d32   : > { %v6347_v20 = vunpack.i.h.bf16 %v6345_v56  ;;  %v6346_v37 = vunpack.i.l.bf16 %v6345_v56  ;;  %v6335_v50 = vpop.permute.xlu0 %6334 }
0x1d33   : > { %v6337_v29 = vunpack.i.h.bf16 %v6335_v50  ;;  %v6336_v7 = vunpack.i.l.bf16 %v6335_v50 }
0x1d34   : > { %v4305_v26 = vsel %vm8616_vm0, %v6346_v37, %v6347_v20  ;;  %v4304_v46 = vsel %vm8618_vm12, %v6326_v6, %v6346_v37  ;;  %vm8624_vm0 = vmmov %vm8623_vm13 }
0x1d35   : > { %v5424_v17 = vpack.c.bf16 %v4307_v8, %v4305_v26  ;;  %v5405_v9 = vpack.c.bf16 %v4306_v49, %v4304_v46  ;;  %v4282_v57 = vsel %vm8621_vm11, %v6337_v29, %v6321_v61  ;;  %v4403_v12 = vsel %vm8624_vm0, %v6331_v33, %v6332_v36 }
0x1d37   : > { %5425 = vmatpush.bf16.msk.msra.mxu2 %vm8096_vm15, %v5424_v17  ;;  %5406 = vmatpush.bf16.msk.msrb.mxu1 %vm8127_vm1, %v5405_v9 }
0x1d39   : > { %v6350_v18 = vpop.permute.xlu1 %6349 }
0x1d3a   : > { %v6352_v21 = vunpack.i.h.bf16 %v6350_v18  ;;  %v6351_v53 = vunpack.i.l.bf16 %v6350_v18  ;;  %v4471_v2 = vpop.permute.xlu0 %4470 }
0x1d3c   : > { %v4281_v14 = vsel %vm8620_vm2, %v6351_v53, %v6352_v21  ;;  %v4280_v55 = vsel %vm8622_vm5, %v6336_v7, %v6351_v53  ;;  %vm8633_vm2 = vcmask 769024   ;;  %vm8635_vm5 = vcmask 1043456  }
0x1d3d   : > { %v5427_v60 = vpack.c.bf16 %v4283_v51, %v4281_v14  ;;  %v5408_v31 = vpack.c.bf16 %v4282_v57, %v4280_v55  ;;  %vm8634_vm11 = vmmov %vm8633_vm2 }
0x1d3f   : > { %5428 = vmatpush.bf16.msk.msra.mxu2 %vm8115_vm4, %v5427_v60  ;;  %5409 = vmatpush.bf16.msk.msrb.mxu1 %vm8073_vm14, %v5408_v31  ;;  %vm8625_vm14 = vmmov %vm8624_vm0 }
0x1d40   : > { %vm8626_vm4 = vmmov %vm8624_vm0  ;;  %vm8637_vm0 = vmmov 1  }
0x1d41   : > { %v6355_v63 = vpop.permute.xlu1 %6354 }
0x1d42   : > { %v6357_v10 = vunpack.i.h.bf16 %v6355_v63  ;;  %v6356_v39 = vunpack.i.l.bf16 %v6355_v63 }
0x1d44   : > { %v4401_v34 = vsel %vm8623_vm13, %v6356_v39, %v6357_v10  ;;  %vm8636_vm13 = vmmov %vm8635_vm5 }
0x1d45   : > { %v4451_v30 = vpack.c.bf16 %v4403_v12, %v4401_v34 }
0x1d47   : > { %4514 = vmatpush.bf16.msra.mxu2 %v4451_v30 }
0x1d49   : > { %v6360_v25 = vpop.permute.xlu1 %6359 }
0x1d4a   : > { %v6362_v41 = vunpack.i.h.bf16 %v6360_v25  ;;  %v6361_v47 = vunpack.i.l.bf16 %v6360_v25 }
0x1d4b   : > { %5431 = vmatpush.bf16.msk.msra.mxu2 %vm8096_vm15, %v5430_v13  ;;  %vm8627_vm15 = vcmask 138240  }
0x1d4c   : > { %v4400_v4 = vsel %vm8625_vm14, %v6361_v47, %v6356_v39  ;;  %v4402_v62 = vsel %vm8626_vm4, %v6362_v41, %v6331_v33  ;;  %vm8630_vm12 = vmmov %vm8627_vm15  ;;  %vm8640_vm4 = vcmask 785408  }
0x1d4d   : > { %v4450_v5 = vpack.c.bf16 %v4402_v62, %v4400_v4  ;;  %vm8632_vm3 = vmmov %vm8630_vm12 }
0x1d4e   : > { %4516 = vmatmul.bf16.vlgmr.msra.gmra.mxu2 %v4476_v54  ;;  %vm8230_vm14 = vmpackc.low %vm8637_vm0, %vm6790_vm9 }
0x1d4f   : > { %4488 = vmatpush.bf16.msrb.mxu1 %v4450_v5 }
0x1d53   : > { %5412 = vmatpush.bf16.msk.msrb.mxu1 %vm8127_vm1, %v5411_v23  ;;  %vm8628_vm1 = vcmask 277640  }
0x1d56   : > { %4490 = vmatmul.bf16.vlgmr.msrb.gmra.mxu1 %v4476_v54 }
0x1d96   : > { %v4504_v11 = vpop.f32.mrf.mxu2 }
0x1d9e   : > { %v4506_v22 = vpop.f32.mrf.mxu2 }
0x1da8   : > { %v4530_v44 = vpop.f32.mrf.mxu0 }
0x1db0   : > { %v4532_v52 = vpop.f32.mrf.mxu0 }
0x1dd1   : > { %v4517_v19 = vpop.f32.mrf.mxu2 }
0x1dd2   : > { %v4518_v45 = vadd.f32 %v4517_v19, %v4471_v2 }
0x1dd3   : > { %v4491_v24 = vpop.f32.mrf.mxu1 }
0x1dd4   : > { %v4492_v15 = vadd.f32 %v4491_v24, %v4471_v2  ;;  %v4531_v28 = vadd.f32 %v4530_v44, %v4518_v45 }
0x1dd6   : > { %v4505_v48 = vadd.f32 %v4504_v11, %v4492_v15  ;;  %v4535_v59 = vmax.f32 %v4531_v28, 0.0 }
0x1dd8   : > { %v4534_v1 = vmax.f32 %v4505_v48, 0.0  ;;  %4542 = vrot.lane.b32.xlu2 %v4535_v59, %s8578_s2 }
0x1dd9   : > { %v4519_v58 = vpop.f32.mrf.mxu2 }
0x1dda   : > { %4540 = vrot.lane.b32.xlu1 %v4534_v1, %s8578_s2 }
0x1ddb   : > { %v4493_v27 = vpop.f32.mrf.mxu1 }
0x1e32   : > { %v4543_v32 = vpop.permute.xlu2 %4542 }
0x1e33   : > { %4550 = vst.msk [vmem:[#allocation2 + $0x10] sm:$0xff] %vm8627_vm15, %v4543_v32  ;;  %vm8641_vm15 = vmmov %vm8640_vm4 }
0x1e3a   : > { %v4555_v3 = vld [vmem:[#allocation2 + $0x10] sm:$0xff] }
0x1e3b   : > { %4599 = vrot.lane.b32.xlu0 %v4555_v3, %s8574_s0  ;;  %4704 = vst.msk [vmem:[#allocation2 + $0x10] sm:$0xff] %vm8628_vm1, %v6495_v0  ;;  %4611 = vrot.lane.b32.xlu2 %v4555_v3, %s8575_s3  ;;  %vm8642_vm1 = vcmask 777216  }
0x1e3c   : > { %4643 = vrot.lane.b32.xlu1 %v4555_v3, %s8579_s15 }
0x1e43   : > { %4633 = vrot.lane.b32.xlu2 %v4555_v3, %s8556_s28 }
0x1e4c   : > { %v4541_v56 = vpop.permute.xlu1 %4540 }
0x1e4d   : > { %4548 = vst.msk [vmem:[#allocation2] sm:$0xff] %vm8629_vm8, %v4541_v56  ;;  %v8198_v20 = vsel %vm8630_vm12, %v4541_v56, %v4543_v32  ;;  %vm8643_vm8 = vmmov %vm8642_vm1 }
0x1e4e   : > { %vm8241_vm12 = vmpackc.low %vm8637_vm0, %vm6794_vm10 }
0x1e54   : > { %v8200_v37 = vld [vmem:[#allocation2] sm:$0xff] }
0x1e55   : > { %v6388_v6 = vpack.i.bf16 %v8198_v20, %v8200_v37  ;;  %4703 = vst.msk [vmem:[#allocation2] sm:$0xff] %vm8632_vm3, %v6495_v0  ;;  %v4660_v0 = vld [vmem:[%s8631_s1] sm:$0xff]  ;;  %vm8646_vm3 = vcmask 900096   ;;  %s8656_s1 = sld [smem:[#allocation24_spill]] }
0x1e57   : > { %6389 = vrot.lane.b32.xlu2 %v6388_v6, %s8556_s28  ;;  %6374 = vrot.lane.b32.xlu1 %v6388_v6, %s8574_s0 }
0x1e58   : > { %6369 = vrot.lane.b32.xlu0 %v6388_v6, %s8575_s3 }
0x1e5f   : > { %6394 = vrot.lane.b32.xlu2 %v6388_v6, %s8552_s5  ;;  %6384 = vrot.lane.b32.xlu1 %v6388_v6, %s8563_s4 }
0x1e60   : > { %6379 = vrot.lane.b32.xlu0 %v6388_v6, %s8579_s15 }
0x1e67   : > { %4575 = vrot.lane.b32.xlu2 %v4555_v3, %s8557_s7  ;;  %4587 = vrot.lane.b32.xlu1 %v4555_v3, %s8563_s4 }
0x1e68   : > { %6399 = vrot.lane.b32.xlu0 %v6388_v6, %s8557_s7 }
0x1e6f   : > { %4563 = vrot.lane.b32.xlu1 %v4555_v3, %s8552_s5 }
0x1e70   : > { %6404 = vrot.lane.b32.xlu0 %v6388_v6, %s8544_s26 }
0x1e77   : > { %4663 = vperm.xlu1 %5727, %v4660_v0  }
0x1e78   : > { %4623 = vrot.lane.b32.xlu0 %v4555_v3, %s8544_s26 }
0x1e95   : > { %v4612_v8 = vpop.permute.xlu2 %4611 }
0x1e9d   : > { %v4634_v46 = vpop.permute.xlu2 %4633 }
0x1ead   : > { %v4600_v49 = vpop.permute.xlu0 %4599 }
0x1eae   : > { %v4644_v26 = vpop.permute.xlu1 %4643 }
0x1eb1   : > { %v6390_v61 = vpop.permute.xlu2 %6389 }
0x1eb2   : > { %v6392_v34 = vunpack.i.h.bf16 %v6390_v61  ;;  %v6391_v12 = vunpack.i.l.bf16 %v6390_v61 }
0x1eb9   : > { %v6395_v54 = vpop.permute.xlu2 %6394 }
0x1eba   : > { %v6397_v11 = vunpack.i.h.bf16 %v6395_v54  ;;  %v6396_v22 = vunpack.i.l.bf16 %v6395_v54 }
0x1ec1   : > { %v4576_v32 = vpop.permute.xlu2 %4575 }
0x1ec9   : > { %v6375_v17 = vpop.permute.xlu1 %6374 }
0x1eca   : > { %v6370_v9 = vpop.permute.xlu0 %6369  ;;  %v6377_v14 = vunpack.i.h.bf16 %v6375_v17  ;;  %v6376_v57 = vunpack.i.l.bf16 %v6375_v17 }
0x1ecb   : > { %v6372_v50 = vunpack.i.h.bf16 %v6370_v9  ;;  %v6371_v16 = vunpack.i.l.bf16 %v6370_v9  ;;  %v4659_v9 = vld [vmem:[%s8656_s1] sm:$0xf] }
0x1ecc   : > { %v4602_v40 = vsel %vm8640_vm4, %v6377_v14, %v4600_v49  ;;  %v4601_v25 = vsel %vm8641_vm15, %v6376_v57, %v6377_v14  ;;  %vm8263_vm4 = vmpackc.low %vm6780_vm6, %vm8637_vm0  ;;  %vm8654_vm15 = vcmask 1031168  }
0x1ecd   : > { %v4614_v29 = vsel %vm8633_vm2, %v6372_v50, %v4612_v8  ;;  %v4613_v18 = vsel %vm8634_vm11, %v6371_v16, %v6372_v50  ;;  %vm8647_vm2 = vcmask 908288   ;;  %vm8254_vm11 = vmpackc.low %vm6784_vm7, %vm8637_vm0  ;;  %v4565_v1 = vsel %vm8654_vm15, %v6396_v22, %v6397_v11 }
0x1ece   : > { %v4617_v21 = vsel %vm6784_vm7, %v4613_v18, 0.0  ;;  %v4618_v53 = vsel %vm6780_vm6, %v4614_v29, 0.0  ;;  %v4635_v23 = vsel %vm8647_vm2, %v6391_v12, %v6392_v34  ;;  %vm5442_vm0 = vmpackc.low %vm6790_vm9, %vm6784_vm7  ;;  %vm8686_vm9 = vcmask 588800  }
0x1ecf   : > { %v4657_v7 = vpack.c.bf16 %v4617_v21, %v4617_v21  ;;  %v4658_v51 = vpack.c.bf16 %v4618_v53, %v4618_v53 }
0x1ed1   : > { %v4670_v55 = vsel %vm8635_vm5, %v4657_v7, 0  ;;  %v4673_v60 = vsel %vm8636_vm13, %v4658_v51, 0  ;;  %v6385_v31 = vpop.permute.xlu1 %6384  ;;  %vm8650_vm5 = vmmov %vm8647_vm2 }
0x1ed2   : > { %v6380_v36 = vpop.permute.xlu0 %6379  ;;  %4678 = vmatpush.bf16.msrb.mxu3 %v4670_v55  ;;  %4691 = vmatpush.bf16.msra.mxu0 %v4673_v60  ;;  %v6387_v10 = vunpack.i.h.bf16 %v6385_v31  ;;  %v6386_v39 = vunpack.i.l.bf16 %v6385_v31  ;;  %v4636_v45 = vsel %vm8650_vm5, %v6392_v34, %v4634_v46  ;;  %vm8651_vm13 = vmmov %vm8646_vm3  ;;  %vm8659_vm5 = vcmask 1039360  }
0x1ed3   : > { %v6382_v33 = vunpack.i.h.bf16 %v6380_v36  ;;  %v6381_v63 = vunpack.i.l.bf16 %v6380_v36  ;;  %vm5455_vm2 = vmpackc.low %vm6794_vm10, %vm6780_vm6  ;;  %vm8689_vm10 = vcmask 1043456  }
0x1ed4   : > { %v4589_v5 = vsel %vm8646_vm3, %v6386_v39, %v6387_v10  ;;  %vm8658_vm3 = vmmov %vm8654_vm15  ;;  %vm8661_vm15 = vcmask 588800  }
0x1ed5   : > { %v4645_v13 = vsel %vm8642_vm1, %v6381_v63, %v6382_v33  ;;  %v4646_v41 = vsel %vm8643_vm8, %v6382_v33, %v4644_v26  ;;  %v5440_v2 = vpack.c.bf16 %v4589_v5, %v4635_v23  ;;  %vm8655_vm1 = vcmask 916480  }
0x1ed6   : > { %v5437_v4 = vpack.c.bf16 %v4645_v13, %v4601_v25  ;;  %v5450_v62 = vpack.c.bf16 %v4646_v41, %v4602_v40  ;;  %vm8657_vm8 = vmmov %vm8655_vm1 }
0x1ed8   : > { %5438 = vmatpush.bf16.msk.msrb.mxu3 %vm8230_vm14, %v5437_v4  ;;  %5451 = vmatpush.bf16.msk.msra.mxu0 %vm8241_vm12, %v5450_v62 }
0x1ed9   : > { %v4588_v44 = vpop.permute.xlu1 %4587 }
0x1eda   : > { %v6400_v19 = vpop.permute.xlu0 %6399  ;;  %v4590_v24 = vsel %vm8651_vm13, %v6387_v10, %v4588_v44  ;;  %vm8660_vm13 = vmmov %vm8659_vm5 }
0x1edb   : > { %v6402_v28 = vunpack.i.h.bf16 %v6400_v19  ;;  %v6401_v48 = vunpack.i.l.bf16 %v6400_v19  ;;  %v5453_v59 = vpack.c.bf16 %v4590_v24, %v4636_v45 }
0x1edc   : > { %5441 = vmatpush.bf16.msk.msrb.mxu3 %vm8254_vm11, %v5440_v2 }
0x1edd   : > { %v4577_v58 = vsel %vm8655_vm1, %v6401_v48, %v6402_v28  ;;  %5454 = vmatpush.bf16.msk.msra.mxu0 %vm8263_vm4, %v5453_v59  ;;  %v4578_v6 = vsel %vm8657_vm8, %v6402_v28, %v4576_v32  ;;  %vm8662_vm1 = vmmov %vm8661_vm15  ;;  %vm8663_vm8 = vcmask 1047688  }
0x1ede   : > { %v5443_v27 = vpack.c.bf16 %v4577_v58, %v4565_v1 }
0x1ee0   : > { %5444 = vmatpush.bf16.msk.msrb.mxu3 %vm5442_vm0, %v5443_v27 }
0x1ee1   : > { %v4564_v3 = vpop.permute.xlu1 %4563 }
0x1ee2   : > { %v6405_v56 = vpop.permute.xlu0 %6404  ;;  %v4566_v0 = vsel %vm8658_vm3, %v6397_v11, %v4564_v3  ;;  %vm8664_vm3 = vcmask 138240  }
0x1ee3   : > { %v6407_v8 = vunpack.i.h.bf16 %v6405_v56  ;;  %v6406_v26 = vunpack.i.l.bf16 %v6405_v56  ;;  %v5456_v49 = vpack.c.bf16 %v4578_v6, %v4566_v0 }
0x1ee5   : > { %v4625_v46 = vsel %vm8659_vm5, %v6406_v26, %v6407_v8  ;;  %5457 = vmatpush.bf16.msk.msra.mxu0 %vm5455_vm2, %v5456_v49  ;;  %vm8665_vm5 = vmmov %vm8664_vm3 }
0x1ee6   : > { %v5446_v17 = vpack.c.bf16 %v4625_v46, %v8200_v37 }
0x1ee8   : > { %5447 = vmatpush.bf16.msk.msrb.mxu3 %vm8230_vm14, %v5446_v17 }
0x1ee9   : > { %v4664_v29 = vpop.permute.xlu1 %4663 }
0x1eea   : > { %v4624_v50 = vpop.permute.xlu0 %4623 }
0x1eeb   : > { %v4626_v16 = vsel %vm8660_vm13, %v6407_v8, %v4624_v50  ;;  %5448 = vmatmul.msk.bf16.vlgmr.msrb.gmra.mxu3 %vm8661_vm15, %v4659_v9  ;;  %vm8667_vm13 = vcmask 769024  }
0x1eec   : > { %v5459_v61 = vpack.c.bf16 %v4626_v16, %v8198_v20  ;;  %vm8668_vm15 = vmmov %vm8667_vm13 }
0x1eee   : > { %5460 = vmatpush.bf16.msk.msra.mxu0 %vm8241_vm12, %v5459_v61 }
0x1ef1   : > { %5461 = vmatmul.msk.bf16.vlgmr.msra.gmra.mxu0 %vm8662_vm1, %v4659_v9  ;;  %vm8669_vm1 = vcmask 1043456  }
0x1f6e   : > { %v4684_v18 = vpop.f32.mrf.mxu3  ;;  %v4697_v21 = vpop.f32.mrf.mxu0 }
0x1f6f   : > { %v4685_v37 = vadd.f32 %v4684_v18, %v4664_v29  ;;  %v4698_v53 = vadd.f32 %v4697_v21, %v4664_v29 }
0x1f71   : > { %v4701_v7 = vmax.f32 %v4685_v37, 0.0  ;;  %v4702_v51 = vmax.f32 %v4698_v53, 0.0 }
0x1f73   : > { %4709 = vrot.lane.b32.xlu0 %v4702_v51, %s8578_s2  ;;  %4707 = vrot.lane.b32.xlu2 %v4701_v7, %s8578_s2  ;;  %s8666_s2 = sld [smem:[#allocation27_spill]] }
0x1f76   : > { %v4699_v14 = vpop.f32.mrf.mxu0  ;;  %v4686_v57 = vpop.f32.mrf.mxu3 }
0x1f79   : > { %v4827_v63 = vld [vmem:[%s8666_s2] sm:$0xf] }
0x1fcd   : > { %v4708_v55 = vpop.permute.xlu2 %4707 }
0x1fce   : > { %4715 = vst.msk [vmem:[#allocation2] sm:$0xff] %vm8663_vm8, %v4708_v55  ;;  %vm8670_vm8 = vmmov %vm8669_vm1 }
0x1fd5   : > { %v8307_v20 = vld [vmem:[#allocation2] sm:$0xff] }
0x1fd6   : > { %4806 = vrot.lane.b32.xlu2 %v8307_v20, %s8579_s15  ;;  %4762 = vrot.lane.b32.xlu1 %v8307_v20, %s8574_s0 }
0x1fd7   : > { %4774 = vrot.lane.b32.xlu0 %v8307_v20, %s8575_s3 }
0x1fdf   : > { %4796 = vrot.lane.b32.xlu0 %v8307_v20, %s8556_s28 }
0x1fe5   : > { %v4710_v60 = vpop.permute.xlu0 %4709 }
0x1fe6   : > { %v8318_v31 = vsel %vm8664_vm3, %v4708_v55, %v4710_v60  ;;  %4717 = vst.msk [vmem:[#allocation2 + $0x10] sm:$0xff] %vm8665_vm5, %v4710_v60  ;;  %vm8671_vm3 = vcmask 785408  }
0x1fe7   : > { %4716 = vst [vmem:[#allocation2 + $0x8] sm:$0xff] %v8318_v31  ;;  %vm8672_vm5 = vmmov %vm8671_vm3 }
0x1fed   : > { %v4722_v36 = vld [vmem:[#allocation2 + $0x10] sm:$0xff] }
0x1fee   : > { %v6428_v33 = vpack.i.bf16 %v4722_v36, %v8318_v31 }
0x1ff0   : > { %6429 = vrot.lane.b32.xlu0 %v6428_v33, %s8556_s28  ;;  %6414 = vrot.lane.b32.xlu2 %v6428_v33, %s8574_s0 }
0x1ff1   : > { %6409 = vrot.lane.b32.xlu1 %v6428_v33, %s8575_s3 }
0x1ff8   : > { %6434 = vrot.lane.b32.xlu0 %v6428_v33, %s8552_s5  ;;  %6424 = vrot.lane.b32.xlu2 %v6428_v33, %s8563_s4 }
0x1ff9   : > { %6419 = vrot.lane.b32.xlu1 %v6428_v33, %s8579_s15 }
0x2000   : > { %4738 = vrot.lane.b32.xlu0 %v8307_v20, %s8557_s7  ;;  %4750 = vrot.lane.b32.xlu2 %v8307_v20, %s8563_s4  ;;  %s8688_s4 = sshll.u32 %s8691_s23, 3 }
0x2001   : > { %6439 = vrot.lane.b32.xlu1 %v6428_v33, %s8557_s7 }
0x2008   : > { %4726 = vrot.lane.b32.xlu2 %v8307_v20, %s8552_s5  ;;  %s8679_s5 = sld [smem:[#allocation26_spill]] }
0x2009   : > { %6444 = vrot.lane.b32.xlu1 %v6428_v33, %s8544_s26 }
0x200e   : > { %v4826_v38 = vld [vmem:[%s8679_s5] sm:$0x3] }
0x2010   : > { %4830 = vperm.xlu2 %5671, %v4827_v63  }
0x2011   : > { %4786 = vrot.lane.b32.xlu1 %v8307_v20, %s8544_s26  ;;  %s1182_s26 = scalar_lea.vmem %s6718_s12, %s8688_s4 }
0x2030   : > { %v4807_v10 = vpop.permute.xlu2 %4806 }
0x2048   : > { %v4763_v40 = vpop.permute.xlu1 %4762 }
0x2049   : > { %v4775_v39 = vpop.permute.xlu0 %4774 }
0x204a   : > { %v6415_v34 = vpop.permute.xlu2 %6414 }
0x204b   : > { %v6417_v2 = vunpack.i.h.bf16 %v6415_v34  ;;  %v6416_v19 = vunpack.i.l.bf16 %v6415_v34 }
0x204d   : > { %v4768_v3 = vsel %vm8671_vm3, %v4763_v40, %v6416_v19  ;;  %v4769_v56 = vsel %vm8672_vm5, %v6416_v19, %v6417_v2  ;;  %vm8677_vm3 = vcmask 900096  }
0x204e   : > { %vm8678_vm5 = vmmov %vm8677_vm3 }
0x2051   : > { %v4797_v12 = vpop.permute.xlu0 %4796 }
0x2052   : > { %v6425_v25 = vpop.permute.xlu2 %6424 }
0x2053   : > { %v6427_v6 = vunpack.i.h.bf16 %v6425_v25  ;;  %v6426_v0 = vunpack.i.l.bf16 %v6425_v25 }
0x2055   : > { %v4757_v50 = vsel %vm8677_vm3, %v6426_v0, %v6427_v6 }
0x205a   : > { %v4751_v45 = vpop.permute.xlu2 %4750 }
0x205b   : > { %v4756_v16 = vsel %vm8678_vm5, %v4751_v45, %v6426_v0 }
0x2062   : > { %v6430_v13 = vpop.permute.xlu0 %6429  ;;  %v4727_v51 = vpop.permute.xlu2 %4726 }
0x2063   : > { %v6410_v41 = vpop.permute.xlu1 %6409  ;;  %v6432_v1 = vunpack.i.h.bf16 %v6430_v13  ;;  %v6431_v58 = vunpack.i.l.bf16 %v6430_v13 }
0x2064   : > { %v6412_v54 = vunpack.i.h.bf16 %v6410_v41  ;;  %v6411_v4 = vunpack.i.l.bf16 %v6410_v41 }
0x2066   : > { %v4780_v62 = vsel %vm8667_vm13, %v4775_v39, %v6411_v4  ;;  %v4781_v5 = vsel %vm8668_vm15, %v6411_v4, %v6412_v54  ;;  %vm8673_vm13 = vcmask 777216  }
0x2067   : > { %v4784_v23 = vsel %vm6784_vm7, %v4780_v62, 0.0  ;;  %v4785_v11 = vsel %vm6780_vm6, %v4781_v5, 0.0  ;;  %vm8674_vm15 = vmmov %vm8673_vm13 }
0x2068   : > { %v4824_v22 = vpack.c.bf16 %v4784_v23, %v4784_v23  ;;  %v4825_v44 = vpack.c.bf16 %v4785_v11, %v4785_v11  ;;  %vm8687_vm6 = vmmov %vm8686_vm9 }
0x206a   : > { %v4837_v24 = vsel %vm8669_vm1, %v4824_v22, 0  ;;  %v4840_v28 = vsel %vm8670_vm8, %v4825_v44, 0  ;;  %v6435_v48 = vpop.permute.xlu0 %6434  ;;  %vm8675_vm1 = vcmask 908288  }
0x206b   : > { %v6420_v59 = vpop.permute.xlu1 %6419  ;;  %4845 = vmatpush.bf16.msra.mxu1 %v4837_v24  ;;  %4858 = vmatpush.bf16.msra.mxu3 %v4840_v28  ;;  %v4802_v17 = vsel %vm8675_vm1, %v4797_v12, %v6431_v58  ;;  %vm8676_vm8 = vmmov %vm8675_vm1  ;;  %v6437_v61 = vunpack.i.h.bf16 %v6435_v48  ;;  %v6436_v29 = vunpack.i.l.bf16 %v6435_v48  ;;  %vm8682_vm1 = vcmask 916480   ;;  %v4831_v12 = vpop.permute.xlu2 %4830 }
0x206c   : > { %v6422_v27 = vunpack.i.h.bf16 %v6420_v59  ;;  %v6421_v32 = vunpack.i.l.bf16 %v6420_v59  ;;  %v4803_v9 = vsel %vm8676_vm8, %v6431_v58, %v6432_v1  ;;  %v5466_v18 = vpack.c.bf16 %v4756_v16, %v4802_v17  ;;  %vm8683_vm8 = vmmov %vm8682_vm1 }
0x206d   : > { %v5479_v21 = vpack.c.bf16 %v4757_v50, %v4803_v9 }
0x206e   : > { %v4812_v8 = vsel %vm8673_vm13, %v4807_v10, %v6421_v32  ;;  %v4813_v26 = vsel %vm8674_vm15, %v6421_v32, %v6422_v27  ;;  %vm8680_vm13 = vcmask 1031168  }
0x206f   : > { %v5463_v49 = vpack.c.bf16 %v4812_v8, %v4768_v3  ;;  %v5476_v46 = vpack.c.bf16 %v4813_v26, %v4769_v56  ;;  %v4732_v57 = vsel %vm8680_vm13, %v4727_v51, %v6436_v29  ;;  %vm8681_vm15 = vmmov %vm8680_vm13 }
0x2070   : > { %v4733_v55 = vsel %vm8681_vm15, %v6436_v29, %v6437_v61 }
0x2071   : > { %5464 = vmatpush.bf16.msk.msra.mxu1 %vm8230_vm14, %v5463_v49  ;;  %5477 = vmatpush.bf16.msk.msra.mxu3 %vm8241_vm12, %v5476_v46 }
0x2072   : > { %v4739_v14 = vpop.permute.xlu0 %4738 }
0x2073   : > { %v6440_v37 = vpop.permute.xlu1 %6439 }
0x2074   : > { %v6442_v53 = vunpack.i.h.bf16 %v6440_v37  ;;  %v6441_v7 = vunpack.i.l.bf16 %v6440_v37 }
0x2075   : > { %5467 = vmatpush.bf16.msk.msra.mxu1 %vm8254_vm11, %v5466_v18  ;;  %5480 = vmatpush.bf16.msk.msra.mxu3 %vm8263_vm4, %v5479_v21  ;;  %vm8684_vm11 = vcmask 1039360  }
0x2076   : > { %v4744_v60 = vsel %vm8682_vm1, %v4739_v14, %v6441_v7  ;;  %v4745_v36 = vsel %vm8683_vm8, %v6441_v7, %v6442_v53  ;;  %vm8685_vm7 = vmmov %vm8684_vm11 }
0x2077   : > { %v5469_v33 = vpack.c.bf16 %v4744_v60, %v4732_v57  ;;  %v5482_v63 = vpack.c.bf16 %v4745_v36, %v4733_v55 }
0x2079   : > { %5470 = vmatpush.bf16.msk.msra.mxu1 %vm5442_vm0, %v5469_v33  ;;  %5483 = vmatpush.bf16.msk.msra.mxu3 %vm5455_vm2, %v5482_v63 }
0x207b   : > { %v6445_v52 = vpop.permute.xlu1 %6444 }
0x207c   : > { %v6447_v15 = vunpack.i.h.bf16 %v6445_v52  ;;  %v6446_v10 = vunpack.i.l.bf16 %v6445_v52 }
0x207e   : > { %v4793_v39 = vsel %vm8684_vm11, %v6446_v10, %v6447_v15 }
0x207f   : > { %v5485_v34 = vpack.c.bf16 %v4793_v39, %v8318_v31 }
0x2081   : > { %5486 = vmatpush.bf16.msk.msra.mxu3 %vm8241_vm12, %v5485_v34 }
0x2083   : > { %v4787_v42 = vpop.permute.xlu1 %4786 }
0x2084   : > { %v4792_v43 = vsel %vm8685_vm7, %v4787_v42, %v6446_v10  ;;  %5487 = vmatmul.msk.bf16.vlgmr.msra.gmra.mxu3 %vm8686_vm9, %v4826_v38 }
0x2085   : > { %v5472_v35 = vpack.c.bf16 %v4792_v43, %v8307_v20 }
0x2087   : > { %5473 = vmatpush.bf16.msk.msra.mxu1 %vm8230_vm14, %v5472_v35 }
0x208a   : > { %5474 = vmatmul.msk.bf16.vlgmr.msra.gmra.mxu1 %vm8687_vm6, %v4826_v38 }
0x2107   : > { %v4851_v40 = vpop.f32.mrf.mxu1  ;;  %v4864_v25 = vpop.f32.mrf.mxu3 }
0x2108   : > { %v4865_v31 = vadd.f32 %v4864_v25, %v4831_v12  ;;  %v4852_v13 = vadd.f32 %v4851_v40, %v4831_v12 }
0x210a   : > { %v4870_v47 = vrot.slane %v4865_v31, 4 }
0x210c   : > { %v4871_v41 = vsel %vm8689_vm10, %v4852_v13, %v4870_v47 }
0x210d   : > { %4873 = vst [vmem:[%s1182_s26] sm:$0xff] %v4871_v41 }
0x210f   : > { %v4853_v54 = vpop.f32.mrf.mxu1  ;;  %v4866_v4 = vpop.f32.mrf.mxu3 }
0x2110 PF: > { %s89_s22 = sadd.s32 1, %s6454_s22  }
0x2111   : > { %p86_p4 = scmp.ge.s32.totalorder %s89_s22, 4  }
0x2113   :  { %88 = sbr.rel (!%p86_p4) target bundleno = 78 (0x4e), region = 245 }

</bundles_post_ra>
